<compile_context>
chip_gen: v7x
topology: tpu7x:2x2x1
jax: 0.10.0
libtpu: 0.0.40
codegen_flags: <defaults>
</compile_context>

<pallas_src>
import functools

import numpy as np
import jax
import jax.numpy as jnp
from jax.experimental import pallas as pl
from jax.experimental.pallas import tpu as pltpu


CONV1_KW = 10   # conv1 kernel (1, 10), padding='same'
POOL_W = 25     # maxpool1 kernel/stride (1, 25)
CONV2_K = 3     # conv2 kernel (3, 3), valid


def _bf16(x):
    return x.astype(jnp.bfloat16)


# ----------------------------------------------------------------------------
# The fused Pallas kernel
# ----------------------------------------------------------------------------
def _fused_forward_kernel(x_ref, w1_ref, b1_ref, w2_ref, b2_ref,
                          wf1_ref, bf1_ref, wf2_ref, bf2_ref, wf3_ref, bf3_ref,
                          out_ref, *, B, H, W, P, Wo):
    O1 = w1_ref.shape[1]             # conv1 out channels (32)
    O2 = w2_ref.shape[1]             # conv2 out channels (64)
    F1 = wf1_ref.shape[1]            # fc1 out features (1024)
    Wpad = W + CONV1_KW - 1          # per-row 'same'-padded width
    R = B * H                        # number of (batch, height) rows
    N1 = R * Wpad - (CONV1_KW - 1)   # columns of the shifted-slice GEMMs

    # --- conv1 (1,10) 'same' + ReLU -----------------------------------------
    # x_ref is (C, R*Wpad) with every (b,h) row individually zero-padded, so a
    # lane shift by tap j aligns xpad[., r, w+j] at column r*Wpad + w for every
    # row at once: conv1 = 10 accumulated (O1,C)@(C,N1) matmuls, time axis on
    # lanes, im2col never materialized.
    x = x_ref[...]                                         # (C, R*Wpad) bf16
    acc1 = jnp.zeros((O1, N1), jnp.float32)
    for j in range(CONV1_KW):
        acc1 = acc1 + jnp.dot(w1_ref[j], x[:, j:j + N1],
                              preferred_element_type=jnp.float32)
    y1 = jnp.maximum(acc1 + b1_ref[...], 0.0)              # (O1, N1) f32

    # --- maxpool1 (1,25): pooled[r][c,p] = max_t y1[c, r*Wpad + 25p + t] -----
    pooled = []
    for r in range(R):
        base = r * Wpad
        cols = [
            jnp.max(y1[:, base + p * POOL_W:base + (p + 1) * POOL_W],
                    axis=1, keepdims=True)
            for p in range(P)
        ]
        pooled.append(jnp.concatenate(cols, axis=1))       # (O1, P)

    # --- conv2 (3,3) valid + ReLU -> y2 (O2, B*Wo); columns ordered (b, w) ---
    acc2 = jnp.zeros((O2, B * Wo), jnp.float32)
    for kh in range(CONV2_K):
        for kw in range(CONV2_K):
            rhs = jnp.concatenate(
                [pooled[b * H + kh][:, kw:kw + Wo] for b in range(B)], axis=1)
            acc2 = acc2 + jnp.dot(w2_ref[kh * CONV2_K + kw], _bf16(rhs),
                                  preferred_element_type=jnp.float32)
    y2 = _bf16(jnp.maximum(acc2 + b2_ref[...], 0.0))       # (O2, B*Wo)

    # --- flatten (channel-major, like torch) + fc1 + ReLU --------------------
    # wf1 is pre-permuted to (Wo, F1, O2), so fc1 is Wo accumulated matmuls
    # over conv2's per-position columns; no in-kernel reshape/transpose needed.
    acc3 = jnp.zeros((F1, B), jnp.float32)
    for w in range(Wo):
        cols = jnp.concatenate(
            [y2[:, b * Wo + w:b * Wo + w + 1] for b in range(B)], axis=1)
        acc3 = acc3 + jnp.dot(wf1_ref[w], cols,
                              preferred_element_type=jnp.float32)
    h1 = _bf16(jnp.maximum(acc3 + bf1_ref[...], 0.0))      # (F1, B)

    # --- fc2 + ReLU, fc3 ------------------------------------------------------
    h2 = jnp.maximum(
        jnp.dot(wf2_ref[...], h1, preferred_element_type=jnp.float32)
        + bf2_ref[...], 0.0)                               # (256, B)
    out = jnp.dot(wf3_ref[...], _bf16(h2),
                  preferred_element_type=jnp.float32) + bf3_ref[...]
    out_ref[...] = out.astype(out_ref.dtype)               # (1, B)


def _vmem_spec(a):
    nd = a.ndim

    def idx(i):
        return (0,) * nd

    return pl.BlockSpec(a.shape, idx)


# ----------------------------------------------------------------------------
# Parameters
# ----------------------------------------------------------------------------
def init_params(key, input_channels, num_samples):
    """PyTorch-style uniform(-1/sqrt(fan_in), 1/sqrt(fan_in)) init, f32."""
    keys = jax.random.split(key, 10)

    def u(k, shape, fan_in):
        bound = 1.0 / np.sqrt(fan_in)
        return jax.random.uniform(k, shape, jnp.float32, -bound, bound)

    fc1_in = 64 * int(num_samples / POOL_W - (CONV2_K - 1))  # module's formula
    return {
        "W1": u(keys[0], (32, input_channels, 1, CONV1_KW), input_channels * CONV1_KW),
        "b1": u(keys[1], (32,), input_channels * CONV1_KW),
        "W2": u(keys[2], (64, 32, CONV2_K, CONV2_K), 32 * CONV2_K * CONV2_K),
        "b2": u(keys[3], (64,), 32 * CONV2_K * CONV2_K),
        "Wf1": u(keys[4], (1024, fc1_in), fc1_in),
        "bf1": u(keys[5], (1024,), fc1_in),
        "Wf2": u(keys[6], (256, 1024), 1024),
        "bf2": u(keys[7], (256,), 1024),
        "Wf3": u(keys[8], (1, 256), 256),
        "bf3": u(keys[9], (1,), 256),
    }


def prepare_params(p, num_samples):
    """One-time repack of PyTorch-layout weights into kernel layouts (bf16)."""
    O1, C, _, KW = p["W1"].shape
    O2 = p["W2"].shape[0]
    F1 = p["Wf1"].shape[0]
    F2 = p["Wf2"].shape[0]
    Wo = num_samples // POOL_W - (CONV2_K - 1)
    assert p["Wf1"].shape[1] == O2 * Wo
    return {
        # conv1 weight: (O1, C, 1, KW) -> (KW, O1, C), one tap per leading idx
        "w1": _bf16(p["W1"].reshape(O1, C, KW).transpose(2, 0, 1)),
        "b1": p["b1"].reshape(O1, 1).astype(jnp.float32),
        # conv2 weight: (O2, O1, 3, 3) -> (9, O2, O1), tap index kh*3 + kw
        "w2": _bf16(p["W2"].transpose(2, 3, 0, 1).reshape(CONV2_K * CONV2_K, O2, O1)),
        "b2": p["b2"].reshape(O2, 1).astype(jnp.float32),
        # fc1 weight: (F1, O2*Wo) channel-major flatten -> (Wo, F1, O2)
        "wf1": _bf16(p["Wf1"].reshape(F1, O2, Wo).transpose(2, 0, 1)),
        "bf1": p["bf1"].reshape(F1, 1).astype(jnp.float32),
        "wf2": _bf16(p["Wf2"]),                       # (F2, F1)
        "bf2": p["bf2"].reshape(F2, 1).astype(jnp.float32),
        "wf3": _bf16(p["Wf3"]),                       # (1, F2)
        "bf3": p["bf3"].reshape(1, 1).astype(jnp.float32),
    }


# ----------------------------------------------------------------------------
# Forward pass
# ----------------------------------------------------------------------------
def regression_cnn_forward(prepared, x):
    """regressionCNN forward for NCHW input x = (B, C, 3, num_samples)."""
    B, C, H, W = x.shape
    assert H == CONV2_K, "module's fc1 sizing implies input height 3"
    assert W % POOL_W == 0, "num_samples must be a multiple of 25"
    P = W // POOL_W
    Wo = P - (CONV2_K - 1)
    assert Wo >= 1

    # PyTorch 'same' padding for even kernel width 10: 4 left, 5 right.
    left = (CONV1_KW - 1) // 2
    right = CONV1_KW - 1 - left
    Wpad = W + CONV1_KW - 1
    xpad = jnp.pad(x, ((0, 0), (0, 0), (0, 0), (left, right)))
    # (C, B*H*Wpad): each (b, h) row flattened onto the lane axis (~15 KB).
    x2d = _bf16(xpad.transpose(1, 0, 2, 3).reshape(C, B * H * Wpad))

    args = (x2d,
            prepared["w1"], prepared["b1"],
            prepared["w2"], prepared["b2"],
            prepared["wf1"], prepared["bf1"],
            prepared["wf2"], prepared["bf2"],
            prepared["wf3"], prepared["bf3"])

    # Single fused kernel: all weights + activations stay resident in VMEM
    # (~1 MB bf16 of weights; largest activation is 32x945 f32 ~ 118 KB).
    # TODO(synk): for large B / num_samples, split the B*H rows over a
    # "parallel" grid axis (v7x megacore) instead of grid=(1,).
    out = pl.pallas_call(
        functools.partial(_fused_forward_kernel, B=B, H=H, W=W, P=P, Wo=Wo),
        grid=(1,),
        in_specs=[_vmem_spec(a) for a in args],
        out_specs=pl.BlockSpec((1, B), lambda i: (0, 0)),
        out_shape=jax.ShapeDtypeStruct((1, B), jnp.float32),
        compiler_params=pltpu.CompilerParams(
            dimension_semantics=("arbitrary",)),
    )(*args)
    return out.T                                           # (B, 1), like torch


# ----------------------------------------------------------------------------
# Pure-JAX f32 reference (ground truth for the correctness check)
# ----------------------------------------------------------------------------
def reference_forward(p, x):
    hp = jax.lax.Precision.HIGHEST
    dn = ("NCHW", "OIHW", "NCHW")
    y = jax.lax.conv_general_dilated(
        x, p["W1"], (1, 1), ((0, 0), (4, 5)), dimension_numbers=dn, precision=hp
    ) + p["b1"][None, :, None, None]
    y = jnp.maximum(y, 0.0)
    B, C32, H, W = y.shape
    y = y.reshape(B, C32, H, W // POOL_W, POOL_W).max(axis=-1)
    y = jax.lax.conv_general_dilated(
        y, p["W2"], (1, 1), "VALID", dimension_numbers=dn, precision=hp
    ) + p["b2"][None, :, None, None]
    y = jnp.maximum(y, 0.0)
    y = jnp.squeeze(y, axis=2)          # (B, 64, Wo)
    y = y.reshape(y.shape[0], -1)       # (B, 64*Wo), channel-major
    y = jnp.maximum(jnp.dot(y, p["Wf1"].T, precision=hp) + p["bf1"], 0.0)
    y = jnp.maximum(jnp.dot(y, p["Wf2"].T, precision=hp) + p["bf2"], 0.0)
    y = jnp.dot(y, p["Wf3"].T, precision=hp) + p["bf3"]
    return y


if __name__ == "__main__":
    # The module's fc1 sizing implies input height 3 (conv2 reduces 3 -> 1)
    # and num_samples a multiple of 25.  Small consistent shapes:
    B, C, H, num_samples = 2, 4, 3, 150
    key = jax.random.PRNGKey(0)
    kx, kp = jax.random.split(key)
    x = jax.random.normal(kx, (B, C, H, num_samples), dtype=jnp.float32)
    params = init_params(kp, C, num_samples)
    prepared = prepare_params(params, num_samples)

    fwd = jax.jit(regression_cnn_forward)
    y = jax.block_until_ready(fwd(prepared, x))
    assert y.shape == (B, 1), y.shape

    y_ref = jax.block_until_ready(reference_forward(params, x))
    # Kernel uses the native bf16 MXU path (f32 accumulation); the reference
    # is full f32 at HIGHEST precision, so compare at bf16-level tolerance.
    np.testing.assert_allclose(np.asarray(y), np.asarray(y_ref),
                               rtol=5e-2, atol=2e-2)
    print("KERNEL_OK")
</pallas_src>

<mosaic_0001>
module attributes {stable_mosaic.version = 11 : i64} {
  func.func @_fused_forward_kernel(%arg0: i32, %arg1: memref<4x954xbf16, #tpu.memory_space<vmem>>, %arg2: memref<10x32x4xbf16, #tpu.memory_space<vmem>>, %arg3: memref<32x1xf32, #tpu.memory_space<vmem>>, %arg4: memref<9x64x32xbf16, #tpu.memory_space<vmem>>, %arg5: memref<64x1xf32, #tpu.memory_space<vmem>>, %arg6: memref<4x1024x64xbf16, #tpu.memory_space<vmem>>, %arg7: memref<1024x1xf32, #tpu.memory_space<vmem>>, %arg8: memref<256x1024xbf16, #tpu.memory_space<vmem>>, %arg9: memref<256x1xf32, #tpu.memory_space<vmem>>, %arg10: memref<1x256xbf16, #tpu.memory_space<vmem>>, %arg11: memref<1x1xf32, #tpu.memory_space<vmem>>, %arg12: memref<1x2xf32, #tpu.memory_space<vmem>>) attributes {dimension_semantics = [#tpu.dimension_semantics<arbitrary>], iteration_bounds = array<i64: 1>, scalar_prefetch = 0 : i64, scratch_operands = 0 : i64, tpu.core_type = #tpu.core_type<tc>, window_params = [{pipeline_mode = #tpu.pipeline_mode<synchronous>, transform_indices = @transform_0, window_bounds = array<i64: 4, 954>}, {pipeline_mode = #tpu.pipeline_mode<synchronous>, transform_indices = @transform_1, window_bounds = array<i64: 10, 32, 4>}, {pipeline_mode = #tpu.pipeline_mode<synchronous>, transform_indices = @transform_2, window_bounds = array<i64: 32, 1>}, {pipeline_mode = #tpu.pipeline_mode<synchronous>, transform_indices = @transform_3, window_bounds = array<i64: 9, 64, 32>}, {pipeline_mode = #tpu.pipeline_mode<synchronous>, transform_indices = @transform_4, window_bounds = array<i64: 64, 1>}, {pipeline_mode = #tpu.pipeline_mode<synchronous>, transform_indices = @transform_5, window_bounds = array<i64: 4, 1024, 64>}, {pipeline_mode = #tpu.pipeline_mode<synchronous>, transform_indices = @transform_6, window_bounds = array<i64: 1024, 1>}, {pipeline_mode = #tpu.pipeline_mode<synchronous>, transform_indices = @transform_7, window_bounds = array<i64: 256, 1024>}, {pipeline_mode = #tpu.pipeline_mode<synchronous>, transform_indices = @transform_8, window_bounds = array<i64: 256, 1>}, {pipeline_mode = #tpu.pipeline_mode<synchronous>, transform_indices = @transform_9, window_bounds = array<i64: 1, 256>}, {pipeline_mode = #tpu.pipeline_mode<synchronous>, transform_indices = @transform_10, window_bounds = array<i64: 1, 1>}, {pipeline_mode = #tpu.pipeline_mode<synchronous>, transform_indices = @transform_11, window_bounds = array<i64: 1, 2>}]} {
    %c0 = arith.constant 0 : index
    %c0_0 = arith.constant 0 : index
    %0 = vector.load %arg1[%c0, %c0_0] : memref<4x954xbf16, #tpu.memory_space<vmem>>, vector<4x954xbf16>
    %cst = arith.constant 0.000000e+00 : f32
    %1 = vector.broadcast %cst : f32 to vector<32x945xf32>
    %c0_1 = arith.constant 0 : index
    %c0_2 = arith.constant 0 : index
    %c0_3 = arith.constant 0 : index
    %2 = vector.load %arg2[%c0_1, %c0_2, %c0_3] : memref<10x32x4xbf16, #tpu.memory_space<vmem>>, vector<1x32x4xbf16>
    %3 = vector.shape_cast %2 : vector<1x32x4xbf16> to vector<32x4xbf16>
    %4 = vector.extract_strided_slice %0 {offsets = [0, 0], sizes = [4, 945], strides = [1, 1]} : vector<4x954xbf16> to vector<4x945xbf16>
    %cst_4 = arith.constant dense<0.000000e+00> : vector<32x945xf32>
    %5 = tpu.matmul %3, %4, %cst_4 {dimension_numbers = #tpu.dot_dimension_numbers<[1], [0], [0], [1], [0, 0, 1, 1], [], []>} : vector<32x4xbf16>, vector<4x945xbf16>, vector<32x945xf32> -> vector<32x945xf32>
    %6 = arith.addf %1, %5 : vector<32x945xf32>
    %c1 = arith.constant 1 : index
    %c0_5 = arith.constant 0 : index
    %c0_6 = arith.constant 0 : index
    %7 = vector.load %arg2[%c1, %c0_5, %c0_6] : memref<10x32x4xbf16, #tpu.memory_space<vmem>>, vector<1x32x4xbf16>
    %8 = vector.shape_cast %7 : vector<1x32x4xbf16> to vector<32x4xbf16>
    %9 = vector.extract_strided_slice %0 {offsets = [0, 1], sizes = [4, 945], strides = [1, 1]} : vector<4x954xbf16> to vector<4x945xbf16>
    %cst_7 = arith.constant dense<0.000000e+00> : vector<32x945xf32>
    %10 = tpu.matmul %8, %9, %cst_7 {dimension_numbers = #tpu.dot_dimension_numbers<[1], [0], [0], [1], [0, 0, 1, 1], [], []>} : vector<32x4xbf16>, vector<4x945xbf16>, vector<32x945xf32> -> vector<32x945xf32>
    %11 = arith.addf %6, %10 : vector<32x945xf32>
    %c2 = arith.constant 2 : index
    %c0_8 = arith.constant 0 : index
    %c0_9 = arith.constant 0 : index
    %12 = vector.load %arg2[%c2, %c0_8, %c0_9] : memref<10x32x4xbf16, #tpu.memory_space<vmem>>, vector<1x32x4xbf16>
    %13 = vector.shape_cast %12 : vector<1x32x4xbf16> to vector<32x4xbf16>
    %14 = vector.extract_strided_slice %0 {offsets = [0, 2], sizes = [4, 945], strides = [1, 1]} : vector<4x954xbf16> to vector<4x945xbf16>
    %cst_10 = arith.constant dense<0.000000e+00> : vector<32x945xf32>
    %15 = tpu.matmul %13, %14, %cst_10 {dimension_numbers = #tpu.dot_dimension_numbers<[1], [0], [0], [1], [0, 0, 1, 1], [], []>} : vector<32x4xbf16>, vector<4x945xbf16>, vector<32x945xf32> -> vector<32x945xf32>
    %16 = arith.addf %11, %15 : vector<32x945xf32>
    %c3 = arith.constant 3 : index
    %c0_11 = arith.constant 0 : index
    %c0_12 = arith.constant 0 : index
    %17 = vector.load %arg2[%c3, %c0_11, %c0_12] : memref<10x32x4xbf16, #tpu.memory_space<vmem>>, vector<1x32x4xbf16>
    %18 = vector.shape_cast %17 : vector<1x32x4xbf16> to vector<32x4xbf16>
    %19 = vector.extract_strided_slice %0 {offsets = [0, 3], sizes = [4, 945], strides = [1, 1]} : vector<4x954xbf16> to vector<4x945xbf16>
    %cst_13 = arith.constant dense<0.000000e+00> : vector<32x945xf32>
    %20 = tpu.matmul %18, %19, %cst_13 {dimension_numbers = #tpu.dot_dimension_numbers<[1], [0], [0], [1], [0, 0, 1, 1], [], []>} : vector<32x4xbf16>, vector<4x945xbf16>, vector<32x945xf32> -> vector<32x945xf32>
    %21 = arith.addf %16, %20 : vector<32x945xf32>
    %c4 = arith.constant 4 : index
    %c0_14 = arith.constant 0 : index
    %c0_15 = arith.constant 0 : index
    %22 = vector.load %arg2[%c4, %c0_14, %c0_15] : memref<10x32x4xbf16, #tpu.memory_space<vmem>>, vector<1x32x4xbf16>
    %23 = vector.shape_cast %22 : vector<1x32x4xbf16> to vector<32x4xbf16>
    %24 = vector.extract_strided_slice %0 {offsets = [0, 4], sizes = [4, 945], strides = [1, 1]} : vector<4x954xbf16> to vector<4x945xbf16>
    %cst_16 = arith.constant dense<0.000000e+00> : vector<32x945xf32>
    %25 = tpu.matmul %23, %24, %cst_16 {dimension_numbers = #tpu.dot_dimension_numbers<[1], [0], [0], [1], [0, 0, 1, 1], [], []>} : vector<32x4xbf16>, vector<4x945xbf16>, vector<32x945xf32> -> vector<32x945xf32>
    %26 = arith.addf %21, %25 : vector<32x945xf32>
    %c5 = arith.constant 5 : index
    %c0_17 = arith.constant 0 : index
    %c0_18 = arith.constant 0 : index
    %27 = vector.load %arg2[%c5, %c0_17, %c0_18] : memref<10x32x4xbf16, #tpu.memory_space<vmem>>, vector<1x32x4xbf16>
    %28 = vector.shape_cast %27 : vector<1x32x4xbf16> to vector<32x4xbf16>
    %29 = vector.extract_strided_slice %0 {offsets = [0, 5], sizes = [4, 945], strides = [1, 1]} : vector<4x954xbf16> to vector<4x945xbf16>
    %cst_19 = arith.constant dense<0.000000e+00> : vector<32x945xf32>
    %30 = tpu.matmul %28, %29, %cst_19 {dimension_numbers = #tpu.dot_dimension_numbers<[1], [0], [0], [1], [0, 0, 1, 1], [], []>} : vector<32x4xbf16>, vector<4x945xbf16>, vector<32x945xf32> -> vector<32x945xf32>
    %31 = arith.addf %26, %30 : vector<32x945xf32>
    %c6 = arith.constant 6 : index
    %c0_20 = arith.constant 0 : index
    %c0_21 = arith.constant 0 : index
    %32 = vector.load %arg2[%c6, %c0_20, %c0_21] : memref<10x32x4xbf16, #tpu.memory_space<vmem>>, vector<1x32x4xbf16>
    %33 = vector.shape_cast %32 : vector<1x32x4xbf16> to vector<32x4xbf16>
    %34 = vector.extract_strided_slice %0 {offsets = [0, 6], sizes = [4, 945], strides = [1, 1]} : vector<4x954xbf16> to vector<4x945xbf16>
    %cst_22 = arith.constant dense<0.000000e+00> : vector<32x945xf32>
    %35 = tpu.matmul %33, %34, %cst_22 {dimension_numbers = #tpu.dot_dimension_numbers<[1], [0], [0], [1], [0, 0, 1, 1], [], []>} : vector<32x4xbf16>, vector<4x945xbf16>, vector<32x945xf32> -> vector<32x945xf32>
    %36 = arith.addf %31, %35 : vector<32x945xf32>
    %c7 = arith.constant 7 : index
    %c0_23 = arith.constant 0 : index
    %c0_24 = arith.constant 0 : index
    %37 = vector.load %arg2[%c7, %c0_23, %c0_24] : memref<10x32x4xbf16, #tpu.memory_space<vmem>>, vector<1x32x4xbf16>
    %38 = vector.shape_cast %37 : vector<1x32x4xbf16> to vector<32x4xbf16>
    %39 = vector.extract_strided_slice %0 {offsets = [0, 7], sizes = [4, 945], strides = [1, 1]} : vector<4x954xbf16> to vector<4x945xbf16>
    %cst_25 = arith.constant dense<0.000000e+00> : vector<32x945xf32>
    %40 = tpu.matmul %38, %39, %cst_25 {dimension_numbers = #tpu.dot_dimension_numbers<[1], [0], [0], [1], [0, 0, 1, 1], [], []>} : vector<32x4xbf16>, vector<4x945xbf16>, vector<32x945xf32> -> vector<32x945xf32>
    %41 = arith.addf %36, %40 : vector<32x945xf32>
    %c8 = arith.constant 8 : index
    %c0_26 = arith.constant 0 : index
    %c0_27 = arith.constant 0 : index
    %42 = vector.load %arg2[%c8, %c0_26, %c0_27] : memref<10x32x4xbf16, #tpu.memory_space<vmem>>, vector<1x32x4xbf16>
    %43 = vector.shape_cast %42 : vector<1x32x4xbf16> to vector<32x4xbf16>
    %44 = vector.extract_strided_slice %0 {offsets = [0, 8], sizes = [4, 945], strides = [1, 1]} : vector<4x954xbf16> to vector<4x945xbf16>
    %cst_28 = arith.constant dense<0.000000e+00> : vector<32x945xf32>
    %45 = tpu.matmul %43, %44, %cst_28 {dimension_numbers = #tpu.dot_dimension_numbers<[1], [0], [0], [1], [0, 0, 1, 1], [], []>} : vector<32x4xbf16>, vector<4x945xbf16>, vector<32x945xf32> -> vector<32x945xf32>
    %46 = arith.addf %41, %45 : vector<32x945xf32>
    %c9 = arith.constant 9 : index
    %c0_29 = arith.constant 0 : index
    %c0_30 = arith.constant 0 : index
    %47 = vector.load %arg2[%c9, %c0_29, %c0_30] : memref<10x32x4xbf16, #tpu.memory_space<vmem>>, vector<1x32x4xbf16>
    %48 = vector.shape_cast %47 : vector<1x32x4xbf16> to vector<32x4xbf16>
    %49 = vector.extract_strided_slice %0 {offsets = [0, 9], sizes = [4, 945], strides = [1, 1]} : vector<4x954xbf16> to vector<4x945xbf16>
    %cst_31 = arith.constant dense<0.000000e+00> : vector<32x945xf32>
    %50 = tpu.matmul %48, %49, %cst_31 {dimension_numbers = #tpu.dot_dimension_numbers<[1], [0], [0], [1], [0, 0, 1, 1], [], []>} : vector<32x4xbf16>, vector<4x945xbf16>, vector<32x945xf32> -> vector<32x945xf32>
    %51 = arith.addf %46, %50 : vector<32x945xf32>
    %c0_32 = arith.constant 0 : index
    %c0_33 = arith.constant 0 : index
    %52 = vector.load %arg3[%c0_32, %c0_33] : memref<32x1xf32, #tpu.memory_space<vmem>>, vector<32x1xf32>
    %53 = vector.broadcast %52 : vector<32x1xf32> to vector<32x945xf32>
    %54 = arith.addf %51, %53 : vector<32x945xf32>
    %cst_34 = arith.constant 0.000000e+00 : f32
    %55 = vector.broadcast %cst_34 : f32 to vector<32x945xf32>
    %56 = arith.maximumf %54, %55 : vector<32x945xf32>
    %57 = vector.extract_strided_slice %56 {offsets = [0, 0], sizes = [32, 25], strides = [1, 1]} : vector<32x945xf32> to vector<32x25xf32>
    %cst_35 = arith.constant dense<0xFF800000> : vector<32xf32>
    %58 = vector.multi_reduction <maximumf>, %57, %cst_35 [1] : vector<32x25xf32> to vector<32xf32>
    %59 = vector.shape_cast %58 : vector<32xf32> to vector<32x1xf32>
    %60 = vector.extract_strided_slice %56 {offsets = [0, 25], sizes = [32, 25], strides = [1, 1]} : vector<32x945xf32> to vector<32x25xf32>
    %cst_36 = arith.constant dense<0xFF800000> : vector<32xf32>
    %61 = vector.multi_reduction <maximumf>, %60, %cst_36 [1] : vector<32x25xf32> to vector<32xf32>
    %62 = vector.shape_cast %61 : vector<32xf32> to vector<32x1xf32>
    %63 = vector.extract_strided_slice %56 {offsets = [0, 50], sizes = [32, 25], strides = [1, 1]} : vector<32x945xf32> to vector<32x25xf32>
    %cst_37 = arith.constant dense<0xFF800000> : vector<32xf32>
    %64 = vector.multi_reduction <maximumf>, %63, %cst_37 [1] : vector<32x25xf32> to vector<32xf32>
    %65 = vector.shape_cast %64 : vector<32xf32> to vector<32x1xf32>
    %66 = vector.extract_strided_slice %56 {offsets = [0, 75], sizes = [32, 25], strides = [1, 1]} : vector<32x945xf32> to vector<32x25xf32>
    %cst_38 = arith.constant dense<0xFF800000> : vector<32xf32>
    %67 = vector.multi_reduction <maximumf>, %66, %cst_38 [1] : vector<32x25xf32> to vector<32xf32>
    %68 = vector.shape_cast %67 : vector<32xf32> to vector<32x1xf32>
    %69 = vector.extract_strided_slice %56 {offsets = [0, 100], sizes = [32, 25], strides = [1, 1]} : vector<32x945xf32> to vector<32x25xf32>
    %cst_39 = arith.constant dense<0xFF800000> : vector<32xf32>
    %70 = vector.multi_reduction <maximumf>, %69, %cst_39 [1] : vector<32x25xf32> to vector<32xf32>
    %71 = vector.shape_cast %70 : vector<32xf32> to vector<32x1xf32>
    %72 = vector.extract_strided_slice %56 {offsets = [0, 125], sizes = [32, 25], strides = [1, 1]} : vector<32x945xf32> to vector<32x25xf32>
    %cst_40 = arith.constant dense<0xFF800000> : vector<32xf32>
    %73 = vector.multi_reduction <maximumf>, %72, %cst_40 [1] : vector<32x25xf32> to vector<32xf32>
    %74 = vector.shape_cast %73 : vector<32xf32> to vector<32x1xf32>
    %75 = tpu.concatenate %59, %62, %65, %68, %71, %74 in 1 : vector<32x1xf32>, vector<32x1xf32>, vector<32x1xf32>, vector<32x1xf32>, vector<32x1xf32>, vector<32x1xf32> -> vector<32x6xf32>
    %76 = vector.extract_strided_slice %56 {offsets = [0, 159], sizes = [32, 25], strides = [1, 1]} : vector<32x945xf32> to vector<32x25xf32>
    %cst_41 = arith.constant dense<0xFF800000> : vector<32xf32>
    %77 = vector.multi_reduction <maximumf>, %76, %cst_41 [1] : vector<32x25xf32> to vector<32xf32>
    %78 = vector.shape_cast %77 : vector<32xf32> to vector<32x1xf32>
    %79 = vector.extract_strided_slice %56 {offsets = [0, 184], sizes = [32, 25], strides = [1, 1]} : vector<32x945xf32> to vector<32x25xf32>
    %cst_42 = arith.constant dense<0xFF800000> : vector<32xf32>
    %80 = vector.multi_reduction <maximumf>, %79, %cst_42 [1] : vector<32x25xf32> to vector<32xf32>
    %81 = vector.shape_cast %80 : vector<32xf32> to vector<32x1xf32>
    %82 = vector.extract_strided_slice %56 {offsets = [0, 209], sizes = [32, 25], strides = [1, 1]} : vector<32x945xf32> to vector<32x25xf32>
    %cst_43 = arith.constant dense<0xFF800000> : vector<32xf32>
    %83 = vector.multi_reduction <maximumf>, %82, %cst_43 [1] : vector<32x25xf32> to vector<32xf32>
    %84 = vector.shape_cast %83 : vector<32xf32> to vector<32x1xf32>
    %85 = vector.extract_strided_slice %56 {offsets = [0, 234], sizes = [32, 25], strides = [1, 1]} : vector<32x945xf32> to vector<32x25xf32>
    %cst_44 = arith.constant dense<0xFF800000> : vector<32xf32>
    %86 = vector.multi_reduction <maximumf>, %85, %cst_44 [1] : vector<32x25xf32> to vector<32xf32>
    %87 = vector.shape_cast %86 : vector<32xf32> to vector<32x1xf32>
    %88 = vector.extract_strided_slice %56 {offsets = [0, 259], sizes = [32, 25], strides = [1, 1]} : vector<32x945xf32> to vector<32x25xf32>
    %cst_45 = arith.constant dense<0xFF800000> : vector<32xf32>
    %89 = vector.multi_reduction <maximumf>, %88, %cst_45 [1] : vector<32x25xf32> to vector<32xf32>
    %90 = vector.shape_cast %89 : vector<32xf32> to vector<32x1xf32>
    %91 = vector.extract_strided_slice %56 {offsets = [0, 284], sizes = [32, 25], strides = [1, 1]} : vector<32x945xf32> to vector<32x25xf32>
    %cst_46 = arith.constant dense<0xFF800000> : vector<32xf32>
    %92 = vector.multi_reduction <maximumf>, %91, %cst_46 [1] : vector<32x25xf32> to vector<32xf32>
    %93 = vector.shape_cast %92 : vector<32xf32> to vector<32x1xf32>
    %94 = tpu.concatenate %78, %81, %84, %87, %90, %93 in 1 : vector<32x1xf32>, vector<32x1xf32>, vector<32x1xf32>, vector<32x1xf32>, vector<32x1xf32>, vector<32x1xf32> -> vector<32x6xf32>
    %95 = vector.extract_strided_slice %56 {offsets = [0, 318], sizes = [32, 25], strides = [1, 1]} : vector<32x945xf32> to vector<32x25xf32>
    %cst_47 = arith.constant dense<0xFF800000> : vector<32xf32>
    %96 = vector.multi_reduction <maximumf>, %95, %cst_47 [1] : vector<32x25xf32> to vector<32xf32>
    %97 = vector.shape_cast %96 : vector<32xf32> to vector<32x1xf32>
    %98 = vector.extract_strided_slice %56 {offsets = [0, 343], sizes = [32, 25], strides = [1, 1]} : vector<32x945xf32> to vector<32x25xf32>
    %cst_48 = arith.constant dense<0xFF800000> : vector<32xf32>
    %99 = vector.multi_reduction <maximumf>, %98, %cst_48 [1] : vector<32x25xf32> to vector<32xf32>
    %100 = vector.shape_cast %99 : vector<32xf32> to vector<32x1xf32>
    %101 = vector.extract_strided_slice %56 {offsets = [0, 368], sizes = [32, 25], strides = [1, 1]} : vector<32x945xf32> to vector<32x25xf32>
    %cst_49 = arith.constant dense<0xFF800000> : vector<32xf32>
    %102 = vector.multi_reduction <maximumf>, %101, %cst_49 [1] : vector<32x25xf32> to vector<32xf32>
    %103 = vector.shape_cast %102 : vector<32xf32> to vector<32x1xf32>
    %104 = vector.extract_strided_slice %56 {offsets = [0, 393], sizes = [32, 25], strides = [1, 1]} : vector<32x945xf32> to vector<32x25xf32>
    %cst_50 = arith.constant dense<0xFF800000> : vector<32xf32>
    %105 = vector.multi_reduction <maximumf>, %104, %cst_50 [1] : vector<32x25xf32> to vector<32xf32>
    %106 = vector.shape_cast %105 : vector<32xf32> to vector<32x1xf32>
    %107 = vector.extract_strided_slice %56 {offsets = [0, 418], sizes = [32, 25], strides = [1, 1]} : vector<32x945xf32> to vector<32x25xf32>
    %cst_51 = arith.constant dense<0xFF800000> : vector<32xf32>
    %108 = vector.multi_reduction <maximumf>, %107, %cst_51 [1] : vector<32x25xf32> to vector<32xf32>
    %109 = vector.shape_cast %108 : vector<32xf32> to vector<32x1xf32>
    %110 = vector.extract_strided_slice %56 {offsets = [0, 443], sizes = [32, 25], strides = [1, 1]} : vector<32x945xf32> to vector<32x25xf32>
    %cst_52 = arith.constant dense<0xFF800000> : vector<32xf32>
    %111 = vector.multi_reduction <maximumf>, %110, %cst_52 [1] : vector<32x25xf32> to vector<32xf32>
    %112 = vector.shape_cast %111 : vector<32xf32> to vector<32x1xf32>
    %113 = tpu.concatenate %97, %100, %103, %106, %109, %112 in 1 : vector<32x1xf32>, vector<32x1xf32>, vector<32x1xf32>, vector<32x1xf32>, vector<32x1xf32>, vector<32x1xf32> -> vector<32x6xf32>
    %114 = vector.extract_strided_slice %56 {offsets = [0, 477], sizes = [32, 25], strides = [1, 1]} : vector<32x945xf32> to vector<32x25xf32>
    %cst_53 = arith.constant dense<0xFF800000> : vector<32xf32>
    %115 = vector.multi_reduction <maximumf>, %114, %cst_53 [1] : vector<32x25xf32> to vector<32xf32>
    %116 = vector.shape_cast %115 : vector<32xf32> to vector<32x1xf32>
    %117 = vector.extract_strided_slice %56 {offsets = [0, 502], sizes = [32, 25], strides = [1, 1]} : vector<32x945xf32> to vector<32x25xf32>
    %cst_54 = arith.constant dense<0xFF800000> : vector<32xf32>
    %118 = vector.multi_reduction <maximumf>, %117, %cst_54 [1] : vector<32x25xf32> to vector<32xf32>
    %119 = vector.shape_cast %118 : vector<32xf32> to vector<32x1xf32>
    %120 = vector.extract_strided_slice %56 {offsets = [0, 527], sizes = [32, 25], strides = [1, 1]} : vector<32x945xf32> to vector<32x25xf32>
    %cst_55 = arith.constant dense<0xFF800000> : vector<32xf32>
    %121 = vector.multi_reduction <maximumf>, %120, %cst_55 [1] : vector<32x25xf32> to vector<32xf32>
    %122 = vector.shape_cast %121 : vector<32xf32> to vector<32x1xf32>
    %123 = vector.extract_strided_slice %56 {offsets = [0, 552], sizes = [32, 25], strides = [1, 1]} : vector<32x945xf32> to vector<32x25xf32>
    %cst_56 = arith.constant dense<0xFF800000> : vector<32xf32>
    %124 = vector.multi_reduction <maximumf>, %123, %cst_56 [1] : vector<32x25xf32> to vector<32xf32>
    %125 = vector.shape_cast %124 : vector<32xf32> to vector<32x1xf32>
    %126 = vector.extract_strided_slice %56 {offsets = [0, 577], sizes = [32, 25], strides = [1, 1]} : vector<32x945xf32> to vector<32x25xf32>
    %cst_57 = arith.constant dense<0xFF800000> : vector<32xf32>
    %127 = vector.multi_reduction <maximumf>, %126, %cst_57 [1] : vector<32x25xf32> to vector<32xf32>
    %128 = vector.shape_cast %127 : vector<32xf32> to vector<32x1xf32>
    %129 = vector.extract_strided_slice %56 {offsets = [0, 602], sizes = [32, 25], strides = [1, 1]} : vector<32x945xf32> to vector<32x25xf32>
    %cst_58 = arith.constant dense<0xFF800000> : vector<32xf32>
    %130 = vector.multi_reduction <maximumf>, %129, %cst_58 [1] : vector<32x25xf32> to vector<32xf32>
    %131 = vector.shape_cast %130 : vector<32xf32> to vector<32x1xf32>
    %132 = tpu.concatenate %116, %119, %122, %125, %128, %131 in 1 : vector<32x1xf32>, vector<32x1xf32>, vector<32x1xf32>, vector<32x1xf32>, vector<32x1xf32>, vector<32x1xf32> -> vector<32x6xf32>
    %133 = vector.extract_strided_slice %56 {offsets = [0, 636], sizes = [32, 25], strides = [1, 1]} : vector<32x945xf32> to vector<32x25xf32>
    %cst_59 = arith.constant dense<0xFF800000> : vector<32xf32>
    %134 = vector.multi_reduction <maximumf>, %133, %cst_59 [1] : vector<32x25xf32> to vector<32xf32>
    %135 = vector.shape_cast %134 : vector<32xf32> to vector<32x1xf32>
    %136 = vector.extract_strided_slice %56 {offsets = [0, 661], sizes = [32, 25], strides = [1, 1]} : vector<32x945xf32> to vector<32x25xf32>
    %cst_60 = arith.constant dense<0xFF800000> : vector<32xf32>
    %137 = vector.multi_reduction <maximumf>, %136, %cst_60 [1] : vector<32x25xf32> to vector<32xf32>
    %138 = vector.shape_cast %137 : vector<32xf32> to vector<32x1xf32>
    %139 = vector.extract_strided_slice %56 {offsets = [0, 686], sizes = [32, 25], strides = [1, 1]} : vector<32x945xf32> to vector<32x25xf32>
    %cst_61 = arith.constant dense<0xFF800000> : vector<32xf32>
    %140 = vector.multi_reduction <maximumf>, %139, %cst_61 [1] : vector<32x25xf32> to vector<32xf32>
    %141 = vector.shape_cast %140 : vector<32xf32> to vector<32x1xf32>
    %142 = vector.extract_strided_slice %56 {offsets = [0, 711], sizes = [32, 25], strides = [1, 1]} : vector<32x945xf32> to vector<32x25xf32>
    %cst_62 = arith.constant dense<0xFF800000> : vector<32xf32>
    %143 = vector.multi_reduction <maximumf>, %142, %cst_62 [1] : vector<32x25xf32> to vector<32xf32>
    %144 = vector.shape_cast %143 : vector<32xf32> to vector<32x1xf32>
    %145 = vector.extract_strided_slice %56 {offsets = [0, 736], sizes = [32, 25], strides = [1, 1]} : vector<32x945xf32> to vector<32x25xf32>
    %cst_63 = arith.constant dense<0xFF800000> : vector<32xf32>
    %146 = vector.multi_reduction <maximumf>, %145, %cst_63 [1] : vector<32x25xf32> to vector<32xf32>
    %147 = vector.shape_cast %146 : vector<32xf32> to vector<32x1xf32>
    %148 = vector.extract_strided_slice %56 {offsets = [0, 761], sizes = [32, 25], strides = [1, 1]} : vector<32x945xf32> to vector<32x25xf32>
    %cst_64 = arith.constant dense<0xFF800000> : vector<32xf32>
    %149 = vector.multi_reduction <maximumf>, %148, %cst_64 [1] : vector<32x25xf32> to vector<32xf32>
    %150 = vector.shape_cast %149 : vector<32xf32> to vector<32x1xf32>
    %151 = tpu.concatenate %135, %138, %141, %144, %147, %150 in 1 : vector<32x1xf32>, vector<32x1xf32>, vector<32x1xf32>, vector<32x1xf32>, vector<32x1xf32>, vector<32x1xf32> -> vector<32x6xf32>
    %152 = vector.extract_strided_slice %56 {offsets = [0, 795], sizes = [32, 25], strides = [1, 1]} : vector<32x945xf32> to vector<32x25xf32>
    %cst_65 = arith.constant dense<0xFF800000> : vector<32xf32>
    %153 = vector.multi_reduction <maximumf>, %152, %cst_65 [1] : vector<32x25xf32> to vector<32xf32>
    %154 = vector.shape_cast %153 : vector<32xf32> to vector<32x1xf32>
    %155 = vector.extract_strided_slice %56 {offsets = [0, 820], sizes = [32, 25], strides = [1, 1]} : vector<32x945xf32> to vector<32x25xf32>
    %cst_66 = arith.constant dense<0xFF800000> : vector<32xf32>
    %156 = vector.multi_reduction <maximumf>, %155, %cst_66 [1] : vector<32x25xf32> to vector<32xf32>
    %157 = vector.shape_cast %156 : vector<32xf32> to vector<32x1xf32>
    %158 = vector.extract_strided_slice %56 {offsets = [0, 845], sizes = [32, 25], strides = [1, 1]} : vector<32x945xf32> to vector<32x25xf32>
    %cst_67 = arith.constant dense<0xFF800000> : vector<32xf32>
    %159 = vector.multi_reduction <maximumf>, %158, %cst_67 [1] : vector<32x25xf32> to vector<32xf32>
    %160 = vector.shape_cast %159 : vector<32xf32> to vector<32x1xf32>
    %161 = vector.extract_strided_slice %56 {offsets = [0, 870], sizes = [32, 25], strides = [1, 1]} : vector<32x945xf32> to vector<32x25xf32>
    %cst_68 = arith.constant dense<0xFF800000> : vector<32xf32>
    %162 = vector.multi_reduction <maximumf>, %161, %cst_68 [1] : vector<32x25xf32> to vector<32xf32>
    %163 = vector.shape_cast %162 : vector<32xf32> to vector<32x1xf32>
    %164 = vector.extract_strided_slice %56 {offsets = [0, 895], sizes = [32, 25], strides = [1, 1]} : vector<32x945xf32> to vector<32x25xf32>
    %cst_69 = arith.constant dense<0xFF800000> : vector<32xf32>
    %165 = vector.multi_reduction <maximumf>, %164, %cst_69 [1] : vector<32x25xf32> to vector<32xf32>
    %166 = vector.shape_cast %165 : vector<32xf32> to vector<32x1xf32>
    %167 = vector.extract_strided_slice %56 {offsets = [0, 920], sizes = [32, 25], strides = [1, 1]} : vector<32x945xf32> to vector<32x25xf32>
    %cst_70 = arith.constant dense<0xFF800000> : vector<32xf32>
    %168 = vector.multi_reduction <maximumf>, %167, %cst_70 [1] : vector<32x25xf32> to vector<32xf32>
    %169 = vector.shape_cast %168 : vector<32xf32> to vector<32x1xf32>
    %170 = tpu.concatenate %154, %157, %160, %163, %166, %169 in 1 : vector<32x1xf32>, vector<32x1xf32>, vector<32x1xf32>, vector<32x1xf32>, vector<32x1xf32>, vector<32x1xf32> -> vector<32x6xf32>
    %cst_71 = arith.constant 0.000000e+00 : f32
    %171 = vector.broadcast %cst_71 : f32 to vector<64x8xf32>
    %172 = vector.extract_strided_slice %75 {offsets = [0, 0], sizes = [32, 4], strides = [1, 1]} : vector<32x6xf32> to vector<32x4xf32>
    %173 = vector.extract_strided_slice %132 {offsets = [0, 0], sizes = [32, 4], strides = [1, 1]} : vector<32x6xf32> to vector<32x4xf32>
    %174 = tpu.concatenate %172, %173 in 1 : vector<32x4xf32>, vector<32x4xf32> -> vector<32x8xf32>
    %c0_72 = arith.constant 0 : index
    %c0_73 = arith.constant 0 : index
    %c0_74 = arith.constant 0 : index
    %175 = vector.load %arg4[%c0_72, %c0_73, %c0_74] : memref<9x64x32xbf16, #tpu.memory_space<vmem>>, vector<1x64x32xbf16>
    %176 = vector.shape_cast %175 : vector<1x64x32xbf16> to vector<64x32xbf16>
    %177 = arith.truncf %174 : vector<32x8xf32> to vector<32x8xbf16>
    %cst_75 = arith.constant dense<0.000000e+00> : vector<64x8xf32>
    %178 = tpu.matmul %176, %177, %cst_75 {dimension_numbers = #tpu.dot_dimension_numbers<[1], [0], [0], [1], [0, 0, 1, 1], [], []>} : vector<64x32xbf16>, vector<32x8xbf16>, vector<64x8xf32> -> vector<64x8xf32>
    %179 = arith.addf %171, %178 : vector<64x8xf32>
    %180 = vector.extract_strided_slice %75 {offsets = [0, 1], sizes = [32, 4], strides = [1, 1]} : vector<32x6xf32> to vector<32x4xf32>
    %181 = vector.extract_strided_slice %132 {offsets = [0, 1], sizes = [32, 4], strides = [1, 1]} : vector<32x6xf32> to vector<32x4xf32>
    %182 = tpu.concatenate %180, %181 in 1 : vector<32x4xf32>, vector<32x4xf32> -> vector<32x8xf32>
    %c1_76 = arith.constant 1 : index
    %c0_77 = arith.constant 0 : index
    %c0_78 = arith.constant 0 : index
    %183 = vector.load %arg4[%c1_76, %c0_77, %c0_78] : memref<9x64x32xbf16, #tpu.memory_space<vmem>>, vector<1x64x32xbf16>
    %184 = vector.shape_cast %183 : vector<1x64x32xbf16> to vector<64x32xbf16>
    %185 = arith.truncf %182 : vector<32x8xf32> to vector<32x8xbf16>
    %cst_79 = arith.constant dense<0.000000e+00> : vector<64x8xf32>
    %186 = tpu.matmul %184, %185, %cst_79 {dimension_numbers = #tpu.dot_dimension_numbers<[1], [0], [0], [1], [0, 0, 1, 1], [], []>} : vector<64x32xbf16>, vector<32x8xbf16>, vector<64x8xf32> -> vector<64x8xf32>
    %187 = arith.addf %179, %186 : vector<64x8xf32>
    %188 = vector.extract_strided_slice %75 {offsets = [0, 2], sizes = [32, 4], strides = [1, 1]} : vector<32x6xf32> to vector<32x4xf32>
    %189 = vector.extract_strided_slice %132 {offsets = [0, 2], sizes = [32, 4], strides = [1, 1]} : vector<32x6xf32> to vector<32x4xf32>
    %190 = tpu.concatenate %188, %189 in 1 : vector<32x4xf32>, vector<32x4xf32> -> vector<32x8xf32>
    %c2_80 = arith.constant 2 : index
    %c0_81 = arith.constant 0 : index
    %c0_82 = arith.constant 0 : index
    %191 = vector.load %arg4[%c2_80, %c0_81, %c0_82] : memref<9x64x32xbf16, #tpu.memory_space<vmem>>, vector<1x64x32xbf16>
    %192 = vector.shape_cast %191 : vector<1x64x32xbf16> to vector<64x32xbf16>
    %193 = arith.truncf %190 : vector<32x8xf32> to vector<32x8xbf16>
    %cst_83 = arith.constant dense<0.000000e+00> : vector<64x8xf32>
    %194 = tpu.matmul %192, %193, %cst_83 {dimension_numbers = #tpu.dot_dimension_numbers<[1], [0], [0], [1], [0, 0, 1, 1], [], []>} : vector<64x32xbf16>, vector<32x8xbf16>, vector<64x8xf32> -> vector<64x8xf32>
    %195 = arith.addf %187, %194 : vector<64x8xf32>
    %196 = vector.extract_strided_slice %94 {offsets = [0, 0], sizes = [32, 4], strides = [1, 1]} : vector<32x6xf32> to vector<32x4xf32>
    %197 = vector.extract_strided_slice %151 {offsets = [0, 0], sizes = [32, 4], strides = [1, 1]} : vector<32x6xf32> to vector<32x4xf32>
    %198 = tpu.concatenate %196, %197 in 1 : vector<32x4xf32>, vector<32x4xf32> -> vector<32x8xf32>
    %c3_84 = arith.constant 3 : index
    %c0_85 = arith.constant 0 : index
    %c0_86 = arith.constant 0 : index
    %199 = vector.load %arg4[%c3_84, %c0_85, %c0_86] : memref<9x64x32xbf16, #tpu.memory_space<vmem>>, vector<1x64x32xbf16>
    %200 = vector.shape_cast %199 : vector<1x64x32xbf16> to vector<64x32xbf16>
    %201 = arith.truncf %198 : vector<32x8xf32> to vector<32x8xbf16>
    %cst_87 = arith.constant dense<0.000000e+00> : vector<64x8xf32>
    %202 = tpu.matmul %200, %201, %cst_87 {dimension_numbers = #tpu.dot_dimension_numbers<[1], [0], [0], [1], [0, 0, 1, 1], [], []>} : vector<64x32xbf16>, vector<32x8xbf16>, vector<64x8xf32> -> vector<64x8xf32>
    %203 = arith.addf %195, %202 : vector<64x8xf32>
    %204 = vector.extract_strided_slice %94 {offsets = [0, 1], sizes = [32, 4], strides = [1, 1]} : vector<32x6xf32> to vector<32x4xf32>
    %205 = vector.extract_strided_slice %151 {offsets = [0, 1], sizes = [32, 4], strides = [1, 1]} : vector<32x6xf32> to vector<32x4xf32>
    %206 = tpu.concatenate %204, %205 in 1 : vector<32x4xf32>, vector<32x4xf32> -> vector<32x8xf32>
    %c4_88 = arith.constant 4 : index
    %c0_89 = arith.constant 0 : index
    %c0_90 = arith.constant 0 : index
    %207 = vector.load %arg4[%c4_88, %c0_89, %c0_90] : memref<9x64x32xbf16, #tpu.memory_space<vmem>>, vector<1x64x32xbf16>
    %208 = vector.shape_cast %207 : vector<1x64x32xbf16> to vector<64x32xbf16>
    %209 = arith.truncf %206 : vector<32x8xf32> to vector<32x8xbf16>
    %cst_91 = arith.constant dense<0.000000e+00> : vector<64x8xf32>
    %210 = tpu.matmul %208, %209, %cst_91 {dimension_numbers = #tpu.dot_dimension_numbers<[1], [0], [0], [1], [0, 0, 1, 1], [], []>} : vector<64x32xbf16>, vector<32x8xbf16>, vector<64x8xf32> -> vector<64x8xf32>
    %211 = arith.addf %203, %210 : vector<64x8xf32>
    %212 = vector.extract_strided_slice %94 {offsets = [0, 2], sizes = [32, 4], strides = [1, 1]} : vector<32x6xf32> to vector<32x4xf32>
    %213 = vector.extract_strided_slice %151 {offsets = [0, 2], sizes = [32, 4], strides = [1, 1]} : vector<32x6xf32> to vector<32x4xf32>
    %214 = tpu.concatenate %212, %213 in 1 : vector<32x4xf32>, vector<32x4xf32> -> vector<32x8xf32>
    %c5_92 = arith.constant 5 : index
    %c0_93 = arith.constant 0 : index
    %c0_94 = arith.constant 0 : index
    %215 = vector.load %arg4[%c5_92, %c0_93, %c0_94] : memref<9x64x32xbf16, #tpu.memory_space<vmem>>, vector<1x64x32xbf16>
    %216 = vector.shape_cast %215 : vector<1x64x32xbf16> to vector<64x32xbf16>
    %217 = arith.truncf %214 : vector<32x8xf32> to vector<32x8xbf16>
    %cst_95 = arith.constant dense<0.000000e+00> : vector<64x8xf32>
    %218 = tpu.matmul %216, %217, %cst_95 {dimension_numbers = #tpu.dot_dimension_numbers<[1], [0], [0], [1], [0, 0, 1, 1], [], []>} : vector<64x32xbf16>, vector<32x8xbf16>, vector<64x8xf32> -> vector<64x8xf32>
    %219 = arith.addf %211, %218 : vector<64x8xf32>
    %220 = vector.extract_strided_slice %113 {offsets = [0, 0], sizes = [32, 4], strides = [1, 1]} : vector<32x6xf32> to vector<32x4xf32>
    %221 = vector.extract_strided_slice %170 {offsets = [0, 0], sizes = [32, 4], strides = [1, 1]} : vector<32x6xf32> to vector<32x4xf32>
    %222 = tpu.concatenate %220, %221 in 1 : vector<32x4xf32>, vector<32x4xf32> -> vector<32x8xf32>
    %c6_96 = arith.constant 6 : index
    %c0_97 = arith.constant 0 : index
    %c0_98 = arith.constant 0 : index
    %223 = vector.load %arg4[%c6_96, %c0_97, %c0_98] : memref<9x64x32xbf16, #tpu.memory_space<vmem>>, vector<1x64x32xbf16>
    %224 = vector.shape_cast %223 : vector<1x64x32xbf16> to vector<64x32xbf16>
    %225 = arith.truncf %222 : vector<32x8xf32> to vector<32x8xbf16>
    %cst_99 = arith.constant dense<0.000000e+00> : vector<64x8xf32>
    %226 = tpu.matmul %224, %225, %cst_99 {dimension_numbers = #tpu.dot_dimension_numbers<[1], [0], [0], [1], [0, 0, 1, 1], [], []>} : vector<64x32xbf16>, vector<32x8xbf16>, vector<64x8xf32> -> vector<64x8xf32>
    %227 = arith.addf %219, %226 : vector<64x8xf32>
    %228 = vector.extract_strided_slice %113 {offsets = [0, 1], sizes = [32, 4], strides = [1, 1]} : vector<32x6xf32> to vector<32x4xf32>
    %229 = vector.extract_strided_slice %170 {offsets = [0, 1], sizes = [32, 4], strides = [1, 1]} : vector<32x6xf32> to vector<32x4xf32>
    %230 = tpu.concatenate %228, %229 in 1 : vector<32x4xf32>, vector<32x4xf32> -> vector<32x8xf32>
    %c7_100 = arith.constant 7 : index
    %c0_101 = arith.constant 0 : index
    %c0_102 = arith.constant 0 : index
    %231 = vector.load %arg4[%c7_100, %c0_101, %c0_102] : memref<9x64x32xbf16, #tpu.memory_space<vmem>>, vector<1x64x32xbf16>
    %232 = vector.shape_cast %231 : vector<1x64x32xbf16> to vector<64x32xbf16>
    %233 = arith.truncf %230 : vector<32x8xf32> to vector<32x8xbf16>
    %cst_103 = arith.constant dense<0.000000e+00> : vector<64x8xf32>
    %234 = tpu.matmul %232, %233, %cst_103 {dimension_numbers = #tpu.dot_dimension_numbers<[1], [0], [0], [1], [0, 0, 1, 1], [], []>} : vector<64x32xbf16>, vector<32x8xbf16>, vector<64x8xf32> -> vector<64x8xf32>
    %235 = arith.addf %227, %234 : vector<64x8xf32>
    %236 = vector.extract_strided_slice %113 {offsets = [0, 2], sizes = [32, 4], strides = [1, 1]} : vector<32x6xf32> to vector<32x4xf32>
    %237 = vector.extract_strided_slice %170 {offsets = [0, 2], sizes = [32, 4], strides = [1, 1]} : vector<32x6xf32> to vector<32x4xf32>
    %238 = tpu.concatenate %236, %237 in 1 : vector<32x4xf32>, vector<32x4xf32> -> vector<32x8xf32>
    %c8_104 = arith.constant 8 : index
    %c0_105 = arith.constant 0 : index
    %c0_106 = arith.constant 0 : index
    %239 = vector.load %arg4[%c8_104, %c0_105, %c0_106] : memref<9x64x32xbf16, #tpu.memory_space<vmem>>, vector<1x64x32xbf16>
    %240 = vector.shape_cast %239 : vector<1x64x32xbf16> to vector<64x32xbf16>
    %241 = arith.truncf %238 : vector<32x8xf32> to vector<32x8xbf16>
    %cst_107 = arith.constant dense<0.000000e+00> : vector<64x8xf32>
    %242 = tpu.matmul %240, %241, %cst_107 {dimension_numbers = #tpu.dot_dimension_numbers<[1], [0], [0], [1], [0, 0, 1, 1], [], []>} : vector<64x32xbf16>, vector<32x8xbf16>, vector<64x8xf32> -> vector<64x8xf32>
    %243 = arith.addf %235, %242 : vector<64x8xf32>
    %c0_108 = arith.constant 0 : index
    %c0_109 = arith.constant 0 : index
    %244 = vector.load %arg5[%c0_108, %c0_109] : memref<64x1xf32, #tpu.memory_space<vmem>>, vector<64x1xf32>
    %245 = vector.broadcast %244 : vector<64x1xf32> to vector<64x8xf32>
    %246 = arith.addf %243, %245 : vector<64x8xf32>
    %cst_110 = arith.constant 0.000000e+00 : f32
    %247 = vector.broadcast %cst_110 : f32 to vector<64x8xf32>
    %248 = arith.maximumf %246, %247 : vector<64x8xf32>
    %249 = arith.truncf %248 : vector<64x8xf32> to vector<64x8xbf16>
    %cst_111 = arith.constant 0.000000e+00 : f32
    %250 = vector.broadcast %cst_111 : f32 to vector<1024x2xf32>
    %251 = vector.extract_strided_slice %249 {offsets = [0, 0], sizes = [64, 1], strides = [1, 1]} : vector<64x8xbf16> to vector<64x1xbf16>
    %252 = vector.extract_strided_slice %249 {offsets = [0, 4], sizes = [64, 1], strides = [1, 1]} : vector<64x8xbf16> to vector<64x1xbf16>
    %253 = tpu.concatenate %251, %252 in 1 : vector<64x1xbf16>, vector<64x1xbf16> -> vector<64x2xbf16>
    %c0_112 = arith.constant 0 : index
    %c0_113 = arith.constant 0 : index
    %c0_114 = arith.constant 0 : index
    %254 = vector.load %arg6[%c0_112, %c0_113, %c0_114] : memref<4x1024x64xbf16, #tpu.memory_space<vmem>>, vector<1x1024x64xbf16>
    %255 = vector.shape_cast %254 : vector<1x1024x64xbf16> to vector<1024x64xbf16>
    %cst_115 = arith.constant dense<0.000000e+00> : vector<1024x2xf32>
    %256 = tpu.matmul %255, %253, %cst_115 {dimension_numbers = #tpu.dot_dimension_numbers<[1], [0], [0], [1], [0, 0, 1, 1], [], []>} : vector<1024x64xbf16>, vector<64x2xbf16>, vector<1024x2xf32> -> vector<1024x2xf32>
    %257 = arith.addf %250, %256 : vector<1024x2xf32>
    %258 = vector.extract_strided_slice %249 {offsets = [0, 1], sizes = [64, 1], strides = [1, 1]} : vector<64x8xbf16> to vector<64x1xbf16>
    %259 = vector.extract_strided_slice %249 {offsets = [0, 5], sizes = [64, 1], strides = [1, 1]} : vector<64x8xbf16> to vector<64x1xbf16>
    %260 = tpu.concatenate %258, %259 in 1 : vector<64x1xbf16>, vector<64x1xbf16> -> vector<64x2xbf16>
    %c1_116 = arith.constant 1 : index
    %c0_117 = arith.constant 0 : index
    %c0_118 = arith.constant 0 : index
    %261 = vector.load %arg6[%c1_116, %c0_117, %c0_118] : memref<4x1024x64xbf16, #tpu.memory_space<vmem>>, vector<1x1024x64xbf16>
    %262 = vector.shape_cast %261 : vector<1x1024x64xbf16> to vector<1024x64xbf16>
    %cst_119 = arith.constant dense<0.000000e+00> : vector<1024x2xf32>
    %263 = tpu.matmul %262, %260, %cst_119 {dimension_numbers = #tpu.dot_dimension_numbers<[1], [0], [0], [1], [0, 0, 1, 1], [], []>} : vector<1024x64xbf16>, vector<64x2xbf16>, vector<1024x2xf32> -> vector<1024x2xf32>
    %264 = arith.addf %257, %263 : vector<1024x2xf32>
    %265 = vector.extract_strided_slice %249 {offsets = [0, 2], sizes = [64, 1], strides = [1, 1]} : vector<64x8xbf16> to vector<64x1xbf16>
    %266 = vector.extract_strided_slice %249 {offsets = [0, 6], sizes = [64, 1], strides = [1, 1]} : vector<64x8xbf16> to vector<64x1xbf16>
    %267 = tpu.concatenate %265, %266 in 1 : vector<64x1xbf16>, vector<64x1xbf16> -> vector<64x2xbf16>
    %c2_120 = arith.constant 2 : index
    %c0_121 = arith.constant 0 : index
    %c0_122 = arith.constant 0 : index
    %268 = vector.load %arg6[%c2_120, %c0_121, %c0_122] : memref<4x1024x64xbf16, #tpu.memory_space<vmem>>, vector<1x1024x64xbf16>
    %269 = vector.shape_cast %268 : vector<1x1024x64xbf16> to vector<1024x64xbf16>
    %cst_123 = arith.constant dense<0.000000e+00> : vector<1024x2xf32>
    %270 = tpu.matmul %269, %267, %cst_123 {dimension_numbers = #tpu.dot_dimension_numbers<[1], [0], [0], [1], [0, 0, 1, 1], [], []>} : vector<1024x64xbf16>, vector<64x2xbf16>, vector<1024x2xf32> -> vector<1024x2xf32>
    %271 = arith.addf %264, %270 : vector<1024x2xf32>
    %272 = vector.extract_strided_slice %249 {offsets = [0, 3], sizes = [64, 1], strides = [1, 1]} : vector<64x8xbf16> to vector<64x1xbf16>
    %273 = vector.extract_strided_slice %249 {offsets = [0, 7], sizes = [64, 1], strides = [1, 1]} : vector<64x8xbf16> to vector<64x1xbf16>
    %274 = tpu.concatenate %272, %273 in 1 : vector<64x1xbf16>, vector<64x1xbf16> -> vector<64x2xbf16>
    %c3_124 = arith.constant 3 : index
    %c0_125 = arith.constant 0 : index
    %c0_126 = arith.constant 0 : index
    %275 = vector.load %arg6[%c3_124, %c0_125, %c0_126] : memref<4x1024x64xbf16, #tpu.memory_space<vmem>>, vector<1x1024x64xbf16>
    %276 = vector.shape_cast %275 : vector<1x1024x64xbf16> to vector<1024x64xbf16>
    %cst_127 = arith.constant dense<0.000000e+00> : vector<1024x2xf32>
    %277 = tpu.matmul %276, %274, %cst_127 {dimension_numbers = #tpu.dot_dimension_numbers<[1], [0], [0], [1], [0, 0, 1, 1], [], []>} : vector<1024x64xbf16>, vector<64x2xbf16>, vector<1024x2xf32> -> vector<1024x2xf32>
    %278 = arith.addf %271, %277 : vector<1024x2xf32>
    %c0_128 = arith.constant 0 : index
    %c0_129 = arith.constant 0 : index
    %279 = vector.load %arg7[%c0_128, %c0_129] : memref<1024x1xf32, #tpu.memory_space<vmem>>, vector<1024x1xf32>
    %280 = vector.broadcast %279 : vector<1024x1xf32> to vector<1024x2xf32>
    %281 = arith.addf %278, %280 : vector<1024x2xf32>
    %cst_130 = arith.constant 0.000000e+00 : f32
    %282 = vector.broadcast %cst_130 : f32 to vector<1024x2xf32>
    %283 = arith.maximumf %281, %282 : vector<1024x2xf32>
    %284 = arith.truncf %283 : vector<1024x2xf32> to vector<1024x2xbf16>
    %c0_131 = arith.constant 0 : index
    %c0_132 = arith.constant 0 : index
    %285 = vector.load %arg8[%c0_131, %c0_132] : memref<256x1024xbf16, #tpu.memory_space<vmem>>, vector<256x1024xbf16>
    %cst_133 = arith.constant dense<0.000000e+00> : vector<256x2xf32>
    %286 = tpu.matmul %285, %284, %cst_133 {dimension_numbers = #tpu.dot_dimension_numbers<[1], [0], [0], [1], [0, 0, 1, 1], [], []>} : vector<256x1024xbf16>, vector<1024x2xbf16>, vector<256x2xf32> -> vector<256x2xf32>
    %c0_134 = arith.constant 0 : index
    %c0_135 = arith.constant 0 : index
    %287 = vector.load %arg9[%c0_134, %c0_135] : memref<256x1xf32, #tpu.memory_space<vmem>>, vector<256x1xf32>
    %288 = vector.broadcast %287 : vector<256x1xf32> to vector<256x2xf32>
    %289 = arith.addf %286, %288 : vector<256x2xf32>
    %cst_136 = arith.constant 0.000000e+00 : f32
    %290 = vector.broadcast %cst_136 : f32 to vector<256x2xf32>
    %291 = arith.maximumf %289, %290 : vector<256x2xf32>
    %c0_137 = arith.constant 0 : index
    %c0_138 = arith.constant 0 : index
    %292 = vector.load %arg10[%c0_137, %c0_138] : memref<1x256xbf16, #tpu.memory_space<vmem>>, vector<1x256xbf16>
    %293 = arith.truncf %291 : vector<256x2xf32> to vector<256x2xbf16>
    %cst_139 = arith.constant dense<0.000000e+00> : vector<1x2xf32>
    %294 = tpu.matmul %292, %293, %cst_139 {dimension_numbers = #tpu.dot_dimension_numbers<[1], [0], [0], [1], [0, 0, 1, 1], [], []>} : vector<1x256xbf16>, vector<256x2xbf16>, vector<1x2xf32> -> vector<1x2xf32>
    %c0_140 = arith.constant 0 : index
    %c0_141 = arith.constant 0 : index
    %295 = vector.load %arg11[%c0_140, %c0_141] : memref<1x1xf32, #tpu.memory_space<vmem>>, vector<1x1xf32>
    %296 = vector.broadcast %295 : vector<1x1xf32> to vector<1x2xf32>
    %297 = arith.addf %294, %296 : vector<1x2xf32>
    %c0_142 = arith.constant 0 : index
    %c0_143 = arith.constant 0 : index
    %298 = vector.load %arg12[%c0_142, %c0_143] : memref<1x2xf32, #tpu.memory_space<vmem>>, vector<1x2xf32>
    tpu.vector_store %arg12[%c0_142, %c0_143], %297 {strides = array<i32>} : memref<1x2xf32, #tpu.memory_space<vmem>>, vector<1x2xf32>,
    return
  }
  func.func @transform_0(%arg0: i32) -> (i32, i32) {
    %c0_i32 = arith.constant 0 : i32
    %c0_i32_0 = arith.constant 0 : i32
    %c0_i32_1 = arith.constant 0 : i32
    return %c0_i32, %c0_i32_0 : i32, i32
  }
  func.func @transform_1(%arg0: i32) -> (i32, i32, i32) {
    %c0_i32 = arith.constant 0 : i32
    %c0_i32_0 = arith.constant 0 : i32
    %c0_i32_1 = arith.constant 0 : i32
    %c0_i32_2 = arith.constant 0 : i32
    return %c0_i32, %c0_i32_0, %c0_i32_1 : i32, i32, i32
  }
  func.func @transform_2(%arg0: i32) -> (i32, i32) {
    %c0_i32 = arith.constant 0 : i32
    %c0_i32_0 = arith.constant 0 : i32
    %c0_i32_1 = arith.constant 0 : i32
    return %c0_i32, %c0_i32_0 : i32, i32
  }
  func.func @transform_3(%arg0: i32) -> (i32, i32, i32) {
    %c0_i32 = arith.constant 0 : i32
    %c0_i32_0 = arith.constant 0 : i32
    %c0_i32_1 = arith.constant 0 : i32
    %c0_i32_2 = arith.constant 0 : i32
    return %c0_i32, %c0_i32_0, %c0_i32_1 : i32, i32, i32
  }
  func.func @transform_4(%arg0: i32) -> (i32, i32) {
    %c0_i32 = arith.constant 0 : i32
    %c0_i32_0 = arith.constant 0 : i32
    %c0_i32_1 = arith.constant 0 : i32
    return %c0_i32, %c0_i32_0 : i32, i32
  }
  func.func @transform_5(%arg0: i32) -> (i32, i32, i32) {
    %c0_i32 = arith.constant 0 : i32
    %c0_i32_0 = arith.constant 0 : i32
    %c0_i32_1 = arith.constant 0 : i32
    %c0_i32_2 = arith.constant 0 : i32
    return %c0_i32, %c0_i32_0, %c0_i32_1 : i32, i32, i32
  }
  func.func @transform_6(%arg0: i32) -> (i32, i32) {
    %c0_i32 = arith.constant 0 : i32
    %c0_i32_0 = arith.constant 0 : i32
    %c0_i32_1 = arith.constant 0 : i32
    return %c0_i32, %c0_i32_0 : i32, i32
  }
  func.func @transform_7(%arg0: i32) -> (i32, i32) {
    %c0_i32 = arith.constant 0 : i32
    %c0_i32_0 = arith.constant 0 : i32
    %c0_i32_1 = arith.constant 0 : i32
    return %c0_i32, %c0_i32_0 : i32, i32
  }
  func.func @transform_8(%arg0: i32) -> (i32, i32) {
    %c0_i32 = arith.constant 0 : i32
    %c0_i32_0 = arith.constant 0 : i32
    %c0_i32_1 = arith.constant 0 : i32
    return %c0_i32, %c0_i32_0 : i32, i32
  }
  func.func @transform_9(%arg0: i32) -> (i32, i32) {
    %c0_i32 = arith.constant 0 : i32
    %c0_i32_0 = arith.constant 0 : i32
    %c0_i32_1 = arith.constant 0 : i32
    return %c0_i32, %c0_i32_0 : i32, i32
  }
  func.func @transform_10(%arg0: i32) -> (i32, i32) {
    %c0_i32 = arith.constant 0 : i32
    %c0_i32_0 = arith.constant 0 : i32
    %c0_i32_1 = arith.constant 0 : i32
    return %c0_i32, %c0_i32_0 : i32, i32
  }
  func.func @transform_11(%arg0: i32) -> (i32, i32) {
    %c0_i32 = arith.constant 0 : i32
    %c0_i32_0 = arith.constant 0 : i32
    %c0_i32_1 = arith.constant 0 : i32
    return %c0_i32, %c0_i32_0 : i32, i32
  }
}

</mosaic_0001>

<bundles_post_ra>
// kernel: regression_cnn_forward.1
= control target key start
LH: loop header
LB: loop body
LE: loop exit
PB: predicated region body
PF: predicated region fallthrough
CT: control target
= control target key end

     0   :  { %s22536_s0 = inlined_call_operand.vmem [shape: bf16[4,954], index: 0, kind: input, shape index: {}]   ;;  %s22537_s1 = inlined_call_operand.vmem [shape: bf16[10,32,4], index: 1, kind: input, shape index: {}]   ;;  %s22538_s2 = inlined_call_operand.vmem [shape: f32[32,1], index: 2, kind: input, shape index: {}]   ;;  %s22539_s3 = inlined_call_operand.vmem [shape: bf16[9,64,32], index: 3, kind: input, shape index: {}]   ;;  %s22540_s4 = inlined_call_operand.vmem [shape: f32[64,1], index: 4, kind: input, shape index: {}]   ;;  %s22541_s5 = inlined_call_operand.vmem [shape: bf16[4,1024,64], index: 5, kind: input, shape index: {}]   ;;  %s22542_s6 = inlined_call_operand.vmem [shape: f32[1024,1], index: 6, kind: input, shape index: {}]   ;;  %s22543_s7 = inlined_call_operand.vmem [shape: bf16[256,1024], index: 7, kind: input, shape index: {}]   ;;  %s22544_s8 = inlined_call_operand.vmem [shape: f32[256,1], index: 8, kind: input, shape index: {}]   ;;  %s22545_s9 = inlined_call_operand.vmem [shape: bf16[1,256], index: 9, kind: input, shape index: {}]   ;;  %s22546_s10 = inlined_call_operand.<no memory space> [shape: f32[1,1], index: 10, kind: input, shape index: {}]   ;;  %s22547_s11 = inlined_call_operand.hbm [shape: f32[1,2], index: 11, kind: output, shape index: {}]  }
   0x1   :  { %v16_v0 = vstv %s22546_s10 }
   0x2   :  { %17 = vst [vmem:[#allocation2] sm:$0x1] %v16_v0 }
   0x3   :  { %v42_v1 = vld [vmem:[%s22536_s0] sm:$0xff]  ;;  %v69_v2 = vlaneseq  ;;  %v17180_v3 = vmov 1983009808   ;;  %v17181_v8 = vmov 0   ;;  %v43_v10 = vld [vmem:[%s22536_s0 + $0x8] sm:$0xff]  ;;  %s17182_s22 = smov 127  }
   0x4   :  { %v67_v4 = vunpack.c.l.s4 %v17180_v3  ;;  %v65_v7 = vcombine.high %v42_v1, %v42_v1  ;;  %187 = vmatprep.mubr.bf16.mxu0 %v17181_v8  ;;  %240 = vmatprep.mubr.bf16.mxu1 %v17181_v8  ;;  %v82_v16 = vcombine.high %v43_v10, %v43_v10  ;;  %s17183_s0 = smov 126   ;;  %s17184_s23 = smov 125   ;;  %vm115_vm0 = vcmask 1039360   ;;  %v16844_v27 = vld [vmem:[%s22537_s1 + $0x10] sm:$0xff]   ;;  %v16845_v39 = vld [vmem:[%s22537_s1 + $0x18] sm:$0xff]   ;;  %v16846_v46 = vld [vmem:[%s22537_s1] sm:$0xff]  }
   0x5   :  { %v17262_v5 = vshrl.u32 %v69_v2, 7  ;;  %16690 = vset.pattern.permute.xlu0 %v17181_v8  ;;  %16691 = vset.pattern.permute.xlu1 %v17181_v8  ;;  %s17185_s24 = smov 124   ;;  %s17186_s25 = smov 123   ;;  %vm130_vm1 = vcmask 1041408   ;;  %vm22548_vm2 = vcmask 31744   ;;  %vm650_vm3 = vcmask 1031168  }
   0x6   :  { %v68_v6 = vunpack.c.0.s8 %v67_v4  ;;  %s17187_s26 = smov 122   ;;  %s17188_s27 = smov 121   ;;  %v16847_v53 = vld [vmem:[%s22537_s1 + $0x8] sm:$0xff]   ;;  %v16848_v0 = vld [vmem:[%s22537_s1 + $0x20] sm:$0xff]   ;;  %vm963_vm4 = vcmask 1022976   ;;  %vm1276_vm5 = vcmask 1014784  }
   0x7   :  { %22598 = vst [vmem:[#allocation6_spill] sm:$0xff] %v17262_v5  ;;  %s17189_s30 = smov 120   ;;  %s17190_s16 = smov 119  }
   0x8   :  { %v71_v9 = vsub.s32 %v68_v6, %v17262_v5 }
   0xa   :  { %v17272_v11 = vrot.slane %v42_v1, %v71_v9  ;;  %v17274_v12 = vrot.slane %v65_v7, %v71_v9  ;;  %v17288_v15 = vrot.slane %v43_v10, %v71_v9  ;;  %v17298_v18 = vrot.slane %v82_v16, %v71_v9 }
   0xc   :  { %99 = vrot.lane.b32.xlu0 %v17272_v11, %s17182_s22  ;;  %103 = vrot.lane.b32.xlu1 %v17274_v12, %s17182_s22  ;;  %v17282_v13 = vcombine.high %v17272_v11, %v17272_v11  ;;  %v17286_v14 = vcombine.high %v17274_v12, %v17274_v12  ;;  %v17296_v17 = vcombine.high %v17288_v15, %v17288_v15  ;;  %v384_v41 = vsel %vm130_vm1, %v17272_v11, 0 }
   0xd   :  { %v17306_v19 = vcombine.high %v17298_v18, %v17298_v18  ;;  %v390_v42 = vsel %vm130_vm1, %v17274_v12, 0  ;;  %v396_v47 = vsel %vm130_vm1, %v17288_v15, 0  ;;  %v402_v49 = vsel %vm130_vm1, %v17298_v18, 0 }
  0x10   :  { %101 = vrot.lane.b32.xlu0 %v17282_v13, %s17182_s22  ;;  %105 = vrot.lane.b32.xlu1 %v17286_v14, %s17182_s22 }
  0x14   :  { %107 = vrot.lane.b32.xlu0 %v17288_v15, %s17182_s22  ;;  %109 = vrot.lane.b32.xlu1 %v17296_v17, %s17182_s22 }
  0x18   :  { %111 = vrot.lane.b32.xlu0 %v17298_v18, %s17182_s22  ;;  %113 = vrot.lane.b32.xlu1 %v17306_v19, %s17182_s22 }
  0x1c   :  { %634 = vrot.lane.b32.xlu0 %v17272_v11, %s17183_s0  ;;  %636 = vrot.lane.b32.xlu1 %v17282_v13, %s17183_s0 }
  0x20   :  { %638 = vrot.lane.b32.xlu0 %v17274_v12, %s17183_s0  ;;  %640 = vrot.lane.b32.xlu1 %v17286_v14, %s17183_s0 }
  0x24   :  { %642 = vrot.lane.b32.xlu0 %v17288_v15, %s17183_s0  ;;  %644 = vrot.lane.b32.xlu1 %v17296_v17, %s17183_s0 }
  0x28   :  { %646 = vrot.lane.b32.xlu0 %v17298_v18, %s17183_s0  ;;  %648 = vrot.lane.b32.xlu1 %v17306_v19, %s17183_s0 }
  0x2c   :  { %947 = vrot.lane.b32.xlu0 %v17272_v11, %s17184_s23  ;;  %949 = vrot.lane.b32.xlu1 %v17282_v13, %s17184_s23 }
  0x30   :  { %951 = vrot.lane.b32.xlu0 %v17274_v12, %s17184_s23  ;;  %953 = vrot.lane.b32.xlu1 %v17286_v14, %s17184_s23 }
  0x34   :  { %955 = vrot.lane.b32.xlu0 %v17288_v15, %s17184_s23  ;;  %957 = vrot.lane.b32.xlu1 %v17296_v17, %s17184_s23 }
  0x38   :  { %959 = vrot.lane.b32.xlu0 %v17298_v18, %s17184_s23  ;;  %961 = vrot.lane.b32.xlu1 %v17306_v19, %s17184_s23 }
  0x3c   :  { %1260 = vrot.lane.b32.xlu0 %v17272_v11, %s17185_s24  ;;  %1262 = vrot.lane.b32.xlu1 %v17282_v13, %s17185_s24 }
  0x40   :  { %1264 = vrot.lane.b32.xlu0 %v17274_v12, %s17185_s24  ;;  %1266 = vrot.lane.b32.xlu1 %v17286_v14, %s17185_s24 }
  0x44   :  { %1268 = vrot.lane.b32.xlu0 %v17288_v15, %s17185_s24  ;;  %1270 = vrot.lane.b32.xlu1 %v17296_v17, %s17185_s24 }
  0x48   :  { %1272 = vrot.lane.b32.xlu0 %v17298_v18, %s17185_s24  ;;  %1274 = vrot.lane.b32.xlu1 %v17306_v19, %s17185_s24 }
  0x4c   :  { %1573 = vrot.lane.b32.xlu0 %v17272_v11, %s17186_s25  ;;  %1575 = vrot.lane.b32.xlu1 %v17282_v13, %s17186_s25 }
  0x50   :  { %1577 = vrot.lane.b32.xlu0 %v17274_v12, %s17186_s25  ;;  %1579 = vrot.lane.b32.xlu1 %v17286_v14, %s17186_s25 }
  0x54   :  { %1581 = vrot.lane.b32.xlu0 %v17288_v15, %s17186_s25  ;;  %1583 = vrot.lane.b32.xlu1 %v17296_v17, %s17186_s25 }
  0x58   :  { %1585 = vrot.lane.b32.xlu0 %v17298_v18, %s17186_s25  ;;  %1587 = vrot.lane.b32.xlu1 %v17306_v19, %s17186_s25 }
  0x5c   :  { %1886 = vrot.lane.b32.xlu0 %v17272_v11, %s17187_s26  ;;  %1888 = vrot.lane.b32.xlu1 %v17282_v13, %s17187_s26 }
  0x60   :  { %1890 = vrot.lane.b32.xlu0 %v17274_v12, %s17187_s26  ;;  %1892 = vrot.lane.b32.xlu1 %v17286_v14, %s17187_s26 }
  0x64   :  { %1894 = vrot.lane.b32.xlu0 %v17288_v15, %s17187_s26  ;;  %1896 = vrot.lane.b32.xlu1 %v17296_v17, %s17187_s26 }
  0x68   :  { %1898 = vrot.lane.b32.xlu0 %v17298_v18, %s17187_s26  ;;  %1900 = vrot.lane.b32.xlu1 %v17306_v19, %s17187_s26 }
  0x6c   :  { %2199 = vrot.lane.b32.xlu0 %v17272_v11, %s17188_s27  ;;  %2201 = vrot.lane.b32.xlu1 %v17282_v13, %s17188_s27 }
  0x70   :  { %2203 = vrot.lane.b32.xlu0 %v17274_v12, %s17188_s27  ;;  %2205 = vrot.lane.b32.xlu1 %v17286_v14, %s17188_s27 }
  0x74   :  { %2207 = vrot.lane.b32.xlu0 %v17288_v15, %s17188_s27  ;;  %2209 = vrot.lane.b32.xlu1 %v17296_v17, %s17188_s27 }
  0x78   :  { %2211 = vrot.lane.b32.xlu0 %v17298_v18, %s17188_s27  ;;  %2213 = vrot.lane.b32.xlu1 %v17306_v19, %s17188_s27 }
  0x7c   :  { %2512 = vrot.lane.b32.xlu0 %v17272_v11, %s17189_s30  ;;  %2514 = vrot.lane.b32.xlu1 %v17282_v13, %s17189_s30 }
  0x7e   :  { %v100_v20 = vpop.permute.xlu0 %99  ;;  %v104_v21 = vpop.permute.xlu1 %103 }
  0x80   :  { %2516 = vrot.lane.b32.xlu0 %v17274_v12, %s17189_s30  ;;  %2518 = vrot.lane.b32.xlu1 %v17286_v14, %s17189_s30 }
  0x82   :  { %v102_v22 = vpop.permute.xlu0 %101  ;;  %v106_v23 = vpop.permute.xlu1 %105 }
  0x83   :  { %v117_v24 = vsel %vm115_vm0, %v102_v22, %v104_v21  ;;  %v116_v25 = vsel %vm115_vm0, %v100_v20, %v102_v22  ;;  %v118_v28 = vsel %vm115_vm0, %v104_v21, %v106_v23 }
  0x84   :  { %13151 = vmatprep.subr.msk.bf16.mxu0 %vm130_vm1, %v117_v24  ;;  %v132_v26 = vsel %vm130_vm1, %v116_v25, 0  ;;  %v138_v33 = vsel %vm130_vm1, %v118_v28, 0  ;;  %2520 = vrot.lane.b32.xlu0 %v17288_v15, %s17189_s30  ;;  %v16850_v24 = vld [vmem:[%s22537_s1 + $0x30] sm:$0xff]  }
  0x85   :  { %156 = vmatpush1.bf16.msra.mxu0 %v132_v26  ;;  %2522 = vrot.lane.b32.xlu1 %v17296_v17, %s17189_s30 }
  0x86   :  { %v108_v29 = vpop.permute.xlu0 %107  ;;  %v110_v30 = vpop.permute.xlu1 %109 }
  0x87   :  { %v119_v31 = vsel %vm115_vm0, %v106_v23, %v108_v29  ;;  %v120_v32 = vsel %vm115_vm0, %v108_v29, %v110_v30 }
  0x88   :  { %13152 = vmatmul.mubr.msk.bf16.vlgmr.msra.gmra.mrb[0].mxu0 %vm22548_vm2, %v16844_v27  ;;  %13154 = vmatprep.subr.msk.bf16.mxu1 %vm130_vm1, %v119_v31  ;;  %v144_v35 = vsel %vm130_vm1, %v120_v32, 0 }
  0x89   :  { %209 = vmatpush1.bf16.msra.mxu1 %v138_v33  ;;  %197 = vmatprep.mubr.bf16.mxu0 %v17181_v8 }
  0x8a   :  { %v112_v34 = vpop.permute.xlu0 %111  ;;  %v114_v36 = vpop.permute.xlu1 %113  ;;  %2524 = vrot.lane.b32.xlu0 %v17298_v18, %s17189_s30  ;;  %2526 = vrot.lane.b32.xlu1 %v17306_v19, %s17189_s30 }
  0x8b   :  { %v121_v37 = vsel %vm115_vm0, %v110_v30, %v112_v34  ;;  %v122_v38 = vsel %vm115_vm0, %v112_v34, %v114_v36  ;;  %13160 = vmatprep.subr.msk.bf16.mxu1 %vm130_vm1, %v114_v36 }
  0x8c   :  { %13155 = vmatmul.mubr.msk.bf16.vlgmr.msra.gmra.mrb[0].mxu1 %vm22548_vm2, %v16844_v27  ;;  %13157 = vmatprep.subr.msk.bf16.mxu0 %vm130_vm1, %v121_v37  ;;  %v150_v40 = vsel %vm130_vm1, %v122_v38, 0 }
  0x8d   :  { %262 = vmatpush1.bf16.msra.mxu0 %v144_v35  ;;  %250 = vmatprep.mubr.bf16.mxu1 %v17181_v8 }
  0x8e   :  { %315 = vmatpush1.bf16.msra.mxu1 %v150_v40  ;;  %13165 = vmatprep.subr.msk.bf16.mxu0 %vm130_vm1, %v17282_v13  ;;  %v635_v43 = vpop.permute.xlu0 %634  ;;  %v637_v45 = vpop.permute.xlu1 %636 }
  0x8f   :  { %13168 = vmatprep.subr.msk.bf16.mxu1 %vm130_vm1, %v17286_v14  ;;  %2825 = vrot.lane.b32.xlu0 %v17272_v11, %s17190_s16  ;;  %v651_v54 = vsel %vm650_vm3, %v635_v43, %v637_v45 }
  0x90   :  { %13153 = vmatmul.mubr.msk.bf16.gmra.mrb[4].mxu0 %vm22548_vm2, %v16845_v39  ;;  %2827 = vrot.lane.b32.xlu1 %v17282_v13, %s17190_s16  ;;  %v665_v55 = vsel %vm130_vm1, %v651_v54, 0 }
  0x91   :  { %293 = vmatprep.mubr.bf16.mxu0 %v17181_v8 }
  0x92   :  { %v639_v44 = vpop.permute.xlu0 %638  ;;  %v641_v51 = vpop.permute.xlu1 %640 }
  0x93   :  { %v652_v48 = vsel %vm650_vm3, %v637_v45, %v639_v44  ;;  %2829 = vrot.lane.b32.xlu0 %v17274_v12, %s17190_s16  ;;  %v653_v58 = vsel %vm650_vm3, %v639_v44, %v641_v51  ;;  %v16849_v12 = vld [vmem:[%s22537_s1 + $0x28] sm:$0xff]  }
  0x94   :  { %13156 = vmatmul.mubr.msk.bf16.gmra.mrb[4].mxu1 %vm22548_vm2, %v16845_v39  ;;  %2831 = vrot.lane.b32.xlu1 %v17286_v14, %s17190_s16  ;;  %v671_v60 = vsel %vm130_vm1, %v653_v58, 0 }
  0x95   :  { %346 = vmatprep.mubr.bf16.mxu1 %v17181_v8 }
  0x96   :  { %v643_v50 = vpop.permute.xlu0 %642  ;;  %v645_v57 = vpop.permute.xlu1 %644 }
  0x97   :  { %v654_v52 = vsel %vm650_vm3, %v641_v51, %v643_v50  ;;  %2833 = vrot.lane.b32.xlu0 %v17288_v15, %s17190_s16  ;;  %v655_v63 = vsel %vm650_vm3, %v643_v50, %v645_v57 }
  0x98   :  { %13158 = vmatmul.mubr.msk.bf16.vlgmr.msra.gmra.mrb[8].mxu0 %vm22548_vm2, %v16844_v27  ;;  %2835 = vrot.lane.b32.xlu1 %v17296_v17, %s17190_s16  ;;  %v677_v3 = vsel %vm130_vm1, %v655_v63, 0 }
  0x99   :  { %303 = vmatprep.mubr.bf16.mxu0 %v17181_v8  ;;  %408 = vmatpush1.bf16.msra.mxu0 %v384_v41 }
  0x9a   :  { %13171 = vmatprep.subr.msk.bf16.mxu0 %vm130_vm1, %v17296_v17  ;;  %v647_v56 = vpop.permute.xlu0 %646  ;;  %v649_v61 = vpop.permute.xlu1 %648 }
  0x9b   :  { %2837 = vrot.lane.b32.xlu0 %v17298_v18, %s17190_s16  ;;  %v656_v59 = vsel %vm650_vm3, %v645_v57, %v647_v56  ;;  %v657_v4 = vsel %vm650_vm3, %v647_v56, %v649_v61 }
  0x9c   :  { %13161 = vmatmul.mubr.msk.bf16.vlgmr.msra.gmra.mrb[8].mxu1 %vm22548_vm2, %v16844_v27  ;;  %2839 = vrot.lane.b32.xlu1 %v17306_v19, %s17190_s16  ;;  %v683_v7 = vsel %vm130_vm1, %v657_v4, 0 }
  0x9d   :  { %356 = vmatprep.mubr.bf16.mxu1 %v17181_v8  ;;  %461 = vmatpush1.bf16.msra.mxu1 %v390_v42 }
  0x9e   :  { %13174 = vmatprep.subr.msk.bf16.mxu1 %vm130_vm1, %v17306_v19  ;;  %v948_v62 = vpop.permute.xlu0 %947  ;;  %v950_v2 = vpop.permute.xlu1 %949 }
  0x9f   :  { %v964_v13 = vsel %vm963_vm4, %v948_v62, %v950_v2 }
  0xa0   :  { %13159 = vmatmul.mubr.msk.bf16.gmra.mrb[12].mxu0 %vm22548_vm2, %v16845_v39  ;;  %v978_v14 = vsel %vm130_vm1, %v964_v13, 0 }
  0xa1   :  { %439 = vmatprep.mubr.bf16.mxu0 %v17181_v8 }
  0xa2   :  { %v952_v1 = vpop.permute.xlu0 %951  ;;  %v954_v10 = vpop.permute.xlu1 %953 }
  0xa3   :  { %v965_v6 = vsel %vm963_vm4, %v950_v2, %v952_v1  ;;  %v966_v17 = vsel %vm963_vm4, %v952_v1, %v954_v10 }
  0xa4   :  { %13162 = vmatmul.mubr.msk.bf16.gmra.mrb[12].mxu1 %vm22548_vm2, %v16845_v39  ;;  %v984_v19 = vsel %vm130_vm1, %v966_v17, 0 }
  0xa5   :  { %492 = vmatprep.mubr.bf16.mxu1 %v17181_v8 }
  0xa6   :  { %v956_v9 = vpop.permute.xlu0 %955  ;;  %v958_v16 = vpop.permute.xlu1 %957 }
  0xa7   :  { %v967_v11 = vsel %vm963_vm4, %v954_v10, %v956_v9  ;;  %v968_v22 = vsel %vm963_vm4, %v956_v9, %v958_v16 }
  0xa8   :  { %13166 = vmatmul.mubr.msk.bf16.vlgmr.msra.gmra.mrb[0].mxu0 %vm22548_vm2, %v16846_v46  ;;  %v990_v27 = vsel %vm130_vm1, %v968_v22, 0 }
  0xa9   :  { %449 = vmatprep.mubr.bf16.mxu0 %v17181_v8  ;;  %514 = vmatpush1.bf16.msra.mxu0 %v396_v47 }
  0xaa   :  { %13183 = vmatprep.subr.msk.bf16.mxu0 %vm130_vm1, %v652_v48  ;;  %v960_v15 = vpop.permute.xlu0 %959  ;;  %v962_v20 = vpop.permute.xlu1 %961 }
  0xab   :  { %v969_v18 = vsel %vm963_vm4, %v958_v16, %v960_v15  ;;  %v970_v23 = vsel %vm963_vm4, %v960_v15, %v962_v20 }
  0xac   :  { %13169 = vmatmul.mubr.msk.bf16.vlgmr.msra.gmra.mrb[0].mxu1 %vm22548_vm2, %v16846_v46  ;;  %v996_v28 = vsel %vm130_vm1, %v970_v23, 0 }
  0xad   :  { %502 = vmatprep.mubr.bf16.mxu1 %v17181_v8  ;;  %567 = vmatpush1.bf16.msra.mxu1 %v402_v49 }
  0xae   :  { %13186 = vmatprep.subr.msk.bf16.mxu1 %vm130_vm1, %v654_v52  ;;  %v1261_v21 = vpop.permute.xlu0 %1260  ;;  %v1263_v26 = vpop.permute.xlu1 %1262 }
  0xb0   :  { %13167 = vmatmul.mubr.msk.bf16.gmra.mrb[4].mxu0 %vm22548_vm2, %v16847_v53 }
  0xb1   :  { %545 = vmatprep.mubr.bf16.mxu0 %v17181_v8 }
  0xb2   :  { %v1265_v25 = vpop.permute.xlu0 %1264  ;;  %v1267_v31 = vpop.permute.xlu1 %1266 }
  0xb3   :  { %v1278_v29 = vsel %vm1276_vm5, %v1263_v26, %v1265_v25 }
  0xb4   :  { %13170 = vmatmul.mubr.msk.bf16.gmra.mrb[4].mxu1 %vm22548_vm2, %v16847_v53 }
  0xb5   :  { %598 = vmatprep.mubr.bf16.mxu1 %v17181_v8 }
  0xb6   :  { %v1269_v30 = vpop.permute.xlu0 %1268 }
  0xb8   :  { %13172 = vmatmul.mubr.msk.bf16.vlgmr.msra.gmra.mrb[8].mxu0 %vm22548_vm2, %v16846_v46 }
  0xb9   :  { %555 = vmatprep.mubr.bf16.mxu0 %v17181_v8  ;;  %689 = vmatpush1.bf16.msra.mxu0 %v665_v55 }
  0xba   :  { %13189 = vmatprep.subr.msk.bf16.mxu0 %vm130_vm1, %v656_v59 }
  0xbc   :  { %13175 = vmatmul.mubr.msk.bf16.vlgmr.msra.gmra.mrb[8].mxu1 %vm22548_vm2, %v16846_v46 }
  0xbd   :  { %608 = vmatprep.mubr.bf16.mxu1 %v17181_v8  ;;  %742 = vmatpush1.bf16.msra.mxu1 %v671_v60 }
  0xbe   :  { %13192 = vmatprep.subr.msk.bf16.mxu1 %vm130_vm1, %v649_v61 }
  0xc0   :  { %13173 = vmatmul.mubr.msk.bf16.gmra.mrb[12].mxu0 %vm22548_vm2, %v16847_v53 }
  0xc1   :  { %720 = vmatprep.mubr.bf16.mxu0 %v17181_v8 }
  0xc4   :  { %13176 = vmatmul.mubr.msk.bf16.gmra.mrb[12].mxu1 %vm22548_vm2, %v16847_v53 }
  0xc5   :  { %773 = vmatprep.mubr.bf16.mxu1 %v17181_v8 }
  0xc8   :  { %13184 = vmatmul.mubr.msk.bf16.vlgmr.msra.gmra.mrb[0].mxu0 %vm22548_vm2, %v16848_v0 }
  0xc9   :  { %730 = vmatprep.mubr.bf16.mxu0 %v17181_v8  ;;  %795 = vmatpush1.bf16.msra.mxu0 %v677_v3 }
  0xca   :  { %13201 = vmatprep.subr.msk.bf16.mxu0 %vm130_vm1, %v965_v6 }
  0xcc   :  { %13187 = vmatmul.mubr.msk.bf16.vlgmr.msra.gmra.mrb[0].mxu1 %vm22548_vm2, %v16848_v0 }
  0xcd   :  { %783 = vmatprep.mubr.bf16.mxu1 %v17181_v8  ;;  %848 = vmatpush1.bf16.msra.mxu1 %v683_v7 }
  0xce   :  { %13204 = vmatprep.subr.msk.bf16.mxu1 %vm130_vm1, %v967_v11 }
  0xd0   :  { %13185 = vmatmul.mubr.msk.bf16.gmra.mrb[4].mxu0 %vm22548_vm2, %v16849_v12 }
  0xd1   :  { %826 = vmatprep.mubr.bf16.mxu0 %v17181_v8 }
  0xd4   :  { %13188 = vmatmul.mubr.msk.bf16.gmra.mrb[4].mxu1 %vm22548_vm2, %v16849_v12 }
  0xd5   :  { %879 = vmatprep.mubr.bf16.mxu1 %v17181_v8 }
  0xd8   :  { %13190 = vmatmul.mubr.msk.bf16.vlgmr.msra.gmra.mrb[8].mxu0 %vm22548_vm2, %v16848_v0 }
  0xd9   :  { %836 = vmatprep.mubr.bf16.mxu0 %v17181_v8  ;;  %1002 = vmatpush1.bf16.msra.mxu0 %v978_v14 }
  0xda   :  { %13207 = vmatprep.subr.msk.bf16.mxu0 %vm130_vm1, %v969_v18 }
  0xdc   :  { %13193 = vmatmul.mubr.msk.bf16.vlgmr.msra.gmra.mrb[8].mxu1 %vm22548_vm2, %v16848_v0 }
  0xdd   :  { %889 = vmatprep.mubr.bf16.mxu1 %v17181_v8  ;;  %1055 = vmatpush1.bf16.msra.mxu1 %v984_v19 }
  0xde   :  { %13210 = vmatprep.subr.msk.bf16.mxu1 %vm130_vm1, %v962_v20 }
  0xe0   :  { %13191 = vmatmul.mubr.msk.bf16.gmra.mrb[12].mxu0 %vm22548_vm2, %v16849_v12 }
  0xe1   :  { %1033 = vmatprep.mubr.bf16.mxu0 %v17181_v8 }
  0xe4   :  { %13194 = vmatmul.mubr.msk.bf16.gmra.mrb[12].mxu1 %vm22548_vm2, %v16849_v12 }
  0xe5   :  { %1086 = vmatprep.mubr.bf16.mxu1 %v17181_v8 }
  0xe8   :  { %13202 = vmatmul.mubr.msk.bf16.vlgmr.msra.gmra.mrb[0].mxu0 %vm22548_vm2, %v16850_v24 }
  0xe9   :  { %1043 = vmatprep.mubr.bf16.mxu0 %v17181_v8  ;;  %1108 = vmatpush1.bf16.msra.mxu0 %v990_v27 }
  0xea   :  { %13219 = vmatprep.subr.msk.bf16.mxu0 %vm130_vm1, %v1278_v29 }
  0xeb   :  { %18 = vsyncpa [#allocation4], 0  ;;  %v1280_v32 = vsel %vm1276_vm5, %v1267_v31, %v1269_v30  ;;  %v16851_v33 = vld [vmem:[%s22537_s1 + $0x38] sm:$0xff]   ;;  %v1277_v34 = vsel %vm1276_vm5, %v1261_v21, %v1263_v26  ;;  %v1273_v35 = vpop.permute.xlu0 %1272  ;;  %v1271_v36 = vpop.permute.xlu1 %1270  ;;  %v1279_v38 = vsel %vm1276_vm5, %v1265_v25, %v1267_v31  ;;  %v16852_v46 = vld [vmem:[%s22537_s1 + $0x40] sm:$0xff]   ;;  %vm1589_vm6 = vcmask 1006592   ;;  %s17192_s13 = smov 3  }
  0xec   :  { %13205 = vmatmul.mubr.msk.bf16.vlgmr.msra.gmra.mrb[0].mxu1 %vm22548_vm2, %v16850_v24  ;;  %v1291_v37 = vsel %vm130_vm1, %v1277_v34, 0  ;;  %v1282_v39 = vsel %vm1276_vm5, %v1271_v36, %v1273_v35  ;;  %v1297_v40 = vsel %vm130_vm1, %v1279_v38, 0  ;;  %v1281_v45 = vsel %vm1276_vm5, %v1269_v30, %v1271_v36  ;;  %v16853_v54 = vld [vmem:[%s22537_s1 + $0x48] sm:$0xff]   ;;  %v16854_v3 = vld [vmem:[%s22537_s1 + $0x50] sm:$0xff]   ;;  %v16855_v13 = vld [vmem:[%s22537_s1 + $0x58] sm:$0xff]   ;;  %s17193_s14 = smov 4  }
  0xed   :  { %1096 = vmatprep.mubr.bf16.mxu1 %v17181_v8  ;;  %1161 = vmatpush1.bf16.msra.mxu1 %v996_v28  ;;  %v1303_v47 = vsel %vm130_vm1, %v1281_v45, 0  ;;  %vm1902_vm7 = vcmask 998400   ;;  %v16856_v26 = vld [vmem:[%s22537_s1 + $0x60] sm:$0xff]   ;;  %vm2215_vm8 = vcmask 990208   ;;  %v3124_v28 = vld [vmem:[%s22538_s2 + $0x8] sm:$0xff]  ;;  %vm2528_vm9 = vcmask 982016  }
  0xee   :  { %13222 = vmatprep.subr.msk.bf16.mxu1 %vm130_vm1, %v1280_v32  ;;  %v3123_v27 = vld [vmem:[%s22538_s2] sm:$0xff]  ;;  %3134 = vperm.xlu1 %16691, %v3124_v28   ;;  %v3126_v32 = vld [vmem:[%s22538_s2 + $0x18] sm:$0xff]  ;;  %v16857_v38 = vld [vmem:[%s22537_s1 + $0x68] sm:$0xff]   ;;  %vm2841_vm10 = vcmask 973824   ;;  %vm22554_vm11 = vcmask 408776   ;;  %vm22549_vm12 = vcmask 203776  }
  0xef   :  { %v1275_v41 = vpop.permute.xlu1 %1274  ;;  %v1574_v42 = vpop.permute.xlu0 %1573  ;;  %3129 = vperm.xlu0 %16690, %v3123_v27   ;;  %v16862_v28 = vld [vmem:[%s22537_s1 + $0x90] sm:$0xff]   ;;  %vm22553_vm13 = vcmask 613776   ;;  %vm22551_vm14 = vcmask 712176   ;;  %vm22552_vm15 = vcmask 818776   ;;  %vm22550_vm0 = vcmask 917176  }
  0xf0   :  { %13203 = vmatmul.mubr.msk.bf16.gmra.mrb[4].mxu0 %vm22548_vm2, %v16851_v33  ;;  %v1283_v48 = vsel %vm1276_vm5, %v1273_v35, %v1275_v41  ;;  %v3125_v35 = vld [vmem:[%s22538_s2 + $0x10] sm:$0xff]  ;;  %vm22561_vm3 = vcmask 277576   ;;  %vm3382_vm4 = vcmask 228376   ;;  %vm22556_vm5 = vcmask 482576  }
  0xf1   :  { %1139 = vmatprep.mubr.bf16.mxu0 %v17181_v8  ;;  %v1309_v52 = vsel %vm130_vm1, %v1283_v48, 0 }
  0xf2   :  { %3139 = vperm.xlu1 %16691, %v3125_v35  }
  0xf3   :  { %v1578_v43 = vpop.permute.xlu0 %1577  ;;  %v1576_v44 = vpop.permute.xlu1 %1575  ;;  %3144 = vperm.xlu0 %16690, %v3126_v32   ;;  %v16863_v32 = vld [vmem:[%s22537_s1 + $0x98] sm:$0xff]  }
  0xf4   :  { %13206 = vmatmul.mubr.msk.bf16.gmra.mrb[4].mxu1 %vm22548_vm2, %v16851_v33  ;;  %v1591_v49 = vsel %vm1589_vm6, %v1576_v44, %v1578_v43  ;;  %v1590_v55 = vsel %vm1589_vm6, %v1574_v42, %v1576_v44 }
  0xf5   :  { %1192 = vmatprep.mubr.bf16.mxu1 %v17181_v8  ;;  %v1604_v58 = vsel %vm130_vm1, %v1590_v55, 0 }
  0xf7   :  { %v1582_v50 = vpop.permute.xlu0 %1581  ;;  %v1580_v51 = vpop.permute.xlu1 %1579 }
  0xf8   :  { %13208 = vmatmul.mubr.msk.bf16.vlgmr.msra.gmra.mrb[8].mxu0 %vm22548_vm2, %v16850_v24  ;;  %v1593_v53 = vsel %vm1589_vm6, %v1580_v51, %v1582_v50  ;;  %v1592_v59 = vsel %vm1589_vm6, %v1578_v43, %v1580_v51  ;;  %v16858_v51 = vld [vmem:[%s22537_s1 + $0x70] sm:$0xff]  }
  0xf9   :  { %1149 = vmatprep.mubr.bf16.mxu0 %v17181_v8  ;;  %1315 = vmatpush1.bf16.msra.mxu0 %v1291_v37  ;;  %v1610_v61 = vsel %vm130_vm1, %v1592_v59, 0  ;;  %v16859_v59 = vld [vmem:[%s22537_s1 + $0x78] sm:$0xff]  }
  0xfa   :  { %13225 = vmatprep.subr.msk.bf16.mxu0 %vm130_vm1, %v1282_v39 }
  0xfb   :  { %v1586_v56 = vpop.permute.xlu0 %1585  ;;  %v1584_v57 = vpop.permute.xlu1 %1583 }
  0xfc   :  { %13211 = vmatmul.mubr.msk.bf16.vlgmr.msra.gmra.mrb[8].mxu1 %vm22548_vm2, %v16850_v24  ;;  %v1595_v60 = vsel %vm1589_vm6, %v1584_v57, %v1586_v56  ;;  %v1594_v2 = vsel %vm1589_vm6, %v1582_v50, %v1584_v57 }
  0xfd   :  { %1202 = vmatprep.mubr.bf16.mxu1 %v17181_v8  ;;  %1368 = vmatpush1.bf16.msra.mxu1 %v1297_v40  ;;  %v1616_v4 = vsel %vm130_vm1, %v1594_v2, 0 }
  0xfe   :  { %13228 = vmatprep.subr.msk.bf16.mxu1 %vm130_vm1, %v1275_v41 }
  0xff   :  { %v1588_v62 = vpop.permute.xlu1 %1587  ;;  %v1887_v63 = vpop.permute.xlu0 %1886 }
 0x100   :  { %13209 = vmatmul.mubr.msk.bf16.gmra.mrb[12].mxu0 %vm22548_vm2, %v16851_v33  ;;  %v1596_v6 = vsel %vm1589_vm6, %v1586_v56, %v1588_v62  ;;  %vm3395_vm6 = vcmask 433376  }
 0x101   :  { %1346 = vmatprep.mubr.bf16.mxu0 %v17181_v8  ;;  %v1622_v11 = vsel %vm130_vm1, %v1596_v6, 0 }
 0x103   :  { %v1891_v0 = vpop.permute.xlu0 %1890  ;;  %v1889_v1 = vpop.permute.xlu1 %1888 }
 0x104   :  { %13212 = vmatmul.mubr.msk.bf16.gmra.mrb[12].mxu1 %vm22548_vm2, %v16851_v33  ;;  %v1904_v7 = vsel %vm1902_vm7, %v1889_v1, %v1891_v0  ;;  %v1903_v14 = vsel %vm1902_vm7, %v1887_v63, %v1889_v1 }
 0x105   :  { %1399 = vmatprep.mubr.bf16.mxu1 %v17181_v8  ;;  %v1917_v17 = vsel %vm130_vm1, %v1903_v14, 0 }
 0x107   :  { %v1895_v9 = vpop.permute.xlu0 %1894  ;;  %v1893_v10 = vpop.permute.xlu1 %1892 }
 0x108   :  { %13220 = vmatmul.mubr.msk.bf16.vlgmr.msra.gmra.mrb[0].mxu0 %vm22548_vm2, %v16852_v46  ;;  %v1906_v12 = vsel %vm1902_vm7, %v1893_v10, %v1895_v9  ;;  %v1905_v18 = vsel %vm1902_vm7, %v1891_v0, %v1893_v10  ;;  %v16860_v10 = vld [vmem:[%s22537_s1 + $0x80] sm:$0xff]  }
 0x109   :  { %1356 = vmatprep.mubr.bf16.mxu0 %v17181_v8  ;;  %1421 = vmatpush1.bf16.msra.mxu0 %v1303_v47  ;;  %v1923_v20 = vsel %vm130_vm1, %v1905_v18, 0  ;;  %v16861_v18 = vld [vmem:[%s22537_s1 + $0x88] sm:$0xff]   ;;  %s17191_s1 = smov 2  }
 0x10a   :  { %13237 = vmatprep.subr.msk.bf16.mxu0 %vm130_vm1, %v1591_v49 }
 0x10b   :  { %v1899_v15 = vpop.permute.xlu0 %1898  ;;  %v1897_v16 = vpop.permute.xlu1 %1896 }
 0x10c   :  { %13223 = vmatmul.mubr.msk.bf16.vlgmr.msra.gmra.mrb[0].mxu1 %vm22548_vm2, %v16852_v46  ;;  %v1908_v19 = vsel %vm1902_vm7, %v1897_v16, %v1899_v15  ;;  %v1907_v25 = vsel %vm1902_vm7, %v1895_v9, %v1897_v16 }
 0x10d   :  { %1409 = vmatprep.mubr.bf16.mxu1 %v17181_v8  ;;  %1474 = vmatpush1.bf16.msra.mxu1 %v1309_v52  ;;  %v1929_v29 = vsel %vm130_vm1, %v1907_v25, 0 }
 0x10e   :  { %13240 = vmatprep.subr.msk.bf16.mxu1 %vm130_vm1, %v1593_v53 }
 0x10f   :  { %v1901_v21 = vpop.permute.xlu1 %1900  ;;  %v2200_v22 = vpop.permute.xlu0 %2199 }
 0x110   :  { %13221 = vmatmul.mubr.msk.bf16.gmra.mrb[4].mxu0 %vm22548_vm2, %v16853_v54  ;;  %v1909_v30 = vsel %vm1902_vm7, %v1899_v15, %v1901_v21  ;;  %vm3322_vm7 = vcmask 457976  }
 0x111   :  { %1452 = vmatprep.mubr.bf16.mxu0 %v17181_v8  ;;  %v1935_v36 = vsel %vm130_vm1, %v1909_v30, 0 }
 0x113   :  { %v2204_v23 = vpop.permute.xlu0 %2203  ;;  %v2202_v24 = vpop.permute.xlu1 %2201 }
 0x114   :  { %13224 = vmatmul.mubr.msk.bf16.gmra.mrb[4].mxu1 %vm22548_vm2, %v16853_v54  ;;  %v2217_v31 = vsel %vm2215_vm8, %v2202_v24, %v2204_v23  ;;  %v2216_v39 = vsel %vm2215_vm8, %v2200_v22, %v2202_v24 }
 0x115   :  { %1505 = vmatprep.mubr.bf16.mxu1 %v17181_v8  ;;  %v2230_v42 = vsel %vm130_vm1, %v2216_v39, 0 }
 0x117   :  { %v2208_v33 = vpop.permute.xlu0 %2207  ;;  %v2206_v34 = vpop.permute.xlu1 %2205 }
 0x118   :  { %13226 = vmatmul.mubr.msk.bf16.vlgmr.msra.gmra.mrb[8].mxu0 %vm22548_vm2, %v16852_v46  ;;  %v2219_v37 = vsel %vm2215_vm8, %v2206_v34, %v2208_v33  ;;  %v2218_v43 = vsel %vm2215_vm8, %v2204_v23, %v2206_v34 }
 0x119   :  { %1462 = vmatprep.mubr.bf16.mxu0 %v17181_v8  ;;  %1628 = vmatpush1.bf16.msra.mxu0 %v1604_v58  ;;  %v2236_v45 = vsel %vm130_vm1, %v2218_v43, 0 }
 0x11a   :  { %13243 = vmatprep.subr.msk.bf16.mxu0 %vm130_vm1, %v1595_v60 }
 0x11b   :  { %v2212_v40 = vpop.permute.xlu0 %2211  ;;  %v2210_v41 = vpop.permute.xlu1 %2209 }
 0x11c   :  { %13229 = vmatmul.mubr.msk.bf16.vlgmr.msra.gmra.mrb[8].mxu1 %vm22548_vm2, %v16852_v46  ;;  %v2221_v44 = vsel %vm2215_vm8, %v2210_v41, %v2212_v40  ;;  %v2220_v50 = vsel %vm2215_vm8, %v2208_v33, %v2210_v41 }
 0x11d   :  { %1515 = vmatprep.mubr.bf16.mxu1 %v17181_v8  ;;  %1681 = vmatpush1.bf16.msra.mxu1 %v1610_v61  ;;  %v2242_v52 = vsel %vm130_vm1, %v2220_v50, 0 }
 0x11e   :  { %13246 = vmatprep.subr.msk.bf16.mxu1 %vm130_vm1, %v1588_v62 }
 0x11f   :  { %v2214_v46 = vpop.permute.xlu1 %2213  ;;  %v2513_v47 = vpop.permute.xlu0 %2512 }
 0x120   :  { %13227 = vmatmul.mubr.msk.bf16.gmra.mrb[12].mxu0 %vm22548_vm2, %v16853_v54  ;;  %v2222_v53 = vsel %vm2215_vm8, %v2212_v40, %v2214_v46  ;;  %vm3276_vm8 = vcmask 1048552  }
 0x121   :  { %1659 = vmatprep.mubr.bf16.mxu0 %v17181_v8  ;;  %v2248_v57 = vsel %vm130_vm1, %v2222_v53, 0 }
 0x123   :  { %v2517_v48 = vpop.permute.xlu0 %2516  ;;  %v2515_v49 = vpop.permute.xlu1 %2514 }
 0x124   :  { %13230 = vmatmul.mubr.msk.bf16.gmra.mrb[12].mxu1 %vm22548_vm2, %v16853_v54  ;;  %v2530_v54 = vsel %vm2528_vm9, %v2515_v49, %v2517_v48  ;;  %v2529_v60 = vsel %vm2528_vm9, %v2513_v47, %v2515_v49 }
 0x125   :  { %1712 = vmatprep.mubr.bf16.mxu1 %v17181_v8  ;;  %v2543_v63 = vsel %vm130_vm1, %v2529_v60, 0 }
 0x127   :  { %v2521_v55 = vpop.permute.xlu0 %2520  ;;  %v2519_v56 = vpop.permute.xlu1 %2518 }
 0x128   :  { %13238 = vmatmul.mubr.msk.bf16.vlgmr.msra.gmra.mrb[0].mxu0 %vm22548_vm2, %v16854_v3  ;;  %v2532_v58 = vsel %vm2528_vm9, %v2519_v56, %v2521_v55  ;;  %v2531_v0 = vsel %vm2528_vm9, %v2517_v48, %v2519_v56 }
 0x129   :  { %1669 = vmatprep.mubr.bf16.mxu0 %v17181_v8  ;;  %1734 = vmatpush1.bf16.msra.mxu0 %v1616_v4  ;;  %v2549_v2 = vsel %vm130_vm1, %v2531_v0, 0 }
 0x12a   :  { %13255 = vmatprep.subr.msk.bf16.mxu0 %vm130_vm1, %v1904_v7 }
 0x12b   :  { %v2525_v61 = vpop.permute.xlu0 %2524  ;;  %v2523_v62 = vpop.permute.xlu1 %2522 }
 0x12c   :  { %13241 = vmatmul.mubr.msk.bf16.vlgmr.msra.gmra.mrb[0].mxu1 %vm22548_vm2, %v16854_v3  ;;  %v2534_v1 = vsel %vm2528_vm9, %v2523_v62, %v2525_v61  ;;  %v2533_v9 = vsel %vm2528_vm9, %v2521_v55, %v2523_v62 }
 0x12d   :  { %1722 = vmatprep.mubr.bf16.mxu1 %v17181_v8  ;;  %1787 = vmatpush1.bf16.msra.mxu1 %v1622_v11  ;;  %v2555_v11 = vsel %vm130_vm1, %v2533_v9, 0 }
 0x12e   :  { %13258 = vmatprep.subr.msk.bf16.mxu1 %vm130_vm1, %v1906_v12 }
 0x12f   :  { %v2826_v4 = vpop.permute.xlu0 %2825 }
 0x130   :  { %13239 = vmatmul.mubr.msk.bf16.gmra.mrb[4].mxu0 %vm22548_vm2, %v16855_v13 }
 0x131   :  { %1765 = vmatprep.mubr.bf16.mxu0 %v17181_v8 }
 0x133   :  { %v2830_v6 = vpop.permute.xlu0 %2829 }
 0x134   :  { %13242 = vmatmul.mubr.msk.bf16.gmra.mrb[4].mxu1 %vm22548_vm2, %v16855_v13 }
 0x135   :  { %1818 = vmatprep.mubr.bf16.mxu1 %v17181_v8 }
 0x137   :  { %v2834_v14 = vpop.permute.xlu0 %2833 }
 0x138   :  { %13244 = vmatmul.mubr.msk.bf16.vlgmr.msra.gmra.mrb[8].mxu0 %vm22548_vm2, %v16854_v3 }
 0x139   :  { %1775 = vmatprep.mubr.bf16.mxu0 %v17181_v8  ;;  %1941 = vmatpush1.bf16.msra.mxu0 %v1917_v17 }
 0x13a   :  { %13261 = vmatprep.subr.msk.bf16.mxu0 %vm130_vm1, %v1908_v19 }
 0x13c   :  { %13247 = vmatmul.mubr.msk.bf16.vlgmr.msra.gmra.mrb[8].mxu1 %vm22548_vm2, %v16854_v3  ;;  %v2527_v3 = vpop.permute.xlu1 %2526 }
 0x13d   :  { %1828 = vmatprep.mubr.bf16.mxu1 %v17181_v8  ;;  %1994 = vmatpush1.bf16.msra.mxu1 %v1923_v20  ;;  %v2535_v12 = vsel %vm2528_vm9, %v2525_v61, %v2527_v3  ;;  %v2838_v20 = vpop.permute.xlu0 %2837  ;;  %vm22555_vm9 = vcmask 687576  }
 0x13e   :  { %13264 = vmatprep.subr.msk.bf16.mxu1 %vm130_vm1, %v1901_v21  ;;  %v2561_v16 = vsel %vm130_vm1, %v2535_v12, 0 }
 0x140   :  { %13245 = vmatmul.mubr.msk.bf16.gmra.mrb[12].mxu0 %vm22548_vm2, %v16855_v13  ;;  %v2828_v7 = vpop.permute.xlu1 %2827 }
 0x141   :  { %1972 = vmatprep.mubr.bf16.mxu0 %v17181_v8  ;;  %v2842_v19 = vsel %vm2841_vm10, %v2826_v4, %v2828_v7 }
 0x142   :  { %v2856_v22 = vsel %vm130_vm1, %v2842_v19, 0 }
 0x144   :  { %13248 = vmatmul.mubr.msk.bf16.gmra.mrb[12].mxu1 %vm22548_vm2, %v16855_v13  ;;  %v2843_v13 = vsel %vm2841_vm10, %v2828_v7, %v2830_v6  ;;  %v2832_v15 = vpop.permute.xlu1 %2831 }
 0x145   :  { %2025 = vmatprep.mubr.bf16.mxu1 %v17181_v8  ;;  %v2845_v17 = vsel %vm2841_vm10, %v2832_v15, %v2834_v14  ;;  %v2844_v23 = vsel %vm2841_vm10, %v2830_v6, %v2832_v15 }
 0x146   :  { %v2862_v25 = vsel %vm130_vm1, %v2844_v23, 0 }
 0x148   :  { %13256 = vmatmul.mubr.msk.bf16.vlgmr.msra.gmra.mrb[0].mxu0 %vm22548_vm2, %v16856_v26  ;;  %v2836_v21 = vpop.permute.xlu1 %2835 }
 0x149   :  { %1982 = vmatprep.mubr.bf16.mxu0 %v17181_v8  ;;  %2047 = vmatpush1.bf16.msra.mxu0 %v1929_v29  ;;  %v2847_v24 = vsel %vm2841_vm10, %v2836_v21, %v2838_v20  ;;  %v2846_v27 = vsel %vm2841_vm10, %v2834_v14, %v2836_v21 }
 0x14a   :  { %13273 = vmatprep.subr.msk.bf16.mxu0 %vm130_vm1, %v2217_v31  ;;  %v2868_v29 = vsel %vm130_vm1, %v2846_v27, 0 }
 0x14c   :  { %13259 = vmatmul.mubr.msk.bf16.vlgmr.msra.gmra.mrb[0].mxu1 %vm22548_vm2, %v16856_v26 }
 0x14d   :  { %2035 = vmatprep.mubr.bf16.mxu1 %v17181_v8  ;;  %2100 = vmatpush1.bf16.msra.mxu1 %v1935_v36 }
 0x14e   :  { %13276 = vmatprep.subr.msk.bf16.mxu1 %vm130_vm1, %v2219_v37 }
 0x150   :  { %13257 = vmatmul.mubr.msk.bf16.gmra.mrb[4].mxu0 %vm22548_vm2, %v16857_v38 }
 0x151   :  { %2078 = vmatprep.mubr.bf16.mxu0 %v17181_v8 }
 0x154   :  { %13260 = vmatmul.mubr.msk.bf16.gmra.mrb[4].mxu1 %vm22548_vm2, %v16857_v38 }
 0x155   :  { %2131 = vmatprep.mubr.bf16.mxu1 %v17181_v8 }
 0x158   :  { %13262 = vmatmul.mubr.msk.bf16.vlgmr.msra.gmra.mrb[8].mxu0 %vm22548_vm2, %v16856_v26 }
 0x159   :  { %2088 = vmatprep.mubr.bf16.mxu0 %v17181_v8  ;;  %2254 = vmatpush1.bf16.msra.mxu0 %v2230_v42 }
 0x15a   :  { %13279 = vmatprep.subr.msk.bf16.mxu0 %vm130_vm1, %v2221_v44 }
 0x15c   :  { %13265 = vmatmul.mubr.msk.bf16.vlgmr.msra.gmra.mrb[8].mxu1 %vm22548_vm2, %v16856_v26  ;;  %v2840_v26 = vpop.permute.xlu1 %2839 }
 0x15d   :  { %2141 = vmatprep.mubr.bf16.mxu1 %v17181_v8  ;;  %2307 = vmatpush1.bf16.msra.mxu1 %v2236_v45  ;;  %v2848_v30 = vsel %vm2841_vm10, %v2838_v20, %v2840_v26  ;;  %vm3335_vm10 = vcmask 662976  }
 0x15e   :  { %13282 = vmatprep.subr.msk.bf16.mxu1 %vm130_vm1, %v2214_v46  ;;  %v2874_v31 = vsel %vm130_vm1, %v2848_v30, 0 }
 0x160   :  { %13263 = vmatmul.mubr.msk.bf16.gmra.mrb[12].mxu0 %vm22548_vm2, %v16857_v38 }
 0x161   :  { %2285 = vmatprep.mubr.bf16.mxu0 %v17181_v8 }
 0x164   :  { %13266 = vmatmul.mubr.msk.bf16.gmra.mrb[12].mxu1 %vm22548_vm2, %v16857_v38 }
 0x165   :  { %2338 = vmatprep.mubr.bf16.mxu1 %v17181_v8 }
 0x168   :  { %13274 = vmatmul.mubr.msk.bf16.vlgmr.msra.gmra.mrb[0].mxu0 %vm22548_vm2, %v16858_v51 }
 0x169   :  { %2295 = vmatprep.mubr.bf16.mxu0 %v17181_v8  ;;  %2360 = vmatpush1.bf16.msra.mxu0 %v2242_v52 }
 0x16a   :  { %13291 = vmatprep.subr.msk.bf16.mxu0 %vm130_vm1, %v2530_v54 }
 0x16c   :  { %13277 = vmatmul.mubr.msk.bf16.vlgmr.msra.gmra.mrb[0].mxu1 %vm22548_vm2, %v16858_v51 }
 0x16d   :  { %2348 = vmatprep.mubr.bf16.mxu1 %v17181_v8  ;;  %2413 = vmatpush1.bf16.msra.mxu1 %v2248_v57  ;;  %v17824_v54 = vpop.permute.xlu1 %3134 }
 0x16e   :  { %13294 = vmatprep.subr.msk.bf16.mxu1 %vm130_vm1, %v2532_v58  ;;  %v17805_v33 = vpop.permute.xlu0 %3129 }
 0x170   :  { %13275 = vmatmul.mubr.msk.bf16.gmra.mrb[4].mxu0 %vm22548_vm2, %v16859_v59 }
 0x171   :  { %2391 = vmatprep.mubr.bf16.mxu0 %v17181_v8  ;;  %v17858_v14 = vpop.permute.xlu1 %3139 }
 0x174   :  { %13278 = vmatmul.mubr.msk.bf16.gmra.mrb[4].mxu1 %vm22548_vm2, %v16859_v59 }
 0x175   :  { %2444 = vmatprep.mubr.bf16.mxu1 %v17181_v8 }
 0x178   :  { %13280 = vmatmul.mubr.msk.bf16.vlgmr.msra.gmra.mrb[8].mxu0 %vm22548_vm2, %v16858_v51 }
 0x179   :  { %2401 = vmatprep.mubr.bf16.mxu0 %v17181_v8  ;;  %2567 = vmatpush1.bf16.msra.mxu0 %v2543_v63 }
 0x17a   :  { %13297 = vmatprep.subr.msk.bf16.mxu0 %vm130_vm1, %v2534_v1 }
 0x17c   :  { %13283 = vmatmul.mubr.msk.bf16.vlgmr.msra.gmra.mrb[8].mxu1 %vm22548_vm2, %v16858_v51 }
 0x17d   :  { %2454 = vmatprep.mubr.bf16.mxu1 %v17181_v8  ;;  %2620 = vmatpush1.bf16.msra.mxu1 %v2549_v2 }
 0x17e   :  { %13300 = vmatprep.subr.msk.bf16.mxu1 %vm130_vm1, %v2527_v3 }
 0x180   :  { %13281 = vmatmul.mubr.msk.bf16.gmra.mrb[12].mxu0 %vm22548_vm2, %v16859_v59 }
 0x181   :  { %2598 = vmatprep.mubr.bf16.mxu0 %v17181_v8 }
 0x184   :  { %13284 = vmatmul.mubr.msk.bf16.gmra.mrb[12].mxu1 %vm22548_vm2, %v16859_v59 }
 0x185   :  { %2651 = vmatprep.mubr.bf16.mxu1 %v17181_v8 }
 0x188   :  { %13292 = vmatmul.mubr.msk.bf16.vlgmr.msra.gmra.mrb[0].mxu0 %vm22548_vm2, %v16860_v10 }
 0x189   :  { %2608 = vmatprep.mubr.bf16.mxu0 %v17181_v8  ;;  %2673 = vmatpush1.bf16.msra.mxu0 %v2555_v11 }
 0x18a   :  { %13309 = vmatprep.subr.msk.bf16.mxu0 %vm130_vm1, %v2843_v13 }
 0x18c   :  { %13295 = vmatmul.mubr.msk.bf16.vlgmr.msra.gmra.mrb[0].mxu1 %vm22548_vm2, %v16860_v10 }
 0x18d   :  { %2661 = vmatprep.mubr.bf16.mxu1 %v17181_v8  ;;  %2726 = vmatpush1.bf16.msra.mxu1 %v2561_v16 }
 0x18e   :  { %13312 = vmatprep.subr.msk.bf16.mxu1 %vm130_vm1, %v2845_v17 }
 0x190   :  { %13293 = vmatmul.mubr.msk.bf16.gmra.mrb[4].mxu0 %vm22548_vm2, %v16861_v18 }
 0x191   :  { %2704 = vmatprep.mubr.bf16.mxu0 %v17181_v8 }
 0x194   :  { %13296 = vmatmul.mubr.msk.bf16.gmra.mrb[4].mxu1 %vm22548_vm2, %v16861_v18 }
 0x195   :  { %2757 = vmatprep.mubr.bf16.mxu1 %v17181_v8 }
 0x198   :  { %13298 = vmatmul.mubr.msk.bf16.vlgmr.msra.gmra.mrb[8].mxu0 %vm22548_vm2, %v16860_v10 }
 0x199   :  { %2714 = vmatprep.mubr.bf16.mxu0 %v17181_v8  ;;  %2880 = vmatpush1.bf16.msra.mxu0 %v2856_v22 }
 0x19a   :  { %13315 = vmatprep.subr.msk.bf16.mxu0 %vm130_vm1, %v2847_v24 }
 0x19c   :  { %13301 = vmatmul.mubr.msk.bf16.vlgmr.msra.gmra.mrb[8].mxu1 %vm22548_vm2, %v16860_v10 }
 0x19d   :  { %2767 = vmatprep.mubr.bf16.mxu1 %v17181_v8  ;;  %2933 = vmatpush1.bf16.msra.mxu1 %v2862_v25 }
 0x19e   :  { %13318 = vmatprep.subr.msk.bf16.mxu1 %vm130_vm1, %v2840_v26  ;;  %vm3263_vm1 = vcmask 1023776  }
 0x1a0   :  { %13299 = vmatmul.mubr.msk.bf16.gmra.mrb[12].mxu0 %vm22548_vm2, %v16861_v18 }
 0x1a1   :  { %2911 = vmatprep.mubr.bf16.mxu0 %v17181_v8 }
 0x1a4   :  { %13302 = vmatmul.mubr.msk.bf16.gmra.mrb[12].mxu1 %vm22548_vm2, %v16861_v18 }
 0x1a5   :  { %2964 = vmatprep.mubr.bf16.mxu1 %v17181_v8 }
 0x1a8   :  { %13310 = vmatmul.mubr.msk.bf16.vlgmr.msra.gmra.mrb[0].mxu0 %vm22548_vm2, %v16862_v28 }
 0x1a9   :  { %2921 = vmatprep.mubr.bf16.mxu0 %v17181_v8  ;;  %2986 = vmatpush1.bf16.msra.mxu0 %v2868_v29  ;;  %v17893_v29 = vpop.permute.xlu0 %3144 }
 0x1ac   :  { %13313 = vmatmul.mubr.msk.bf16.vlgmr.msra.gmra.mrb[0].mxu1 %vm22548_vm2, %v16862_v28 }
 0x1ad   :  { %2974 = vmatprep.mubr.bf16.mxu1 %v17181_v8  ;;  %3039 = vmatpush1.bf16.msra.mxu1 %v2874_v31 }
 0x1b0   :  { %13311 = vmatmul.mubr.msk.bf16.gmra.mrb[4].mxu0 %vm22548_vm2, %v16863_v32 }
 0x1b1   :  { %3017 = vmatprep.mubr.bf16.mxu0 %v17181_v8 }
 0x1b4   :  { %13314 = vmatmul.mubr.msk.bf16.gmra.mrb[4].mxu1 %vm22548_vm2, %v16863_v32 }
 0x1b5   :  { %3070 = vmatprep.mubr.bf16.mxu1 %v17181_v8 }
 0x1b8   :  { %13316 = vmatmul.mubr.msk.bf16.vlgmr.msra.gmra.mrb[8].mxu0 %vm22548_vm2, %v16862_v28 }
 0x1b9   :  { %3027 = vmatprep.mubr.bf16.mxu0 %v17181_v8 }
 0x1bc   :  { %13319 = vmatmul.mubr.msk.bf16.vlgmr.msra.gmra.mrb[8].mxu1 %vm22548_vm2, %v16862_v28 }
 0x1bd   :  { %3080 = vmatprep.mubr.bf16.mxu1 %v17181_v8 }
 0x1c0   :  { %13317 = vmatmul.mubr.msk.bf16.gmra.mrb[12].mxu0 %vm22548_vm2, %v16863_v32 }
 0x1c4   :  { %13320 = vmatmul.mubr.msk.bf16.gmra.mrb[12].mxu1 %vm22548_vm2, %v16863_v32  ;;  %vm22557_vm2 = vcmask 179200  }
 0x27b   :  { %v2913_v34 = vpop.f32.mrb[0].mxu0 }
 0x27c   :  { %v3147_v35 = vadd.f32 %v17805_v33, %v2913_v34  ;;  %v2915_v36 = vpop.f32.mrb[1].mxu0 }
 0x27d   :  { %v2917_v37 = vpop.f32.mrb[2].mxu0  ;;  %v3148_v52 = vadd.f32 %v17805_v33, %v2915_v36 }
 0x27e   :  { %v3179_v38 = vmax.f32 %v3147_v35, 0.0  ;;  %v2919_v39 = vpop.f32.mrb[3].mxu0  ;;  %v3155_v1 = vadd.f32 %v17824_v54, %v2917_v37 }
 0x27f   :  { %v2966_v40 = vpop.f32.mrb[0].mxu1  ;;  %v3180_v61 = vmax.f32 %v3148_v52, 0.0  ;;  %v3156_v62 = vadd.f32 %v17824_v54, %v2919_v39 }
 0x280   :  { %v3149_v41 = vadd.f32 %v17805_v33, %v2966_v40  ;;  %v2968_v42 = vpop.f32.mrb[1].mxu1  ;;  %v3225_v8 = vsel %vm22554_vm11, %v3179_v38, -inf  ;;  %v3212_v43 = vsel %vm22549_vm12, %v3179_v38, -inf  ;;  %v3238_v50 = vsel %vm22553_vm13, %v3179_v38, -inf }
 0x281   :  { %3226 = vmax.xlane.f32.xlu0 %v3225_v8  ;;  %3213 = vmax.xlane.f32.xlu1 %v3212_v43  ;;  %v2970_v44 = vpop.f32.mrb[2].mxu1  ;;  %v3150_v48 = vadd.f32 %v17805_v33, %v2968_v42  ;;  %v3251_v59 = vsel %vm22552_vm15, %v3179_v38, -inf  ;;  %vm3535_vm12 = vcmask 966376   ;;  %vm22562_vm15 = vcmask 1048400  }
 0x282   :  { %v17811_v45 = vmax.f32 %v3149_v41, 0.0  ;;  %v2972_v46 = vpop.f32.mrb[3].mxu1  ;;  %v3264_v4 = vsel %vm3263_vm1, %v3179_v38, -inf  ;;  %v17847_v7 = vsel %vm3276_vm8, %v3179_v38, -inf  ;;  %vm3454_vm13 = vcmask 1048448  }
 0x283   :  { %v17813_v47 = vpop.f32.mrb[4].mxu0  ;;  %v17828_v57 = vmax.f32 %v3150_v48, 0.0  ;;  %v17849_v9 = vmax.f32 %v3156_v62, 0.0  ;;  %v3157_v10 = vadd.f32 %v17824_v54, %v2970_v44  ;;  %v17855_v12 = vsel %vm22557_vm2, %v3180_v61, -inf }
 0x284   :  { %v17816_v49 = vpop.f32.mrb[5].mxu0  ;;  %v3429_v51 = vsel %vm22551_vm14, %v17811_v45, -inf  ;;  %v3442_v60 = vsel %vm22550_vm0, %v17811_v45, -inf  ;;  %vm3348_vm0 = vcmask 867976   ;;  %vm22558_vm14 = vcmask 23552  }
 0x285   :  { %3239 = vmax.xlane.f32.xlu0 %v3238_v50  ;;  %v17822_v53 = vpop.f32.mrb[6].mxu0  ;;  %3430 = vmax.xlane.f32.xlu1 %v3429_v51  ;;  %v3477_v6 = vsel %vm22561_vm3, %v17828_v57, -inf  ;;  %vm3456_vm11 = vcmask 72704   ;;  %v3158_v13 = vadd.f32 %v17824_v54, %v2972_v46  ;;  %v17862_v16 = vmax.f32 %v3155_v1, 0.0 }
 0x286   :  { %v17826_v55 = vpop.f32.mrb[7].mxu0  ;;  %v17865_v17 = vsel %vm3322_vm7, %v3180_v61, -inf  ;;  %v17872_v20 = vsel %vm3335_vm10, %v3180_v61, -inf  ;;  %v17875_v21 = vsel %vm3348_vm0, %v3180_v61, -inf  ;;  %v17878_v22 = vsel %vm22562_vm15, %v3180_v61, -inf }
 0x287   :  { %v2976_v56 = vpop.f32.mrb[4].mxu1  ;;  %v17882_v23 = vsel %vm22558_vm14, %v17811_v45, -inf  ;;  %v3383_v26 = vsel %vm3382_vm4, %v17811_v45, -inf  ;;  %v3490_v27 = vsel %vm22556_vm5, %v17828_v57, -inf  ;;  %v3164_v30 = vadd.f32 %v17858_v14, %v17816_v49 }
 0x288   :  { %v2978_v58 = vpop.f32.mrb[5].mxu1  ;;  %v3165_v24 = vadd.f32 %v17858_v14, %v2976_v56  ;;  %v17902_v34 = vsel %vm3454_vm13, %v17811_v45, -inf  ;;  %v17906_v35 = vsel %vm3456_vm11, %v17828_v57, -inf  ;;  %v17908_v36 = vmax.f32 %v3157_v10, 0.0 }
 0x289   :  { %3252 = vmax.xlane.f32.xlu0 %v3251_v59  ;;  %3443 = vmax.xlane.f32.xlu1 %v3442_v60  ;;  %v17834_v63 = vpop.f32.mrb[6].mxu1  ;;  %v3166_v31 = vadd.f32 %v17858_v14, %v2978_v58  ;;  %v17910_v37 = vmax.f32 %v3158_v13, 0.0  ;;  %v3171_v38 = vadd.f32 %v17893_v29, %v17822_v53  ;;  %v3396_v42 = vsel %vm3395_vm6, %v17811_v45, -inf }
 0x28a   :  { %v17836_v0 = vpop.f32.mrb[7].mxu1  ;;  %v3503_v8 = vsel %vm22555_vm9, %v17828_v57, -inf  ;;  %v17926_v43 = vsel %vm3276_vm8, %v17862_v16, -inf  ;;  %v17930_v44 = vsel %vm22557_vm2, %v17849_v9, -inf  ;;  %v3172_v46 = vadd.f32 %v17893_v29, %v17826_v55 }
 0x28b   :  { %v17839_v2 = vpop.f32.mrb[8].mxu0  ;;  %v17934_v48 = vmax.f32 %v3165_v24, 0.0  ;;  %v3536_v45 = vsel %vm3535_vm12, %v17828_v57, -inf  ;;  %v17942_v51 = vmax.f32 %v3164_v30, 0.0  ;;  %v17944_v52 = vmax.f32 %v3166_v31, 0.0 }
 0x28c   :  { %v17841_v3 = vpop.f32.mrb[9].mxu0  ;;  %v3173_v53 = vadd.f32 %v17893_v29, %v17834_v63  ;;  %vm22599_vm9 = vcmask 408776   ;;  %v3174_v58 = vadd.f32 %v17893_v29, %v17836_v0  ;;  %vm3812_vm5 = vcmask 195584  }
 0x28d   :  { %3265 = vmax.xlane.f32.xlu0 %v3264_v4  ;;  %3478 = vmax.xlane.f32.xlu1 %v3477_v6  ;;  %v17852_v11 = vpop.f32.mrb[10].mxu0  ;;  %v3228_v56 = vsel %vm22599_vm9, %v17862_v16, -inf  ;;  %v17958_v60 = vsel %vm22562_vm15, %v17849_v9, -inf  ;;  %v17962_v61 = vsel %vm22558_vm14, %v17908_v36, -inf  ;;  %v17966_v62 = vsel %vm3454_vm13, %v17908_v36, -inf }
 0x28e   :  { %v17860_v15 = vpop.f32.mrb[11].mxu0  ;;  %v17968_v63 = vmax.f32 %v3171_v38, 0.0  ;;  %vm22600_vm9 = vcmask 613776   ;;  %vm22601_vm2 = vcmask 818776   ;;  %v17978_v10 = vmax.f32 %v3172_v46, 0.0 }
 0x28f   :  { %v17869_v19 = vpop.f32.mrb[8].mxu1  ;;  %v3241_v0 = vsel %vm22600_vm9, %v17862_v16, -inf  ;;  %v3254_v4 = vsel %vm22601_vm2, %v17862_v16, -inf  ;;  %v3267_v24 = vsel %vm3263_vm1, %v17862_v16, -inf  ;;  %vm22602_vm14 = vcmask 712176  }
 0x290   :  { %v17885_v25 = vpop.f32.mrb[9].mxu1  ;;  %v17992_v30 = vmax.f32 %v3173_v53, 0.0  ;;  %v17998_v38 = vsel %vm3382_vm4, %v17908_v36, -inf  ;;  %v18004_v46 = vmax.f32 %v3174_v58, 0.0  ;;  %v18008_v53 = vadd.f32 %v17805_v33, %v17839_v2 }
 0x291   :  { %3384 = vmax.xlane.f32.xlu0 %v3383_v26  ;;  %3491 = vmax.xlane.f32.xlu1 %v3490_v27  ;;  %v17898_v32 = vpop.f32.mrb[10].mxu1  ;;  %v17986_v26 = vsel %vm3456_vm11, %v17910_v37, -inf  ;;  %v17990_v27 = vsel %vm22602_vm14, %v17934_v48, -inf  ;;  %vm22603_vm2 = vcmask 917176   ;;  %v18016_v6 = vsel %vm22561_vm3, %v17944_v52, -inf }
 0x292   :  { %v17914_v39 = vpop.f32.mrb[11].mxu1  ;;  %vm22604_vm14 = vcmask 203776   ;;  %v18031_v50 = vadd.f32 %v17824_v54, %v17860_v15  ;;  %vm22605_vm9 = vcmask 408776   ;;  %vm22611_vm3 = vcmask 818776  }
 0x293   :  { %v17918_v41 = vpop.f32.mrb[12].mxu0  ;;  %v18027_v2 = vsel %vm22604_vm14, %v17968_v63, -inf  ;;  %v18035_v40 = vsel %vm22605_vm9, %v17968_v63, -inf  ;;  %vm22614_vm15 = vmmov %vm22611_vm3 }
 0x294   :  { %v17936_v49 = vpop.f32.mrb[13].mxu0  ;;  %22606 = vst [vmem:[#allocation7_spill] sm:$0xff] %v18035_v40  ;;  %v18068_v28 = vsel %vm22614_vm15, %v17968_v63, -inf  ;;  %v18081_v40 = vsel %vm3263_vm1, %v17968_v63, -inf  ;;  %vm22627_vm15 = vcmask 712176  }
 0x295   :  { %3397 = vmax.xlane.f32.xlu0 %v3396_v42  ;;  %3504 = vmax.xlane.f32.xlu1 %v3503_v8  ;;  %v17948_v55 = vpop.f32.mrb[14].mxu0  ;;  %v3163_v8 = vadd.f32 %v17858_v14, %v17813_v47  ;;  %v18020_v42 = vadd.f32 %v17824_v54, %v17852_v11  ;;  %22615 = vst [vmem:[#allocation13_spill] sm:$0xff] %v18068_v28  ;;  %22618 = vst [vmem:[#allocation15_spill] sm:$0xff] %v18081_v40  ;;  %v18089_v28 = vsel %vm3382_vm4, %v17992_v30, -inf }
 0x296   :  { %v17954_v59 = vpop.f32.mrb[15].mxu0  ;;  %22620 = vst [vmem:[#allocation17_spill] sm:$0xff] %v18089_v28  ;;  %v18110_v28 = vsel %vm3348_vm0, %v17942_v51, -inf  ;;  %v18161_v40 = vsel %vm3276_vm8, %v17968_v63, -inf }
 0x297   :  { %v17970_v1 = vpop.f32.mrb[12].mxu1  ;;  %v3195_v58 = vmax.f32 %v3163_v8, 0.0  ;;  %v18047_v8 = vadd.f32 %v17805_v33, %v17885_v25  ;;  %22625 = vst [vmem:[#allocation22_spill] sm:$0xff] %v18110_v28  ;;  %22637 = vst [vmem:[#allocation29_spill] sm:$0xff] %v18161_v40 }
 0x298   :  { %v17980_v13 = vpop.f32.mrb[13].mxu1 }
 0x299   :  { %3537 = vmax.xlane.f32.xlu0 %v3536_v45  ;;  %v17994_v31 = vpop.f32.mrb[14].mxu1  ;;  %3229 = vmax.xlane.f32.xlu1 %v3228_v56  ;;  %v18012_v56 = vsel %vm22603_vm2, %v17934_v48, -inf  ;;  %vm22607_vm2 = vcmask 613776   ;;  %22610 = vst [vmem:[#allocation10_spill] sm:$0xff] %v18047_v8  ;;  %v18052_v15 = vsel %vm22604_vm14, %v3195_v58, -inf  ;;  %v18055_v18 = vsel %vm22605_vm9, %v3195_v58, -inf }
 0x29a   :  { %v3088_v45 = vpop.f32.mrb[15].mxu1  ;;  %v18039_v11 = vsel %vm22607_vm2, %v17968_v63, -inf  ;;  %v18058_v5 = vsel %vm22607_vm2, %v3195_v58, -inf  ;;  %v18064_v25 = vsel %vm3263_vm1, %v3195_v58, -inf  ;;  %vm22630_vm1 = vcmask 917176  }
 0x29b   :  { %v18023_v47 = vadd.f32 %v17893_v29, %v3088_v45  ;;  %22608 = vst [vmem:[#allocation8_spill] sm:$0xff] %v18039_v11  ;;  %v18043_v45 = vsel %vm3382_vm4, %v17934_v48, -inf  ;;  %22613 = vst [vmem:[#allocation12_spill] sm:$0xff] %v18064_v25  ;;  %v18077_v11 = vsel %vm3395_vm6, %v17934_v48, -inf  ;;  %v18085_v25 = vsel %vm3535_vm12, %v17944_v52, -inf }
 0x29c   :  { %22609 = vst [vmem:[#allocation9_spill] sm:$0xff] %v18043_v45  ;;  %v18061_v45 = vsel %vm22611_vm3, %v3195_v58, -inf  ;;  %22617 = vst [vmem:[#allocation14_spill] sm:$0xff] %v18077_v11  ;;  %v18101_v11 = vsel %vm3335_vm10, %v17942_v51, -inf  ;;  %v18133_v28 = vsel %vm3276_vm8, %v3195_v58, -inf  ;;  %vm22633_vm3 = vcmask 179200  }
 0x29d   :  { %3324 = vmax.xlane.f32.xlu0 %v17865_v17  ;;  %3242 = vmax.xlane.f32.xlu1 %v3241_v0  ;;  %22612 = vst [vmem:[#allocation11_spill] sm:$0xff] %v18061_v45  ;;  %v22616_v17 = vmax.f32 %v18023_v47, 0.0  ;;  %22619 = vst [vmem:[#allocation16_spill] sm:$0xff] %v18085_v25  ;;  %v18097_v45 = vsel %vm3395_vm6, %v17992_v30, -inf  ;;  %v18106_v25 = vsel %vm3535_vm12, %v18004_v46, -inf  ;;  %vm22634_vm4 = vcmask 1048400  }
 0x29e   :  { %22622 = vst [vmem:[#allocation19_spill] sm:$0xff] %v18097_v45  ;;  %22623 = vst [vmem:[#allocation20_spill] sm:$0xff] %v18101_v11  ;;  %v18118_v45 = vsel %vm22627_vm15, %v17992_v30, -inf  ;;  %vm22635_vm14 = vcmask 23552   ;;  %vm22574_vm9 = vcmask 1048496   ;;  %vm22573_vm2 = vcmask 121856  }
 0x29f   :  { %v18073_v0 = vsel %vm3812_vm5, %v22616_v17, -inf  ;;  %v18093_v17 = vsel %vm3322_vm7, %v17942_v51, -inf  ;;  %22624 = vst [vmem:[#allocation21_spill] sm:$0xff] %v18106_v25  ;;  %22628 = vst [vmem:[#allocation24_spill] sm:$0xff] %v18118_v45  ;;  %v18130_v25 = vsel %vm3348_vm0, %v17978_v10, -inf  ;;  %v18141_v45 = vsel %vm3454_vm13, %v17934_v48, -inf }
 0x2a0   :  { %22621 = vst [vmem:[#allocation18_spill] sm:$0xff] %v18093_v17  ;;  %v18114_v17 = vsel %vm3322_vm7, %v17978_v10, -inf  ;;  %22632 = vst [vmem:[#allocation27_spill] sm:$0xff] %v18130_v25  ;;  %v18157_v11 = vsel %vm22635_vm14, %v17934_v48, -inf  ;;  %vm3716_vm14 = vcmask 1048520   ;;  %vm22643_vm15 = vcmask 23552  }
 0x2a1   :  { %3337 = vmax.xlane.f32.xlu0 %v17872_v20  ;;  %3255 = vmax.xlane.f32.xlu1 %v3254_v4  ;;  %22626 = vst [vmem:[#allocation23_spill] sm:$0xff] %v18114_v17  ;;  %v18122_v20 = vsel %vm3335_vm10, %v17978_v10, -inf  ;;  %v18126_v4 = vsel %vm22630_vm1, %v17992_v30, -inf  ;;  %v18137_v17 = vsel %vm22633_vm3, %v17942_v51, -inf  ;;  %22636 = vst [vmem:[#allocation28_spill] sm:$0xff] %v18157_v11  ;;  %v18190_v58 = vsel %vm3456_vm11, %v18004_v46, -inf }
 0x2a2   :  { %22629 = vst [vmem:[#allocation25_spill] sm:$0xff] %v18122_v20  ;;  %22631 = vst [vmem:[#allocation26_spill] sm:$0xff] %v18126_v4  ;;  %v18145_v20 = vsel %vm3456_vm11, %v17944_v52, -inf  ;;  %v18149_v4 = vsel %vm22634_vm4, %v17942_v51, -inf  ;;  %v18186_v51 = vsel %vm3454_vm13, %v17992_v30, -inf  ;;  %v18205_v11 = vadd.f32 %v17824_v54, %v17914_v39 }
 0x2a3   :  { %vm22638_vm1 = vmmov %vm22633_vm3  ;;  %vm22640_vm3 = vcmask 277576   ;;  %22644 = vst [vmem:[#allocation32_spill] sm:$0xff] %v18186_v51  ;;  %vm22647_vm11 = vcmask 203776   ;;  %vm3810_vm13 = vcmask 1048568   ;;  %v3326_v39 = vsel %vm3322_vm7, %v17849_v9, -inf }
 0x2a4   :  { %v18168_v25 = vsel %vm22638_vm1, %v17978_v10, -inf  ;;  %v18172_v48 = vsel %vm22640_vm3, %v18004_v46, -inf  ;;  %vm22642_vm8 = vmmov %vm22634_vm4  ;;  %vm3644_vm4 = vcmask 171008   ;;  %22645 = vst [vmem:[#allocation33_spill] sm:$0xff] %v18190_v58  ;;  %vm3718_vm1 = vcmask 146432  }
 0x2a5   :  { %3350 = vmax.xlane.f32.xlu0 %v17875_v21  ;;  %3268 = vmax.xlane.f32.xlu1 %v3267_v24  ;;  %22639 = vst [vmem:[#allocation30_spill] sm:$0xff] %v18168_v25  ;;  %22641 = vst [vmem:[#allocation31_spill] sm:$0xff] %v18172_v48  ;;  %v18176_v63 = vsel %vm22642_vm8, %v17978_v10, -inf  ;;  %v18182_v24 = vsel %vm22643_vm15, %v17992_v30, -inf  ;;  %v3152_v10 = vadd.f32 %v17805_v33, %v17841_v3  ;;  %v3215_v3 = vsel %vm22647_vm11, %v17862_v16, -inf }
 0x2a6   :  { %v3161_v48 = vadd.f32 %v17824_v54, %v17898_v32  ;;  %v3153_v30 = vadd.f32 %v17805_v33, %v17869_v19  ;;  %22646 = vst [vmem:[#allocation34_spill] sm:$0xff] %v18205_v11  ;;  %v18210_v32 = vmax.f32 %v18020_v42, 0.0  ;;  %v3399_v25 = vsel %vm3395_vm6, %v17908_v36, -inf }
 0x2a7   :  { %vm22648_vm15 = vcmask 712176   ;;  %v3539_v54 = vsel %vm3535_vm12, %v17910_v37, -inf  ;;  %v18220_v19 = vmax.f32 %v18031_v50, 0.0  ;;  %vm22649_vm3 = vcmask 917176  }
 0x2a8   :  { %v3432_v33 = vsel %vm22648_vm15, %v17908_v36, -inf  ;;  %v3445_v16 = vsel %vm22649_vm3, %v17908_v36, -inf  ;;  %v18231_v42 = vmax.f32 %v18008_v53, 0.0  ;;  %v18235_v21 = vmax.f32 %v3161_v48, 0.0 }
 0x2a9   :  { %3387 = vmax.xlane.f32.xlu1 %v17998_v38  ;;  %3216 = vmax.xlane.f32.xlu0 %v3215_v3  ;;  %v18228_v38 = vsel %vm3335_vm10, %v17849_v9, -inf  ;;  %v18233_v3 = vmax.f32 %v3152_v10, 0.0  ;;  %v18239_v50 = vsel %vm3348_vm0, %v17849_v9, -inf  ;;  %v18241_v40 = vmax.f32 %v3153_v30, 0.0 }
 0x2aa   :  { %v22650_v36 = vmax.f32 %v18047_v8, 0.0  ;;  %v3167_v53 = vadd.f32 %v17858_v14, %v17918_v41  ;;  %vm22580_vm12 = vcmask 326776   ;;  %v18253_v48 = vadd.f32 %v17858_v14, %v17980_v13 }
 0x2ab   :  { %vm22578_vm0 = vcmask 531776   ;;  %v18257_v9 = vsel %vm22574_vm9, %v17910_v37, -inf  ;;  %v18261_v10 = vsel %vm22573_vm2, %v18210_v32, -inf  ;;  %vm22653_vm6 = vcmask 1048544  }
 0x2ac   :  { %v18246_v58 = vsel %vm3812_vm5, %v22650_v36, -inf  ;;  %22651 = vst [vmem:[#allocation35_spill] sm:$0xff] %v18257_v9  ;;  %22652 = vst [vmem:[#allocation36_spill] sm:$0xff] %v18261_v10  ;;  %v18265_v30 = vsel %vm22653_vm6, %v18210_v32, -inf  ;;  %v3169_v41 = vadd.f32 %v17858_v14, %v17970_v1  ;;  %vm22579_vm7 = vcmask 736776  }
 0x2ad   :  { %3400 = vmax.xlane.f32.xlu1 %v3399_v25  ;;  %3433 = vmax.xlane.f32.xlu0 %v3432_v33  ;;  %22654 = vst [vmem:[#allocation37_spill] sm:$0xff] %v18265_v30  ;;  %vm3609_vm10 = vcmask 941776   ;;  %v18273_v25 = vsel %vm3644_vm4, %v18220_v19, -inf  ;;  %v18277_v33 = vsel %vm3716_vm14, %v18220_v19, -inf  ;;  %v18283_v1 = vsel %vm3718_vm1, %v18235_v21, -inf }
 0x2ae   :  { %22655 = vst [vmem:[#allocation38_spill] sm:$0xff] %v18273_v25  ;;  %v18287_v51 = vsel %vm22574_vm9, %v17828_v57, -inf  ;;  %v18291_v13 = vsel %vm22573_vm2, %v18231_v42, -inf  ;;  %v3168_v8 = vadd.f32 %v17858_v14, %v17936_v49  ;;  %v3175_v10 = vadd.f32 %v17893_v29, %v17948_v55 }
 0x2af   :  { %v22656_v57 = vmax.f32 %v18205_v11, 0.0  ;;  %v18306_v9 = vmax.f32 %v3167_v53, 0.0  ;;  %v3176_v14 = vadd.f32 %v17893_v29, %v17954_v59  ;;  %vm3797_vm15 = vcmask 1040176  }
 0x2b0   :  { %v18311_v55 = vmax.f32 %v3169_v41, 0.0  ;;  %v3177_v25 = vadd.f32 %v17893_v29, %v17994_v31  ;;  %vm3664_vm3 = vcmask 375976   ;;  %vm3677_vm6 = vcmask 580976  }
 0x2b1   :  { %v18304_v30 = vsel %vm3812_vm5, %v22656_v57, -inf  ;;  %3540 = vmax.xlane.f32.xlu1 %v3539_v54  ;;  %3446 = vmax.xlane.f32.xlu0 %v3445_v16  ;;  %vm3690_vm11 = vcmask 785976   ;;  %vm22657_vm8 = vcmask 1048544   ;;  %v18321_v59 = vsel %vm3644_vm4, %v18233_v3, -inf }
 0x2b2   :  { %v18317_v53 = vsel %vm22657_vm8, %v18231_v42, -inf  ;;  %22659 = vst [vmem:[#allocation40_spill] sm:$0xff] %v18321_v59  ;;  %vm3758_vm2 = vcmask 425176   ;;  %vm3703_vm9 = vcmask 990976   ;;  %v18327_v16 = vsel %vm3716_vm14, %v18233_v3, -inf }
 0x2b3   :  { %22658 = vst [vmem:[#allocation39_spill] sm:$0xff] %v18317_v53  ;;  %v18331_v29 = vsel %vm3718_vm1, %v18241_v40, -inf  ;;  %v18335_v31 = vsel %vm3810_vm13, %v18241_v40, -inf  ;;  %v18337_v41 = vmax.f32 %v3175_v10, 0.0  ;;  %vm22660_vm8 = vcmask 277576  }
 0x2b4   :  { %v3480_v57 = vsel %vm22660_vm8, %v17910_v37, -inf  ;;  %v18345_v49 = vmax.f32 %v3176_v14, 0.0  ;;  %v22661_v11 = vmax.f32 %v18253_v48, 0.0  ;;  %v22663_v10 = vmax.f32 %v17847_v7, %v17855_v12 }
 0x2b5   :  { %3327 = vmax.xlane.f32.xlu1 %v3326_v39  ;;  %v18357_v53 = vsel %vm3810_vm13, %v18235_v21, -inf  ;;  %v18361_v54 = vsel %vm22580_vm12, %v18306_v9, -inf  ;;  %v3200_v14 = vmax.f32 %v3168_v8, 0.0  ;;  %v3209_v36 = vmax.f32 %v3177_v25, 0.0 }
 0x2b6   :  { %v18350_v59 = vsel %vm3812_vm5, %v22661_v11, -inf  ;;  %3281 = vmax.xlane.f32.xlu0 %v22663_v10  ;;  %vm3832_vm8 = vcmask 400576   ;;  %v18367_v39 = vsel %vm22578_vm0, %v18306_v9, -inf  ;;  %v18371_v7 = vsel %vm22579_vm7, %v18306_v9, -inf }
 0x2b7   :  { %22662 = vst [vmem:[#allocation41_spill] sm:$0xff] %v18350_v59  ;;  %22664 = vst [vmem:[#allocation42_spill] sm:$0xff] %v18367_v39  ;;  %v18375_v12 = vsel %vm3810_vm13, %v18311_v55, -inf  ;;  %v18379_v8 = vsel %vm3609_vm10, %v18306_v9, -inf  ;;  %vm22667_vm5 = vcmask 1048496   ;;  %vm22668_vm0 = vcmask 121856  }
 0x2b8   :  { %22665 = vst [vmem:[#allocation43_spill] sm:$0xff] %v18371_v7  ;;  %22666 = vst [vmem:[#allocation44_spill] sm:$0xff] %v18379_v8  ;;  %v18383_v25 = vsel %vm22667_vm5, %v18004_v46, -inf  ;;  %v18389_v11 = vsel %vm22668_vm0, %v18337_v41, -inf  ;;  %vm22670_vm7 = vcmask 630176   ;;  %vm22672_vm12 = vcmask 482576  }
 0x2b9   :  { %22669 = vst [vmem:[#allocation45_spill] sm:$0xff] %v18389_v11  ;;  %v18393_v7 = vsel %vm22670_vm7, %v18311_v55, -inf  ;;  %v18397_v39 = vsel %vm22672_vm12, %v17944_v52, -inf  ;;  %3340 = vmax.xlane.f32.xlu1 %v18228_v38  ;;  %v22674_v8 = vmax.f32 %v17878_v22, %v17882_v23  ;;  %vm22675_vm0 = vcmask 835176   ;;  %vm22686_vm12 = vmmov %vm22667_vm5 }
 0x2ba   :  { %22671 = vst [vmem:[#allocation46_spill] sm:$0xff] %v18393_v7  ;;  %22673 = vst [vmem:[#allocation47_spill] sm:$0xff] %v18397_v39  ;;  %v18407_v59 = vsel %vm22675_vm0, %v18311_v55, -inf  ;;  %vm22677_vm7 = vcmask 1048544   ;;  %v18415_v39 = vsel %vm3644_vm4, %v18345_v49, -inf  ;;  %v18421_v22 = vsel %vm3797_vm15, %v18311_v55, -inf }
 0x2bb   :  { %3365 = vmax.xlane.f32.xlu0 %v22674_v8  ;;  %22676 = vst [vmem:[#allocation48_spill] sm:$0xff] %v18407_v59  ;;  %v18411_v7 = vsel %vm22677_vm7, %v18337_v41, -inf  ;;  %22679 = vst [vmem:[#allocation50_spill] sm:$0xff] %v18415_v39  ;;  %v18425_v23 = vsel %vm3716_vm14, %v18345_v49, -inf  ;;  %v18428_v8 = vsel %vm3718_vm1, %v3209_v36, -inf  ;;  %v18433_v59 = vsel %vm3664_vm3, %v3200_v14, -inf }
 0x2bc   :  { %22678 = vst [vmem:[#allocation49_spill] sm:$0xff] %v18411_v7  ;;  %22680 = vst [vmem:[#allocation51_spill] sm:$0xff] %v18421_v22  ;;  %v18436_v11 = vsel %vm3677_vm6, %v3200_v14, -inf  ;;  %v18439_v38 = vsel %vm3690_vm11, %v3200_v14, -inf  ;;  %v18442_v22 = vsel %vm3703_vm9, %v3200_v14, -inf  ;;  %v18446_v39 = vsel %vm22686_vm12, %v17944_v52, -inf }
 0x2bd   :  { %22681 = vst [vmem:[#allocation52_spill] sm:$0xff] %v18428_v8  ;;  %22682 = vst [vmem:[#allocation53_spill] sm:$0xff] %v18433_v59  ;;  %vm22687_vm5 = vcmask 121856   ;;  %v18453_v10 = vsel %vm3758_vm2, %v3209_v36, -inf  ;;  %3353 = vmax.xlane.f32.xlu1 %v18239_v50  ;;  %vm22690_vm0 = vcmask 630176   ;;  %vm22692_vm7 = vcmask 835176  }
 0x2be   :  { %22683 = vst [vmem:[#allocation54_spill] sm:$0xff] %v18436_v11  ;;  %22684 = vst [vmem:[#allocation55_spill] sm:$0xff] %v18439_v38  ;;  %v18450_v7 = vsel %vm22687_vm5, %v18306_v9, -inf  ;;  %v18459_v11 = vsel %vm22690_vm0, %v3209_v36, -inf  ;;  %v18465_v59 = vsel %vm3797_vm15, %v3209_v36, -inf  ;;  %vm22695_vm12 = vcmask 1048544  }
 0x2bf   :  { %22685 = vst [vmem:[#allocation56_spill] sm:$0xff] %v18442_v22  ;;  %22688 = vst [vmem:[#allocation57_spill] sm:$0xff] %v18450_v7  ;;  %3481 = vmax.xlane.f32.xlu0 %v3480_v57  ;;  %v18462_v22 = vsel %vm22692_vm7, %v3209_v36, -inf  ;;  %v18469_v8 = vsel %vm22695_vm12, %v18306_v9, -inf  ;;  %v18475_v50 = vsel %vm3716_vm14, %v3200_v14, -inf  ;;  %v18479_v57 = vsel %vm3718_vm1, %v18311_v55, -inf }
 0x2c0   :  { %22689 = vst [vmem:[#allocation58_spill] sm:$0xff] %v18453_v10  ;;  %22691 = vst [vmem:[#allocation59_spill] sm:$0xff] %v18459_v11  ;;  %v18472_v10 = vsel %vm3644_vm4, %v3200_v14, -inf  ;;  %vm22697_vm4 = vcmask 482576   ;;  %v18497_v7 = vsel %vm3810_vm13, %v3209_v36, -inf  ;;  %vm22700_vm1 = vcmask 687576  }
 0x2c1   :  { %22693 = vst [vmem:[#allocation60_spill] sm:$0xff] %v18462_v22  ;;  %22694 = vst [vmem:[#allocation61_spill] sm:$0xff] %v18465_v59  ;;  %v22696_v22 = vmax.f32 %v18023_v47, 0.0  ;;  %v18492_v11 = vsel %vm22697_vm4, %v18004_v46, -inf  ;;  %v18501_v38 = vsel %vm22700_vm1, %v18004_v46, -inf  ;;  %v3829_v59 = vmax.f32 %v18497_v7, %v18073_v0  ;;  %v22719_v46 = vld [vmem:[#allocation20_spill] sm:$0xff] }
 0x2c2   :  { %22698 = vst [vmem:[#allocation62_spill] sm:$0xff] %v18492_v11  ;;  %vm22699_vm14 = vmmov %vm22697_vm4  ;;  %v22704_v11 = vmax.f32 %v17926_v43, %v17930_v44  ;;  %v22709_v43 = vld [vmem:[#allocation12_spill] sm:$0xff]  ;;  %vm3298_vm13 = vcmask 7168   ;;  %vm22739_vm12 = vcmask 326776   ;;  %vm3303_vm4 = vcmask 15360  }
 0x2c3   :  { %v18488_v9 = vsel %vm3832_vm8, %v22696_v22, -inf  ;;  %v3493_v14 = vsel %vm22699_vm14, %v17910_v37, -inf  ;;  %vm22701_vm5 = vmmov %vm22700_vm1  ;;  %v22702_v22 = vmax.f32 %v17902_v34, %v17906_v35  ;;  %v22706_v34 = vmax.f32 %v17966_v62, %v17986_v26  ;;  %v22707_v35 = vld [vmem:[#allocation11_spill] sm:$0xff]  ;;  %v22710_v44 = vld [vmem:[#allocation8_spill] sm:$0xff] }
 0x2c4   :  { %v18505_v47 = vsel %vm22701_vm5, %v17944_v52, -inf  ;;  %3494 = vmax.xlane.f32.xlu0 %v3493_v14  ;;  %vm22703_vm0 = vmmov %vm22700_vm1  ;;  %v22705_v52 = vmax.f32 %v17958_v60, %v17962_v61  ;;  %v22711_v60 = vld [vmem:[#allocation9_spill] sm:$0xff]  ;;  %v22713_v62 = vld [vmem:[#allocation14_spill] sm:$0xff]  ;;  %vm22741_vm1 = vcmask 531776   ;;  %vm22742_vm5 = vcmask 23552  }
 0x2c5   :  { %3459 = vmax.xlane.f32.xlu1 %v22702_v22  ;;  %v3506_v36 = vsel %vm22703_vm0, %v17910_v37, -inf  ;;  %v22708_v37 = vld [vmem:[#allocation7_spill] sm:$0xff]  ;;  %v22712_v61 = vld [vmem:[#allocation13_spill] sm:$0xff]  ;;  %v22717_v26 = vld [vmem:[#allocation18_spill] sm:$0xff] }
 0x2c6   :  { %v22724_v14 = vld [vmem:[#allocation25_spill] sm:$0xff]  ;;  %v22725_v22 = vld [vmem:[#allocation26_spill] sm:$0xff]  ;;  %vm22740_vm14 = vmmov %vm22739_vm12 }
 0x2c7   :  { %vm22743_vm0 = vmmov %vm22741_vm1 }
 0x2c8   :  { %3507 = vmax.xlane.f32.xlu0 %v3506_v36  ;;  %v22726_v36 = vld [vmem:[#allocation27_spill] sm:$0xff] }
 0x2c9   :  { %3286 = vmax.xlane.f32.xlu1 %v22704_v11  ;;  %v22723_v11 = vld [vmem:[#allocation24_spill] sm:$0xff] }
 0x2cc   :  { %3464 = vmax.xlane.f32.xlu0 %v22706_v34  ;;  %v22728_v34 = vmax.f32 %v18141_v45, %v18145_v20 }
 0x2cd   :  { %3370 = vmax.xlane.f32.xlu1 %v22705_v52  ;;  %v22727_v52 = vmax.f32 %v18133_v28, %v18137_v17  ;;  %v22736_v28 = vld [vmem:[#allocation32_spill] sm:$0xff]  ;;  %v22737_v17 = vld [vmem:[#allocation33_spill] sm:$0xff] }
 0x2d0   :  { %3219 = vmax.xlane.f32.xlu0 %v18052_v15  ;;  %v22722_v15 = vld [vmem:[#allocation23_spill] sm:$0xff] }
 0x2d1   :  { %3436 = vmax.xlane.f32.xlu1 %v17990_v27  ;;  %v22718_v27 = vld [vmem:[#allocation19_spill] sm:$0xff] }
 0x2d4   :  { %3232 = vmax.xlane.f32.xlu0 %v18055_v18  ;;  %v22714_v18 = vld [vmem:[#allocation15_spill] sm:$0xff] }
 0x2d5   :  { %3449 = vmax.xlane.f32.xlu1 %v18012_v56  ;;  %v22720_v56 = vld [vmem:[#allocation21_spill] sm:$0xff] }
 0x2d8   :  { %3245 = vmax.xlane.f32.xlu0 %v18058_v5  ;;  %v22716_v5 = vld [vmem:[#allocation17_spill] sm:$0xff] }
 0x2d9   :  { %3484 = vmax.xlane.f32.xlu1 %v18016_v6  ;;  %v22715_v6 = vld [vmem:[#allocation16_spill] sm:$0xff] }
 0x2dc   :  { %3258 = vmax.xlane.f32.xlu0 %v22707_v35  ;;  %v22729_v35 = vld [vmem:[#allocation28_spill] sm:$0xff] }
 0x2dd   :  { %3222 = vmax.xlane.f32.xlu1 %v18027_v2  ;;  %v22721_v2 = vld [vmem:[#allocation22_spill] sm:$0xff] }
 0x2e0   :  { %3271 = vmax.xlane.f32.xlu0 %v22709_v43  ;;  %v22731_v43 = vld [vmem:[#allocation29_spill] sm:$0xff] }
 0x2e1   :  { %3235 = vmax.xlane.f32.xlu1 %v22708_v37  ;;  %v22730_v37 = vmax.f32 %v18149_v4, %v22729_v35 }
 0x2e4   :  { %3390 = vmax.xlane.f32.xlu0 %v22711_v60 }
 0x2e5   :  { %3248 = vmax.xlane.f32.xlu1 %v22710_v44  ;;  %v22732_v44 = vld [vmem:[#allocation30_spill] sm:$0xff] }
 0x2e6   :  { %v22733_v60 = vmax.f32 %v22731_v43, %v22732_v44 }
 0x2e8   :  { %3403 = vmax.xlane.f32.xlu0 %v22713_v62  ;;  %v22735_v62 = vmax.f32 %v18176_v63, %v18182_v24 }
 0x2e9   :  { %3261 = vmax.xlane.f32.xlu1 %v22712_v61  ;;  %v22734_v61 = vld [vmem:[#allocation31_spill] sm:$0xff] }
 0x2ec   :  { %3543 = vmax.xlane.f32.xlu0 %v22715_v6  ;;  %v3785_v6 = vsel %vm22692_vm7, %v18241_v40, -inf  ;;  %vm22744_vm7 = vcmask 736776  }
 0x2ed   :  { %3274 = vmax.xlane.f32.xlu1 %v22714_v18  ;;  %v22738_v18 = vmax.f32 %v22736_v28, %v22737_v17 }
 0x2f0   :  { %3330 = vmax.xlane.f32.xlu0 %v22717_v26 }
 0x2f1   :  { %3393 = vmax.xlane.f32.xlu1 %v22716_v5  ;;  %v3571_v5 = vsel %vm22739_vm12, %v18231_v42, -inf  ;;  %vm22745_vm12 = vcmask 31744  }
 0x2f4   :  { %3343 = vmax.xlane.f32.xlu0 %v22719_v46  ;;  %v3584_v46 = vsel %vm22741_vm1, %v18231_v42, -inf  ;;  %vm22747_vm1 = vcmask 630176  }
 0x2f5   :  { %3406 = vmax.xlane.f32.xlu1 %v22718_v27  ;;  %v3574_v27 = vsel %vm22740_vm14, %v18210_v32, -inf  ;;  %vm22746_vm14 = vmmov %vm22744_vm7  ;;  %v3772_v17 = vsel %vm22747_vm1, %v18241_v40, -inf }
 0x2f6   :  { %v3600_v35 = vsel %vm22746_vm14, %v18210_v32, -inf  ;;  %vm22761_vm14 = vmmov %vm22742_vm5 }
 0x2f8   :  { %3356 = vmax.xlane.f32.xlu0 %v22721_v2 }
 0x2f9   :  { %3546 = vmax.xlane.f32.xlu1 %v22720_v56 }
 0x2fc   :  { %3439 = vmax.xlane.f32.xlu0 %v22723_v11 }
 0x2fd   :  { %3333 = vmax.xlane.f32.xlu1 %v22722_v15 }
 0x300   :  { %3452 = vmax.xlane.f32.xlu0 %v22725_v22  ;;  %v3597_v22 = vsel %vm22744_vm7, %v18231_v42, -inf  ;;  %vm3317_vm7 = vcmask 39936  }
 0x301   :  { %3346 = vmax.xlane.f32.xlu1 %v22724_v14  ;;  %v3587_v14 = vsel %vm22743_vm0, %v18210_v32, -inf  ;;  %vm22751_vm0 = vmmov %vm22745_vm12 }
 0x304   :  { %3291 = vmax.xlane.f32.xlu0 %v22727_v52 }
 0x305   :  { %3359 = vmax.xlane.f32.xlu1 %v22726_v36 }
 0x308   :  { %3375 = vmax.xlane.f32.xlu0 %v22730_v37  ;;  %v3610_v37 = vsel %vm3609_vm10, %v18231_v42, -inf  ;;  %v3762_v42 = vsel %vm3758_vm2, %v18235_v21, -inf }
 0x309   :  { %3469 = vmax.xlane.f32.xlu1 %v22728_v34 }
 0x30c   :  { %3487 = vmax.xlane.f32.xlu0 %v22734_v61  ;;  %v3759_v61 = vsel %vm3758_vm2, %v18241_v40, -inf }
 0x30d   :  { %3296 = vmax.xlane.f32.xlu1 %v22733_v60  ;;  %v3613_v60 = vsel %vm3609_vm10, %v18210_v32, -inf }
 0x30e   :  { %v3227_v45 = vpop.xlane.xlu0 %3226  ;;  %v3214_v20 = vpop.xlane.xlu1 %3213 }
 0x30f   :  { %v3299_v4 = vsel %vm3298_vm13, %v3214_v20, %v3227_v45  ;;  %v3668_v45 = vsel %vm3664_vm3, %v18220_v19, -inf  ;;  %v3798_v20 = vsel %vm3797_vm15, %v18241_v40, -inf  ;;  %v3678_v40 = vsel %vm3677_vm6, %v18233_v3, -inf }
 0x310   :  { %3474 = vmax.xlane.f32.xlu0 %v22738_v18 }
 0x311   :  { %3380 = vmax.xlane.f32.xlu1 %v22735_v62 }
 0x312   :  { %v3240_v26 = vpop.xlane.xlu0 %3239  ;;  %v3431_v63 = vpop.xlane.xlu1 %3430 }
 0x313   :  { %v3304_v24 = vsel %vm3303_vm4, %v3299_v4, %v3240_v26  ;;  %v3665_v26 = vsel %vm3664_vm3, %v18233_v3, -inf }
 0x314   :  { %3572 = vmax.xlane.f32.xlu0 %v3571_v5  ;;  %v3681_v5 = vsel %vm3677_vm6, %v18220_v19, -inf }
 0x315   :  { %3786 = vmax.xlane.f32.xlu1 %v3785_v6 }
 0x316   :  { %v3253_v56 = vpop.xlane.xlu0 %3252  ;;  %v3444_v2 = vpop.xlane.xlu1 %3443 }
 0x317   :  { %v3309_v15 = vsel %vm22742_vm5, %v3304_v24, %v3253_v56  ;;  %v18581_v11 = vsel %vm3298_vm13, %v3431_v63, %v3444_v2 }
 0x318   :  { %3585 = vmax.xlane.f32.xlu0 %v3584_v46  ;;  %v3694_v46 = vsel %vm3690_vm11, %v18220_v19, -inf }
 0x319   :  { %3575 = vmax.xlane.f32.xlu1 %v3574_v27 }
 0x31a   :  { %v3266_v36 = vpop.xlane.xlu0 %3265  ;;  %v18587_v52 = vpop.xlane.xlu1 %3478 }
 0x31b   :  { %v18590_v34 = vsel %vm22745_vm12, %v3309_v15, %v3266_v36  ;;  %vm22760_vm12 = vmmov %vm22747_vm1 }
 0x31c   :  { %3598 = vmax.xlane.f32.xlu0 %v3597_v22  ;;  %v3691_v22 = vsel %vm3690_vm11, %v18233_v3, -inf  ;;  %vm22762_vm1 = vmmov %vm22751_vm0 }
 0x31d   :  { %3588 = vmax.xlane.f32.xlu1 %v3587_v14  ;;  %v3707_v14 = vsel %vm3703_vm9, %v18220_v19, -inf }
 0x31e   :  { %v18596_v43 = vpop.xlane.xlu0 %3384  ;;  %v18598_v44 = vpop.xlane.xlu1 %3491 }
 0x320   :  { %3611 = vmax.xlane.f32.xlu0 %v3610_v37 }
 0x321   :  { %3601 = vmax.xlane.f32.xlu1 %v3600_v35 }
 0x322   :  { %v18604_v62 = vpop.xlane.xlu0 %3397  ;;  %v18606_v28 = vpop.xlane.xlu1 %3504 }
 0x324   :  { %3760 = vmax.xlane.f32.xlu0 %v3759_v61  ;;  %v3704_v61 = vsel %vm3703_vm9, %v18233_v3, -inf }
 0x325   :  { %3614 = vmax.xlane.f32.xlu1 %v3613_v60 }
 0x326   :  { %v18612_v18 = vpop.xlane.xlu0 %3537  ;;  %v3230_v32 = vpop.xlane.xlu1 %3229 }
 0x328   :  { %3773 = vmax.xlane.f32.xlu0 %v3772_v17  ;;  %v22749_v17 = vld [vmem:[#allocation36_spill] sm:$0xff] }
 0x329   :  { %3763 = vmax.xlane.f32.xlu1 %v3762_v42  ;;  %v22748_v42 = vld [vmem:[#allocation35_spill] sm:$0xff] }
 0x32a   :  { %v3325_v4 = vpop.xlane.xlu0 %3324  ;;  %v3243_v6 = vpop.xlane.xlu1 %3242 }
 0x32c   :  { %3799 = vmax.xlane.f32.xlu0 %v3798_v20 }
 0x32d   :  { %3669 = vmax.xlane.f32.xlu1 %v3668_v45  ;;  %v22750_v45 = vmax.f32 %v22748_v42, %v22749_v17  ;;  %v22764_v42 = vmax.f32 %v18253_v48, 0.0 }
 0x32e   :  { %v3338_v63 = vpop.xlane.xlu0 %3337  ;;  %v3256_v24 = vpop.xlane.xlu1 %3255 }
 0x32f   :  { %v3408_v27 = vsel %vm3298_vm13, %v3325_v4, %v3338_v63  ;;  %v3839_v17 = vsel %vm3832_vm8, %v22764_v42, -inf  ;;  %v22785_v42 = vmax.f32 %v18357_v53, %v18304_v30 }
 0x330   :  { %3666 = vmax.xlane.f32.xlu0 %v3665_v26  ;;  %v22752_v26 = vld [vmem:[#allocation10_spill] sm:$0xff] }
 0x331   :  { %3682 = vmax.xlane.f32.xlu1 %v3681_v5  ;;  %v22753_v63 = vmax.f32 %v22752_v26, 0.0 }
 0x332   :  { %v3351_v56 = vpop.xlane.xlu0 %3350  ;;  %v3269_v2 = vpop.xlane.xlu1 %3268 }
 0x333   :  { %v3412_v15 = vsel %vm3303_vm4, %v3408_v27, %v3351_v56  ;;  %v22755_v27 = vld [vmem:[#allocation38_spill] sm:$0xff] }
 0x334   :  { %3679 = vmax.xlane.f32.xlu0 %v3678_v40 }
 0x335   :  { %3695 = vmax.xlane.f32.xlu1 %v3694_v46 }
 0x336   :  { %v3217_v36 = vpop.xlane.xlu0 %3216  ;;  %v18632_v35 = vpop.xlane.xlu1 %3387 }
 0x337   :  { %v3300_v37 = vsel %vm3298_vm13, %v3217_v36, %v3230_v32  ;;  %v3833_v32 = vsel %vm3832_vm8, %v22753_v63, -inf }
 0x338   :  { %3692 = vmax.xlane.f32.xlu0 %v3691_v22  ;;  %v3305_v60 = vsel %vm3303_vm4, %v3300_v37, %v3243_v6  ;;  %v22754_v6 = vld [vmem:[#allocation37_spill] sm:$0xff]  ;;  %v3775_v37 = vsel %vm22760_vm12, %v18235_v21, -inf  ;;  %vm22767_vm12 = vcmask 531776  }
 0x339   :  { %3708 = vmax.xlane.f32.xlu1 %v3707_v14  ;;  %v3310_v19 = vsel %vm22742_vm5, %v3305_v60, %v3256_v24  ;;  %v22756_v46 = vmax.f32 %v22754_v6, %v22755_v27  ;;  %v22757_v24 = vmax.f32 %v18277_v33, %v18283_v1  ;;  %v3765_v60 = vsel %vm3758_vm2, %v18311_v55, -inf  ;;  %v22770_v6 = vld [vmem:[#allocation40_spill] sm:$0xff] }
 0x33a   :  { %v3434_v20 = vpop.xlane.xlu0 %3433  ;;  %v3401_v4 = vpop.xlane.xlu1 %3400  ;;  %v18643_v5 = vsel %vm22751_vm0, %v3310_v19, %v3269_v2  ;;  %v22758_v2 = vmax.f32 %v18287_v51, %v18291_v13  ;;  %vm22763_vm5 = vcmask 835176   ;;  %v3801_v19 = vsel %vm3797_vm15, %v18235_v21, -inf  ;;  %vm22766_vm0 = vmmov %vm22761_vm14 }
 0x33b   :  { %vm22765_vm2 = vcmask 326776   ;;  %v3593_v63 = vsel %vm22767_vm12, %v18337_v41, -inf  ;;  %vm22773_vm15 = vcmask 736776  }
 0x33c   :  { %3705 = vmax.xlane.f32.xlu0 %v3704_v61 }
 0x33d   :  { %3558 = vmax.xlane.f32.xlu1 %v22750_v45 }
 0x33e   :  { %v3447_v3 = vpop.xlane.xlu0 %3446  ;;  %v18651_v40 = vpop.xlane.xlu1 %3540 }
 0x33f   :  { %v3516_v56 = vsel %vm3298_vm13, %v3434_v20, %v3447_v3 }
 0x340   :  { %3834 = vmax.xlane.f32.xlu0 %v3833_v32 }
 0x341   :  { %3652 = vmax.xlane.f32.xlu1 %v22756_v46 }
 0x342   :  { %v3328_v22 = vpop.xlane.xlu1 %3327 }
 0x343   :  { %v3282_v14 = vpop.xlane.xlu0 %3281 }
 0x344   :  { %3553 = vmax.xlane.f32.xlu0 %v22758_v2  ;;  %v18662_v36 = vsel %vm3317_vm7, %v18590_v34, %v3282_v14  ;;  %v3788_v34 = vsel %vm22763_vm5, %v18235_v21, -inf  ;;  %v22769_v21 = vld [vmem:[#allocation39_spill] sm:$0xff]  ;;  %vm22776_vm5 = vmmov %vm22766_vm0 }
 0x345   :  { %3726 = vmax.xlane.f32.xlu1 %v22757_v24  ;;  %22759 = vst [vmem:[#allocation11_spill] sm:$0xff] %v18662_v36  ;;  %v22771_v27 = vmax.f32 %v22769_v21, %v22770_v6  ;;  %v22774_v24 = vmax.f32 %v18327_v16, %v18331_v29  ;;  %v22792_v6 = vld [vmem:[#allocation45_spill] sm:$0xff] }
 0x346   :  { %v3341_v1 = vpop.xlane.xlu1 %3340 }
 0x347   :  { %v3409_v51 = vsel %vm3298_vm13, %v3328_v22, %v3341_v1  ;;  %v22779_v1 = vmax.f32 %v18335_v31, %v18246_v58  ;;  %v3687_v31 = vsel %vm3677_vm6, %v18345_v49, -inf }
 0x348   :  { %3776 = vmax.xlane.f32.xlu0 %v3775_v37  ;;  %v3366_v33 = vpop.xlane.xlu0 %3365 }
 0x349   :  { %3766 = vmax.xlane.f32.xlu1 %v3765_v60  ;;  %v3416_v61 = vsel %vm22761_vm14, %v3412_v15, %v3366_v33  ;;  %vm22768_vm14 = vmmov %vm22762_vm1  ;;  %v3619_v33 = vsel %vm3609_vm10, %v18337_v41, -inf }
 0x34a   :  { %v3420_v13 = vsel %vm22762_vm1, %v3416_v61, %v18596_v43  ;;  %v3354_v15 = vpop.xlane.xlu1 %3353  ;;  %v3580_v43 = vsel %vm22765_vm2, %v18337_v41, -inf  ;;  %vm22775_vm1 = vmmov %vm22766_vm0 }
 0x34b   :  { %v18679_v55 = vsel %vm3317_vm7, %v3420_v13, %v18604_v62  ;;  %vm22777_vm2 = vmmov %vm22768_vm14 }
 0x34c   :  { %3789 = vmax.xlane.f32.xlu0 %v3788_v34  ;;  %v3482_v45 = vpop.xlane.xlu0 %3481  ;;  %vm22831_vm12 = vmmov %vm22775_vm1 }
 0x34d   :  { %3840 = vmax.xlane.f32.xlu1 %v3839_v17 }
 0x350   :  { %3802 = vmax.xlane.f32.xlu0 %v3801_v19 }
 0x351   :  { %3581 = vmax.xlane.f32.xlu1 %v3580_v43  ;;  %v3495_v20 = vpop.xlane.xlu0 %3494 }
 0x352   :  { %v3460_v48 = vpop.xlane.xlu1 %3459 }
 0x353   :  { %v3519_v26 = vsel %vm3303_vm4, %v18581_v11, %v3460_v48  ;;  %v22787_v48 = vld [vmem:[#allocation42_spill] sm:$0xff] }
 0x354   :  { %v3523_v62 = vsel %vm22766_vm0, %v3519_v26, %v18587_v52  ;;  %3647 = vmax.xlane.f32.xlu0 %v22771_v27  ;;  %v3606_v52 = vsel %vm22773_vm15, %v18337_v41, -inf  ;;  %vm22778_vm0 = vmmov %vm22777_vm2  ;;  %v22788_v26 = vld [vmem:[#allocation43_spill] sm:$0xff]  ;;  %v22793_v27 = vmax.f32 %v18383_v25, %v22792_v6 }
 0x355   :  { %v3527_v32 = vsel %vm22768_vm14, %v3523_v62, %v18598_v44  ;;  %3594 = vmax.xlane.f32.xlu1 %v3593_v63  ;;  %v3508_v3 = vpop.xlane.xlu0 %3507  ;;  %v3413_v44 = vsel %vm3303_vm4, %v3409_v51, %v3354_v15  ;;  %v3700_v15 = vsel %vm3690_vm11, %v18345_v49, -inf  ;;  %v22789_v62 = vld [vmem:[#allocation41_spill] sm:$0xff]  ;;  %v22800_v25 = vld [vmem:[#allocation51_spill] sm:$0xff]  ;;  %vm22814_vm10 = vmmov %vm22778_vm0 }
 0x356   :  { %v18698_v46 = vsel %vm3317_vm7, %v3527_v32, %v18606_v28  ;;  %v18700_v11 = vpop.xlane.xlu1 %3286  ;;  %v22790_v63 = vmax.f32 %v18375_v12, %v22789_v62  ;;  %v22797_v12 = vld [vmem:[#allocation49_spill] sm:$0xff]  ;;  %vm22815_vm11 = vmmov %vm22775_vm1 }
 0x357   :  { %22772 = vst [vmem:[#allocation7_spill] sm:$0xff] %v18698_v46  ;;  %vm22818_vm6 = vmmov %vm22778_vm0 }
 0x358   :  { %3721 = vmax.xlane.f32.xlu0 %v22774_v24  ;;  %v22795_v24 = vld [vmem:[#allocation47_spill] sm:$0xff]  ;;  %vm22832_vm14 = vmmov %vm22778_vm0 }
 0x359   :  { %3607 = vmax.xlane.f32.xlu1 %v3606_v52  ;;  %v3465_v2 = vpop.xlane.xlu0 %3464  ;;  %v22794_v52 = vld [vmem:[#allocation46_spill] sm:$0xff]  ;;  %vm22833_vm15 = vmmov %vm22775_vm1 }
 0x35a   :  { %v3371_v14 = vpop.xlane.xlu1 %3370  ;;  %v3520_v22 = vsel %vm3303_vm4, %v3516_v56, %v3465_v2 }
 0x35b   :  { %v3417_v28 = vsel %vm22775_vm1, %v3413_v44, %v3371_v14  ;;  %v3524_v37 = vsel %vm22776_vm5, %v3520_v22, %v3482_v45  ;;  %v22796_v14 = vld [vmem:[#allocation48_spill] sm:$0xff]  ;;  %v22798_v22 = vld [vmem:[#allocation50_spill] sm:$0xff] }
 0x35c   :  { %v3421_v60 = vsel %vm22777_vm2, %v3417_v28, %v18632_v35  ;;  %v3528_v16 = vsel %vm22778_vm0, %v3524_v37, %v3495_v20  ;;  %3815 = vmax.xlane.f32.xlu0 %v22779_v1  ;;  %v22782_v35 = vld [vmem:[#allocation34_spill] sm:$0xff]  ;;  %v3713_v20 = vsel %vm3703_vm9, %v18345_v49, -inf  ;;  %v22799_v28 = vmax.f32 %v22797_v12, %v22798_v22  ;;  %vm22813_vm9 = vmmov %vm22775_vm1 }
 0x35d   :  { %v18717_v29 = vsel %vm3317_vm7, %v3421_v60, %v3401_v4  ;;  %3620 = vmax.xlane.f32.xlu1 %v3619_v33  ;;  %v18723_v56 = vsel %vm3317_vm7, %v3528_v16, %v3508_v3  ;;  %v18725_v61 = vpop.xlane.xlu0 %3219  ;;  %v22783_v13 = vmax.f32 %v22782_v35, 0.0  ;;  %v3674_v4 = vsel %vm3664_vm3, %v18345_v49, -inf  ;;  %v22801_v33 = vld [vmem:[#allocation52_spill] sm:$0xff]  ;;  %vm22816_vm3 = vmmov %vm22775_vm1 }
 0x35e   :  { %22780 = vst [vmem:[#allocation12_spill] sm:$0xff] %v18723_v56  ;;  %v18727_v51 = vpop.xlane.xlu1 %3436  ;;  %v22802_v16 = vmax.f32 %v18425_v23, %v22801_v33  ;;  %v18785_v23 = vsel %vm3317_vm7, %v18643_v5, %v18700_v11  ;;  %v22810_v5 = vld [vmem:[#allocation57_spill] sm:$0xff]  ;;  %vm22834_vm1 = vmmov %vm22778_vm0 }
 0x35f   :  { %22781 = vst [vmem:[#allocation8_spill] sm:$0xff] %v18727_v51  ;;  %v3836_v41 = vsel %vm3832_vm8, %v22783_v13, -inf  ;;  %22806 = vst [vmem:[#allocation15_spill] sm:$0xff] %v18785_v23  ;;  %v22811_v11 = vmax.f32 %v18446_v39, %v22810_v5 }
 0x360   :  { %3837 = vmax.xlane.f32.xlu0 %v3836_v41  ;;  %v22803_v41 = vld [vmem:[#allocation53_spill] sm:$0xff]  ;;  %vm22819_vm8 = vmmov %vm22778_vm0 }
 0x361   :  { %3675 = vmax.xlane.f32.xlu1 %v3674_v4  ;;  %v3233_v34 = vpop.xlane.xlu0 %3232  ;;  %vm22838_vm5 = vmmov %vm22816_vm3 }
 0x362   :  { %v18734_v58 = vpop.xlane.xlu1 %3449  ;;  %v3301_v12 = vsel %vm3298_vm13, %v18725_v61, %v3233_v34  ;;  %vm22839_vm2 = vmmov %vm22778_vm0  ;;  %vm3958_vm0 = vcmask 261120  }
 0x363   :  { %22784 = vst [vmem:[#allocation9_spill] sm:$0xff] %v18734_v58 }
 0x364   :  { %3820 = vmax.xlane.f32.xlu0 %v22785_v42  ;;  %v22804_v42 = vld [vmem:[#allocation54_spill] sm:$0xff] }
 0x365   :  { %3688 = vmax.xlane.f32.xlu1 %v3687_v31  ;;  %v3246_v17 = vpop.xlane.xlu0 %3245 }
 0x366   :  { %v18741_v45 = vpop.xlane.xlu1 %3484 }
 0x367   :  { %22786 = vst [vmem:[#allocation13_spill] sm:$0xff] %v18741_v45 }
 0x368   :  { %3578 = vmax.xlane.f32.xlu0 %v18361_v54  ;;  %v22791_v54 = vld [vmem:[#allocation44_spill] sm:$0xff] }
 0x369   :  { %3701 = vmax.xlane.f32.xlu1 %v3700_v15  ;;  %v3259_v19 = vpop.xlane.xlu0 %3258 }
 0x36a   :  { %v3223_v43 = vpop.xlane.xlu1 %3222 }
 0x36c   :  { %3591 = vmax.xlane.f32.xlu0 %v22787_v48  ;;  %v22807_v48 = vld [vmem:[#allocation55_spill] sm:$0xff] }
 0x36d   :  { %3714 = vmax.xlane.f32.xlu1 %v3713_v20  ;;  %v3272_v30 = vpop.xlane.xlu0 %3271 }
 0x36e   :  { %v3236_v53 = vpop.xlane.xlu1 %3235 }
 0x36f   :  { %v3302_v22 = vsel %vm3298_vm13, %v3223_v43, %v3236_v53 }
 0x370   :  { %3604 = vmax.xlane.f32.xlu0 %v22788_v26 }
 0x371   :  { %3825 = vmax.xlane.f32.xlu1 %v22790_v63  ;;  %v3391_v32 = vpop.xlane.xlu0 %3390  ;;  %v18794_v63 = vpack.i.bf16 %v18785_v23, %v18662_v36 }
 0x372   :  { %v3249_v21 = vpop.xlane.xlu1 %3248 }
 0x374   :  { %3617 = vmax.xlane.f32.xlu0 %v22791_v54  ;;  %v22809_v54 = vld [vmem:[#allocation56_spill] sm:$0xff] }
 0x375   :  { %3568 = vmax.xlane.f32.xlu1 %v22793_v27  ;;  %v3404_v49 = vpop.xlane.xlu0 %3403 }
 0x376   :  { %v3262_v3 = vpop.xlane.xlu1 %3261 }
 0x378   :  { %3779 = vmax.xlane.f32.xlu0 %v22794_v52 }
 0x379   :  { %3497 = vmax.xlane.f32.xlu1 %v22795_v24  ;;  %v18759_v44 = vpop.xlane.xlu0 %3543 }
 0x37a   :  { %v3275_v2 = vpop.xlane.xlu1 %3274 }
 0x37c   :  { %3792 = vmax.xlane.f32.xlu0 %v22796_v14 }
 0x37d   :  { %3662 = vmax.xlane.f32.xlu1 %v22799_v28  ;;  %v3331_v37 = vpop.xlane.xlu0 %3330 }
 0x37e   :  { %v18765_v60 = vpop.xlane.xlu1 %3393 }
 0x380   :  { %3805 = vmax.xlane.f32.xlu0 %v22800_v25  ;;  %v3307_v25 = vsel %vm3303_vm4, %v3302_v22, %v3249_v21  ;;  %v22823_v21 = vld [vmem:[#allocation59_spill] sm:$0xff] }
 0x381   :  { %3736 = vmax.xlane.f32.xlu1 %v22802_v16  ;;  %v3344_v1 = vpop.xlane.xlu0 %3343  ;;  %v3312_v16 = vsel %vm22816_vm3, %v3307_v25, %v3262_v3  ;;  %v22825_v3 = vld [vmem:[#allocation60_spill] sm:$0xff] }
 0x382   :  { %v18771_v35 = vpop.xlane.xlu1 %3406  ;;  %v3410_v13 = vsel %vm3298_vm13, %v3331_v37, %v3344_v1  ;;  %v3306_v37 = vsel %vm3303_vm4, %v3301_v12, %v3246_v17  ;;  %v3316_v34 = vsel %vm22819_vm8, %v3312_v16, %v3275_v2  ;;  %vm22852_vm8 = vmmov %vm22838_vm5 }
 0x383   :  { %v3311_v39 = vsel %vm22815_vm11, %v3306_v37, %v3259_v19  ;;  %vm22849_vm11 = vmmov %vm22834_vm1 }
 0x384   :  { %3672 = vmax.xlane.f32.xlu0 %v22803_v41  ;;  %v3315_v61 = vsel %vm22818_vm6, %v3311_v39, %v3272_v30  ;;  %vm22851_vm6 = vmmov %vm22838_vm5 }
 0x385   :  { %v3357_v4 = vpop.xlane.xlu0 %3356 }
 0x386   :  { %v18775_v31 = vpop.xlane.xlu1 %3546  ;;  %v3414_v52 = vsel %vm3303_vm4, %v3410_v13, %v3357_v4  ;;  %v22817_v13 = vld [vmem:[#allocation58_spill] sm:$0xff]  ;;  %v22826_v4 = vld [vmem:[#allocation61_spill] sm:$0xff] }
 0x388   :  { %3685 = vmax.xlane.f32.xlu0 %v22804_v42 }
 0x389   :  { %v18778_v15 = vpop.xlane.xlu0 %3439 }
 0x38a   :  { %22805 = vst [vmem:[#allocation14_spill] sm:$0xff] %v18778_v15  ;;  %v18780_v20 = vpop.xlane.xlu1 %3333 }
 0x38c   :  { %3698 = vmax.xlane.f32.xlu0 %v22807_v48 }
 0x38d   :  { %v18788_v26 = vpop.xlane.xlu0 %3452 }
 0x38e   :  { %22808 = vst [vmem:[#allocation16_spill] sm:$0xff] %v18788_v26  ;;  %v18790_v62 = vpop.xlane.xlu1 %3346 }
 0x390   :  { %3711 = vmax.xlane.f32.xlu0 %v22809_v54  ;;  %v22827_v54 = vmax.f32 %v18469_v8, %v18472_v10 }
 0x391   :  { %v3292_v6 = vpop.xlane.xlu0 %3291 }
 0x392   :  { %16698 = vrot.lane.b32.xlu1 %v18794_v63, %s17183_s0  ;;  %v18799_v27 = vpop.xlane.xlu1 %3359  ;;  %v18825_v53 = vsel %vm3317_vm7, %v3315_v61, %v3292_v6 }
 0x393   :  { %22821 = vst [vmem:[#allocation19_spill] sm:$0xff] %v18825_v53 }
 0x394   :  { %3563 = vmax.xlane.f32.xlu0 %v22811_v11  ;;  %v22828_v11 = vmax.f32 %v18475_v50, %v18479_v57 }
 0x395   :  { %v3376_v24 = vpop.xlane.xlu0 %3375 }
 0x396   :  { %v18805_v14 = vpop.xlane.xlu1 %3469  ;;  %v3418_v28 = vsel %vm22813_vm9, %v3414_v52, %v3376_v24  ;;  %vm22840_vm9 = vmmov %vm22816_vm3 }
 0x397   :  { %22812 = vst [vmem:[#allocation17_spill] sm:$0xff] %v18805_v14  ;;  %v3422_v33 = vsel %vm22814_vm10, %v3418_v28, %v3391_v32  ;;  %v22829_v28 = vld [vmem:[#allocation62_spill] sm:$0xff]  ;;  %vm22841_vm10 = vmmov %vm22834_vm1 }
 0x398   :  { %v18817_v1 = vsel %vm3317_vm7, %v3422_v33, %v3404_v49  ;;  %3769 = vmax.xlane.f32.xlu0 %v22817_v13  ;;  %vm22850_vm3 = vmmov %vm22834_vm1 }
 0x399   :  { %v18822_v43 = vpop.xlane.xlu0 %3487 }
 0x39a   :  { %22820 = vst [vmem:[#allocation18_spill] sm:$0xff] %v18822_v43  ;;  %v3297_v17 = vpop.xlane.xlu1 %3296 }
 0x39b   :  { %v18828_v32 = vsel %vm3317_vm7, %v3316_v34, %v3297_v17 }
 0x39c   :  { %22822 = vst [vmem:[#allocation20_spill] sm:$0xff] %v18828_v32  ;;  %v16702_v19 = vpack.i.bf16 %v18828_v32, %v18825_v53  ;;  %3782 = vmax.xlane.f32.xlu0 %v22823_v21 }
 0x39d   :  { %v18833_v49 = vpop.xlane.xlu0 %3474 }
 0x39e   :  { %22824 = vst [vmem:[#allocation21_spill] sm:$0xff] %v18833_v49  ;;  %16703 = vrot.lane.b32.xlu1 %v16702_v19, %s17182_s22  ;;  %v18836_v30 = vpop.xlane.xlu1 %3380 }
 0x3a0   :  { %3795 = vmax.xlane.f32.xlu0 %v22825_v3 }
 0x3a1   :  { %v3573_v2 = vpop.xlane.xlu0 %3572 }
 0x3a2   :  { %16708 = vrot.lane.b32.xlu1 %v16702_v19, %s17183_s0  ;;  %v18840_v41 = vpop.xlane.xlu1 %3786 }
 0x3a4   :  { %3808 = vmax.xlane.f32.xlu0 %v22826_v4 }
 0x3a5   :  { %v3586_v42 = vpop.xlane.xlu0 %3585 }
 0x3a6   :  { %v3576_v48 = vpop.xlane.xlu1 %3575 }
 0x3a8   :  { %3657 = vmax.xlane.f32.xlu0 %v22827_v54 }
 0x3a9   :  { %v3599_v6 = vpop.xlane.xlu0 %3598 }
 0x3aa   :  { %v3589_v5 = vpop.xlane.xlu1 %3588 }
 0x3ac   :  { %3731 = vmax.xlane.f32.xlu0 %v22828_v11 }
 0x3ad   :  { %v3612_v52 = vpop.xlane.xlu0 %3611 }
 0x3ae   :  { %v3602_v24 = vpop.xlane.xlu1 %3601 }
 0x3b0   :  { %3843 = vmax.xlane.f32.xlu0 %v18488_v9 }
 0x3b1   :  { %v18850_v12 = vpop.xlane.xlu0 %3760 }
 0x3b2   :  { %v3615_v22 = vpop.xlane.xlu1 %3614 }
 0x3b4   :  { %3500 = vmax.xlane.f32.xlu0 %v22829_v28 }
 0x3b5   :  { %v18853_v37 = vpop.xlane.xlu0 %3773 }
 0x3b6   :  { %v18855_v25 = vpop.xlane.xlu1 %3763 }
 0x3b8   :  { %3830 = vmax.xlane.f32.xlu0 %v3829_v59 }
 0x3b9   :  { %v18860_v10 = vpop.xlane.xlu0 %3799 }
 0x3ba   :  { %v18862_v8 = vpop.xlane.xlu1 %3669 }
 0x3bd   :  { %v18864_v50 = vpop.xlane.xlu0 %3666 }
 0x3be   :  { %v18866_v57 = vpop.xlane.xlu1 %3682 }
 0x3c1   :  { %v18868_v9 = vpop.xlane.xlu0 %3679 }
 0x3c2   :  { %v18870_v33 = vpop.xlane.xlu1 %3695 }
 0x3c5   :  { %v18872_v39 = vpop.xlane.xlu0 %3692 }
 0x3c6   :  { %v18874_v16 = vpop.xlane.xlu1 %3708 }
 0x3c9   :  { %v18876_v13 = vpop.xlane.xlu0 %3705 }
 0x3ca   :  { %v3559_v0 = vpop.xlane.xlu1 %3558 }
 0x3cb   :  { %v3623_v59 = vsel %vm3298_vm13, %v18651_v40, %v3559_v0 }
 0x3cc   :  { %v3627_v7 = vsel %vm3303_vm4, %v3623_v59, %v3576_v48 }
 0x3cd   :  { %v18881_v61 = vpop.xlane.xlu0 %3834  ;;  %v3631_v17 = vsel %vm22831_vm12, %v3627_v7, %v3589_v5  ;;  %vm22853_vm12 = vmmov %vm22834_vm1 }
 0x3ce   :  { %22830 = vst [vmem:[#allocation22_spill] sm:$0xff] %v18881_v61  ;;  %v18883_v34 = vpop.xlane.xlu1 %3652  ;;  %16693 = vrot.lane.b32.xlu0 %v18794_v63, %s17182_s22  ;;  %v3635_v4 = vsel %vm22832_vm14, %v3631_v17, %v3602_v24  ;;  %vm22854_vm14 = vmmov %vm22838_vm5 }
 0x3cf   :  { %v3639_v5 = vsel %vm3317_vm7, %v3635_v4, %v3615_v22 }
 0x3d1   :  { %v3554_v19 = vpop.xlane.xlu0 %3553 }
 0x3d2   :  { %v18888_v21 = vpop.xlane.xlu1 %3726  ;;  %v3622_v3 = vsel %vm3298_vm13, %v18612_v18, %v3554_v19 }
 0x3d3   :  { %v3626_v40 = vsel %vm3303_vm4, %v3622_v3, %v3573_v2 }
 0x3d4   :  { %v3630_v48 = vsel %vm22833_vm15, %v3626_v40, %v3586_v42  ;;  %vm22855_vm15 = vmmov %vm22834_vm1 }
 0x3d5   :  { %v3634_v54 = vsel %vm22834_vm1, %v3630_v48, %v3599_v6  ;;  %v18896_v11 = vpop.xlane.xlu0 %3776  ;;  %vm22856_vm1 = vmmov %vm22838_vm5 }
 0x3d6   :  { %v18898_v28 = vpop.xlane.xlu1 %3766  ;;  %v3638_v63 = vsel %vm3317_vm7, %v3634_v54, %v3612_v52 }
 0x3d7   :  { %v16722_v0 = vpack.i.bf16 %v3639_v5, %v3638_v63 }
 0x3d9   :  { %v18902_v59 = vpop.xlane.xlu0 %3789  ;;  %16723 = vrot.lane.b32.xlu0 %v16722_v0, %s17191_s1  ;;  %16713 = vrot.lane.b32.xlu1 %v16722_v0, %s17192_s13 }
 0x3da   :  { %v18906_v18 = vpop.xlane.xlu1 %3840 }
 0x3db   :  { %22835 = vst [vmem:[#allocation23_spill] sm:$0xff] %v18906_v18 }
 0x3dd   :  { %v18908_v2 = vpop.xlane.xlu0 %3802  ;;  %16718 = vrot.lane.b32.xlu1 %v16722_v0, %s17193_s14 }
 0x3de   :  { %v3582_v42 = vpop.xlane.xlu1 %3581 }
 0x3e1   :  { %v18911_v6 = vpop.xlane.xlu0 %3647 }
 0x3e2   :  { %v3595_v24 = vpop.xlane.xlu1 %3594 }
 0x3e5   :  { %v18913_v52 = vpop.xlane.xlu0 %3721 }
 0x3e6   :  { %v3608_v7 = vpop.xlane.xlu1 %3607 }
 0x3e9   :  { %v18915_v22 = vpop.xlane.xlu0 %3815 }
 0x3ea   :  { %v3621_v3 = vpop.xlane.xlu1 %3620 }
 0x3ed   :  { %v18917_v17 = vpop.xlane.xlu0 %3837 }
 0x3ee   :  { %v18921_v40 = vpop.xlane.xlu1 %3675 }
 0x3f1   :  { %v18919_v19 = vpop.xlane.xlu0 %3820 }
 0x3f2   :  { %v18923_v63 = vpop.xlane.xlu1 %3688 }
 0x3f5   :  { %v3579_v4 = vpop.xlane.xlu0 %3578 }
 0x3f6   :  { %v18925_v0 = vpop.xlane.xlu1 %3701 }
 0x3f9   :  { %v3592_v48 = vpop.xlane.xlu0 %3591 }
 0x3fa   :  { %v18931_v14 = vpop.xlane.xlu1 %3714 }
 0x3fd   :  { %v3605_v54 = vpop.xlane.xlu0 %3604 }
 0x3fe   :  { %v18935_v51 = vpop.xlane.xlu1 %3825 }
 0x3ff   :  { %22837 = vst [vmem:[#allocation25_spill] sm:$0xff] %v18935_v51 }
 0x401   :  { %v3618_v5 = vpop.xlane.xlu0 %3617 }
 0x402   :  { %v3569_v26 = vpop.xlane.xlu1 %3568 }
 0x403   :  { %v3625_v53 = vsel %vm3298_vm13, %v18775_v31, %v3569_v26 }
 0x404   :  { %v3629_v23 = vsel %vm3303_vm4, %v3625_v53, %v3582_v42 }
 0x405   :  { %v18927_v45 = vpop.xlane.xlu0 %3779  ;;  %v3633_v56 = vsel %vm22838_vm5, %v3629_v23, %v3595_v24  ;;  %vm22857_vm5 = vmmov %vm22839_vm2 }
 0x406   :  { %v3637_v61 = vsel %vm22839_vm2, %v3633_v56, %v3608_v7  ;;  %vm22858_vm2 = vmmov %vm22856_vm1 }
 0x409   :  { %v18929_v43 = vpop.xlane.xlu0 %3792 }
 0x40d   :  { %v18933_v49 = vpop.xlane.xlu0 %3805 }
 0x40e   :  { %22836 = vst [vmem:[#allocation24_spill] sm:$0xff] %v18933_v49  ;;  %v16864_v49 = vld [vmem:[%s22539_s3 + $0x20] sm:$0xff]  }
 0x40f   :  { %15282 = vmatprep.mubr.msk.bf16.mxu0 %vm3958_vm0, %v16864_v49 }
 0x411   :  { %v3673_v58 = vpop.xlane.xlu0 %3672 }
 0x415   :  { %v3686_v15 = vpop.xlane.xlu0 %3685 }
 0x419   :  { %v3699_v32 = vpop.xlane.xlu0 %3698 }
 0x41d   :  { %v18940_v36 = vpop.xlane.xlu0 %3711 }
 0x421   :  { %v3564_v46 = vpop.xlane.xlu0 %3563 }
 0x422   :  { %v3624_v18 = vsel %vm3298_vm13, %v18759_v44, %v3564_v46  ;;  %v3641_v46 = vsel %vm3317_vm7, %v3637_v61, %v3621_v3  ;;  %v18957_v44 = vpop.xlane.xlu1 %3497 }
 0x423   :  { %v3628_v51 = vsel %vm3303_vm4, %v3624_v18, %v3579_v4  ;;  %22842 = vst [vmem:[#allocation26_spill] sm:$0xff] %v18957_v44 }
 0x424   :  { %v3632_v31 = vsel %vm22840_vm9, %v3628_v51, %v3592_v48  ;;  %vm22859_vm9 = vmmov %vm22850_vm3 }
 0x425   :  { %v3636_v26 = vsel %vm22841_vm10, %v3632_v31, %v3605_v54  ;;  %v18952_v53 = vpop.xlane.xlu0 %3769  ;;  %vm22860_vm10 = vmmov %vm22850_vm3 }
 0x426   :  { %v3640_v23 = vsel %vm3317_vm7, %v3636_v26, %v3618_v5  ;;  %v3663_v42 = vpop.xlane.xlu1 %3662 }
 0x427   :  { %v16732_v56 = vpack.i.bf16 %v3641_v46, %v3640_v23 }
 0x429   :  { %v18959_v18 = vpop.xlane.xlu0 %3782  ;;  %16733 = vrot.lane.b32.xlu1 %v16732_v56, %s17193_s14  ;;  %16728 = vrot.lane.b32.xlu0 %v16732_v56, %s17192_s13 }
 0x42a   :  { %v3737_v49 = vpop.xlane.xlu1 %3736 }
 0x42d   :  { %v18963_v51 = vpop.xlane.xlu0 %3795  ;;  %16738 = vrot.lane.b32.xlu0 %v16732_v56, %s17191_s1 }
 0x42e   :  { %v18968_v61 = vpop.permute.xlu1 %16698 }
 0x42f   :  { %22844 = vst [vmem:[#allocation28_spill] sm:$0xff] %v18968_v61  ;;  %v3738_v61 = vsel %vm3298_vm13, %v18911_v6, %v18864_v50  ;;  %v3741_v6 = vsel %vm3298_vm13, %v3663_v42, %v18921_v40 }
 0x431   :  { %v18966_v24 = vpop.xlane.xlu0 %3808 }
 0x432   :  { %22843 = vst [vmem:[#allocation27_spill] sm:$0xff] %v18966_v24  ;;  %v18972_v48 = vpop.permute.xlu1 %16703 }
 0x433   :  { %22846 = vst [vmem:[#allocation30_spill] sm:$0xff] %v18972_v48 }
 0x435   :  { %v3658_v7 = vpop.xlane.xlu0 %3657 }
 0x436   :  { %v18978_v31 = vpop.permute.xlu1 %16708 }
 0x437   :  { %22848 = vst [vmem:[#allocation32_spill] sm:$0xff] %v18978_v31  ;;  %v3739_v31 = vsel %vm3298_vm13, %v18883_v34, %v18862_v8 }
 0x438   :  { %v3743_v50 = vsel %vm3303_vm4, %v3739_v31, %v18866_v57 }
 0x439   :  { %v3732_v4 = vpop.xlane.xlu0 %3731  ;;  %v3747_v8 = vsel %vm22852_vm8, %v3743_v50, %v18870_v33  ;;  %vm22863_vm8 = vmmov %vm22850_vm3 }
 0x43a   :  { %v3751_v34 = vsel %vm22855_vm15, %v3747_v8, %v18874_v16  ;;  %vm22868_vm15 = vmmov %vm22850_vm3 }
 0x43b   :  { %v3755_v16 = vsel %vm3317_vm7, %v3751_v34, %v18888_v21 }
 0x43d   :  { %v18970_v3 = vpop.xlane.xlu0 %3843 }
 0x43e   :  { %22845 = vst [vmem:[#allocation29_spill] sm:$0xff] %v18970_v3 }
 0x441   :  { %v18974_v54 = vpop.xlane.xlu0 %3500 }
 0x442   :  { %22847 = vst [vmem:[#allocation31_spill] sm:$0xff] %v18974_v54 }
 0x445   :  { %v18976_v5 = vpop.xlane.xlu0 %3830 }
 0x449   :  { %v16694_v26 = vpop.permute.xlu0 %16693 }
 0x44a   :  { %v16696_v46 = vunpack.i.h.bf16 %v16694_v26  ;;  %v16695_v56 = vunpack.i.l.bf16 %v16694_v26  ;;  %v3742_v26 = vsel %vm3303_vm4, %v3738_v61, %v18868_v9  ;;  %v22873_v61 = vld [vmem:[#allocation23_spill] sm:$0xff] }
 0x44b   :  { %v16714_v23 = vpop.permute.xlu1 %16713 }
 0x44c   :  { %v16716_v44 = vunpack.i.h.bf16 %v16714_v23  ;;  %v16715_v24 = vunpack.i.l.bf16 %v16714_v23  ;;  %3513 = vmax.xlane.f32.xlu0 %v18501_v38  ;;  %v3740_v38 = vsel %vm3298_vm13, %v3658_v7, %v3673_v58  ;;  %v3745_v58 = vsel %vm3303_vm4, %v3741_v6, %v18923_v63  ;;  %v22872_v7 = vld [vmem:[#allocation29_spill] sm:$0xff]  ;;  %v5134_v23 = vld [vmem:[%s22540_s4 + $0x8] sm:$0xff] }
 0x44d   :  { %3510 = vmax.xlane.f32.xlu1 %v18505_v47  ;;  %v3746_v47 = vsel %vm22851_vm6, %v3742_v26, %v18872_v39  ;;  %v3411_v39 = vsel %vm3298_vm13, %v18780_v20, %v18790_v62  ;;  %v3749_v33 = vsel %vm22856_vm1, %v3745_v58, %v18925_v0  ;;  %vm22862_vm6 = vmmov %vm22856_vm1  ;;  %v5140_v26 = vld [vmem:[%s22540_s4 + $0x38] sm:$0xff]  ;;  %v16724_v50 = vpop.permute.xlu0 %16723 }
 0x44e   :  { %v3923_v54 = vsel %vm22849_vm11, %v16695_v56, %v16715_v24  ;;  %v3924_v48 = vsel %vm22850_vm3, %v16696_v46, %v16716_v44  ;;  %v3744_v44 = vsel %vm3303_vm4, %v3740_v38, %v3686_v15  ;;  %v3750_v9 = vsel %vm22853_vm12, %v3746_v47, %v18876_v13  ;;  %vm22861_vm11 = vmmov %vm22856_vm1  ;;  %v5136_v46 = vld [vmem:[%s22540_s4 + $0x18] sm:$0xff]  ;;  %v5138_v56 = vld [vmem:[%s22540_s4 + $0x28] sm:$0xff] }
 0x44f   :  { %v3936_v3 = vpack.c.bf16 %v3924_v48, %v3923_v54  ;;  %v3748_v57 = vsel %vm22854_vm14, %v3744_v44, %v3699_v32  ;;  %v3754_v15 = vsel %vm3317_vm7, %v3750_v9, %v18913_v52  ;;  %v3415_v13 = vsel %vm3303_vm4, %v3411_v39, %v18799_v27  ;;  %vm22865_vm12 = vmmov %vm22856_vm1  ;;  %v22874_v54 = vld [vmem:[#allocation7_spill] sm:$0xff]  ;;  %v16719_v38 = vpop.permute.xlu1 %16718  ;;  %v22876_v9 = vld [vmem:[#allocation30_spill] sm:$0xff] }
 0x450   :  { %v3752_v40 = vsel %vm22857_vm5, %v3748_v57, %v18940_v36  ;;  %v3419_v32 = vsel %vm22858_vm2, %v3415_v13, %v18836_v30  ;;  %v16742_v63 = vpack.i.bf16 %v3755_v16, %v3754_v15  ;;  %v3753_v20 = vsel %vm22859_vm9, %v3749_v33, %v18931_v14  ;;  %vm22867_vm14 = vmmov %vm22856_vm1  ;;  %v22877_v15 = vld [vmem:[#allocation11_spill] sm:$0xff] }
 0x451   :  { %15278 = vmatprep.subr.bf16.mxu0 %v3936_v3  ;;  %v3756_v62 = vsel %vm3317_vm7, %v3752_v40, %v3732_v4  ;;  %v3423_v52 = vsel %vm22860_vm10, %v3419_v32, %v18765_v60  ;;  %v3757_v27 = vsel %vm3317_vm7, %v3753_v20, %v3737_v49  ;;  %v16752_v30 = vpack.i.bf16 %v18717_v29, %v18679_v55  ;;  %vm22871_vm1 = vmmov %vm22850_vm3  ;;  %v22879_v13 = vld [vmem:[#allocation15_spill] sm:$0xff] }
 0x452   :  { %15279 = vmatpush3.bf16.msra.mxu0 %v3936_v3  ;;  %v16747_v36 = vpack.i.bf16 %v3757_v27, %v3756_v62  ;;  %v19035_v21 = vsel %vm3317_vm7, %v3423_v52, %v18771_v35  ;;  %v3845_v60 = vsel %vm3298_vm13, %v18850_v12, %v18853_v37  ;;  %v3846_v35 = vsel %vm3298_vm13, %v18855_v25, %v18896_v11  ;;  %vm22878_vm5 = vmmov %vm22871_vm1  ;;  %v16865_v27 = vld [vmem:[%s22539_s3 + $0x28] sm:$0xff]  }
 0x453   :  { %v16762_v14 = vpack.i.bf16 %v19035_v21, %v18817_v1  ;;  %v3850_v0 = vsel %vm3303_vm4, %v3846_v35, %v18902_v59  ;;  %v3849_v24 = vsel %vm3303_vm4, %v3845_v60, %v18840_v41  ;;  %v3847_v37 = vsel %vm3298_vm13, %v18898_v28, %v18927_v45  ;;  %v22866_v45 = vld [vmem:[#allocation27_spill] sm:$0xff]  ;;  %vm22880_vm2 = vmmov %vm22871_vm1  ;;  %v22885_v35 = vld [vmem:[#allocation20_spill] sm:$0xff] }
 0x454   :  { %v3854_v42 = vsel %vm22861_vm11, %v3850_v0, %v18908_v2  ;;  %v3853_v12 = vsel %vm22862_vm6, %v3849_v24, %v18860_v10  ;;  %v3848_v25 = vsel %vm3298_vm13, %v18952_v53, %v18959_v18  ;;  %v3851_v11 = vsel %vm3303_vm4, %v3847_v37, %v18929_v43  ;;  %v22864_v2 = vld [vmem:[#allocation24_spill] sm:$0xff]  ;;  %v22869_v43 = vld [vmem:[#allocation22_spill] sm:$0xff]  ;;  %vm22881_vm9 = vmmov %vm22871_vm1 }
 0x455   :  { %v3858_v49 = vsel %vm22850_vm3, %v3854_v42, %v18919_v19  ;;  %v3857_v41 = vsel %vm22863_vm8, %v3853_v12, %v18915_v22  ;;  %v3852_v59 = vsel %vm3303_vm4, %v3848_v25, %v18963_v51  ;;  %v3855_v19 = vsel %vm22865_vm12, %v3851_v11, %v22864_v2  ;;  %v22870_v51 = vld [vmem:[#allocation25_spill] sm:$0xff]  ;;  %vm22882_vm10 = vmmov %vm22871_vm1  ;;  %v16866_v42 = vld [vmem:[%s22539_s3 + $0x30] sm:$0xff]  }
 0x456   :  { %v3862_v10 = vsel %vm3317_vm7, %v3858_v49, %v18917_v17  ;;  %v3856_v28 = vsel %vm22867_vm14, %v3852_v59, %v22866_v45  ;;  %v3861_v22 = vsel %vm3317_vm7, %v3857_v41, %v22869_v43  ;;  %v3859_v17 = vsel %vm22871_vm1, %v3855_v19, %v22870_v51  ;;  %vm22884_vm11 = vmmov %vm22871_vm1  ;;  %v22887_v24 = vld [vmem:[#allocation28_spill] sm:$0xff] }
 0x457   :  { %v3860_v53 = vsel %vm22868_vm15, %v3856_v28, %v18976_v5  ;;  %v16792_v18 = vpack.i.bf16 %v3862_v10, %v3861_v22  ;;  %v3863_v3 = vsel %vm3317_vm7, %v3859_v17, %v22873_v61  ;;  %v22875_v5 = vld [vmem:[#allocation12_spill] sm:$0xff]  ;;  %v16721_v47 = vunpack.i.h.bf16 %v16719_v38  ;;  %vm22886_vm3 = vmmov %vm22871_vm1  ;;  %v16868_v10 = vld [vmem:[%s22539_s3] sm:$0xff]  }
 0x458   :  { %v3864_v4 = vsel %vm3317_vm7, %v3860_v53, %v22872_v7  ;;  %v19095_v31 = vpack.i.bf16 %v22875_v5, %v22874_v54  ;;  %v16720_v6 = vunpack.i.l.bf16 %v16719_v38  ;;  %v16706_v58 = vunpack.i.h.bf16 %v22876_v9  ;;  %vm22888_vm6 = vmmov %vm22871_vm1  ;;  %v16867_v59 = vld [vmem:[%s22539_s3 + $0x38] sm:$0xff]   ;;  %v16869_v22 = vld [vmem:[%s22539_s3 + $0x8] sm:$0xff]  }
 0x459   :  { %v16797_v48 = vpack.i.bf16 %v3864_v4, %v3863_v3  ;;  %v16705_v57 = vunpack.i.l.bf16 %v22876_v9  ;;  %v3882_v40 = vsel %vm22880_vm2, %v22879_v13, %v16721_v47  ;;  %v16701_v49 = vunpack.i.h.bf16 %v22887_v24  ;;  %vm22889_vm8 = vmmov %vm22871_vm1  ;;  %v22890_v28 = vld [vmem:[#allocation32_spill] sm:$0xff]  ;;  %v16872_v61 = vld [vmem:[%s22539_s3 + $0x40] sm:$0xff]  }
 0x45a   :  { %v3881_v33 = vsel %vm22878_vm5, %v22877_v15, %v16720_v6  ;;  %v16700_v12 = vunpack.i.l.bf16 %v22887_v24  ;;  %v16711_v53 = vunpack.i.h.bf16 %v22890_v28  ;;  %v16710_v43 = vunpack.i.l.bf16 %v22890_v28  ;;  %vm22891_vm12 = vmmov %vm22871_vm1  ;;  %v16870_v17 = vld [vmem:[%s22539_s3 + $0x10] sm:$0xff]   ;;  %v16871_v4 = vld [vmem:[%s22539_s3 + $0x18] sm:$0xff]  }
 0x45b   :  { %v3893_v52 = vpack.c.bf16 %v3882_v40, %v3881_v33  ;;  %vm22892_vm14 = vmmov %vm22871_vm1  ;;  %v16873_v3 = vld [vmem:[%s22539_s3 + $0x48] sm:$0xff]   ;;  %v22896_v47 = vld [vmem:[#allocation8_spill] sm:$0xff]  ;;  %vm22900_vm15 = vcmask 23552  }
 0x45c   :  { %v22898_v9 = vld [vmem:[#allocation17_spill] sm:$0xff]  ;;  %vm22902_vm1 = vmmov %vm22900_vm15  ;;  %v22903_v33 = vld [vmem:[#allocation31_spill] sm:$0xff] }
 0x45d   :  { %vm22904_vm5 = vmmov %vm22880_vm2 }
 0x45e   :  { %16743 = vrot.lane.b32.xlu1 %v16742_v63, %s17193_s14 }
 0x462   :  { %16753 = vrot.lane.b32.xlu1 %v16752_v30, %s17182_s22  ;;  %16748 = vrot.lane.b32.xlu0 %v16747_v36, %s17193_s14 }
 0x466   :  { %16758 = vrot.lane.b32.xlu1 %v16742_v63, %s17192_s13  ;;  %16763 = vrot.lane.b32.xlu0 %v16762_v14, %s17182_s22 }
 0x46a   :  { %16768 = vrot.lane.b32.xlu1 %v16747_v36, %s17192_s13  ;;  %16773 = vrot.lane.b32.xlu0 %v16752_v30, %s17183_s0  ;;  %v16725_v30 = vunpack.i.l.bf16 %v16724_v50 }
 0x46c   :  { %v4157_v25 = vsel %vm22888_vm6, %v16700_v12, %v16725_v30  ;;  %vm22912_vm6 = vmmov %vm22880_vm2 }
 0x46e   :  { %16778 = vrot.lane.b32.xlu1 %v16742_v63, %s17191_s1  ;;  %16783 = vrot.lane.b32.xlu0 %v16762_v14, %s17183_s0  ;;  %v22883_v14 = vld [vmem:[#allocation19_spill] sm:$0xff] }
 0x472   :  { %16788 = vrot.lane.b32.xlu1 %v16747_v36, %s17191_s1  ;;  %16793 = vrot.lane.b32.xlu0 %v16792_v18, %s17193_s14  ;;  %v16726_v36 = vunpack.i.h.bf16 %v16724_v50  ;;  %v22895_v50 = vld [vmem:[#allocation9_spill] sm:$0xff] }
 0x473   :  { %v3517_v6 = vsel %vm3298_vm13, %v22896_v47, %v22895_v50  ;;  %v16879_v50 = vld [vmem:[%s22539_s3 + $0x78] sm:$0xff]  }
 0x474   :  { %v4158_v41 = vsel %vm22889_vm8, %v16701_v49, %v16726_v36  ;;  %vm22913_vm8 = vmmov %vm22880_vm2 }
 0x475   :  { %v4170_v11 = vpack.c.bf16 %v4158_v41, %v4157_v25 }
 0x476   :  { %16798 = vrot.lane.b32.xlu1 %v16797_v48, %s17193_s14  ;;  %16803 = vrot.lane.b32.xlu0 %v19095_v31, %s17182_s22 }
 0x47a   :  { %16808 = vrot.lane.b32.xlu1 %v16792_v18, %s17192_s13 }
 0x47e   :  { %16818 = vrot.lane.b32.xlu1 %v16797_v48, %s17192_s13 }
 0x482   :  { %16828 = vrot.lane.b32.xlu1 %v16792_v18, %s17191_s1 }
 0x486   :  { %16838 = vrot.lane.b32.xlu1 %v16797_v48, %s17191_s1  ;;  %v16874_v48 = vld [vmem:[%s22539_s3 + $0x50] sm:$0xff]  }
 0x48a   :  { %5148 = vperm.xlu1 %16691, %v5134_v23   ;;  %v16875_v23 = vld [vmem:[%s22539_s3 + $0x58] sm:$0xff]  }
 0x48e   :  { %5158 = vperm.xlu1 %16691, %v5136_v46   ;;  %v16876_v46 = vld [vmem:[%s22539_s3 + $0x60] sm:$0xff]  }
 0x492   :  { %5168 = vperm.xlu1 %16691, %v5138_v56   ;;  %v22893_v56 = vld [vmem:[#allocation16_spill] sm:$0xff] }
 0x496   :  { %5178 = vperm.xlu1 %16691, %v5140_v26   ;;  %v22894_v26 = vld [vmem:[#allocation14_spill] sm:$0xff] }
 0x497   :  { %v3518_v38 = vsel %vm3298_vm13, %v22894_v26, %v22893_v56  ;;  %v5137_v26 = vld [vmem:[%s22540_s4 + $0x20] sm:$0xff] }
 0x49b   :  { %v16729_v44 = vpop.permute.xlu0 %16728  ;;  %v16734_v8 = vpop.permute.xlu1 %16733 }
 0x49c   :  { %v16731_v34 = vunpack.i.h.bf16 %v16729_v44  ;;  %v16730_v39 = vunpack.i.l.bf16 %v16729_v44  ;;  %v16736_v32 = vunpack.i.h.bf16 %v16734_v8  ;;  %v16735_v16 = vunpack.i.l.bf16 %v16734_v8  ;;  %v22897_v44 = vld [vmem:[#allocation21_spill] sm:$0xff] }
 0x49d   :  { %v3522_v8 = vsel %vm3303_vm4, %v3518_v38, %v22897_v44  ;;  %v16880_v44 = vld [vmem:[%s22539_s3 + $0x80] sm:$0xff]  }
 0x49e   :  { %v3925_v63 = vsel %vm22881_vm9, %v16705_v57, %v16730_v39  ;;  %v3926_v20 = vsel %vm22882_vm10, %v16706_v58, %v16731_v34  ;;  %v3883_v60 = vsel %vm22884_vm11, %v22883_v14, %v16735_v16  ;;  %v3884_v0 = vsel %vm22886_vm3, %v22885_v35, %v16736_v32  ;;  %v22899_v57 = vld [vmem:[#allocation18_spill] sm:$0xff]  ;;  %v22901_v39 = vld [vmem:[#allocation13_spill] sm:$0xff]  ;;  %vm22907_vm9 = vmmov %vm22880_vm2 }
 0x49f   :  { %v3937_v62 = vpack.c.bf16 %v3926_v20, %v3925_v63  ;;  %v3894_v37 = vpack.c.bf16 %v3884_v0, %v3883_v60  ;;  %v16739_v2 = vpop.permute.xlu0 %16738  ;;  %v3521_v58 = vsel %vm3303_vm4, %v3517_v6, %v22898_v9  ;;  %v3526_v34 = vsel %vm22900_vm15, %v3522_v8, %v22899_v57  ;;  %v22905_v32 = vld [vmem:[#allocation26_spill] sm:$0xff]  ;;  %vm22906_vm4 = vmmov %vm22880_vm2 }
 0x4a0   :  { %v16741_v19 = vunpack.i.h.bf16 %v16739_v2  ;;  %v16740_v45 = vunpack.i.l.bf16 %v16739_v2  ;;  %v3525_v15 = vsel %vm22902_vm1, %v3521_v58, %v22901_v39  ;;  %v3530_v13 = vsel %vm22904_vm5, %v3526_v34, %v22903_v33  ;;  %vm22909_vm10 = vmmov %vm22880_vm2  ;;  %v5139_v58 = vld [vmem:[%s22540_s4 + $0x30] sm:$0xff] }
 0x4a1   :  { %15280 = vmatprep.subr.bf16.mxu0 %v3937_v62  ;;  %v3529_v16 = vsel %vm22880_vm2, %v3525_v15, %v22905_v32  ;;  %vm22910_vm11 = vmmov %vm22880_vm2 }
 0x4a2   :  { %15281 = vmatpush3.bf16.msra.mxu0 %v3937_v62  ;;  %v4159_v18 = vsel %vm22891_vm12, %v16710_v43, %v16740_v45  ;;  %v4160_v51 = vsel %vm22892_vm14, %v16711_v53, %v16741_v19  ;;  %vm22911_vm3 = vmmov %vm22880_vm2  ;;  %v16878_v19 = vld [vmem:[%s22539_s3 + $0x70] sm:$0xff]  }
 0x4a3   :  { %15290 = vmatprep.subr.bf16.mxu0 %v3893_v52  ;;  %v4171_v7 = vpack.c.bf16 %v4160_v51, %v4159_v18  ;;  %vm22914_vm12 = vmmov %vm22880_vm2 }
 0x4a4   :  { %vm22915_vm14 = vmmov %vm22880_vm2 }
 0x4a5   :  { %15283 = vmatmul.mubr.msk.bf16.vlgmr.msra.gmra.mrb[16].mxu0 %vm3958_vm0, %v16865_v27  ;;  %vm22916_vm15 = vmmov %vm22880_vm2 }
 0x4a6   :  { %15291 = vmatpush3.bf16.msra.mxu0 %v3893_v52  ;;  %15286 = vmatprep.mubr.msk.bf16.mxu0 %vm3958_vm0, %v16866_v42  ;;  %vm22917_vm1 = vmmov %vm22880_vm2 }
 0x4a7   :  { %15292 = vmatprep.subr.bf16.mxu0 %v3894_v37  ;;  %vm22918_vm5 = vmmov %vm22917_vm1 }
 0x4aa   :  { %15293 = vmatpush3.bf16.msra.mxu0 %v3894_v37 }
 0x4ab   :  { %15302 = vmatprep.subr.bf16.mxu0 %v4170_v11 }
 0x4ad   :  { %15287 = vmatmul.mubr.msk.bf16.gmra.mrb[20].mxu0 %vm3958_vm0, %v16867_v59 }
 0x4ae   :  { %15294 = vmatprep.mubr.msk.bf16.mxu0 %vm3958_vm0, %v16868_v10 }
 0x4b5   :  { %15295 = vmatmul.mubr.msk.bf16.vlgmr.msra.gmra.mrb[16].mxu0 %vm3958_vm0, %v16869_v22 }
 0x4b6   :  { %15303 = vmatpush3.bf16.msra.mxu0 %v4170_v11  ;;  %15298 = vmatprep.mubr.msk.bf16.mxu0 %vm3958_vm0, %v16870_v17  ;;  %v5135_v17 = vld [vmem:[%s22540_s4 + $0x10] sm:$0xff] }
 0x4b7   :  { %15304 = vmatprep.subr.bf16.mxu0 %v4171_v7 }
 0x4ba   :  { %15305 = vmatpush3.bf16.msra.mxu0 %v4171_v7 }
 0x4bd   :  { %15299 = vmatmul.mubr.msk.bf16.gmra.mrb[20].mxu0 %vm3958_vm0, %v16871_v4 }
 0x4be   :  { %15306 = vmatprep.mubr.msk.bf16.mxu0 %vm3958_vm0, %v16872_v61 }
 0x4c5   :  { %15307 = vmatmul.mubr.msk.bf16.vlgmr.msra.gmra.mrb[16].mxu0 %vm3958_vm0, %v16873_v3 }
 0x4c6   :  { %15310 = vmatprep.mubr.msk.bf16.mxu0 %vm3958_vm0, %v16874_v48 }
 0x4cd   :  { %15311 = vmatmul.mubr.msk.bf16.gmra.mrb[20].mxu0 %vm3958_vm0, %v16875_v23 }
 0x4ce   :  { %15318 = vmatprep.mubr.msk.bf16.mxu0 %vm3958_vm0, %v16876_v46 }
 0x4d9   :  { %v3514_v40 = vpop.xlane.xlu0 %3513 }
 0x4da   :  { %v19203_v63 = vsel %vm3317_vm7, %v3530_v13, %v3514_v40  ;;  %v3511_v20 = vpop.xlane.xlu1 %3510  ;;  %v16881_v13 = vld [vmem:[%s22539_s3 + $0x88] sm:$0xff]  }
 0x4db   :  { %v19206_v62 = vsel %vm3317_vm7, %v3529_v16, %v3511_v20  ;;  %vm22908_vm7 = vmmov %vm22880_vm2 }
 0x4dc   :  { %v16812_v52 = vpack.i.bf16 %v19203_v63, %v19206_v62  ;;  %vm22919_vm2 = vmmov %vm22917_vm1 }
 0x4dd   :  { %v16749_v27 = vpop.permute.xlu0 %16748 }
 0x4de   :  { %v16751_v36 = vunpack.i.h.bf16 %v16749_v27  ;;  %v16750_v30 = vunpack.i.l.bf16 %v16749_v27  ;;  %16813 = vrot.lane.b32.xlu0 %v16812_v52, %s17182_s22  ;;  %v16744_v14 = vpop.permute.xlu1 %16743 }
 0x4df   :  { %v16746_v60 = vunpack.i.h.bf16 %v16744_v14  ;;  %v16745_v35 = vunpack.i.l.bf16 %v16744_v14 }
 0x4e0   :  { %v4295_v24 = vsel %vm22908_vm7, %v18817_v1, %v16750_v30  ;;  %v4296_v49 = vsel %vm22909_vm10, %v19035_v21, %v16751_v36  ;;  %v5133_v21 = vld [vmem:[%s22540_s4] sm:$0xff]  ;;  %vm22922_vm7 = vmmov %vm22917_vm1 }
 0x4e1   :  { %v4293_v0 = vsel %vm22906_vm4, %v18679_v55, %v16745_v35  ;;  %v4294_v42 = vsel %vm22907_vm9, %v18717_v29, %v16746_v60  ;;  %v16764_v25 = vpop.permute.xlu0 %16763  ;;  %v4307_v41 = vpack.c.bf16 %v4296_v49, %v4295_v24  ;;  %v16883_v35 = vld [vmem:[%s22539_s3 + $0x98] sm:$0xff]   ;;  %v16885_v49 = vld [vmem:[%s22539_s3 + $0xa8] sm:$0xff]   ;;  %vm22920_vm4 = vmmov %vm22917_vm1 }
 0x4e2   :  { %16823 = vrot.lane.b32.xlu0 %v19095_v31, %s17183_s0  ;;  %v16754_v12 = vpop.permute.xlu1 %16753  ;;  %v4306_v37 = vpack.c.bf16 %v4294_v42, %v4293_v0  ;;  %v16877_v31 = vld [vmem:[%s22539_s3 + $0x68] sm:$0xff]   ;;  %v16766_v43 = vunpack.i.h.bf16 %v16764_v25  ;;  %v16765_v22 = vunpack.i.l.bf16 %v16764_v25  ;;  %v16884_v0 = vld [vmem:[%s22539_s3 + $0xa0] sm:$0xff]   ;;  %vm22921_vm9 = vmmov %vm22917_vm1 }
 0x4e3   :  { %v16756_v29 = vunpack.i.h.bf16 %v16754_v12  ;;  %v16755_v11 = vunpack.i.l.bf16 %v16754_v12  ;;  %vm22923_vm10 = vmmov %vm22917_vm1 }
 0x4e4   :  { %15314 = vmatprep.subr.bf16.mxu0 %v4306_v37 }
 0x4e5   :  { %15315 = vmatpush3.bf16.msra.mxu0 %v4306_v37  ;;  %v16774_v45 = vpop.permute.xlu0 %16773 }
 0x4e6   :  { %16833 = vrot.lane.b32.xlu0 %v16812_v52, %s17183_s0  ;;  %v16759_v55 = vpop.permute.xlu1 %16758  ;;  %15316 = vmatprep.subr.bf16.mxu0 %v4307_v41  ;;  %v16776_v48 = vunpack.i.h.bf16 %v16774_v45  ;;  %v16775_v23 = vunpack.i.l.bf16 %v16774_v45  ;;  %v16882_v52 = vld [vmem:[%s22539_s3 + $0x90] sm:$0xff]   ;;  %v16892_v45 = vld [vmem:[%s22539_s3 + $0xe0] sm:$0xff]  }
 0x4e7   :  { %v16761_v59 = vunpack.i.h.bf16 %v16759_v55  ;;  %v16760_v1 = vunpack.i.l.bf16 %v16759_v55  ;;  %v16886_v55 = vld [vmem:[%s22539_s3 + $0xb0] sm:$0xff]  }
 0x4e9   :  { %15317 = vmatpush3.bf16.msra.mxu0 %v4307_v41  ;;  %v4441_v10 = vsel %vm22910_vm11, %v16755_v11, %v16760_v1  ;;  %v4442_v2 = vsel %vm22911_vm3, %v16756_v29, %v16761_v59  ;;  %v16784_v38 = vpop.permute.xlu0 %16783  ;;  %vm22924_vm11 = vmmov %vm22917_vm1 }
 0x4ea   :  { %5143 = vperm.xlu0 %16690, %v5133_v21   ;;  %v16769_v28 = vpop.permute.xlu1 %16768  ;;  %v4454_v53 = vpack.c.bf16 %v4442_v2, %v4441_v10  ;;  %v16786_v15 = vunpack.i.h.bf16 %v16784_v38  ;;  %v16785_v33 = vunpack.i.l.bf16 %v16784_v38  ;;  %v16889_v10 = vld [vmem:[%s22539_s3 + $0xc8] sm:$0xff]   ;;  %v16890_v2 = vld [vmem:[%s22539_s3 + $0xd0] sm:$0xff]   ;;  %vm22925_vm3 = vmmov %vm22917_vm1 }
 0x4eb   :  { %v16771_v18 = vunpack.i.h.bf16 %v16769_v28  ;;  %v16770_v51 = vunpack.i.l.bf16 %v16769_v28  ;;  %v16893_v38 = vld [vmem:[%s22539_s3 + $0xe8] sm:$0xff]  }
 0x4ec   :  { %15319 = vmatmul.mubr.msk.bf16.vlgmr.msra.gmra.mrb[16].mxu0 %vm3958_vm0, %v16877_v31  ;;  %15326 = vmatprep.subr.bf16.mxu0 %v4454_v53  ;;  %v16888_v31 = vld [vmem:[%s22539_s3 + $0xc0] sm:$0xff]  }
 0x4ed   :  { %15327 = vmatpush3.bf16.msra.mxu0 %v4454_v53  ;;  %v4443_v7 = vsel %vm22912_vm6, %v16765_v22, %v16770_v51  ;;  %v4444_v4 = vsel %vm22913_vm8, %v16766_v43, %v16771_v18  ;;  %15322 = vmatprep.mubr.msk.bf16.mxu0 %vm3958_vm0, %v16878_v19  ;;  %v16794_v39 = vpop.permute.xlu0 %16793  ;;  %v16891_v19 = vld [vmem:[%s22539_s3 + $0xd8] sm:$0xff]   ;;  %vm22926_vm6 = vmmov %vm22917_vm1 }
 0x4ee   :  { %5153 = vperm.xlu0 %16690, %v5135_v17   ;;  %v16779_v61 = vpop.permute.xlu1 %16778  ;;  %v4455_v3 = vpack.c.bf16 %v4444_v4, %v4443_v7  ;;  %v16796_v40 = vunpack.i.h.bf16 %v16794_v39  ;;  %v16795_v32 = vunpack.i.l.bf16 %v16794_v39  ;;  %vm22927_vm8 = vmmov %vm22917_vm1 }
 0x4ef   :  { %v16781_v46 = vunpack.i.h.bf16 %v16779_v61  ;;  %v16780_v56 = vunpack.i.l.bf16 %v16779_v61 }
 0x4f0   :  { %15328 = vmatprep.subr.bf16.mxu0 %v4455_v3  ;;  %v4721_v36 = vsel %vm22918_vm5, %v22874_v54, %v16795_v32  ;;  %v4722_v30 = vsel %vm22919_vm2, %v22875_v5, %v16796_v40  ;;  %v16896_v40 = vld [vmem:[%s22539_s3 + $0x100] sm:$0xff]   ;;  %v16897_v32 = vld [vmem:[%s22539_s3 + $0x108] sm:$0xff]  }
 0x4f1   :  { %15329 = vmatpush3.bf16.msra.mxu0 %v4455_v3  ;;  %v4585_v47 = vsel %vm22914_vm12, %v16775_v23, %v16780_v56  ;;  %v4586_v6 = vsel %vm22915_vm14, %v16776_v48, %v16781_v46  ;;  %v4734_v60 = vpack.c.bf16 %v4722_v30, %v4721_v36  ;;  %v16804_v24 = vpop.permute.xlu0 %16803  ;;  %vm22928_vm12 = vmmov %vm22917_vm1 }
 0x4f2   :  { %5163 = vperm.xlu0 %16690, %v5137_v26   ;;  %v16789_v8 = vpop.permute.xlu1 %16788  ;;  %v4598_v9 = vpack.c.bf16 %v4586_v6, %v4585_v47  ;;  %v16806_v29 = vunpack.i.h.bf16 %v16804_v24  ;;  %v16805_v11 = vunpack.i.l.bf16 %v16804_v24  ;;  %v16894_v6 = vld [vmem:[%s22539_s3 + $0xf0] sm:$0xff]   ;;  %vm22929_vm14 = vmmov %vm22917_vm1 }
 0x4f3   :  { %v16791_v57 = vunpack.i.h.bf16 %v16789_v8  ;;  %v16790_v34 = vunpack.i.l.bf16 %v16789_v8 }
 0x4f4   :  { %15323 = vmatmul.mubr.msk.bf16.gmra.mrb[20].mxu0 %vm3958_vm0, %v16879_v50  ;;  %15338 = vmatprep.subr.bf16.mxu0 %v4598_v9 }
 0x4f5   :  { %15330 = vmatprep.mubr.msk.bf16.mxu0 %vm3958_vm0, %v16880_v44  ;;  %v4587_v16 = vsel %vm22916_vm15, %v16785_v33, %v16790_v34  ;;  %v4588_v20 = vsel %vm22917_vm1, %v16786_v15, %v16791_v57 }
 0x4f6   :  { %5173 = vperm.xlu0 %16690, %v5139_v58   ;;  %v4599_v27 = vpack.c.bf16 %v4588_v20, %v4587_v16  ;;  %v16799_v14 = vpop.permute.xlu1 %16798  ;;  %v16898_v16 = vld [vmem:[%s22539_s3 + $0x110] sm:$0xff]   ;;  %v16899_v20 = vld [vmem:[%s22539_s3 + $0x118] sm:$0xff]  }
 0x4f7   :  { %v16801_v54 = vunpack.i.h.bf16 %v16799_v14  ;;  %v16800_v42 = vunpack.i.l.bf16 %v16799_v14 }
 0x4f9   :  { %v4723_v25 = vsel %vm22920_vm4, %v19206_v62, %v16800_v42  ;;  %v4724_v41 = vsel %vm22921_vm9, %v19203_v63, %v16801_v54  ;;  %v16887_v63 = vld [vmem:[%s22539_s3 + $0xb8] sm:$0xff]  }
 0x4fa   :  { %v16809_v5 = vpop.permute.xlu1 %16808  ;;  %v4735_v59 = vpack.c.bf16 %v4724_v41, %v4723_v25 }
 0x4fb   :  { %v16811_v12 = vunpack.i.h.bf16 %v16809_v5  ;;  %v16810_v37 = vunpack.i.l.bf16 %v16809_v5 }
 0x4fc   :  { %15331 = vmatmul.mubr.msk.bf16.vlgmr.msra.gmra.mrb[16].mxu0 %vm3958_vm0, %v16881_v13  ;;  %v16895_v13 = vld [vmem:[%s22539_s3 + $0xf8] sm:$0xff]  }
 0x4fd   :  { %15339 = vmatpush3.bf16.msra.mxu0 %v4598_v9  ;;  %15334 = vmatprep.mubr.msk.bf16.mxu0 %vm3958_vm0, %v16882_v52  ;;  %v4869_v1 = vsel %vm22922_vm7, %v16805_v11, %v16810_v37  ;;  %v4870_v21 = vsel %vm22923_vm10, %v16806_v29, %v16811_v12 }
 0x4fe   :  { %15340 = vmatprep.subr.bf16.mxu0 %v4599_v27  ;;  %v4882_v62 = vpack.c.bf16 %v4870_v21, %v4869_v1  ;;  %v16819_v28 = vpop.permute.xlu1 %16818 }
 0x4ff   :  { %v16821_v22 = vunpack.i.h.bf16 %v16819_v28  ;;  %v16820_v18 = vunpack.i.l.bf16 %v16819_v28  ;;  %v16900_v28 = vld [vmem:[%s22541_s5 + $0x360] sm:$0xff]  }
 0x501   :  { %15341 = vmatpush3.bf16.msra.mxu0 %v4599_v27 }
 0x502   :  { %15350 = vmatprep.subr.bf16.mxu0 %v4734_v60  ;;  %v16829_v53 = vpop.permute.xlu1 %16828 }
 0x503   :  { %v16831_v48 = vunpack.i.h.bf16 %v16829_v53  ;;  %v16830_v23 = vunpack.i.l.bf16 %v16829_v53 }
 0x504   :  { %15335 = vmatmul.mubr.msk.bf16.gmra.mrb[20].mxu0 %vm3958_vm0, %v16883_v35 }
 0x505   :  { %15342 = vmatprep.mubr.msk.bf16.mxu0 %vm3958_vm0, %v16884_v0 }
 0x506   :  { %v16839_v26 = vpop.permute.xlu1 %16838 }
 0x507   :  { %v16841_v9 = vunpack.i.h.bf16 %v16839_v26  ;;  %v16840_v58 = vunpack.i.l.bf16 %v16839_v26  ;;  %v10334_v26 = vld [vmem:[%s22542_s6 + $0xa8] sm:$0xff] }
 0x50a   :  { %v5149_v27 = vpop.permute.xlu1 %5148 }
 0x50c   :  { %15343 = vmatmul.mubr.msk.bf16.vlgmr.msra.gmra.mrb[16].mxu0 %vm3958_vm0, %v16885_v49 }
 0x50d   :  { %15351 = vmatpush3.bf16.msra.mxu0 %v4734_v60  ;;  %15346 = vmatprep.mubr.msk.bf16.mxu0 %vm3958_vm0, %v16886_v55 }
 0x50e   :  { %15352 = vmatprep.subr.bf16.mxu0 %v4735_v59  ;;  %v5159_v30 = vpop.permute.xlu1 %5158 }
 0x511   :  { %15353 = vmatpush3.bf16.msra.mxu0 %v4735_v59 }
 0x512   :  { %15362 = vmatprep.subr.bf16.mxu0 %v4882_v62  ;;  %v5169_v49 = vpop.permute.xlu1 %5168 }
 0x514   :  { %15347 = vmatmul.mubr.msk.bf16.gmra.mrb[20].mxu0 %vm3958_vm0, %v16887_v63 }
 0x515   :  { %15354 = vmatprep.mubr.msk.bf16.mxu0 %vm3958_vm0, %v16888_v31 }
 0x516   :  { %v5179_v63 = vpop.permute.xlu1 %5178 }
 0x51c   :  { %15355 = vmatmul.mubr.msk.bf16.vlgmr.msra.gmra.mrb[16].mxu0 %vm3958_vm0, %v16889_v10 }
 0x51d   :  { %15363 = vmatpush3.bf16.msra.mxu0 %v4882_v62  ;;  %15358 = vmatprep.mubr.msk.bf16.mxu0 %vm3958_vm0, %v16890_v2 }
 0x524   :  { %15359 = vmatmul.mubr.msk.bf16.gmra.mrb[20].mxu0 %vm3958_vm0, %v16891_v19 }
 0x525   :  { %15366 = vmatprep.mubr.msk.bf16.mxu0 %vm3958_vm0, %v16892_v45 }
 0x550   :  { %v16814_v43 = vpop.permute.xlu0 %16813 }
 0x551   :  { %v16816_v51 = vunpack.i.h.bf16 %v16814_v43  ;;  %v16815_v17 = vunpack.i.l.bf16 %v16814_v43 }
 0x553   :  { %v4871_v7 = vsel %vm22924_vm11, %v16815_v17, %v16820_v18  ;;  %v4872_v4 = vsel %vm22925_vm3, %v16816_v51, %v16821_v22 }
 0x554   :  { %v16824_v61 = vpop.permute.xlu0 %16823  ;;  %v4883_v3 = vpack.c.bf16 %v4872_v4, %v4871_v7  ;;  %v10330_v7 = vld [vmem:[%s22542_s6 + $0x88] sm:$0xff]  ;;  %v10329_v4 = vld [vmem:[%s22542_s6 + $0x80] sm:$0xff] }
 0x555   :  { %v16826_v46 = vunpack.i.h.bf16 %v16824_v61  ;;  %v16825_v56 = vunpack.i.l.bf16 %v16824_v61  ;;  %v10314_v61 = vld [vmem:[%s22542_s6 + $0x8] sm:$0xff] }
 0x556   :  { %15364 = vmatprep.subr.bf16.mxu0 %v4883_v3 }
 0x557   :  { %15365 = vmatpush3.bf16.msra.mxu0 %v4883_v3  ;;  %v5013_v50 = vsel %vm22926_vm6, %v16825_v56, %v16830_v23  ;;  %v5014_v47 = vsel %vm22927_vm8, %v16826_v46, %v16831_v48  ;;  %v10313_v3 = vld [vmem:[%s22542_s6] sm:$0xff]  ;;  %v10332_v48 = vld [vmem:[%s22542_s6 + $0x98] sm:$0xff]  ;;  %v10331_v23 = vld [vmem:[%s22542_s6 + $0x90] sm:$0xff] }
 0x558   :  { %v16834_v44 = vpop.permute.xlu0 %16833  ;;  %v5026_v8 = vpack.c.bf16 %v5014_v47, %v5013_v50  ;;  %v10316_v46 = vld [vmem:[%s22542_s6 + $0x18] sm:$0xff]  ;;  %v10315_v56 = vld [vmem:[%s22542_s6 + $0x10] sm:$0xff]  ;;  %v10318_v50 = vld [vmem:[%s22542_s6 + $0x28] sm:$0xff] }
 0x559   :  { %v16836_v57 = vunpack.i.h.bf16 %v16834_v44  ;;  %v16835_v34 = vunpack.i.l.bf16 %v16834_v44  ;;  %v10317_v47 = vld [vmem:[%s22542_s6 + $0x20] sm:$0xff]  ;;  %v10335_v44 = vld [vmem:[%s22542_s6 + $0xb0] sm:$0xff] }
 0x55a   :  { %15367 = vmatmul.mubr.msk.bf16.vlgmr.msra.gmra.mrb[16].mxu0 %vm3958_vm0, %v16893_v38  ;;  %15374 = vmatprep.subr.bf16.mxu0 %v5026_v8  ;;  %v10333_v38 = vld [vmem:[%s22542_s6 + $0xa0] sm:$0xff] }
 0x55b   :  { %15375 = vmatpush3.bf16.msra.mxu0 %v5026_v8  ;;  %v5015_v39 = vsel %vm22928_vm12, %v16835_v34, %v16840_v58  ;;  %v5016_v15 = vsel %vm22929_vm14, %v16836_v57, %v16841_v9  ;;  %15370 = vmatprep.mubr.msk.bf16.mxu0 %vm3958_vm0, %v16894_v6  ;;  %v10336_v6 = vld [vmem:[%s22542_s6 + $0xb8] sm:$0xff]  ;;  %v10319_v9 = vld [vmem:[%s22542_s6 + $0x30] sm:$0xff]  ;;  %v10338_v58 = vld [vmem:[%s22542_s6 + $0xc8] sm:$0xff] }
 0x55c   :  { %v5027_v33 = vpack.c.bf16 %v5016_v15, %v5015_v39  ;;  %v10320_v8 = vld [vmem:[%s22542_s6 + $0x38] sm:$0xff]  ;;  %v10337_v57 = vld [vmem:[%s22542_s6 + $0xc0] sm:$0xff]  ;;  %v10322_v34 = vld [vmem:[%s22542_s6 + $0x48] sm:$0xff] }
 0x55d   :  { %v10321_v39 = vld [vmem:[%s22542_s6 + $0x40] sm:$0xff]  ;;  %v10340_v15 = vld [vmem:[%s22542_s6 + $0xd8] sm:$0xff] }
 0x55e   :  { %15376 = vmatprep.subr.bf16.mxu0 %v5027_v33 }
 0x55f   :  { %15377 = vmatpush3.bf16.msra.mxu0 %v5027_v33  ;;  %v10339_v33 = vld [vmem:[%s22542_s6 + $0xd0] sm:$0xff] }
 0x562   :  { %15371 = vmatmul.mubr.msk.bf16.gmra.mrb[20].mxu0 %vm3958_vm0, %v16895_v13  ;;  %v10324_v13 = vld [vmem:[%s22542_s6 + $0x58] sm:$0xff] }
 0x563   :  { %15378 = vmatprep.mubr.msk.bf16.mxu0 %vm3958_vm0, %v16896_v40  ;;  %v10323_v40 = vld [vmem:[%s22542_s6 + $0x50] sm:$0xff] }
 0x569   :  { %v5144_v52 = vpop.permute.xlu0 %5143 }
 0x56a   :  { %15379 = vmatmul.mubr.msk.bf16.vlgmr.msra.gmra.mrb[16].mxu0 %vm3958_vm0, %v16897_v32  ;;  %v10342_v32 = vld [vmem:[%s22542_s6 + $0xe8] sm:$0xff] }
 0x56b   :  { %15382 = vmatprep.mubr.msk.bf16.mxu0 %vm3958_vm0, %v16898_v16  ;;  %v10341_v16 = vld [vmem:[%s22542_s6 + $0xe0] sm:$0xff] }
 0x56d   :  { %v5154_v36 = vpop.permute.xlu0 %5153 }
 0x571   :  { %v5164_v0 = vpop.permute.xlu0 %5163 }
 0x572   :  { %15383 = vmatmul.mubr.msk.bf16.gmra.mrb[20].mxu0 %vm3958_vm0, %v16899_v20  ;;  %vm5838_vm0 = vcmask 523264   ;;  %v10326_v20 = vld [vmem:[%s22542_s6 + $0x68] sm:$0xff] }
 0x573   :  { %15482 = vmatprep.mubr.msk.bf16.mxu1 %vm5838_vm0, %v16900_v28  ;;  %v10350_v28 = vld [vmem:[%s22542_s6 + $0x128] sm:$0xff] }
 0x575   :  { %v5174_v11 = vpop.permute.xlu0 %5173 }
 0x63d   :  { %v15380_v14 = vpop.f32.mrb[16].mxu0 }
 0x63e   :  { %v5183_v60 = vadd.f32 %v15380_v14, %v5154_v36  ;;  %v5094_v35 = vpop.f32.mrb[17].mxu0  ;;  %v10343_v36 = vld [vmem:[%s22542_s6 + $0xf0] sm:$0xff] }
 0x63f   :  { %v5181_v54 = vadd.f32 %v5144_v52, %v5094_v35  ;;  %v15381_v42 = vpop.f32.mrb[18].mxu0  ;;  %v10325_v52 = vld [vmem:[%s22542_s6 + $0x60] sm:$0xff]  ;;  %v10327_v14 = vld [vmem:[%s22542_s6 + $0x70] sm:$0xff] }
 0x640   :  { %v5184_v5 = vadd.f32 %v15381_v42, %v5159_v30  ;;  %v5097_v24 = vpop.f32.mrb[19].mxu0  ;;  %v5191_v37 = vmax.f32 %v5183_v60, 0.0  ;;  %v10328_v30 = vld [vmem:[%s22542_s6 + $0x78] sm:$0xff]  ;;  %v10362_v60 = vld [vmem:[%s22542_s6 + $0x188] sm:$0xff]  ;;  %v10361_v35 = vld [vmem:[%s22542_s6 + $0x180] sm:$0xff] }
 0x641   :  { %v5182_v12 = vadd.f32 %v5149_v27, %v5097_v24  ;;  %v5189_v41 = vmax.f32 %v5181_v54, 0.0  ;;  %v10344_v27 = vld [vmem:[%s22542_s6 + $0xf8] sm:$0xff]  ;;  %v10346_v42 = vld [vmem:[%s22542_s6 + $0x108] sm:$0xff] }
 0x642   :  { %v5192_v25 = vmax.f32 %v5184_v5, 0.0  ;;  %v10345_v5 = vld [vmem:[%s22542_s6 + $0x100] sm:$0xff] }
 0x643   :  { %v5190_v55 = vmax.f32 %v5182_v12, 0.0 }
 0x644   :  { %v19350_v29 = vpack.c.bf16 %v5192_v25, %v5191_v37  ;;  %v10364_v37 = vld [vmem:[%s22542_s6 + $0x198] sm:$0xff]  ;;  %v10363_v25 = vld [vmem:[%s22542_s6 + $0x190] sm:$0xff] }
 0x645   :  { %v19352_v59 = vpack.c.bf16 %v5190_v55, %v5189_v41  ;;  %v15384_v1 = vpop.f32.mrb[20].mxu0 }
 0x646   :  { %v5187_v21 = vadd.f32 %v15384_v1, %v5174_v11  ;;  %v5110_v62 = vpop.f32.mrb[21].mxu0  ;;  %v10348_v1 = vld [vmem:[%s22542_s6 + $0x118] sm:$0xff] }
 0x647   :  { %v5185_v31 = vadd.f32 %v5164_v0, %v5110_v62  ;;  %5365 = vrot.lane.b32.xlu1 %v19352_v59, %s17185_s24  ;;  %5357 = vrot.lane.b32.xlu0 %v19352_v59, %s17182_s22  ;;  %v15385_v10 = vpop.f32.mrb[22].mxu0 }
 0x648   :  { %v5188_v2 = vadd.f32 %v15385_v10, %v5179_v63  ;;  %v5113_v19 = vpop.f32.mrb[23].mxu0  ;;  %v5195_v53 = vmax.f32 %v5187_v21, 0.0  ;;  %v10347_v21 = vld [vmem:[%s22542_s6 + $0x110] sm:$0xff]  ;;  %v10366_v10 = vld [vmem:[%s22542_s6 + $0x1a8] sm:$0xff] }
 0x649   :  { %v5186_v45 = vadd.f32 %v5169_v49, %v5113_v19  ;;  %v5193_v22 = vmax.f32 %v5185_v31, 0.0 }
 0x64a   :  { %v5196_v43 = vmax.f32 %v5188_v2, 0.0  ;;  %v10365_v2 = vld [vmem:[%s22542_s6 + $0x1a0] sm:$0xff] }
 0x64b   :  { %v5194_v18 = vmax.f32 %v5186_v45, 0.0  ;;  %5367 = vrot.lane.b32.xlu1 %v19350_v29, %s17185_s24  ;;  %5359 = vrot.lane.b32.xlu0 %v19350_v29, %s17182_s22 }
 0x64c   :  { %v19365_v51 = vpack.c.bf16 %v5196_v43, %v5195_v53  ;;  %v10349_v53 = vld [vmem:[%s22542_s6 + $0x120] sm:$0xff]  ;;  %v16901_v43 = vld [vmem:[%s22541_s5 + $0x368] sm:$0xff]  }
 0x64d   :  { %v19368_v17 = vpack.c.bf16 %v5194_v18, %v5193_v22  ;;  %v16902_v18 = vld [vmem:[%s22541_s5 + $0x370] sm:$0xff]  }
 0x64f   :  { %5369 = vrot.lane.b32.xlu1 %v19368_v17, %s17185_s24  ;;  %5361 = vrot.lane.b32.xlu0 %v19368_v17, %s17182_s22 }
 0x653   :  { %5371 = vrot.lane.b32.xlu1 %v19365_v51, %s17185_s24  ;;  %5363 = vrot.lane.b32.xlu0 %v19365_v51, %s17182_s22 }
 0x657   :  { %5207 = vrot.lane.b32.xlu1 %v19350_v29, %s17184_s23  ;;  %5205 = vrot.lane.b32.xlu0 %v19352_v59, %s17184_s23 }
 0x65b   :  { %5211 = vrot.lane.b32.xlu1 %v19365_v51, %s17184_s23  ;;  %5209 = vrot.lane.b32.xlu0 %v19368_v17, %s17184_s23 }
 0x65f   :  { %7641 = vrot.lane.b32.xlu1 %v19352_v59, %s17186_s25  ;;  %7633 = vrot.lane.b32.xlu0 %v19352_v59, %s17183_s0 }
 0x663   :  { %7643 = vrot.lane.b32.xlu1 %v19350_v29, %s17186_s25  ;;  %7635 = vrot.lane.b32.xlu0 %v19350_v29, %s17183_s0 }
 0x667   :  { %7645 = vrot.lane.b32.xlu1 %v19368_v17, %s17186_s25  ;;  %7637 = vrot.lane.b32.xlu0 %v19368_v17, %s17183_s0 }
 0x66b   :  { %7647 = vrot.lane.b32.xlu1 %v19365_v51, %s17186_s25  ;;  %7639 = vrot.lane.b32.xlu0 %v19365_v51, %s17183_s0 }
 0x66f   :  { %8981 = vrot.lane.b32.xlu1 %v19350_v29, %s17187_s26  ;;  %8979 = vrot.lane.b32.xlu0 %v19352_v59, %s17187_s26 }
 0x673   :  { %8985 = vrot.lane.b32.xlu1 %v19365_v51, %s17187_s26  ;;  %8983 = vrot.lane.b32.xlu0 %v19368_v17, %s17187_s26 }
 0x677   :  { %10528 = vperm.xlu1 %16691, %v10330_v7   ;;  %10523 = vperm.xlu0 %16690, %v10329_v4   ;;  %v10368_v4 = vld [vmem:[%s22542_s6 + $0x1b8] sm:$0xff] }
 0x67b   :  { %10448 = vperm.xlu1 %16691, %v10314_v61   ;;  %10443 = vperm.xlu0 %16690, %v10313_v3   ;;  %v10367_v61 = vld [vmem:[%s22542_s6 + $0x1b0] sm:$0xff] }
 0x67f   :  { %10538 = vperm.xlu1 %16691, %v10332_v48   ;;  %10533 = vperm.xlu0 %16690, %v10331_v23   ;;  %v10352_v23 = vld [vmem:[%s22542_s6 + $0x138] sm:$0xff] }
 0x683   :  { %10458 = vperm.xlu1 %16691, %v10316_v46   ;;  %10453 = vperm.xlu0 %16690, %v10315_v56   ;;  %v10351_v46 = vld [vmem:[%s22542_s6 + $0x130] sm:$0xff] }
 0x687   :  { %10548 = vperm.xlu1 %16691, %v10334_v26   ;;  %10543 = vperm.xlu0 %16690, %v10333_v38   ;;  %v16904_v26 = vld [vmem:[%s22541_s5 + $0x380] sm:$0xff]   ;;  %v10370_v38 = vld [vmem:[%s22542_s6 + $0x1c8] sm:$0xff] }
 0x68b   :  { %10468 = vperm.xlu1 %16691, %v10318_v50   ;;  %10463 = vperm.xlu0 %16690, %v10317_v47   ;;  %v10369_v50 = vld [vmem:[%s22542_s6 + $0x1c0] sm:$0xff] }
 0x68f   :  { %10558 = vperm.xlu1 %16691, %v10336_v6   ;;  %10553 = vperm.xlu0 %16690, %v10335_v44   ;;  %v10354_v44 = vld [vmem:[%s22542_s6 + $0x148] sm:$0xff] }
 0x693   :  { %10478 = vperm.xlu1 %16691, %v10320_v8   ;;  %10473 = vperm.xlu0 %16690, %v10319_v9   ;;  %v10353_v8 = vld [vmem:[%s22542_s6 + $0x140] sm:$0xff]  ;;  %v16905_v9 = vld [vmem:[%s22541_s5 + $0x388] sm:$0xff]  }
 0x697   :  { %10568 = vperm.xlu1 %16691, %v10338_v58   ;;  %10563 = vperm.xlu0 %16690, %v10337_v57   ;;  %v16906_v58 = vld [vmem:[%s22541_s5 + $0x390] sm:$0xff]   ;;  %v10372_v57 = vld [vmem:[%s22542_s6 + $0x1d8] sm:$0xff] }
 0x69b   :  { %10488 = vperm.xlu1 %16691, %v10322_v34   ;;  %10483 = vperm.xlu0 %16690, %v10321_v39   ;;  %v10371_v34 = vld [vmem:[%s22542_s6 + $0x1d0] sm:$0xff]  ;;  %v10356_v39 = vld [vmem:[%s22542_s6 + $0x158] sm:$0xff] }
 0x69f   :  { %10578 = vperm.xlu1 %16691, %v10340_v15   ;;  %10573 = vperm.xlu0 %16690, %v10339_v33   ;;  %v10355_v15 = vld [vmem:[%s22542_s6 + $0x150] sm:$0xff]  ;;  %v16907_v33 = vld [vmem:[%s22541_s5 + $0x398] sm:$0xff]  }
 0x6a3   :  { %10498 = vperm.xlu1 %16691, %v10324_v13   ;;  %10493 = vperm.xlu0 %16690, %v10323_v40   ;;  %v16908_v40 = vld [vmem:[%s22541_s5 + $0x3a0] sm:$0xff]  }
 0x6a7   :  { %10588 = vperm.xlu1 %16691, %v10342_v32   ;;  %10583 = vperm.xlu0 %16690, %v10341_v16   ;;  %v10374_v16 = vld [vmem:[%s22542_s6 + $0x1e8] sm:$0xff] }
 0x6ab   :  { %10508 = vperm.xlu1 %16691, %v10326_v20   ;;  %10503 = vperm.xlu0 %16690, %v10325_v52   ;;  %v10373_v20 = vld [vmem:[%s22542_s6 + $0x1e0] sm:$0xff] }
 0x6af   :  { %10598 = vperm.xlu1 %16691, %v10344_v27   ;;  %10593 = vperm.xlu0 %16690, %v10343_v36   ;;  %v10358_v27 = vld [vmem:[%s22542_s6 + $0x168] sm:$0xff]  ;;  %v10357_v36 = vld [vmem:[%s22542_s6 + $0x160] sm:$0xff] }
 0x6b3   :  { %10518 = vperm.xlu1 %16691, %v10328_v30   ;;  %10513 = vperm.xlu0 %16690, %v10327_v14   ;;  %v16909_v30 = vld [vmem:[%s22541_s5 + $0x3a8] sm:$0xff]  }
 0x6b7   :  { %10688 = vperm.xlu1 %16691, %v10362_v60   ;;  %10683 = vperm.xlu0 %16690, %v10361_v35   ;;  %v16910_v60 = vld [vmem:[%s22541_s5 + $0x3b0] sm:$0xff]   ;;  %v10376_v35 = vld [vmem:[%s22542_s6 + $0x1f8] sm:$0xff] }
 0x6b9   :  { %v5366_v0 = vpop.permute.xlu1 %5365  ;;  %v5358_v54 = vpop.permute.xlu0 %5357 }
 0x6ba   :  { %v5375_v24 = vsel %vm3298_vm13, %v5358_v54, %v5366_v0  ;;  %v10375_v0 = vld [vmem:[%s22542_s6 + $0x1f0] sm:$0xff] }
 0x6bb   :  { %15386 = vmatprep.subr.bf16.mxu0 %v5375_v24  ;;  %15930 = vmatprep.subr.bf16.mxu1 %v5375_v24 }
 0x6bc   :  { %10608 = vperm.xlu1 %16691, %v10346_v42   ;;  %10603 = vperm.xlu0 %16690, %v10345_v5   ;;  %v10360_v5 = vld [vmem:[%s22542_s6 + $0x178] sm:$0xff] }
 0x6bd   :  { %15387 = vmatpush3.bf16.msra.mxu0 %v5375_v24  ;;  %15934 = vmatpush3.bf16.msra.mxu1 %v5375_v24  ;;  %v5368_v49 = vpop.permute.xlu1 %5367  ;;  %v5360_v12 = vpop.permute.xlu0 %5359  ;;  %v10359_v24 = vld [vmem:[%s22542_s6 + $0x170] sm:$0xff] }
 0x6be   :  { %v5379_v41 = vsel %vm3298_vm13, %v5360_v12, %v5368_v49  ;;  %v16911_v49 = vld [vmem:[%s22541_s5 + $0x3b8] sm:$0xff]   ;;  %v16912_v12 = vld [vmem:[%s22541_s5 + $0x3c0] sm:$0xff]  }
 0x6bf   :  { %15388 = vmatprep.subr.bf16.mxu0 %v5379_v41  ;;  %15931 = vmatprep.subr.bf16.mxu1 %v5379_v41 }
 0x6c0   :  { %10698 = vperm.xlu1 %16691, %v10364_v37   ;;  %10693 = vperm.xlu0 %16690, %v10363_v25   ;;  %v10394_v25 = vld [vmem:[%s22542_s6 + $0x288] sm:$0xff] }
 0x6c1   :  { %15389 = vmatpush3.bf16.msra.mxu0 %v5379_v41  ;;  %15935 = vmatpush3.bf16.msra.mxu1 %v5379_v41  ;;  %v5370_v55 = vpop.permute.xlu1 %5369  ;;  %v5362_v11 = vpop.permute.xlu0 %5361  ;;  %v10393_v41 = vld [vmem:[%s22542_s6 + $0x280] sm:$0xff] }
 0x6c2   :  { %v5383_v62 = vsel %vm3298_vm13, %v5362_v11, %v5370_v55  ;;  %v10378_v11 = vld [vmem:[%s22542_s6 + $0x208] sm:$0xff] }
 0x6c3   :  { %15390 = vmatprep.subr.bf16.mxu0 %v5383_v62  ;;  %15932 = vmatprep.subr.bf16.mxu1 %v5383_v62 }
 0x6c4   :  { %10618 = vperm.xlu1 %16691, %v10348_v1   ;;  %10613 = vperm.xlu0 %16690, %v10347_v21   ;;  %v10377_v1 = vld [vmem:[%s22542_s6 + $0x200] sm:$0xff]  ;;  %v16913_v21 = vld [vmem:[%s22541_s5 + $0x3c8] sm:$0xff]  }
 0x6c5   :  { %15391 = vmatpush3.bf16.msra.mxu0 %v5383_v62  ;;  %15936 = vmatpush3.bf16.msra.mxu1 %v5383_v62  ;;  %v5372_v63 = vpop.permute.xlu1 %5371  ;;  %v5364_v31 = vpop.permute.xlu0 %5363 }
 0x6c6   :  { %v5387_v19 = vsel %vm3298_vm13, %v5364_v31, %v5372_v63  ;;  %v16914_v63 = vld [vmem:[%s22541_s5 + $0x3d0] sm:$0xff]  }
 0x6c7   :  { %15392 = vmatprep.subr.bf16.mxu0 %v5387_v19  ;;  %15933 = vmatprep.subr.bf16.mxu1 %v5387_v19 }
 0x6c8   :  { %10708 = vperm.xlu1 %16691, %v10366_v10   ;;  %10703 = vperm.xlu0 %16690, %v10365_v2   ;;  %v10396_v10 = vld [vmem:[%s22542_s6 + $0x298] sm:$0xff]  ;;  %v10395_v2 = vld [vmem:[%s22542_s6 + $0x290] sm:$0xff] }
 0x6c9   :  { %15393 = vmatpush3.bf16.msra.mxu0 %v5387_v19  ;;  %15937 = vmatpush3.bf16.msra.mxu1 %v5387_v19  ;;  %v19540_v45 = vpop.permute.xlu0 %5205  ;;  %v19557_v7 = vpop.permute.xlu1 %5207 }
 0x6ca   :  { %v5215_v22 = vsel %vm3298_vm13, %v19352_v59, %v19540_v45  ;;  %v5219_v59 = vsel %vm3298_vm13, %v19350_v29, %v19557_v7  ;;  %v16903_v29 = vld [vmem:[%s22541_s5 + $0x378] sm:$0xff]  }
 0x6cb   :  { %15522 = vmatprep.subr.bf16.mxu1 %v5215_v22 }
 0x6cc   :  { %10628 = vperm.xlu1 %16691, %v10350_v28   ;;  %10623 = vperm.xlu0 %16690, %v10349_v53   ;;  %v10380_v53 = vld [vmem:[%s22542_s6 + $0x218] sm:$0xff] }
 0x6cd   :  { %15483 = vmatmul.mubr.msk.bf16.vlgmr.msra.gmra.mrb[16].mxu1 %vm5838_vm0, %v16901_v43  ;;  %v19570_v3 = vpop.permute.xlu0 %5209  ;;  %v19572_v48 = vpop.permute.xlu1 %5211  ;;  %v10379_v43 = vld [vmem:[%s22542_s6 + $0x210] sm:$0xff] }
 0x6ce   :  { %15523 = vmatpush3.bf16.msra.mxu1 %v5215_v22  ;;  %15486 = vmatprep.mubr.msk.bf16.mxu1 %vm5838_vm0, %v16902_v18  ;;  %v5223_v56 = vsel %vm3298_vm13, %v19368_v17, %v19570_v3  ;;  %v5227_v17 = vsel %vm3298_vm13, %v19365_v51, %v19572_v48  ;;  %v16915_v22 = vld [vmem:[%s22541_s5 + $0x3d8] sm:$0xff]   ;;  %v16916_v18 = vld [vmem:[%s22541_s5 + $0x3e0] sm:$0xff]  }
 0x6cf   :  { %15524 = vmatprep.subr.bf16.mxu1 %v5219_v59 }
 0x6d0   :  { %10718 = vperm.xlu1 %16691, %v10368_v4   ;;  %10713 = vperm.xlu0 %16690, %v10367_v61   ;;  %v10398_v61 = vld [vmem:[%s22542_s6 + $0x2a8] sm:$0xff] }
 0x6d1   :  { %v7642_v47 = vpop.permute.xlu1 %7641  ;;  %v7634_v6 = vpop.permute.xlu0 %7633 }
 0x6d2   :  { %15525 = vmatpush3.bf16.msra.mxu1 %v5219_v59  ;;  %v19610_v51 = vsel %vm3298_vm13, %v7634_v6, %v7642_v47  ;;  %v10397_v59 = vld [vmem:[%s22542_s6 + $0x2a0] sm:$0xff]  ;;  %v10399_v47 = vld [vmem:[%s22542_s6 + $0x2b0] sm:$0xff] }
 0x6d3   :  { %15526 = vmatprep.subr.bf16.mxu1 %v5223_v56 }
 0x6d4   :  { %10638 = vperm.xlu1 %16691, %v10352_v23   ;;  %10633 = vperm.xlu0 %16690, %v10351_v46   ;;  %v10382_v46 = vld [vmem:[%s22542_s6 + $0x228] sm:$0xff] }
 0x6d5   :  { %15487 = vmatmul.mubr.msk.bf16.gmra.mrb[20].mxu1 %vm5838_vm0, %v16903_v29  ;;  %v19633_v13 = vpop.permute.xlu0 %7635  ;;  %v19638_v32 = vpop.permute.xlu1 %7643  ;;  %v10381_v29 = vld [vmem:[%s22542_s6 + $0x220] sm:$0xff] }
 0x6d6   :  { %15527 = vmatpush3.bf16.msra.mxu1 %v5223_v56  ;;  %15490 = vmatprep.mubr.msk.bf16.mxu1 %vm5838_vm0, %v16904_v26  ;;  %v16917_v56 = vld [vmem:[%s22541_s5 + $0x3e8] sm:$0xff]  }
 0x6d7   :  { %15528 = vmatprep.subr.bf16.mxu1 %v5227_v17 }
 0x6d8   :  { %10728 = vperm.xlu1 %16691, %v10370_v38   ;;  %10723 = vperm.xlu0 %16690, %v10369_v50   ;;  %v16918_v38 = vld [vmem:[%s22541_s5 + $0x3f0] sm:$0xff]  }
 0x6d9   :  { %v19648_v52 = vpop.permute.xlu0 %7637  ;;  %v19659_v14 = vpop.permute.xlu1 %7645 }
 0x6da   :  { %15529 = vmatpush3.bf16.msra.mxu1 %v5227_v17  ;;  %v10400_v17 = vld [vmem:[%s22542_s6 + $0x2b8] sm:$0xff] }
 0x6db   :  { %15658 = vmatprep.subr.bf16.mxu1 %v19610_v51 }
 0x6dc   :  { %10648 = vperm.xlu1 %16691, %v10354_v44   ;;  %10643 = vperm.xlu0 %16690, %v10353_v8   ;;  %v10384_v44 = vld [vmem:[%s22542_s6 + $0x238] sm:$0xff]  ;;  %v10383_v8 = vld [vmem:[%s22542_s6 + $0x230] sm:$0xff] }
 0x6dd   :  { %15491 = vmatmul.mubr.msk.bf16.gmra.mrb[24].mxu1 %vm5838_vm0, %v16905_v9  ;;  %v19671_v54 = vpop.permute.xlu0 %7639  ;;  %v19674_v42 = vpop.permute.xlu1 %7647  ;;  %v16919_v9 = vld [vmem:[%s22541_s5 + $0x3f8] sm:$0xff]  }
 0x6de   :  { %15494 = vmatprep.mubr.msk.bf16.mxu1 %vm5838_vm0, %v16906_v58 }
 0x6e0   :  { %10738 = vperm.xlu1 %16691, %v10372_v57   ;;  %10733 = vperm.xlu0 %16690, %v10371_v34   ;;  %v16920_v57 = vld [vmem:[%s22541_s5] sm:$0xff]   ;;  %v10402_v34 = vld [vmem:[%s22542_s6 + $0x2c8] sm:$0xff] }
 0x6e1   :  { %v19688_v37 = vpop.permute.xlu0 %8979  ;;  %v19697_v55 = vpop.permute.xlu1 %8981 }
 0x6e4   :  { %10658 = vperm.xlu1 %16691, %v10356_v39   ;;  %10653 = vperm.xlu0 %16690, %v10355_v15   ;;  %v10401_v39 = vld [vmem:[%s22542_s6 + $0x2c0] sm:$0xff] }
 0x6e5   :  { %15495 = vmatmul.mubr.msk.bf16.gmra.mrb[28].mxu1 %vm5838_vm0, %v16907_v33  ;;  %v19709_v62 = vpop.permute.xlu0 %8983  ;;  %v19714_v31 = vpop.permute.xlu1 %8985 }
 0x6e6   :  { %15498 = vmatprep.mubr.msk.bf16.mxu1 %vm5838_vm0, %v16908_v40  ;;  %v10386_v40 = vld [vmem:[%s22542_s6 + $0x248] sm:$0xff] }
 0x6e8   :  { %10748 = vperm.xlu1 %16691, %v10374_v16   ;;  %10743 = vperm.xlu0 %16690, %v10373_v20   ;;  %v10385_v16 = vld [vmem:[%s22542_s6 + $0x240] sm:$0xff]  ;;  %v16921_v20 = vld [vmem:[%s22541_s5 + $0x8] sm:$0xff]  }
 0x6ec   :  { %10668 = vperm.xlu1 %16691, %v10358_v27   ;;  %10663 = vperm.xlu0 %16690, %v10357_v36   ;;  %v16922_v27 = vld [vmem:[%s22541_s5 + $0x10] sm:$0xff]  }
 0x6ed   :  { %15499 = vmatmul.mubr.msk.bf16.gmra.mrb[32].mxu1 %vm5838_vm0, %v16909_v30  ;;  %v10404_v30 = vld [vmem:[%s22542_s6 + $0x2d8] sm:$0xff] }
 0x6ee   :  { %15502 = vmatprep.mubr.msk.bf16.mxu1 %vm5838_vm0, %v16910_v60  ;;  %v10403_v60 = vld [vmem:[%s22542_s6 + $0x2d0] sm:$0xff] }
 0x6f0   :  { %10758 = vperm.xlu1 %16691, %v10376_v35   ;;  %10753 = vperm.xlu0 %16690, %v10375_v0   ;;  %v7655_v0 = vsel %vm3298_vm13, %v19633_v13, %v19638_v32  ;;  %v7659_v13 = vsel %vm3298_vm13, %v19648_v52, %v19659_v14  ;;  %v16924_v32 = vld [vmem:[%s22541_s5 + $0x20] sm:$0xff]   ;;  %v7663_v52 = vsel %vm3298_vm13, %v19671_v54, %v19674_v42 }
 0x6f1   :  { %v19878_v42 = vsel %vm3298_vm13, %v19540_v45, %v19688_v37 }
 0x6f4   :  { %10678 = vperm.xlu1 %16691, %v10360_v5   ;;  %10673 = vperm.xlu0 %16690, %v10359_v24   ;;  %v10388_v5 = vld [vmem:[%s22542_s6 + $0x258] sm:$0xff] }
 0x6f5   :  { %15503 = vmatmul.mubr.msk.bf16.gmra.mrb[36].mxu1 %vm5838_vm0, %v16911_v49  ;;  %v16923_v24 = vld [vmem:[%s22541_s5 + $0x18] sm:$0xff]  }
 0x6f6   :  { %15506 = vmatprep.mubr.msk.bf16.mxu1 %vm5838_vm0, %v16912_v12  ;;  %v19723_v19 = vpop.permute.xlu0 %10523  ;;  %v19726_v28 = vpop.permute.xlu1 %10528 }
 0x6f8   :  { %10848 = vperm.xlu1 %16691, %v10394_v25   ;;  %10843 = vperm.xlu0 %16690, %v10393_v41   ;;  %v10406_v25 = vld [vmem:[%s22542_s6 + $0x2e8] sm:$0xff]  ;;  %v10405_v41 = vld [vmem:[%s22542_s6 + $0x2e0] sm:$0xff] }
 0x6fa   :  { %v19740_v4 = vpop.permute.xlu0 %10443  ;;  %v19749_v23 = vpop.permute.xlu1 %10448 }
 0x6fc   :  { %10768 = vperm.xlu1 %16691, %v10378_v11   ;;  %10763 = vperm.xlu0 %16690, %v10377_v1   ;;  %v10390_v11 = vld [vmem:[%s22542_s6 + $0x268] sm:$0xff] }
 0x6fd   :  { %15507 = vmatmul.mubr.msk.bf16.gmra.mrb[40].mxu1 %vm5838_vm0, %v16913_v21  ;;  %v16925_v1 = vld [vmem:[%s22541_s5 + $0x28] sm:$0xff]   ;;  %v10389_v21 = vld [vmem:[%s22542_s6 + $0x260] sm:$0xff] }
 0x6fe   :  { %15510 = vmatprep.mubr.msk.bf16.mxu1 %vm5838_vm0, %v16914_v63  ;;  %v19761_v26 = vpop.permute.xlu0 %10533  ;;  %v19766_v50 = vpop.permute.xlu1 %10538  ;;  %v16926_v63 = vld [vmem:[%s22541_s5 + $0x30] sm:$0xff]  }
 0x700   :  { %10858 = vperm.xlu1 %16691, %v10396_v10   ;;  %10853 = vperm.xlu0 %16690, %v10395_v2   ;;  %v10408_v10 = vld [vmem:[%s22542_s6 + $0x2f8] sm:$0xff]  ;;  %v10407_v2 = vld [vmem:[%s22542_s6 + $0x2f0] sm:$0xff] }
 0x702   :  { %v19776_v6 = vpop.permute.xlu0 %10453  ;;  %v19787_v58 = vpop.permute.xlu1 %10458 }
 0x704   :  { %10778 = vperm.xlu1 %16691, %v10380_v53   ;;  %10773 = vperm.xlu0 %16690, %v10379_v43   ;;  %v10392_v53 = vld [vmem:[%s22542_s6 + $0x278] sm:$0xff] }
 0x705   :  { %15511 = vmatmul.mubr.msk.bf16.gmra.mrb[44].mxu1 %vm5838_vm0, %v16915_v22  ;;  %v16927_v43 = vld [vmem:[%s22541_s5 + $0x38] sm:$0xff]   ;;  %v10391_v22 = vld [vmem:[%s22542_s6 + $0x270] sm:$0xff] }
 0x706   :  { %15514 = vmatprep.mubr.msk.bf16.mxu1 %vm5838_vm0, %v16916_v18  ;;  %v19799_v15 = vpop.permute.xlu0 %10543  ;;  %v19802_v33 = vpop.permute.xlu1 %10548  ;;  %v16928_v18 = vld [vmem:[%s22541_s5 + $0x40] sm:$0xff]  }
 0x708   :  { %10868 = vperm.xlu1 %16691, %v10398_v61   ;;  %10863 = vperm.xlu0 %16690, %v10397_v59   ;;  %v10426_v59 = vld [vmem:[%s22542_s6 + $0x388] sm:$0xff] }
 0x70a   :  { %v19816_v36 = vpop.permute.xlu0 %10463  ;;  %v19825_v35 = vpop.permute.xlu1 %10468 }
 0x70c   :  { %10788 = vperm.xlu1 %16691, %v10382_v46   ;;  %10783 = vperm.xlu0 %16690, %v10381_v29   ;;  %v10425_v46 = vld [vmem:[%s22542_s6 + $0x380] sm:$0xff] }
 0x70d   :  { %15515 = vmatmul.mubr.msk.bf16.gmra.mrb[48].mxu1 %vm5838_vm0, %v16917_v56  ;;  %v10410_v56 = vld [vmem:[%s22542_s6 + $0x308] sm:$0xff] }
 0x70e   :  { %15518 = vmatprep.mubr.msk.bf16.mxu1 %vm5838_vm0, %v16918_v38  ;;  %v19841_v49 = vpop.permute.xlu0 %10553  ;;  %v19849_v12 = vpop.permute.xlu1 %10558  ;;  %v16929_v38 = vld [vmem:[%s22541_s5 + $0x48] sm:$0xff]  }
 0x710   :  { %10878 = vperm.xlu1 %16691, %v10400_v17   ;;  %10873 = vperm.xlu0 %16690, %v10399_v47   ;;  %v10409_v17 = vld [vmem:[%s22542_s6 + $0x300] sm:$0xff] }
 0x712   :  { %v19862_v14 = vpop.permute.xlu0 %10473  ;;  %v19873_v54 = vpop.permute.xlu1 %10478 }
 0x714   :  { %10798 = vperm.xlu1 %16691, %v10384_v44   ;;  %10793 = vperm.xlu0 %16690, %v10383_v8   ;;  %v16930_v44 = vld [vmem:[%s22541_s5 + $0x50] sm:$0xff]  }
 0x715   :  { %15519 = vmatmul.mubr.msk.bf16.gmra.mrb[52].mxu1 %vm5838_vm0, %v16919_v9  ;;  %v10428_v9 = vld [vmem:[%s22542_s6 + $0x398] sm:$0xff] }
 0x716   :  { %15530 = vmatprep.mubr.msk.bf16.mxu1 %vm5838_vm0, %v16920_v57  ;;  %v19891_v45 = vpop.permute.xlu0 %10563  ;;  %v19894_v37 = vpop.permute.xlu1 %10568  ;;  %v10427_v57 = vld [vmem:[%s22542_s6 + $0x390] sm:$0xff] }
 0x717   :  { %22930 = vst [vmem:[#allocation33_spill] sm:$0xff] %v19891_v45  ;;  %22931 = vst [vmem:[#allocation35_spill] sm:$0xff] %v19894_v37 }
 0x718   :  { %10888 = vperm.xlu1 %16691, %v10402_v34   ;;  %10883 = vperm.xlu0 %16690, %v10401_v39   ;;  %v10412_v39 = vld [vmem:[%s22542_s6 + $0x318] sm:$0xff] }
 0x71a   :  { %v19908_v61 = vpop.permute.xlu0 %10483  ;;  %v19917_v29 = vpop.permute.xlu1 %10488 }
 0x71c   :  { %10808 = vperm.xlu1 %16691, %v10386_v40   ;;  %10803 = vperm.xlu0 %16690, %v10385_v16   ;;  %v16931_v40 = vld [vmem:[%s22541_s5 + $0x58] sm:$0xff]   ;;  %v10411_v16 = vld [vmem:[%s22542_s6 + $0x310] sm:$0xff] }
 0x71d   :  { %15531 = vmatmul.mubr.msk.bf16.vlgmr.msra.gmra.mrb[56].mxu1 %vm5838_vm0, %v16921_v20 }
 0x71e   :  { %15659 = vmatpush3.bf16.msra.mxu1 %v19610_v51  ;;  %15534 = vmatprep.mubr.msk.bf16.mxu1 %vm5838_vm0, %v16922_v27  ;;  %v10387_v51 = vld [vmem:[%s22542_s6 + $0x250] sm:$0xff]  ;;  %v19929_v47 = vpop.permute.xlu0 %10573  ;;  %v19934_v8 = vpop.permute.xlu1 %10578  ;;  %v16932_v27 = vld [vmem:[%s22541_s5 + $0x60] sm:$0xff]  }
 0x71f   :  { %15660 = vmatprep.subr.bf16.mxu1 %v7655_v0  ;;  %22932 = vst [vmem:[#allocation36_spill] sm:$0xff] %v19934_v8  ;;  %v17137_v8 = vld [vmem:[%s22541_s5 + $0x768] sm:$0xff]  }
 0x720   :  { %10898 = vperm.xlu1 %16691, %v10404_v30   ;;  %10893 = vperm.xlu0 %16690, %v10403_v60   ;;  %v10430_v30 = vld [vmem:[%s22542_s6 + $0x3a8] sm:$0xff]  ;;  %v10429_v60 = vld [vmem:[%s22542_s6 + $0x3a0] sm:$0xff] }
 0x722   :  { %15661 = vmatpush3.bf16.msra.mxu1 %v7655_v0  ;;  %v19944_v34 = vpop.permute.xlu0 %10493  ;;  %v19955_v20 = vpop.permute.xlu1 %10498 }
 0x723   :  { %15662 = vmatprep.subr.bf16.mxu1 %v7659_v13 }
 0x724   :  { %10818 = vperm.xlu1 %16691, %v10388_v5   ;;  %10813 = vperm.xlu0 %16690, %v10387_v51   ;;  %v16933_v51 = vld [vmem:[%s22541_s5 + $0x68] sm:$0xff]  }
 0x725   :  { %15535 = vmatmul.mubr.msk.bf16.gmra.mrb[60].mxu1 %vm5838_vm0, %v16923_v24  ;;  %v10414_v24 = vld [vmem:[%s22542_s6 + $0x328] sm:$0xff] }
 0x726   :  { %15663 = vmatpush3.bf16.msra.mxu1 %v7659_v13  ;;  %15538 = vmatprep.mubr.msk.bf16.mxu1 %vm5838_vm0, %v16924_v32  ;;  %v19967_v0 = vpop.permute.xlu0 %10583  ;;  %v19970_v5 = vpop.permute.xlu1 %10588  ;;  %v10413_v13 = vld [vmem:[%s22542_s6 + $0x320] sm:$0xff]  ;;  %v16934_v32 = vld [vmem:[%s22541_s5 + $0x70] sm:$0xff]  }
 0x727   :  { %15664 = vmatprep.subr.bf16.mxu1 %v7663_v52  ;;  %22933 = vst [vmem:[#allocation10_spill] sm:$0xff] %v19967_v0  ;;  %22934 = vst [vmem:[#allocation37_spill] sm:$0xff] %v19970_v5  ;;  %v17125_v5 = vld [vmem:[%s22541_s5 + $0x730] sm:$0xff]  }
 0x728   :  { %10908 = vperm.xlu1 %16691, %v10406_v25   ;;  %10903 = vperm.xlu0 %16690, %v10405_v41   ;;  %v10432_v41 = vld [vmem:[%s22542_s6 + $0x3b8] sm:$0xff] }
 0x72a   :  { %15665 = vmatpush3.bf16.msra.mxu1 %v7663_v52  ;;  %v19984_v25 = vpop.permute.xlu0 %10503  ;;  %v10431_v52 = vld [vmem:[%s22542_s6 + $0x3b0] sm:$0xff] }
 0x72b   :  { %15794 = vmatprep.subr.bf16.mxu1 %v19878_v42 }
 0x72c   :  { %10828 = vperm.xlu1 %16691, %v10390_v11   ;;  %10823 = vperm.xlu0 %16690, %v10389_v21   ;;  %v19993_v11 = vpop.permute.xlu1 %10508  ;;  %v16935_v21 = vld [vmem:[%s22541_s5 + $0x78] sm:$0xff]  }
 0x72d   :  { %15539 = vmatmul.mubr.msk.bf16.gmra.mrb[64].mxu1 %vm5838_vm0, %v16925_v1  ;;  %v10416_v1 = vld [vmem:[%s22542_s6 + $0x338] sm:$0xff] }
 0x72e   :  { %15542 = vmatprep.mubr.msk.bf16.mxu1 %vm5838_vm0, %v16926_v63  ;;  %v10415_v63 = vld [vmem:[%s22542_s6 + $0x330] sm:$0xff] }
 0x730   :  { %10918 = vperm.xlu1 %16691, %v10408_v10   ;;  %10913 = vperm.xlu0 %16690, %v10407_v2   ;;  %v20005_v10 = vpop.permute.xlu0 %10593  ;;  %v16936_v2 = vld [vmem:[%s22541_s5 + $0x80] sm:$0xff]  }
 0x731   :  { %22935 = vst [vmem:[#allocation38_spill] sm:$0xff] %v20005_v10  ;;  %v17127_v10 = vld [vmem:[%s22541_s5 + $0x738] sm:$0xff]  }
 0x734   :  { %10838 = vperm.xlu1 %16691, %v10392_v53   ;;  %10833 = vperm.xlu0 %16690, %v10391_v22   ;;  %v20010_v53 = vpop.permute.xlu1 %10598  ;;  %v10433_v22 = vld [vmem:[%s22542_s6 + $0x3c0] sm:$0xff] }
 0x735   :  { %15543 = vmatmul.mubr.msk.bf16.gmra.mrb[68].mxu1 %vm5838_vm0, %v16927_v43  ;;  %22936 = vst [vmem:[#allocation39_spill] sm:$0xff] %v20010_v53  ;;  %v10434_v43 = vld [vmem:[%s22542_s6 + $0x3c8] sm:$0xff] }
 0x736   :  { %15546 = vmatprep.mubr.msk.bf16.mxu1 %vm5838_vm0, %v16928_v18  ;;  %v20020_v18 = vpop.permute.xlu0 %10513 }
 0x738   :  { %11008 = vperm.xlu1 %16691, %v10426_v59   ;;  %11003 = vperm.xlu0 %16690, %v10425_v46   ;;  %v10418_v59 = vld [vmem:[%s22542_s6 + $0x348] sm:$0xff] }
 0x739   :  { %v16937_v46 = vld [vmem:[%s22541_s5 + $0x88] sm:$0xff]  }
 0x73c   :  { %10928 = vperm.xlu1 %16691, %v10410_v56   ;;  %10923 = vperm.xlu0 %16690, %v10409_v17   ;;  %v10417_v56 = vld [vmem:[%s22542_s6 + $0x340] sm:$0xff]  ;;  %v16938_v17 = vld [vmem:[%s22541_s5 + $0x90] sm:$0xff]  }
 0x73d   :  { %15547 = vmatmul.mubr.msk.bf16.gmra.mrb[72].mxu1 %vm5838_vm0, %v16929_v38  ;;  %v20031_v38 = vpop.permute.xlu1 %10518 }
 0x73e   :  { %15550 = vmatprep.mubr.msk.bf16.mxu1 %vm5838_vm0, %v16930_v44  ;;  %v10436_v44 = vld [vmem:[%s22542_s6 + $0x3d8] sm:$0xff] }
 0x740   :  { %11018 = vperm.xlu1 %16691, %v10428_v9   ;;  %11013 = vperm.xlu0 %16690, %v10427_v57   ;;  %v10435_v9 = vld [vmem:[%s22542_s6 + $0x3d0] sm:$0xff]  ;;  %v20043_v57 = vpop.permute.xlu0 %10683 }
 0x741   :  { %22937 = vst [vmem:[#allocation40_spill] sm:$0xff] %v20043_v57  ;;  %v17109_v57 = vld [vmem:[%s22541_s5 + $0x6f0] sm:$0xff]  }
 0x744   :  { %10938 = vperm.xlu1 %16691, %v10412_v39   ;;  %10933 = vperm.xlu0 %16690, %v10411_v16   ;;  %v20046_v39 = vpop.permute.xlu1 %10688  ;;  %v16939_v16 = vld [vmem:[%s22541_s5 + $0x98] sm:$0xff]  }
 0x745   :  { %15551 = vmatmul.mubr.msk.bf16.gmra.mrb[76].mxu1 %vm5838_vm0, %v16931_v40  ;;  %22938 = vst [vmem:[#allocation34_spill] sm:$0xff] %v20046_v39  ;;  %v10420_v40 = vld [vmem:[%s22542_s6 + $0x358] sm:$0xff] }
 0x746   :  { %15554 = vmatprep.mubr.msk.bf16.mxu1 %vm5838_vm0, %v16932_v27  ;;  %v10419_v27 = vld [vmem:[%s22542_s6 + $0x350] sm:$0xff] }
 0x748   :  { %11028 = vperm.xlu1 %16691, %v10430_v30   ;;  %11023 = vperm.xlu0 %16690, %v10429_v60   ;;  %v16940_v30 = vld [vmem:[%s22541_s5 + $0xa0] sm:$0xff]   ;;  %v20060_v60 = vpop.permute.xlu0 %10603 }
 0x749   :  { %22939 = vst [vmem:[#allocation42_spill] sm:$0xff] %v20060_v60 }
 0x74c   :  { %10948 = vperm.xlu1 %16691, %v10414_v24   ;;  %10943 = vperm.xlu0 %16690, %v10413_v13   ;;  %v10438_v24 = vld [vmem:[%s22542_s6 + $0x3e8] sm:$0xff]  ;;  %v20069_v13 = vpop.permute.xlu1 %10608 }
 0x74d   :  { %15555 = vmatmul.mubr.msk.bf16.gmra.mrb[80].mxu1 %vm5838_vm0, %v16933_v51  ;;  %v10437_v51 = vld [vmem:[%s22542_s6 + $0x3e0] sm:$0xff]  ;;  %22940 = vst [vmem:[#allocation43_spill] sm:$0xff] %v20069_v13 }
 0x74e   :  { %15558 = vmatprep.mubr.msk.bf16.mxu1 %vm5838_vm0, %v16934_v32  ;;  %v10422_v32 = vld [vmem:[%s22542_s6 + $0x368] sm:$0xff]  ;;  %v17121_v13 = vld [vmem:[%s22541_s5 + $0x720] sm:$0xff]  }
 0x750   :  { %11038 = vperm.xlu1 %16691, %v10432_v41   ;;  %11033 = vperm.xlu0 %16690, %v10431_v52   ;;  %v16941_v41 = vld [vmem:[%s22541_s5 + $0xa8] sm:$0xff]   ;;  %v10421_v52 = vld [vmem:[%s22542_s6 + $0x360] sm:$0xff] }
 0x754   :  { %10958 = vperm.xlu1 %16691, %v10416_v1   ;;  %10953 = vperm.xlu0 %16690, %v10415_v63   ;;  %v20081_v1 = vpop.permute.xlu0 %10693  ;;  %v20086_v63 = vpop.permute.xlu1 %10698 }
 0x755   :  { %15559 = vmatmul.mubr.msk.bf16.gmra.mrb[84].mxu1 %vm5838_vm0, %v16935_v21  ;;  %22941 = vst [vmem:[#allocation41_spill] sm:$0xff] %v20081_v1  ;;  %v16942_v21 = vld [vmem:[%s22541_s5 + $0xb0] sm:$0xff]   ;;  %22942 = vst [vmem:[#allocation44_spill] sm:$0xff] %v20086_v63 }
 0x756   :  { %15562 = vmatprep.mubr.msk.bf16.mxu1 %vm5838_vm0, %v16936_v2  ;;  %v10440_v2 = vld [vmem:[%s22542_s6 + $0x3f8] sm:$0xff]  ;;  %v16962_v63 = vld [vmem:[%s22541_s5 + $0x150] sm:$0xff]  }
 0x758   :  { %11048 = vperm.xlu1 %16691, %v10434_v43   ;;  %11043 = vperm.xlu0 %16690, %v10433_v22   ;;  %v10439_v43 = vld [vmem:[%s22542_s6 + $0x3f0] sm:$0xff]  ;;  %v20096_v22 = vpop.permute.xlu0 %10613 }
 0x759   :  { %22943 = vst [vmem:[#allocation45_spill] sm:$0xff] %v20096_v22  ;;  %v17123_v22 = vld [vmem:[%s22541_s5 + $0x728] sm:$0xff]  }
 0x75c   :  { %10968 = vperm.xlu1 %16691, %v10418_v59   ;;  %10963 = vperm.xlu0 %16690, %v10417_v56   ;;  %v10424_v59 = vld [vmem:[%s22542_s6 + $0x378] sm:$0xff]  ;;  %v10423_v56 = vld [vmem:[%s22542_s6 + $0x370] sm:$0xff] }
 0x75d   :  { %15563 = vmatmul.mubr.msk.bf16.gmra.mrb[88].mxu1 %vm5838_vm0, %v16937_v46  ;;  %v16943_v46 = vld [vmem:[%s22541_s5 + $0xb8] sm:$0xff]  }
 0x75e   :  { %15566 = vmatprep.mubr.msk.bf16.mxu1 %vm5838_vm0, %v16938_v17  ;;  %v20107_v17 = vpop.permute.xlu1 %10618 }
 0x75f   :  { %22944 = vst [vmem:[#allocation46_spill] sm:$0xff] %v20107_v17 }
 0x760   :  { %11058 = vperm.xlu1 %16691, %v10436_v44   ;;  %11053 = vperm.xlu0 %16690, %v10435_v9   ;;  %v16944_v44 = vld [vmem:[%s22541_s5 + $0xc0] sm:$0xff]   ;;  %v11546_v9 = vld [vmem:[%s22544_s8 + $0x88] sm:$0xff] }
 0x764   :  { %10978 = vperm.xlu1 %16691, %v10420_v40   ;;  %10973 = vperm.xlu0 %16690, %v10419_v27   ;;  %v11545_v40 = vld [vmem:[%s22544_s8 + $0x80] sm:$0xff]  ;;  %v20122_v27 = vpop.permute.xlu1 %10708 }
 0x765   :  { %15567 = vmatmul.mubr.msk.bf16.gmra.mrb[92].mxu1 %vm5838_vm0, %v16939_v16  ;;  %v20119_v16 = vpop.permute.xlu0 %10703  ;;  %22946 = vst [vmem:[#allocation48_spill] sm:$0xff] %v20122_v27  ;;  %v11555_v27 = vld [vmem:[%s22544_s8 + $0xd0] sm:$0xff] }
 0x766   :  { %15570 = vmatprep.mubr.msk.bf16.mxu1 %vm5838_vm0, %v16940_v30  ;;  %22945 = vst [vmem:[#allocation47_spill] sm:$0xff] %v20119_v16  ;;  %v11530_v30 = vld [vmem:[%s22544_s8 + $0x8] sm:$0xff] }
 0x768   :  { %11068 = vperm.xlu1 %16691, %v10438_v24   ;;  %11063 = vperm.xlu0 %16690, %v10437_v51   ;;  %v16945_v24 = vld [vmem:[%s22541_s5 + $0xc8] sm:$0xff]   ;;  %v11529_v51 = vld [vmem:[%s22544_s8] sm:$0xff] }
 0x76c   :  { %10988 = vperm.xlu1 %16691, %v10422_v32   ;;  %10983 = vperm.xlu0 %16690, %v10421_v52   ;;  %v16946_v32 = vld [vmem:[%s22541_s5 + $0xd0] sm:$0xff]   ;;  %v11548_v52 = vld [vmem:[%s22544_s8 + $0x98] sm:$0xff] }
 0x76d   :  { %15571 = vmatmul.mubr.msk.bf16.gmra.mrb[96].mxu1 %vm5838_vm0, %v16941_v41  ;;  %v20136_v41 = vpop.permute.xlu0 %10623 }
 0x76e   :  { %15574 = vmatprep.mubr.msk.bf16.mxu1 %vm5838_vm0, %v16942_v21  ;;  %22947 = vst [vmem:[#allocation49_spill] sm:$0xff] %v20136_v41  ;;  %v11547_v21 = vld [vmem:[%s22544_s8 + $0x90] sm:$0xff] }
 0x770   :  { %11078 = vperm.xlu1 %16691, %v10440_v2   ;;  %11073 = vperm.xlu0 %16690, %v10439_v43   ;;  %v20145_v2 = vpop.permute.xlu1 %10628  ;;  %v11532_v43 = vld [vmem:[%s22544_s8 + $0x18] sm:$0xff] }
 0x771   :  { %22948 = vst [vmem:[#allocation50_spill] sm:$0xff] %v20145_v2  ;;  %v17117_v2 = vld [vmem:[%s22541_s5 + $0x710] sm:$0xff]  }
 0x774   :  { %10998 = vperm.xlu1 %16691, %v10424_v59   ;;  %10993 = vperm.xlu0 %16690, %v10423_v56   ;;  %v16947_v59 = vld [vmem:[%s22541_s5 + $0xd8] sm:$0xff]   ;;  %v20157_v56 = vpop.permute.xlu0 %10713 }
 0x775   :  { %15575 = vmatmul.mubr.msk.bf16.gmra.mrb[100].mxu1 %vm5838_vm0, %v16943_v46  ;;  %v11531_v46 = vld [vmem:[%s22544_s8 + $0x10] sm:$0xff]  ;;  %22949 = vst [vmem:[#allocation51_spill] sm:$0xff] %v20157_v56 }
 0x776   :  { %15578 = vmatprep.mubr.msk.bf16.mxu1 %vm5838_vm0, %v16944_v44  ;;  %v16948_v44 = vld [vmem:[%s22541_s5 + $0xe0] sm:$0xff]  }
 0x778   :  { %11648 = vperm.xlu1 %16691, %v11546_v9   ;;  %11643 = vperm.xlu0 %16690, %v11545_v40   ;;  %v20162_v9 = vpop.permute.xlu1 %10718  ;;  %v11550_v40 = vld [vmem:[%s22544_s8 + $0xa8] sm:$0xff] }
 0x779   :  { %22950 = vst [vmem:[#allocation52_spill] sm:$0xff] %v20162_v9 }
 0x77c   :  { %11568 = vperm.xlu1 %16691, %v11530_v30   ;;  %11563 = vperm.xlu0 %16690, %v11529_v51   ;;  %v11549_v30 = vld [vmem:[%s22544_s8 + $0xa0] sm:$0xff]  ;;  %v11534_v51 = vld [vmem:[%s22544_s8 + $0x28] sm:$0xff] }
 0x77d   :  { %15579 = vmatmul.mubr.msk.bf16.gmra.mrb[104].mxu1 %vm5838_vm0, %v16945_v24  ;;  %v20172_v24 = vpop.permute.xlu0 %10633 }
 0x77e   :  { %15582 = vmatprep.mubr.msk.bf16.mxu1 %vm5838_vm0, %v16946_v32  ;;  %22951 = vst [vmem:[#allocation53_spill] sm:$0xff] %v20172_v24  ;;  %v16949_v32 = vld [vmem:[%s22541_s5 + $0xe8] sm:$0xff]   ;;  %v17119_v24 = vld [vmem:[%s22541_s5 + $0x718] sm:$0xff]  }
 0x780   :  { %11658 = vperm.xlu1 %16691, %v11548_v52   ;;  %11653 = vperm.xlu0 %16690, %v11547_v21   ;;  %v11533_v52 = vld [vmem:[%s22544_s8 + $0x20] sm:$0xff]  ;;  %v20183_v21 = vpop.permute.xlu1 %10638 }
 0x781   :  { %22952 = vst [vmem:[#allocation54_spill] sm:$0xff] %v20183_v21 }
 0x784   :  { %11578 = vperm.xlu1 %16691, %v11532_v43   ;;  %11573 = vperm.xlu0 %16690, %v11531_v46   ;;  %v16950_v43 = vld [vmem:[%s22541_s5 + $0xf0] sm:$0xff]  }
 0x785   :  { %15583 = vmatmul.mubr.msk.bf16.gmra.mrb[108].mxu1 %vm5838_vm0, %v16947_v59  ;;  %v11552_v59 = vld [vmem:[%s22544_s8 + $0xb8] sm:$0xff]  ;;  %v11551_v46 = vld [vmem:[%s22544_s8 + $0xb0] sm:$0xff] }
 0x786   :  { %15586 = vmatprep.mubr.msk.bf16.mxu1 %vm5838_vm0, %v16948_v44  ;;  %v20195_v44 = vpop.permute.xlu0 %10723 }
 0x787   :  { %22953 = vst [vmem:[#allocation55_spill] sm:$0xff] %v20195_v44 }
 0x788   :  { %11668 = vperm.xlu1 %16691, %v11550_v40   ;;  %11663 = vperm.xlu0 %16690, %v11549_v30   ;;  %v20198_v40 = vpop.permute.xlu1 %10728  ;;  %v11536_v30 = vld [vmem:[%s22544_s8 + $0x38] sm:$0xff] }
 0x789   :  { %22954 = vst [vmem:[#allocation56_spill] sm:$0xff] %v20198_v40 }
 0x78c   :  { %11588 = vperm.xlu1 %16691, %v11534_v51   ;;  %11583 = vperm.xlu0 %16690, %v11533_v52   ;;  %v16951_v51 = vld [vmem:[%s22541_s5 + $0xf8] sm:$0xff]   ;;  %v16952_v52 = vld [vmem:[%s22541_s5 + $0x100] sm:$0xff]   ;;  %v20221_v40 = vpop.permute.xlu1 %10648 }
 0x78d   :  { %15587 = vmatmul.mubr.msk.bf16.gmra.mrb[112].mxu1 %vm5838_vm0, %v16949_v32  ;;  %v11535_v32 = vld [vmem:[%s22544_s8 + $0x30] sm:$0xff]  ;;  %22956 = vst [vmem:[#allocation58_spill] sm:$0xff] %v20221_v40 }
 0x78e   :  { %15590 = vmatprep.mubr.msk.bf16.mxu1 %vm5838_vm0, %v16950_v43  ;;  %v20212_v43 = vpop.permute.xlu0 %10643 }
 0x78f   :  { %22955 = vst [vmem:[#allocation57_spill] sm:$0xff] %v20212_v43 }
 0x790   :  { %11678 = vperm.xlu1 %16691, %v11552_v59   ;;  %11673 = vperm.xlu0 %16690, %v11551_v46   ;;  %v11554_v59 = vld [vmem:[%s22544_s8 + $0xc8] sm:$0xff]  ;;  %v11553_v46 = vld [vmem:[%s22544_s8 + $0xc0] sm:$0xff] }
 0x792   :  { %v20233_v44 = vpop.permute.xlu0 %10733 }
 0x793   :  { %22957 = vst [vmem:[#allocation59_spill] sm:$0xff] %v20233_v44 }
 0x794   :  { %11598 = vperm.xlu1 %16691, %v11536_v30   ;;  %11593 = vperm.xlu0 %16690, %v11535_v32   ;;  %v11538_v30 = vld [vmem:[%s22544_s8 + $0x48] sm:$0xff]  ;;  %v11537_v32 = vld [vmem:[%s22544_s8 + $0x40] sm:$0xff] }
 0x795   :  { %15591 = vmatmul.mubr.msk.bf16.gmra.mrb[116].mxu1 %vm5838_vm0, %v16951_v51  ;;  %v16953_v51 = vld [vmem:[%s22541_s5 + $0x108] sm:$0xff]  }
 0x796   :  { %15594 = vmatprep.mubr.msk.bf16.mxu1 %vm5838_vm0, %v16952_v52  ;;  %v16954_v52 = vld [vmem:[%s22541_s5 + $0x110] sm:$0xff]   ;;  %v20248_v44 = vpop.permute.xlu0 %10653 }
 0x797   :  { %22959 = vst [vmem:[#allocation61_spill] sm:$0xff] %v20248_v44  ;;  %v17115_v44 = vld [vmem:[%s22541_s5 + $0x708] sm:$0xff]  }
 0x798   :  { %11688 = vperm.xlu1 %16691, %v11554_v59   ;;  %11683 = vperm.xlu0 %16690, %v11553_v46   ;;  %v20238_v59 = vpop.permute.xlu1 %10738  ;;  %v11556_v46 = vld [vmem:[%s22544_s8 + $0xd8] sm:$0xff] }
 0x799   :  { %22958 = vst [vmem:[#allocation60_spill] sm:$0xff] %v20238_v59 }
 0x79a   :  { %v20271_v9 = vpop.permute.xlu0 %10743 }
 0x79b   :  { %22961 = vst [vmem:[#allocation24_spill] sm:$0xff] %v20271_v9 }
 0x79c   :  { %11608 = vperm.xlu1 %16691, %v11538_v30   ;;  %11603 = vperm.xlu0 %16690, %v11537_v32   ;;  %v11540_v30 = vld [vmem:[%s22544_s8 + $0x58] sm:$0xff]  ;;  %v11539_v32 = vld [vmem:[%s22544_s8 + $0x50] sm:$0xff]  ;;  %v20259_v59 = vpop.permute.xlu1 %10658 }
 0x79d   :  { %15595 = vmatmul.mubr.msk.bf16.gmra.mrb[120].mxu1 %vm5838_vm0, %v16953_v51  ;;  %v16955_v51 = vld [vmem:[%s22541_s5 + $0x118] sm:$0xff]   ;;  %22960 = vst [vmem:[#allocation62_spill] sm:$0xff] %v20259_v59 }
 0x79e   :  { %15598 = vmatprep.mubr.msk.bf16.mxu1 %vm5838_vm0, %v16954_v52  ;;  %v16956_v52 = vld [vmem:[%s22541_s5 + $0x120] sm:$0xff]   ;;  %v20288_v9 = vpop.permute.xlu0 %10663 }
 0x79f   :  { %22963 = vst [vmem:[#allocation22_spill] sm:$0xff] %v20288_v9 }
 0x7a0   :  { %11698 = vperm.xlu1 %16691, %v11556_v46   ;;  %11693 = vperm.xlu0 %16690, %v11555_v27   ;;  %v11558_v27 = vld [vmem:[%s22544_s8 + $0xe8] sm:$0xff]  ;;  %v11557_v46 = vld [vmem:[%s22544_s8 + $0xe0] sm:$0xff]  ;;  %v20274_v16 = vpop.permute.xlu1 %10748 }
 0x7a1   :  { %22962 = vst [vmem:[#allocation27_spill] sm:$0xff] %v20274_v16 }
 0x7a2   :  { %v20309_v56 = vpop.permute.xlu0 %10753 }
 0x7a3   :  { %22965 = vst [vmem:[#allocation29_spill] sm:$0xff] %v20309_v56  ;;  %v16961_v56 = vld [vmem:[%s22541_s5 + $0x148] sm:$0xff]  }
 0x7a4   :  { %11618 = vperm.xlu1 %16691, %v11540_v30   ;;  %11613 = vperm.xlu0 %16690, %v11539_v32   ;;  %v11542_v30 = vld [vmem:[%s22544_s8 + $0x68] sm:$0xff]  ;;  %v11541_v32 = vld [vmem:[%s22544_s8 + $0x60] sm:$0xff]  ;;  %v20297_v16 = vpop.permute.xlu1 %10668 }
 0x7a5   :  { %15599 = vmatmul.mubr.msk.bf16.gmra.mrb[124].mxu1 %vm5838_vm0, %v16955_v51  ;;  %v16957_v51 = vld [vmem:[%s22541_s5 + $0x128] sm:$0xff]   ;;  %22964 = vst [vmem:[#allocation25_spill] sm:$0xff] %v20297_v16 }
 0x7a6   :  { %15602 = vmatprep.mubr.msk.bf16.mxu1 %vm5838_vm0, %v16956_v52  ;;  %v16958_v52 = vld [vmem:[%s22541_s5 + $0x130] sm:$0xff]   ;;  %v20318_v39 = vpop.permute.xlu0 %10673 }
 0x7a7   :  { %22967 = vst [vmem:[#allocation7_spill] sm:$0xff] %v20318_v39  ;;  %v17113_v39 = vld [vmem:[%s22541_s5 + $0x700] sm:$0xff]  }
 0x7a8   :  { %11708 = vperm.xlu1 %16691, %v11558_v27   ;;  %11703 = vperm.xlu0 %16690, %v11557_v46   ;;  %v11560_v27 = vld [vmem:[%s22544_s8 + $0xf8] sm:$0xff]  ;;  %v11559_v46 = vld [vmem:[%s22544_s8 + $0xf0] sm:$0xff] }
 0x7ac   :  { %11628 = vperm.xlu1 %16691, %v11542_v30   ;;  %11623 = vperm.xlu0 %16690, %v11541_v32   ;;  %v11544_v30 = vld [vmem:[%s22544_s8 + $0x78] sm:$0xff]  ;;  %v11543_v32 = vld [vmem:[%s22544_s8 + $0x70] sm:$0xff] }
 0x7ad   :  { %15603 = vmatmul.mubr.msk.bf16.gmra.mrb[128].mxu1 %vm5838_vm0, %v16957_v51  ;;  %v16959_v51 = vld [vmem:[%s22541_s5 + $0x138] sm:$0xff]  }
 0x7ae   :  { %15606 = vmatprep.mubr.msk.bf16.mxu1 %vm5838_vm0, %v16958_v52  ;;  %v16960_v52 = vld [vmem:[%s22541_s5 + $0x140] sm:$0xff]  }
 0x7b0   :  { %11718 = vperm.xlu1 %16691, %v11560_v27   ;;  %11713 = vperm.xlu0 %16690, %v11559_v46   ;;  %v20314_v27 = vpop.permute.xlu1 %10758  ;;  %v13054_v46 = vld [vmem:[#allocation2] sm:$0x1] }
 0x7b1   :  { %22966 = vst [vmem:[#allocation23_spill] sm:$0xff] %v20314_v27 }
 0x7b4   :  { %11638 = vperm.xlu1 %16691, %v11544_v30   ;;  %11633 = vperm.xlu0 %16690, %v11543_v32   ;;  %v16963_v30 = vld [vmem:[%s22541_s5 + $0x158] sm:$0xff]   ;;  %v16965_v32 = vld [vmem:[%s22541_s5 + $0x168] sm:$0xff]  }
 0x7b5   :  { %15607 = vmatmul.mubr.msk.bf16.gmra.mrb[132].mxu1 %vm5838_vm0, %v16959_v51  ;;  %v16964_v51 = vld [vmem:[%s22541_s5 + $0x160] sm:$0xff]  }
 0x7b6   :  { %15610 = vmatprep.mubr.msk.bf16.mxu1 %vm5838_vm0, %v16960_v52  ;;  %v16968_v52 = vld [vmem:[%s22541_s5 + $0x180] sm:$0xff]  }
 0x7b8   :  { %13057 = vperm.xlu0 %16690, %v13054_v46   ;;  %v16969_v46 = vld [vmem:[%s22541_s5 + $0x188] sm:$0xff]  }
 0x7bd   :  { %15611 = vmatmul.mubr.msk.bf16.gmra.mrb[136].mxu1 %vm5838_vm0, %v16961_v56  ;;  %v16967_v56 = vld [vmem:[%s22541_s5 + $0x178] sm:$0xff]  }
 0x7be   :  { %15614 = vmatprep.mubr.msk.bf16.mxu1 %vm5838_vm0, %v16962_v63  ;;  %v16966_v63 = vld [vmem:[%s22541_s5 + $0x170] sm:$0xff]  }
 0x7c5   :  { %15615 = vmatmul.mubr.msk.bf16.gmra.mrb[140].mxu1 %vm5838_vm0, %v16963_v30  ;;  %v16970_v30 = vld [vmem:[%s22541_s5 + $0x190] sm:$0xff]  }
 0x7c6   :  { %15618 = vmatprep.mubr.msk.bf16.mxu1 %vm5838_vm0, %v16964_v51  ;;  %v16971_v51 = vld [vmem:[%s22541_s5 + $0x198] sm:$0xff]  }
 0x7cd   :  { %15619 = vmatmul.mubr.msk.bf16.gmra.mrb[16].mxu1 %vm5838_vm0, %v16965_v32  ;;  %v16972_v32 = vld [vmem:[%s22541_s5 + $0x1a0] sm:$0xff]  }
 0x7ce   :  { %15622 = vmatprep.mubr.msk.bf16.mxu1 %vm5838_vm0, %v16966_v63  ;;  %v16973_v63 = vld [vmem:[%s22541_s5 + $0x1a8] sm:$0xff]  }
 0x7d5   :  { %15623 = vmatmul.mubr.msk.bf16.gmra.mrb[20].mxu1 %vm5838_vm0, %v16967_v56  ;;  %v16974_v56 = vld [vmem:[%s22541_s5 + $0x1b0] sm:$0xff]  }
 0x7d6   :  { %15626 = vmatprep.mubr.msk.bf16.mxu1 %vm5838_vm0, %v16968_v52  ;;  %v16975_v52 = vld [vmem:[%s22541_s5 + $0x1b8] sm:$0xff]  }
 0x7dd   :  { %15627 = vmatmul.mubr.msk.bf16.gmra.mrb[24].mxu1 %vm5838_vm0, %v16969_v46  ;;  %v16976_v46 = vld [vmem:[%s22541_s5 + $0x1c0] sm:$0xff]  }
 0x7de   :  { %15630 = vmatprep.mubr.msk.bf16.mxu1 %vm5838_vm0, %v16970_v30  ;;  %v16977_v30 = vld [vmem:[%s22541_s5 + $0x1c8] sm:$0xff]  }
 0x7e5   :  { %15631 = vmatmul.mubr.msk.bf16.gmra.mrb[28].mxu1 %vm5838_vm0, %v16971_v51  ;;  %v16978_v51 = vld [vmem:[%s22541_s5 + $0x1d0] sm:$0xff]  }
 0x7e6   :  { %15634 = vmatprep.mubr.msk.bf16.mxu1 %vm5838_vm0, %v16972_v32  ;;  %v16979_v32 = vld [vmem:[%s22541_s5 + $0x1d8] sm:$0xff]  }
 0x7ed   :  { %15635 = vmatmul.mubr.msk.bf16.gmra.mrb[32].mxu1 %vm5838_vm0, %v16973_v63  ;;  %v16980_v63 = vld [vmem:[%s22541_s5 + $0x1e0] sm:$0xff]  }
 0x7ee   :  { %15638 = vmatprep.mubr.msk.bf16.mxu1 %vm5838_vm0, %v16974_v56  ;;  %v16981_v56 = vld [vmem:[%s22541_s5 + $0x1e8] sm:$0xff]  }
 0x7f5   :  { %15639 = vmatmul.mubr.msk.bf16.gmra.mrb[36].mxu1 %vm5838_vm0, %v16975_v52  ;;  %v16982_v52 = vld [vmem:[%s22541_s5 + $0x1f0] sm:$0xff]  }
 0x7f6   :  { %15642 = vmatprep.mubr.msk.bf16.mxu1 %vm5838_vm0, %v16976_v46  ;;  %v16983_v46 = vld [vmem:[%s22541_s5 + $0x1f8] sm:$0xff]  }
 0x7fd   :  { %15643 = vmatmul.mubr.msk.bf16.gmra.mrb[40].mxu1 %vm5838_vm0, %v16977_v30  ;;  %v16984_v30 = vld [vmem:[%s22541_s5 + $0x400] sm:$0xff]  }
 0x7fe   :  { %15646 = vmatprep.mubr.msk.bf16.mxu1 %vm5838_vm0, %v16978_v51  ;;  %v16985_v51 = vld [vmem:[%s22541_s5 + $0x408] sm:$0xff]  }
 0x805   :  { %15647 = vmatmul.mubr.msk.bf16.gmra.mrb[44].mxu1 %vm5838_vm0, %v16979_v32  ;;  %v16986_v32 = vld [vmem:[%s22541_s5 + $0x410] sm:$0xff]  }
 0x806   :  { %15650 = vmatprep.mubr.msk.bf16.mxu1 %vm5838_vm0, %v16980_v63  ;;  %v8991_v63 = vsel %vm3298_vm13, %v19557_v7, %v19697_v55  ;;  %v8997_v7 = vsel %vm3298_vm13, %v19572_v48, %v19714_v31  ;;  %v16989_v55 = vld [vmem:[%s22541_s5 + $0x428] sm:$0xff]   ;;  %v16991_v48 = vld [vmem:[%s22541_s5 + $0x438] sm:$0xff]  }
 0x807   :  { %v16993_v31 = vld [vmem:[%s22541_s5 + $0x448] sm:$0xff]  }
 0x80d   :  { %15651 = vmatmul.mubr.msk.bf16.gmra.mrb[48].mxu1 %vm5838_vm0, %v16981_v56  ;;  %v16987_v56 = vld [vmem:[%s22541_s5 + $0x418] sm:$0xff]  }
 0x80e   :  { %15654 = vmatprep.mubr.msk.bf16.mxu1 %vm5838_vm0, %v16982_v52  ;;  %v8994_v52 = vsel %vm3298_vm13, %v19570_v3, %v19709_v62  ;;  %v16990_v3 = vld [vmem:[%s22541_s5 + $0x430] sm:$0xff]   ;;  %v16992_v62 = vld [vmem:[%s22541_s5 + $0x440] sm:$0xff]   ;;  %vm13129_vm13 = vcmask 8192  }
 0x815   :  { %15655 = vmatmul.mubr.msk.bf16.gmra.mrb[52].mxu1 %vm5838_vm0, %v16983_v46  ;;  %v16994_v46 = vld [vmem:[%s22541_s5 + $0x450] sm:$0xff]  }
 0x816   :  { %15666 = vmatprep.mubr.msk.bf16.mxu1 %vm5838_vm0, %v16984_v30  ;;  %v16995_v30 = vld [vmem:[%s22541_s5 + $0x458] sm:$0xff]  }
 0x81d   :  { %15667 = vmatmul.mubr.msk.bf16.vlgmr.msra.gmra.mrb[56].mxu1 %vm5838_vm0, %v16985_v51  ;;  %v16996_v51 = vld [vmem:[%s22541_s5 + $0x460] sm:$0xff]  }
 0x81e   :  { %15795 = vmatpush3.bf16.msra.mxu1 %v19878_v42  ;;  %15670 = vmatprep.mubr.msk.bf16.mxu1 %vm5838_vm0, %v16986_v32  ;;  %v16988_v42 = vld [vmem:[%s22541_s5 + $0x420] sm:$0xff]   ;;  %v16997_v32 = vld [vmem:[%s22541_s5 + $0x468] sm:$0xff]  }
 0x81f   :  { %15796 = vmatprep.subr.bf16.mxu1 %v8991_v63 }
 0x822   :  { %15797 = vmatpush3.bf16.msra.mxu1 %v8991_v63  ;;  %v16998_v63 = vld [vmem:[%s22541_s5 + $0x470] sm:$0xff]  }
 0x823   :  { %15798 = vmatprep.subr.bf16.mxu1 %v8994_v52 }
 0x825   :  { %15671 = vmatmul.mubr.msk.bf16.gmra.mrb[60].mxu1 %vm5838_vm0, %v16987_v56  ;;  %v16999_v56 = vld [vmem:[%s22541_s5 + $0x478] sm:$0xff]  }
 0x826   :  { %15799 = vmatpush3.bf16.msra.mxu1 %v8994_v52  ;;  %15674 = vmatprep.mubr.msk.bf16.mxu1 %vm5838_vm0, %v16988_v42  ;;  %v17000_v52 = vld [vmem:[%s22541_s5 + $0x480] sm:$0xff]   ;;  %v17001_v42 = vld [vmem:[%s22541_s5 + $0x488] sm:$0xff]  }
 0x827   :  { %15800 = vmatprep.subr.bf16.mxu1 %v8997_v7 }
 0x82a   :  { %15801 = vmatpush3.bf16.msra.mxu1 %v8997_v7  ;;  %v17002_v7 = vld [vmem:[%s22541_s5 + $0x490] sm:$0xff]  }
 0x82d   :  { %15675 = vmatmul.mubr.msk.bf16.gmra.mrb[64].mxu1 %vm5838_vm0, %v16989_v55  ;;  %v17003_v55 = vld [vmem:[%s22541_s5 + $0x498] sm:$0xff]  }
 0x82e   :  { %15678 = vmatprep.mubr.msk.bf16.mxu1 %vm5838_vm0, %v16990_v3  ;;  %v17004_v3 = vld [vmem:[%s22541_s5 + $0x4a0] sm:$0xff]  }
 0x835   :  { %15679 = vmatmul.mubr.msk.bf16.gmra.mrb[68].mxu1 %vm5838_vm0, %v16991_v48  ;;  %v17005_v48 = vld [vmem:[%s22541_s5 + $0x4a8] sm:$0xff]  }
 0x836   :  { %15682 = vmatprep.mubr.msk.bf16.mxu1 %vm5838_vm0, %v16992_v62  ;;  %v17006_v62 = vld [vmem:[%s22541_s5 + $0x4b0] sm:$0xff]  }
 0x83d   :  { %15683 = vmatmul.mubr.msk.bf16.gmra.mrb[72].mxu1 %vm5838_vm0, %v16993_v31  ;;  %v17007_v31 = vld [vmem:[%s22541_s5 + $0x4b8] sm:$0xff]  }
 0x83e   :  { %15686 = vmatprep.mubr.msk.bf16.mxu1 %vm5838_vm0, %v16994_v46  ;;  %v17008_v46 = vld [vmem:[%s22541_s5 + $0x4c0] sm:$0xff]  }
 0x845   :  { %15687 = vmatmul.mubr.msk.bf16.gmra.mrb[76].mxu1 %vm5838_vm0, %v16995_v30  ;;  %v17009_v30 = vld [vmem:[%s22541_s5 + $0x4c8] sm:$0xff]  }
 0x846   :  { %15690 = vmatprep.mubr.msk.bf16.mxu1 %vm5838_vm0, %v16996_v51  ;;  %v17010_v51 = vld [vmem:[%s22541_s5 + $0x4d0] sm:$0xff]  }
 0x84d   :  { %15691 = vmatmul.mubr.msk.bf16.gmra.mrb[80].mxu1 %vm5838_vm0, %v16997_v32  ;;  %v17011_v32 = vld [vmem:[%s22541_s5 + $0x4d8] sm:$0xff]  }
 0x84e   :  { %15694 = vmatprep.mubr.msk.bf16.mxu1 %vm5838_vm0, %v16998_v63  ;;  %v17012_v63 = vld [vmem:[%s22541_s5 + $0x4e0] sm:$0xff]  }
 0x855   :  { %15695 = vmatmul.mubr.msk.bf16.gmra.mrb[84].mxu1 %vm5838_vm0, %v16999_v56  ;;  %v17013_v56 = vld [vmem:[%s22541_s5 + $0x4e8] sm:$0xff]  }
 0x856   :  { %15698 = vmatprep.mubr.msk.bf16.mxu1 %vm5838_vm0, %v17000_v52  ;;  %v17014_v52 = vld [vmem:[%s22541_s5 + $0x4f0] sm:$0xff]  }
 0x85d   :  { %15699 = vmatmul.mubr.msk.bf16.gmra.mrb[88].mxu1 %vm5838_vm0, %v17001_v42  ;;  %v17015_v42 = vld [vmem:[%s22541_s5 + $0x4f8] sm:$0xff]  }
 0x85e   :  { %15702 = vmatprep.mubr.msk.bf16.mxu1 %vm5838_vm0, %v17002_v7  ;;  %v17016_v7 = vld [vmem:[%s22541_s5 + $0x500] sm:$0xff]  }
 0x865   :  { %15703 = vmatmul.mubr.msk.bf16.gmra.mrb[92].mxu1 %vm5838_vm0, %v17003_v55  ;;  %v17048_v55 = vld [vmem:[%s22541_s5 + $0x200] sm:$0xff]  }
 0x866   :  { %15706 = vmatprep.mubr.msk.bf16.mxu1 %vm5838_vm0, %v17004_v3  ;;  %v17049_v3 = vld [vmem:[%s22541_s5 + $0x208] sm:$0xff]   ;;  %15394 = vmatprep.mubr.msk.bf16.mxu0 %vm5838_vm0, %v17048_v55  ;;  %v17023_v55 = vld [vmem:[%s22541_s5 + $0x538] sm:$0xff]  }
 0x867   :  { %15395 = vmatmul.mubr.msk.bf16.vlgmr.msra.gmra.mrb[24].mxu0 %vm5838_vm0, %v17049_v3  ;;  %v17024_v3 = vld [vmem:[%s22541_s5 + $0x540] sm:$0xff]  }
 0x86d   :  { %15707 = vmatmul.mubr.msk.bf16.gmra.mrb[96].mxu1 %vm5838_vm0, %v17005_v48  ;;  %v17017_v48 = vld [vmem:[%s22541_s5 + $0x508] sm:$0xff]  }
 0x86e   :  { %15710 = vmatprep.mubr.msk.bf16.mxu1 %vm5838_vm0, %v17006_v62  ;;  %v17018_v62 = vld [vmem:[%s22541_s5 + $0x510] sm:$0xff]  }
 0x875   :  { %15711 = vmatmul.mubr.msk.bf16.gmra.mrb[100].mxu1 %vm5838_vm0, %v17007_v31  ;;  %v17052_v31 = vld [vmem:[%s22541_s5 + $0x210] sm:$0xff]  }
 0x876   :  { %15714 = vmatprep.mubr.msk.bf16.mxu1 %vm5838_vm0, %v17008_v46  ;;  %v17053_v46 = vld [vmem:[%s22541_s5 + $0x218] sm:$0xff]   ;;  %15398 = vmatprep.mubr.msk.bf16.mxu0 %vm5838_vm0, %v17052_v31  ;;  %v17025_v31 = vld [vmem:[%s22541_s5 + $0x548] sm:$0xff]  }
 0x877   :  { %15399 = vmatmul.mubr.msk.bf16.gmra.mrb[28].mxu0 %vm5838_vm0, %v17053_v46  ;;  %v17026_v46 = vld [vmem:[%s22541_s5 + $0x550] sm:$0xff]  }
 0x87d   :  { %15715 = vmatmul.mubr.msk.bf16.gmra.mrb[104].mxu1 %vm5838_vm0, %v17009_v30  ;;  %v17019_v30 = vld [vmem:[%s22541_s5 + $0x518] sm:$0xff]  }
 0x87e   :  { %15718 = vmatprep.mubr.msk.bf16.mxu1 %vm5838_vm0, %v17010_v51  ;;  %v17020_v51 = vld [vmem:[%s22541_s5 + $0x520] sm:$0xff]  }
 0x885   :  { %15719 = vmatmul.mubr.msk.bf16.gmra.mrb[108].mxu1 %vm5838_vm0, %v17011_v32  ;;  %v17056_v32 = vld [vmem:[%s22541_s5 + $0x220] sm:$0xff]  }
 0x886   :  { %15722 = vmatprep.mubr.msk.bf16.mxu1 %vm5838_vm0, %v17012_v63  ;;  %v17057_v63 = vld [vmem:[%s22541_s5 + $0x228] sm:$0xff]   ;;  %15402 = vmatprep.mubr.msk.bf16.mxu0 %vm5838_vm0, %v17056_v32  ;;  %v17027_v32 = vld [vmem:[%s22541_s5 + $0x558] sm:$0xff]  }
 0x887   :  { %15403 = vmatmul.mubr.msk.bf16.gmra.mrb[32].mxu0 %vm5838_vm0, %v17057_v63  ;;  %v17028_v63 = vld [vmem:[%s22541_s5 + $0x560] sm:$0xff]  }
 0x88d   :  { %15723 = vmatmul.mubr.msk.bf16.gmra.mrb[112].mxu1 %vm5838_vm0, %v17013_v56  ;;  %v17021_v56 = vld [vmem:[%s22541_s5 + $0x528] sm:$0xff]  }
 0x88e   :  { %15726 = vmatprep.mubr.msk.bf16.mxu1 %vm5838_vm0, %v17014_v52  ;;  %v17022_v52 = vld [vmem:[%s22541_s5 + $0x530] sm:$0xff]  }
 0x895   :  { %15727 = vmatmul.mubr.msk.bf16.gmra.mrb[116].mxu1 %vm5838_vm0, %v17015_v42  ;;  %v17060_v42 = vld [vmem:[%s22541_s5 + $0x230] sm:$0xff]  }
 0x896   :  { %15730 = vmatprep.mubr.msk.bf16.mxu1 %vm5838_vm0, %v17016_v7  ;;  %v17061_v7 = vld [vmem:[%s22541_s5 + $0x238] sm:$0xff]   ;;  %15406 = vmatprep.mubr.msk.bf16.mxu0 %vm5838_vm0, %v17060_v42  ;;  %v17029_v42 = vld [vmem:[%s22541_s5 + $0x568] sm:$0xff]  }
 0x897   :  { %15407 = vmatmul.mubr.msk.bf16.gmra.mrb[36].mxu0 %vm5838_vm0, %v17061_v7  ;;  %v17030_v7 = vld [vmem:[%s22541_s5 + $0x570] sm:$0xff]  }
 0x89d   :  { %15731 = vmatmul.mubr.msk.bf16.gmra.mrb[120].mxu1 %vm5838_vm0, %v17017_v48  ;;  %v17064_v48 = vld [vmem:[%s22541_s5 + $0x240] sm:$0xff]  }
 0x89e   :  { %15734 = vmatprep.mubr.msk.bf16.mxu1 %vm5838_vm0, %v17018_v62  ;;  %v17065_v62 = vld [vmem:[%s22541_s5 + $0x248] sm:$0xff]   ;;  %15410 = vmatprep.mubr.msk.bf16.mxu0 %vm5838_vm0, %v17064_v48  ;;  %v17031_v48 = vld [vmem:[%s22541_s5 + $0x578] sm:$0xff]  }
 0x89f   :  { %15411 = vmatmul.mubr.msk.bf16.gmra.mrb[40].mxu0 %vm5838_vm0, %v17065_v62  ;;  %v17032_v62 = vld [vmem:[%s22541_s5 + $0x580] sm:$0xff]  }
 0x8a5   :  { %15735 = vmatmul.mubr.msk.bf16.gmra.mrb[124].mxu1 %vm5838_vm0, %v17019_v30  ;;  %v17068_v30 = vld [vmem:[%s22541_s5 + $0x250] sm:$0xff]  }
 0x8a6   :  { %15738 = vmatprep.mubr.msk.bf16.mxu1 %vm5838_vm0, %v17020_v51  ;;  %v17070_v51 = vld [vmem:[%s22541_s5 + $0x258] sm:$0xff]   ;;  %15414 = vmatprep.mubr.msk.bf16.mxu0 %vm5838_vm0, %v17068_v30  ;;  %v17033_v30 = vld [vmem:[%s22541_s5 + $0x588] sm:$0xff]  }
 0x8a7   :  { %15415 = vmatmul.mubr.msk.bf16.gmra.mrb[44].mxu0 %vm5838_vm0, %v17070_v51  ;;  %v17034_v51 = vld [vmem:[%s22541_s5 + $0x590] sm:$0xff]  }
 0x8ad   :  { %15739 = vmatmul.mubr.msk.bf16.gmra.mrb[128].mxu1 %vm5838_vm0, %v17021_v56  ;;  %v17072_v56 = vld [vmem:[%s22541_s5 + $0x260] sm:$0xff]  }
 0x8ae   :  { %15742 = vmatprep.mubr.msk.bf16.mxu1 %vm5838_vm0, %v17022_v52  ;;  %v17074_v52 = vld [vmem:[%s22541_s5 + $0x268] sm:$0xff]   ;;  %15418 = vmatprep.mubr.msk.bf16.mxu0 %vm5838_vm0, %v17072_v56  ;;  %v17035_v56 = vld [vmem:[%s22541_s5 + $0x598] sm:$0xff]  }
 0x8af   :  { %15419 = vmatmul.mubr.msk.bf16.gmra.mrb[48].mxu0 %vm5838_vm0, %v17074_v52  ;;  %v17036_v52 = vld [vmem:[%s22541_s5 + $0x5a0] sm:$0xff]  }
 0x8b5   :  { %15743 = vmatmul.mubr.msk.bf16.gmra.mrb[132].mxu1 %vm5838_vm0, %v17023_v55  ;;  %v17076_v55 = vld [vmem:[%s22541_s5 + $0x270] sm:$0xff]  }
 0x8b6   :  { %15746 = vmatprep.mubr.msk.bf16.mxu1 %vm5838_vm0, %v17024_v3  ;;  %v17078_v3 = vld [vmem:[%s22541_s5 + $0x278] sm:$0xff]   ;;  %15422 = vmatprep.mubr.msk.bf16.mxu0 %vm5838_vm0, %v17076_v55  ;;  %v17037_v55 = vld [vmem:[%s22541_s5 + $0x5a8] sm:$0xff]  }
 0x8b7   :  { %15423 = vmatmul.mubr.msk.bf16.gmra.mrb[52].mxu0 %vm5838_vm0, %v17078_v3  ;;  %v17038_v3 = vld [vmem:[%s22541_s5 + $0x5b0] sm:$0xff]  }
 0x8bd   :  { %15747 = vmatmul.mubr.msk.bf16.gmra.mrb[136].mxu1 %vm5838_vm0, %v17025_v31  ;;  %v17080_v31 = vld [vmem:[%s22541_s5 + $0x280] sm:$0xff]  }
 0x8be   :  { %15750 = vmatprep.mubr.msk.bf16.mxu1 %vm5838_vm0, %v17026_v46  ;;  %v17082_v46 = vld [vmem:[%s22541_s5 + $0x288] sm:$0xff]   ;;  %15426 = vmatprep.mubr.msk.bf16.mxu0 %vm5838_vm0, %v17080_v31  ;;  %v17039_v31 = vld [vmem:[%s22541_s5 + $0x5b8] sm:$0xff]  }
 0x8bf   :  { %15427 = vmatmul.mubr.msk.bf16.gmra.mrb[56].mxu0 %vm5838_vm0, %v17082_v46  ;;  %v17040_v46 = vld [vmem:[%s22541_s5 + $0x5c0] sm:$0xff]  }
 0x8c5   :  { %15751 = vmatmul.mubr.msk.bf16.gmra.mrb[140].mxu1 %vm5838_vm0, %v17027_v32  ;;  %v17084_v32 = vld [vmem:[%s22541_s5 + $0x290] sm:$0xff]  }
 0x8c6   :  { %15754 = vmatprep.mubr.msk.bf16.mxu1 %vm5838_vm0, %v17028_v63  ;;  %v17086_v63 = vld [vmem:[%s22541_s5 + $0x298] sm:$0xff]   ;;  %15430 = vmatprep.mubr.msk.bf16.mxu0 %vm5838_vm0, %v17084_v32  ;;  %v17041_v32 = vld [vmem:[%s22541_s5 + $0x5c8] sm:$0xff]  }
 0x8c7   :  { %15431 = vmatmul.mubr.msk.bf16.gmra.mrb[60].mxu0 %vm5838_vm0, %v17086_v63  ;;  %v17042_v63 = vld [vmem:[%s22541_s5 + $0x5d0] sm:$0xff]  }
 0x8cd   :  { %15755 = vmatmul.mubr.msk.bf16.gmra.mrb[16].mxu1 %vm5838_vm0, %v17029_v42  ;;  %v17088_v42 = vld [vmem:[%s22541_s5 + $0x2a0] sm:$0xff]  }
 0x8ce   :  { %15758 = vmatprep.mubr.msk.bf16.mxu1 %vm5838_vm0, %v17030_v7  ;;  %v17090_v7 = vld [vmem:[%s22541_s5 + $0x2a8] sm:$0xff]   ;;  %15434 = vmatprep.mubr.msk.bf16.mxu0 %vm5838_vm0, %v17088_v42  ;;  %v17043_v42 = vld [vmem:[%s22541_s5 + $0x5d8] sm:$0xff]  }
 0x8cf   :  { %15435 = vmatmul.mubr.msk.bf16.gmra.mrb[64].mxu0 %vm5838_vm0, %v17090_v7  ;;  %v17044_v7 = vld [vmem:[%s22541_s5 + $0x5e0] sm:$0xff]  }
 0x8d5   :  { %15759 = vmatmul.mubr.msk.bf16.gmra.mrb[20].mxu1 %vm5838_vm0, %v17031_v48  ;;  %v17092_v48 = vld [vmem:[%s22541_s5 + $0x2b0] sm:$0xff]  }
 0x8d6   :  { %15762 = vmatprep.mubr.msk.bf16.mxu1 %vm5838_vm0, %v17032_v62  ;;  %v17094_v62 = vld [vmem:[%s22541_s5 + $0x2b8] sm:$0xff]   ;;  %15438 = vmatprep.mubr.msk.bf16.mxu0 %vm5838_vm0, %v17092_v48  ;;  %v17045_v48 = vld [vmem:[%s22541_s5 + $0x5e8] sm:$0xff]  }
 0x8d7   :  { %15439 = vmatmul.mubr.msk.bf16.gmra.mrb[68].mxu0 %vm5838_vm0, %v17094_v62  ;;  %v17046_v62 = vld [vmem:[%s22541_s5 + $0x5f0] sm:$0xff]  }
 0x8dd   :  { %15763 = vmatmul.mubr.msk.bf16.gmra.mrb[24].mxu1 %vm5838_vm0, %v17033_v30  ;;  %v17096_v30 = vld [vmem:[%s22541_s5 + $0x2c0] sm:$0xff]  }
 0x8de   :  { %15766 = vmatprep.mubr.msk.bf16.mxu1 %vm5838_vm0, %v17034_v51  ;;  %v17098_v51 = vld [vmem:[%s22541_s5 + $0x2c8] sm:$0xff]   ;;  %15442 = vmatprep.mubr.msk.bf16.mxu0 %vm5838_vm0, %v17096_v30  ;;  %v17047_v30 = vld [vmem:[%s22541_s5 + $0x5f8] sm:$0xff]  }
 0x8df   :  { %15443 = vmatmul.mubr.msk.bf16.gmra.mrb[72].mxu0 %vm5838_vm0, %v17098_v51  ;;  %v17050_v51 = vld [vmem:[%s22541_s5 + $0x600] sm:$0xff]  }
 0x8e5   :  { %15767 = vmatmul.mubr.msk.bf16.gmra.mrb[28].mxu1 %vm5838_vm0, %v17035_v56  ;;  %v17100_v56 = vld [vmem:[%s22541_s5 + $0x2d0] sm:$0xff]  }
 0x8e6   :  { %15770 = vmatprep.mubr.msk.bf16.mxu1 %vm5838_vm0, %v17036_v52  ;;  %v17102_v52 = vld [vmem:[%s22541_s5 + $0x2d8] sm:$0xff]   ;;  %15446 = vmatprep.mubr.msk.bf16.mxu0 %vm5838_vm0, %v17100_v56  ;;  %v17051_v56 = vld [vmem:[%s22541_s5 + $0x608] sm:$0xff]  }
 0x8e7   :  { %15447 = vmatmul.mubr.msk.bf16.gmra.mrb[76].mxu0 %vm5838_vm0, %v17102_v52  ;;  %v17054_v52 = vld [vmem:[%s22541_s5 + $0x610] sm:$0xff]  }
 0x8ed   :  { %15771 = vmatmul.mubr.msk.bf16.gmra.mrb[32].mxu1 %vm5838_vm0, %v17037_v55  ;;  %v17104_v55 = vld [vmem:[%s22541_s5 + $0x2e0] sm:$0xff]  }
 0x8ee   :  { %15774 = vmatprep.mubr.msk.bf16.mxu1 %vm5838_vm0, %v17038_v3  ;;  %v17106_v3 = vld [vmem:[%s22541_s5 + $0x2e8] sm:$0xff]   ;;  %15450 = vmatprep.mubr.msk.bf16.mxu0 %vm5838_vm0, %v17104_v55  ;;  %v17055_v55 = vld [vmem:[%s22541_s5 + $0x618] sm:$0xff]  }
 0x8ef   :  { %15451 = vmatmul.mubr.msk.bf16.gmra.mrb[80].mxu0 %vm5838_vm0, %v17106_v3  ;;  %v17058_v3 = vld [vmem:[%s22541_s5 + $0x620] sm:$0xff]  }
 0x8f5   :  { %15775 = vmatmul.mubr.msk.bf16.gmra.mrb[36].mxu1 %vm5838_vm0, %v17039_v31  ;;  %v17108_v31 = vld [vmem:[%s22541_s5 + $0x2f0] sm:$0xff]  }
 0x8f6   :  { %15778 = vmatprep.mubr.msk.bf16.mxu1 %vm5838_vm0, %v17040_v46  ;;  %v17110_v46 = vld [vmem:[%s22541_s5 + $0x2f8] sm:$0xff]   ;;  %15454 = vmatprep.mubr.msk.bf16.mxu0 %vm5838_vm0, %v17108_v31  ;;  %v17059_v31 = vld [vmem:[%s22541_s5 + $0x628] sm:$0xff]  }
 0x8f7   :  { %15455 = vmatmul.mubr.msk.bf16.gmra.mrb[84].mxu0 %vm5838_vm0, %v17110_v46  ;;  %v17062_v46 = vld [vmem:[%s22541_s5 + $0x630] sm:$0xff]  }
 0x8fd   :  { %15779 = vmatmul.mubr.msk.bf16.gmra.mrb[40].mxu1 %vm5838_vm0, %v17041_v32  ;;  %v17112_v32 = vld [vmem:[%s22541_s5 + $0x300] sm:$0xff]  }
 0x8fe   :  { %15782 = vmatprep.mubr.msk.bf16.mxu1 %vm5838_vm0, %v17042_v63  ;;  %v17114_v63 = vld [vmem:[%s22541_s5 + $0x308] sm:$0xff]   ;;  %15458 = vmatprep.mubr.msk.bf16.mxu0 %vm5838_vm0, %v17112_v32  ;;  %v17063_v32 = vld [vmem:[%s22541_s5 + $0x638] sm:$0xff]  }
 0x8ff   :  { %15459 = vmatmul.mubr.msk.bf16.gmra.mrb[88].mxu0 %vm5838_vm0, %v17114_v63  ;;  %v17066_v63 = vld [vmem:[%s22541_s5 + $0x640] sm:$0xff]  }
 0x905   :  { %15783 = vmatmul.mubr.msk.bf16.gmra.mrb[44].mxu1 %vm5838_vm0, %v17043_v42  ;;  %v17116_v42 = vld [vmem:[%s22541_s5 + $0x310] sm:$0xff]  }
 0x906   :  { %15786 = vmatprep.mubr.msk.bf16.mxu1 %vm5838_vm0, %v17044_v7  ;;  %v17118_v7 = vld [vmem:[%s22541_s5 + $0x318] sm:$0xff]   ;;  %15462 = vmatprep.mubr.msk.bf16.mxu0 %vm5838_vm0, %v17116_v42  ;;  %v17067_v42 = vld [vmem:[%s22541_s5 + $0x648] sm:$0xff]  }
 0x907   :  { %15463 = vmatmul.mubr.msk.bf16.gmra.mrb[92].mxu0 %vm5838_vm0, %v17118_v7  ;;  %v17069_v7 = vld [vmem:[%s22541_s5 + $0x650] sm:$0xff]  }
 0x90d   :  { %15787 = vmatmul.mubr.msk.bf16.gmra.mrb[48].mxu1 %vm5838_vm0, %v17045_v48  ;;  %v17120_v48 = vld [vmem:[%s22541_s5 + $0x320] sm:$0xff]  }
 0x90e   :  { %15790 = vmatprep.mubr.msk.bf16.mxu1 %vm5838_vm0, %v17046_v62  ;;  %v17122_v62 = vld [vmem:[%s22541_s5 + $0x328] sm:$0xff]   ;;  %15466 = vmatprep.mubr.msk.bf16.mxu0 %vm5838_vm0, %v17120_v48  ;;  %v17071_v48 = vld [vmem:[%s22541_s5 + $0x658] sm:$0xff]  }
 0x90f   :  { %15467 = vmatmul.mubr.msk.bf16.gmra.mrb[96].mxu0 %vm5838_vm0, %v17122_v62  ;;  %v17073_v62 = vld [vmem:[%s22541_s5 + $0x660] sm:$0xff]  }
 0x915   :  { %15791 = vmatmul.mubr.msk.bf16.gmra.mrb[52].mxu1 %vm5838_vm0, %v17047_v30  ;;  %v17124_v30 = vld [vmem:[%s22541_s5 + $0x330] sm:$0xff]  }
 0x916   :  { %15802 = vmatprep.mubr.msk.bf16.mxu1 %vm5838_vm0, %v17050_v51  ;;  %v17126_v51 = vld [vmem:[%s22541_s5 + $0x338] sm:$0xff]   ;;  %15470 = vmatprep.mubr.msk.bf16.mxu0 %vm5838_vm0, %v17124_v30 }
 0x917   :  { %15471 = vmatmul.mubr.msk.bf16.gmra.mrb[100].mxu0 %vm5838_vm0, %v17126_v51  ;;  %v17079_v30 = vld [vmem:[%s22541_s5 + $0x678] sm:$0xff]   ;;  %v17081_v51 = vld [vmem:[%s22541_s5 + $0x680] sm:$0xff]  }
 0x91d   :  { %15803 = vmatmul.mubr.msk.bf16.vlgmr.msra.gmra.mrb[56].mxu1 %vm5838_vm0, %v17051_v56  ;;  %v17128_v56 = vld [vmem:[%s22541_s5 + $0x340] sm:$0xff]  }
 0x91e   :  { %15806 = vmatprep.mubr.msk.bf16.mxu1 %vm5838_vm0, %v17054_v52  ;;  %v17130_v52 = vld [vmem:[%s22541_s5 + $0x348] sm:$0xff]   ;;  %15474 = vmatprep.mubr.msk.bf16.mxu0 %vm5838_vm0, %v17128_v56  ;;  %v17087_v56 = vld [vmem:[%s22541_s5 + $0x698] sm:$0xff]  }
 0x91f   :  { %15475 = vmatmul.mubr.msk.bf16.gmra.mrb[104].mxu0 %vm5838_vm0, %v17130_v52  ;;  %v17089_v52 = vld [vmem:[%s22541_s5 + $0x6a0] sm:$0xff]  }
 0x925   :  { %15807 = vmatmul.mubr.msk.bf16.gmra.mrb[60].mxu1 %vm5838_vm0, %v17055_v55  ;;  %v17132_v55 = vld [vmem:[%s22541_s5 + $0x350] sm:$0xff]  }
 0x926   :  { %15810 = vmatprep.mubr.msk.bf16.mxu1 %vm5838_vm0, %v17058_v3  ;;  %v17134_v3 = vld [vmem:[%s22541_s5 + $0x358] sm:$0xff]   ;;  %15478 = vmatprep.mubr.msk.bf16.mxu0 %vm5838_vm0, %v17132_v55 }
 0x927   :  { %15479 = vmatmul.mubr.msk.bf16.gmra.mrb[108].mxu0 %vm5838_vm0, %v17134_v3 }
 0x92d   :  { %15811 = vmatmul.mubr.msk.bf16.gmra.mrb[64].mxu1 %vm5838_vm0, %v17059_v31  ;;  %v17075_v31 = vld [vmem:[%s22541_s5 + $0x668] sm:$0xff]  }
 0x92e   :  { %15814 = vmatprep.mubr.msk.bf16.mxu1 %vm5838_vm0, %v17062_v46  ;;  %v17077_v46 = vld [vmem:[%s22541_s5 + $0x670] sm:$0xff]  }
 0x935   :  { %15815 = vmatmul.mubr.msk.bf16.gmra.mrb[68].mxu1 %vm5838_vm0, %v17063_v32  ;;  %v17083_v32 = vld [vmem:[%s22541_s5 + $0x688] sm:$0xff]  }
 0x936   :  { %15818 = vmatprep.mubr.msk.bf16.mxu1 %vm5838_vm0, %v17066_v63  ;;  %v17085_v63 = vld [vmem:[%s22541_s5 + $0x690] sm:$0xff]  }
 0x93a   :  { %v20944_v55 = vpop.f32.mrb[24].mxu0 }
 0x93b   :  { %v20947_v3 = vpop.f32.mrb[25].mxu0 }
 0x93d   :  { %15819 = vmatmul.mubr.msk.bf16.gmra.mrb[72].mxu1 %vm5838_vm0, %v17067_v42  ;;  %v17091_v42 = vld [vmem:[%s22541_s5 + $0x6a8] sm:$0xff]  }
 0x93e   :  { %15822 = vmatprep.mubr.msk.bf16.mxu1 %vm5838_vm0, %v17069_v7  ;;  %v17093_v7 = vld [vmem:[%s22541_s5 + $0x6b0] sm:$0xff]  }
 0x945   :  { %15823 = vmatmul.mubr.msk.bf16.gmra.mrb[76].mxu1 %vm5838_vm0, %v17071_v48  ;;  %v20950_v48 = vpop.f32.mrb[26].mxu0 }
 0x946   :  { %15826 = vmatprep.mubr.msk.bf16.mxu1 %vm5838_vm0, %v17073_v62  ;;  %v20952_v62 = vpop.f32.mrb[27].mxu0 }
 0x94d   :  { %15827 = vmatmul.mubr.msk.bf16.gmra.mrb[80].mxu1 %vm5838_vm0, %v17075_v31  ;;  %v17095_v31 = vld [vmem:[%s22541_s5 + $0x6b8] sm:$0xff]  }
 0x94e   :  { %15830 = vmatprep.mubr.msk.bf16.mxu1 %vm5838_vm0, %v17077_v46  ;;  %v17097_v46 = vld [vmem:[%s22541_s5 + $0x6c0] sm:$0xff]  }
 0x955   :  { %15831 = vmatmul.mubr.msk.bf16.gmra.mrb[84].mxu1 %vm5838_vm0, %v17079_v30  ;;  %v17099_v30 = vld [vmem:[%s22541_s5 + $0x6c8] sm:$0xff]  }
 0x956   :  { %15834 = vmatprep.mubr.msk.bf16.mxu1 %vm5838_vm0, %v17081_v51  ;;  %v17101_v51 = vld [vmem:[%s22541_s5 + $0x6d0] sm:$0xff]  }
 0x95d   :  { %15835 = vmatmul.mubr.msk.bf16.gmra.mrb[88].mxu1 %vm5838_vm0, %v17083_v32  ;;  %v20968_v32 = vpop.f32.mrb[28].mxu0 }
 0x95e   :  { %15838 = vmatprep.mubr.msk.bf16.mxu1 %vm5838_vm0, %v17085_v63  ;;  %v20970_v63 = vpop.f32.mrb[29].mxu0 }
 0x965   :  { %15839 = vmatmul.mubr.msk.bf16.gmra.mrb[92].mxu1 %vm5838_vm0, %v17087_v56  ;;  %v20972_v56 = vpop.f32.mrb[30].mxu0 }
 0x966   :  { %15842 = vmatprep.mubr.msk.bf16.mxu1 %vm5838_vm0, %v17089_v52  ;;  %v20975_v52 = vpop.f32.mrb[31].mxu0 }
 0x96d   :  { %15843 = vmatmul.mubr.msk.bf16.gmra.mrb[96].mxu1 %vm5838_vm0, %v17091_v42  ;;  %v17103_v42 = vld [vmem:[%s22541_s5 + $0x6d8] sm:$0xff]  }
 0x96e   :  { %15846 = vmatprep.mubr.msk.bf16.mxu1 %vm5838_vm0, %v17093_v7  ;;  %v17105_v7 = vld [vmem:[%s22541_s5 + $0x6e0] sm:$0xff]  }
 0x975   :  { %15847 = vmatmul.mubr.msk.bf16.gmra.mrb[100].mxu1 %vm5838_vm0, %v17095_v31  ;;  %v20984_v31 = vpop.f32.mrb[32].mxu0 }
 0x976   :  { %15850 = vmatprep.mubr.msk.bf16.mxu1 %vm5838_vm0, %v17097_v46  ;;  %v20986_v46 = vpop.f32.mrb[33].mxu0 }
 0x977   :  { %v20988_v27 = vpop.f32.mrb[34].mxu0 }
 0x97d   :  { %15851 = vmatmul.mubr.msk.bf16.gmra.mrb[104].mxu1 %vm5838_vm0, %v17099_v30  ;;  %v20991_v30 = vpop.f32.mrb[35].mxu0 }
 0x97e   :  { %15854 = vmatprep.mubr.msk.bf16.mxu1 %vm5838_vm0, %v17101_v51  ;;  %v17107_v51 = vld [vmem:[%s22541_s5 + $0x6e8] sm:$0xff]   ;;  %v21000_v1 = vpop.f32.mrb[36].mxu0 }
 0x97f   :  { %v21002_v16 = vpop.f32.mrb[37].mxu0 }
 0x980   :  { %v21004_v9 = vpop.f32.mrb[38].mxu0 }
 0x985   :  { %15855 = vmatmul.mubr.msk.bf16.gmra.mrb[108].mxu1 %vm5838_vm0, %v17103_v42  ;;  %v21007_v42 = vpop.f32.mrb[39].mxu0 }
 0x986   :  { %15858 = vmatprep.mubr.msk.bf16.mxu1 %vm5838_vm0, %v17105_v7  ;;  %v17111_v7 = vld [vmem:[%s22541_s5 + $0x6f8] sm:$0xff]   ;;  %v21016_v40 = vpop.f32.mrb[40].mxu0 }
 0x987   :  { %v21018_v59 = vpop.f32.mrb[41].mxu0 }
 0x988   :  { %v21020_v43 = vpop.f32.mrb[42].mxu0 }
 0x98d   :  { %15859 = vmatmul.mubr.msk.bf16.gmra.mrb[112].mxu1 %vm5838_vm0, %v17107_v51  ;;  %v21023_v51 = vpop.f32.mrb[43].mxu0 }
 0x98e   :  { %15862 = vmatprep.mubr.msk.bf16.mxu1 %vm5838_vm0, %v17109_v57  ;;  %v21026_v57 = vpop.f32.mrb[44].mxu0 }
 0x98f   :  { %v21035_v21 = vpop.f32.mrb[45].mxu0 }
 0x995   :  { %15863 = vmatmul.mubr.msk.bf16.gmra.mrb[116].mxu1 %vm5838_vm0, %v17111_v7  ;;  %v21038_v7 = vpop.f32.mrb[46].mxu0 }
 0x996   :  { %15866 = vmatprep.mubr.msk.bf16.mxu1 %vm5838_vm0, %v17113_v39  ;;  %v21040_v41 = vpop.f32.mrb[47].mxu0 }
 0x997   :  { %v21042_v39 = vpop.f32.mrb[48].mxu0 }
 0x99d   :  { %15867 = vmatmul.mubr.msk.bf16.gmra.mrb[120].mxu1 %vm5838_vm0, %v17115_v44  ;;  %v21051_v44 = vpop.f32.mrb[49].mxu0 }
 0x99e   :  { %15870 = vmatprep.mubr.msk.bf16.mxu1 %vm5838_vm0, %v17117_v2  ;;  %v21054_v2 = vpop.f32.mrb[50].mxu0 }
 0x99f   :  { %22968 = vst [vmem:[#allocation12_spill] sm:$0xff] %v21054_v2  ;;  %v21056_v17 = vpop.f32.mrb[51].mxu0 }
 0x9a0   :  { %22969 = vst [vmem:[#allocation30_spill] sm:$0xff] %v21056_v17  ;;  %v21058_v60 = vpop.f32.mrb[52].mxu0 }
 0x9a1   :  { %22970 = vst [vmem:[#allocation11_spill] sm:$0xff] %v21058_v60  ;;  %v17129_v60 = vld [vmem:[%s22541_s5 + $0x740] sm:$0xff]  }
 0x9a5   :  { %15871 = vmatmul.mubr.msk.bf16.gmra.mrb[124].mxu1 %vm5838_vm0, %v17119_v24  ;;  %v21067_v24 = vpop.f32.mrb[53].mxu0 }
 0x9a6   :  { %15874 = vmatprep.mubr.msk.bf16.mxu1 %vm5838_vm0, %v17121_v13  ;;  %22971 = vst [vmem:[#allocation15_spill] sm:$0xff] %v21067_v24  ;;  %v21070_v13 = vpop.f32.mrb[54].mxu0 }
 0x9a7   :  { %22972 = vst [vmem:[#allocation19_spill] sm:$0xff] %v21070_v13  ;;  %v21072_v53 = vpop.f32.mrb[55].mxu0  ;;  %v17133_v13 = vld [vmem:[%s22541_s5 + $0x750] sm:$0xff]  }
 0x9a8   :  { %22973 = vst [vmem:[#allocation20_spill] sm:$0xff] %v21072_v53  ;;  %v21074_v0 = vpop.f32.mrb[56].mxu0 }
 0x9a9   :  { %22974 = vst [vmem:[#allocation28_spill] sm:$0xff] %v21074_v0  ;;  %v17131_v0 = vld [vmem:[%s22541_s5 + $0x748] sm:$0xff]  }
 0x9ad   :  { %15875 = vmatmul.mubr.msk.bf16.gmra.mrb[128].mxu1 %vm5838_vm0, %v17123_v22  ;;  %v21083_v22 = vpop.f32.mrb[57].mxu0 }
 0x9ae   :  { %15878 = vmatprep.mubr.msk.bf16.mxu1 %vm5838_vm0, %v17125_v5  ;;  %22975 = vst [vmem:[#allocation32_spill] sm:$0xff] %v21083_v22  ;;  %v21086_v5 = vpop.f32.mrb[58].mxu0 }
 0x9af   :  { %22976 = vst [vmem:[#allocation16_spill] sm:$0xff] %v21086_v5  ;;  %v21091_v53 = vpop.f32.mrb[59].mxu0  ;;  %v17135_v5 = vld [vmem:[%s22541_s5 + $0x758] sm:$0xff]  }
 0x9b0   :  { %22977 = vst [vmem:[#allocation14_spill] sm:$0xff] %v21091_v53  ;;  %v21096_v24 = vpop.f32.mrb[60].mxu0  ;;  %v17136_v53 = vld [vmem:[%s22541_s5 + $0x760] sm:$0xff]  }
 0x9b1   :  { %22978 = vst [vmem:[#allocation9_spill] sm:$0xff] %v21096_v24 }
 0x9b5   :  { %15879 = vmatmul.mubr.msk.bf16.gmra.mrb[132].mxu1 %vm5838_vm0, %v17127_v10  ;;  %v21099_v10 = vpop.f32.mrb[61].mxu0 }
 0x9b6   :  { %15882 = vmatprep.mubr.msk.bf16.mxu1 %vm5838_vm0, %v17129_v60  ;;  %22979 = vst [vmem:[#allocation8_spill] sm:$0xff] %v21099_v10  ;;  %v21102_v60 = vpop.f32.mrb[62].mxu0  ;;  %v17138_v10 = vld [vmem:[%s22541_s5 + $0x770] sm:$0xff]  }
 0x9b7   :  { %22980 = vst [vmem:[#allocation21_spill] sm:$0xff] %v21102_v60  ;;  %v21107_v22 = vpop.f32.mrb[63].mxu0 }
 0x9b8   :  { %22981 = vst [vmem:[#allocation17_spill] sm:$0xff] %v21107_v22  ;;  %v21122_v60 = vpop.f32.mrb[64].mxu0 }
 0x9b9   :  { %22984 = vst [vmem:[#allocation31_spill] sm:$0xff] %v21122_v60  ;;  %v21129_v24 = vpop.f32.mrb[65].mxu0 }
 0x9ba   :  { %22985 = vst [vmem:[#allocation26_spill] sm:$0xff] %v21129_v24  ;;  %v21132_v37 = vpop.f32.mrb[66].mxu0 }
 0x9bb   :  { %22986 = vst [vmem:[#allocation63_spill] sm:$0xff] %v21132_v37  ;;  %v21137_v60 = vpop.f32.mrb[67].mxu0 }
 0x9bc   :  { %22987 = vst [vmem:[#allocation64_spill] sm:$0xff] %v21137_v60  ;;  %v17140_v60 = vld [vmem:[%s22541_s5 + $0x780] sm:$0xff]  }
 0x9bd   :  { %15883 = vmatmul.mubr.msk.bf16.gmra.mrb[136].mxu1 %vm5838_vm0, %v17131_v0  ;;  %v21115_v0 = vld [vmem:[%s22543_s7] sm:$0xff] }
 0x9be   :  { %15886 = vmatprep.mubr.msk.bf16.mxu1 %vm5838_vm0, %v17133_v13  ;;  %22982 = vst [vmem:[#allocation18_spill] sm:$0xff] %v21115_v0  ;;  %v21120_v13 = vld [vmem:[%s22543_s7 + $0x20] sm:$0xff] }
 0x9bf   :  { %22983 = vst [vmem:[#allocation13_spill] sm:$0xff] %v21120_v13  ;;  %v14354_v22 = vcombine.high %v21115_v0, %v21120_v13  ;;  %v21142_v13 = vpop.f32.mrb[68].mxu0  ;;  %v17147_v0 = vld [vmem:[%s22541_s5 + $0x7b8] sm:$0xff]  }
 0x9c0   :  { %22988 = vst [vmem:[#allocation65_spill] sm:$0xff] %v21142_v13 }
 0x9c1   :  { %12393 = vmatprep.mubr.bf16.mxu0 %v14354_v22  ;;  %v21145_v22 = vpop.f32.mrb[69].mxu0 }
 0x9c2   :  { %22989 = vst [vmem:[#allocation66_spill] sm:$0xff] %v21145_v22 }
 0x9c5   :  { %15887 = vmatmul.mubr.msk.bf16.gmra.mrb[140].mxu1 %vm5838_vm0, %v17135_v5  ;;  %v17139_v5 = vld [vmem:[%s22541_s5 + $0x778] sm:$0xff]  }
 0x9c6   :  { %15890 = vmatprep.mubr.msk.bf16.mxu1 %vm5838_vm0, %v17136_v53  ;;  %v21148_v53 = vpop.f32.mrb[70].mxu0 }
 0x9c7   :  { %22990 = vst [vmem:[#allocation67_spill] sm:$0xff] %v21148_v53  ;;  %v21153_v37 = vpop.f32.mrb[71].mxu0 }
 0x9c8   :  { %22991 = vst [vmem:[#allocation68_spill] sm:$0xff] %v21153_v37  ;;  %v21158_v24 = vpop.f32.mrb[72].mxu0  ;;  %v17141_v37 = vld [vmem:[%s22541_s5 + $0x788] sm:$0xff]  }
 0x9c9   :  { %22992 = vst [vmem:[#allocation69_spill] sm:$0xff] %v21158_v24  ;;  %v17142_v24 = vld [vmem:[%s22541_s5 + $0x790] sm:$0xff]  }
 0x9cd   :  { %15891 = vmatmul.mubr.msk.bf16.gmra.mrb[16].mxu1 %vm5838_vm0, %v17137_v8  ;;  %v21161_v8 = vpop.f32.mrb[73].mxu0 }
 0x9ce   :  { %15894 = vmatprep.mubr.msk.bf16.mxu1 %vm5838_vm0, %v17138_v10  ;;  %22993 = vst [vmem:[#allocation70_spill] sm:$0xff] %v21161_v8  ;;  %v21164_v10 = vpop.f32.mrb[74].mxu0  ;;  %v17144_v8 = vld [vmem:[%s22541_s5 + $0x7a0] sm:$0xff]  }
 0x9cf   :  { %22994 = vst [vmem:[#allocation71_spill] sm:$0xff] %v21164_v10  ;;  %v21166_v53 = vpop.f32.mrb[75].mxu0 }
 0x9d0   :  { %22995 = vst [vmem:[#allocation72_spill] sm:$0xff] %v21166_v53  ;;  %v21168_v22 = vpop.f32.mrb[76].mxu0 }
 0x9d1   :  { %22996 = vst [vmem:[#allocation73_spill] sm:$0xff] %v21168_v22  ;;  %v17143_v22 = vld [vmem:[%s22541_s5 + $0x798] sm:$0xff]  }
 0x9d5   :  { %15895 = vmatmul.mubr.msk.bf16.gmra.mrb[20].mxu1 %vm5838_vm0, %v17139_v5  ;;  %v21177_v5 = vpop.f32.mrb[77].mxu0 }
 0x9d6   :  { %15898 = vmatprep.mubr.msk.bf16.mxu1 %vm5838_vm0, %v17140_v60  ;;  %22997 = vst [vmem:[#allocation74_spill] sm:$0xff] %v21177_v5  ;;  %v21180_v60 = vpop.f32.mrb[78].mxu0  ;;  %v17146_v5 = vld [vmem:[%s22541_s5 + $0x7b0] sm:$0xff]  }
 0x9d7   :  { %22998 = vst [vmem:[#allocation75_spill] sm:$0xff] %v21180_v60  ;;  %v21182_v10 = vpop.f32.mrb[79].mxu0 }
 0x9d8   :  { %22999 = vst [vmem:[#allocation76_spill] sm:$0xff] %v21182_v10  ;;  %v21184_v53 = vpop.f32.mrb[80].mxu0 }
 0x9d9   :  { %23000 = vst [vmem:[#allocation77_spill] sm:$0xff] %v21184_v53  ;;  %v17145_v53 = vld [vmem:[%s22541_s5 + $0x7a8] sm:$0xff]  }
 0x9dd   :  { %15899 = vmatmul.mubr.msk.bf16.gmra.mrb[24].mxu1 %vm5838_vm0, %v17141_v37  ;;  %v21193_v37 = vpop.f32.mrb[81].mxu0 }
 0x9de   :  { %15902 = vmatprep.mubr.msk.bf16.mxu1 %vm5838_vm0, %v17142_v24  ;;  %23001 = vst [vmem:[#allocation78_spill] sm:$0xff] %v21193_v37  ;;  %v21196_v24 = vpop.f32.mrb[82].mxu0 }
 0x9df   :  { %23002 = vst [vmem:[#allocation79_spill] sm:$0xff] %v21196_v24  ;;  %v21198_v60 = vpop.f32.mrb[83].mxu0 }
 0x9e0   :  { %23003 = vst [vmem:[#allocation80_spill] sm:$0xff] %v21198_v60  ;;  %v21200_v10 = vpop.f32.mrb[84].mxu0 }
 0x9e1   :  { %23004 = vst [vmem:[#allocation81_spill] sm:$0xff] %v21200_v10 }
 0x9e5   :  { %15903 = vmatmul.mubr.msk.bf16.gmra.mrb[28].mxu1 %vm5838_vm0, %v17143_v22  ;;  %v21209_v22 = vpop.f32.mrb[85].mxu0 }
 0x9e6   :  { %15906 = vmatprep.mubr.msk.bf16.mxu1 %vm5838_vm0, %v17144_v8  ;;  %23005 = vst [vmem:[#allocation82_spill] sm:$0xff] %v21209_v22  ;;  %v21212_v8 = vpop.f32.mrb[86].mxu0 }
 0x9e7   :  { %23006 = vst [vmem:[#allocation83_spill] sm:$0xff] %v21212_v8  ;;  %v21214_v24 = vpop.f32.mrb[87].mxu0 }
 0x9e8   :  { %23007 = vst [vmem:[#allocation84_spill] sm:$0xff] %v21214_v24  ;;  %v21216_v10 = vpop.f32.mrb[88].mxu0 }
 0x9e9   :  { %23008 = vst [vmem:[#allocation85_spill] sm:$0xff] %v21216_v10  ;;  %v21232_v45 = vpop.f32.mrb[89].mxu0 }
 0x9ed   :  { %15907 = vmatmul.mubr.msk.bf16.gmra.mrb[32].mxu1 %vm5838_vm0, %v17145_v53 }
 0x9ee   :  { %15910 = vmatprep.mubr.msk.bf16.mxu1 %vm5838_vm0, %v17146_v5  ;;  %v17148_v5 = vld [vmem:[%s22541_s5 + $0x7c0] sm:$0xff]  }
 0x9f0   :  { %v15804_v60 = vpop.f32.mrb[56].mxu1 }
 0x9f1   :  { %v15938_v37 = vadd.f32 %v15804_v60, %v20944_v55  ;;  %v9674_v13 = vpop.f32.mrb[57].mxu1 }
 0x9f2   :  { %v15939_v53 = vadd.f32 %v9674_v13, %v20947_v3  ;;  %v15805_v17 = vpop.f32.mrb[58].mxu1  ;;  %v21236_v13 = vpop.f32.mrb[90].mxu0 }
 0x9f3   :  { %v11083_v8 = vadd.f32 %v15938_v37, %v19776_v6  ;;  %v15940_v24 = vadd.f32 %v15805_v17, %v20950_v48  ;;  %v9677_v22 = vpop.f32.mrb[59].mxu1 }
 0x9f4   :  { %v11081_v10 = vadd.f32 %v15939_v53, %v19740_v4  ;;  %v15941_v55 = vadd.f32 %v9677_v22, %v20952_v62 }
 0x9f5   :  { %v11084_v60 = vadd.f32 %v15940_v24, %v19787_v58  ;;  %15911 = vmatmul.mubr.msk.bf16.gmra.mrb[36].mxu1 %vm5838_vm0, %v17147_v0  ;;  %v11211_v6 = vmax.f32 %v11083_v8, 0.0  ;;  %v17149_v0 = vld [vmem:[%s22541_s5 + $0x7c8] sm:$0xff]   ;;  %v21244_v24 = vpop.f32.mrb[91].mxu0 }
 0x9f6   :  { %v11082_v3 = vadd.f32 %v15941_v55, %v19749_v23  ;;  %15914 = vmatprep.mubr.msk.bf16.mxu1 %vm5838_vm0, %v17148_v5  ;;  %v11209_v17 = vmax.f32 %v11081_v10, 0.0  ;;  %v17150_v10 = vld [vmem:[%s22541_s5 + $0x7d0] sm:$0xff]   ;;  %v21252_v53 = vpop.f32.mrb[92].mxu0 }
 0x9f7   :  { %v11212_v37 = vmax.f32 %v11084_v60, 0.0 }
 0x9f8   :  { %v11210_v48 = vmax.f32 %v11082_v3, 0.0  ;;  %v15808_v2 = vpop.f32.mrb[60].mxu1 }
 0x9f9   :  { %v21238_v4 = vpack.c.bf16 %v11212_v37, %v11211_v6  ;;  %v15942_v62 = vadd.f32 %v15808_v2, %v20968_v32  ;;  %v9690_v58 = vpop.f32.mrb[61].mxu1 }
 0x9fa   :  { %v21246_v23 = vpack.c.bf16 %v11210_v48, %v11209_v17  ;;  %v15943_v22 = vadd.f32 %v9690_v58, %v20970_v63  ;;  %v15809_v8 = vpop.f32.mrb[62].mxu1  ;;  %v21260_v63 = vpop.f32.mrb[93].mxu0  ;;  %v17151_v58 = vld [vmem:[%s22541_s5 + $0x7d8] sm:$0xff]  }
 0x9fb   :  { %v11087_v32 = vadd.f32 %v15942_v62, %v19862_v14  ;;  %v15944_v2 = vadd.f32 %v15809_v8, %v20972_v56  ;;  %v9693_v5 = vpop.f32.mrb[63].mxu1  ;;  %v21264_v37 = vpop.f32.mrb[94].mxu0 }
 0x9fc   :  { %v11085_v55 = vadd.f32 %v15943_v22, %v19816_v36  ;;  %v15945_v60 = vadd.f32 %v9693_v5, %v20975_v52 }
 0x9fd   :  { %v11088_v3 = vadd.f32 %v15944_v2, %v19873_v54  ;;  %15915 = vmatmul.mubr.msk.bf16.gmra.mrb[40].mxu1 %vm5838_vm0, %v17149_v0  ;;  %v11215_v14 = vmax.f32 %v11087_v32, 0.0  ;;  %v21272_v0 = vpop.f32.mrb[95].mxu0 }
 0x9fe   :  { %v11086_v6 = vadd.f32 %v15945_v60, %v19825_v35  ;;  %15918 = vmatprep.mubr.msk.bf16.mxu1 %vm5838_vm0, %v17150_v10  ;;  %v11213_v56 = vmax.f32 %v11085_v55, 0.0  ;;  %v17152_v10 = vld [vmem:[%s22541_s5 + $0x7e0] sm:$0xff]   ;;  %v21280_v32 = vpop.f32.mrb[96].mxu0 }
 0x9ff   :  { %v11216_v17 = vmax.f32 %v11088_v3, 0.0 }
 0xa00   :  { %v11214_v48 = vmax.f32 %v11086_v6, 0.0  ;;  %v15812_v62 = vpop.f32.mrb[64].mxu1 }
 0xa01   :  { %v21266_v36 = vpack.c.bf16 %v11216_v17, %v11215_v14  ;;  %v15946_v52 = vadd.f32 %v15812_v62, %v20984_v31  ;;  %v9706_v54 = vpop.f32.mrb[65].mxu1 }
 0xa02   :  { %v21274_v35 = vpack.c.bf16 %v11214_v48, %v11213_v56  ;;  %v15947_v22 = vadd.f32 %v9706_v54, %v20986_v46  ;;  %v15813_v8 = vpop.f32.mrb[66].mxu1  ;;  %v21288_v46 = vpop.f32.mrb[97].mxu0 }
 0xa03   :  { %v11091_v31 = vadd.f32 %v15946_v52, %v19944_v34  ;;  %v15948_v2 = vadd.f32 %v15813_v8, %v20988_v27  ;;  %v9709_v5 = vpop.f32.mrb[67].mxu1  ;;  %v21292_v14 = vpop.f32.mrb[98].mxu0  ;;  %v17154_v8 = vld [vmem:[%s22541_s5 + $0x7f0] sm:$0xff]  }
 0xa04   :  { %v11089_v55 = vadd.f32 %v15947_v22, %v19908_v61  ;;  %v15949_v60 = vadd.f32 %v9709_v5, %v20991_v30  ;;  %v21294_v27 = vpop.permute.xlu1 %10678  ;;  %v21302_v52 = vpop.f32.mrb[99].mxu0 }
 0xa05   :  { %v11092_v3 = vadd.f32 %v15948_v2, %v19955_v20  ;;  %15919 = vmatmul.mubr.msk.bf16.gmra.mrb[44].mxu1 %vm5838_vm0, %v17151_v58  ;;  %v11219_v34 = vmax.f32 %v11091_v31, 0.0 }
 0xa06   :  { %v11090_v6 = vadd.f32 %v15949_v60, %v19917_v29  ;;  %15922 = vmatprep.mubr.msk.bf16.mxu1 %vm5838_vm0, %v17152_v10  ;;  %v11217_v56 = vmax.f32 %v11089_v55, 0.0  ;;  %v17153_v29 = vld [vmem:[%s22541_s5 + $0x7e8] sm:$0xff]   ;;  %v21310_v10 = vpop.f32.mrb[100].mxu0 }
 0xa07   :  { %v11220_v17 = vmax.f32 %v11092_v3, 0.0  ;;  %v21320_v3 = vpop.permute.xlu0 %10843 }
 0xa08   :  { %v11218_v61 = vmax.f32 %v11090_v6, 0.0  ;;  %v15816_v48 = vpop.f32.mrb[68].mxu1  ;;  %23009 = vst [vmem:[#allocation86_spill] sm:$0xff] %v21320_v3  ;;  %v23087_v3 = vld [vmem:[#allocation51_spill] sm:$0xff] }
 0xa09   :  { %v21296_v30 = vpack.c.bf16 %v11220_v17, %v11219_v34  ;;  %v15950_v20 = vadd.f32 %v15816_v48, %v21000_v1  ;;  %v9722_v62 = vpop.f32.mrb[69].mxu1  ;;  %v21326_v17 = vpop.permute.xlu1 %10848 }
 0xa0a   :  { %v21304_v54 = vpack.c.bf16 %v11218_v61, %v11217_v56  ;;  %v15951_v58 = vadd.f32 %v9722_v62, %v21002_v16  ;;  %v15817_v22 = vpop.f32.mrb[70].mxu1  ;;  %v21318_v16 = vpop.f32.mrb[101].mxu0  ;;  %23010 = vst [vmem:[#allocation87_spill] sm:$0xff] %v21326_v17  ;;  %v23078_v17 = vld [vmem:[#allocation71_spill] sm:$0xff] }
 0xa0b   :  { %v11095_v1 = vadd.f32 %v15950_v20, %v20020_v18  ;;  %v15952_v31 = vadd.f32 %v15817_v22, %v21004_v9  ;;  %v9725_v2 = vpop.f32.mrb[71].mxu1  ;;  %v21324_v18 = vpop.f32.mrb[102].mxu0 }
 0xa0c   :  { %v11093_v5 = vadd.f32 %v15951_v58, %v19984_v25  ;;  %v15953_v55 = vadd.f32 %v9725_v2, %v21007_v42  ;;  %v21334_v20 = vpop.f32.mrb[103].mxu0 }
 0xa0d   :  { %v11096_v60 = vadd.f32 %v15952_v31, %v20031_v38  ;;  %15923 = vmatmul.mubr.msk.bf16.gmra.mrb[48].mxu1 %vm5838_vm0, %v17153_v29  ;;  %v11223_v9 = vmax.f32 %v11095_v1, 0.0  ;;  %v21339_v22 = vpop.f32.mrb[104].mxu0 }
 0xa0e   :  { %v11094_v6 = vadd.f32 %v15953_v55, %v19993_v11  ;;  %15926 = vmatprep.mubr.msk.bf16.mxu1 %vm5838_vm0, %v17154_v8  ;;  %v11221_v25 = vmax.f32 %v11093_v5, 0.0  ;;  %v17155_v11 = vld [vmem:[%s22541_s5 + $0x7f8] sm:$0xff]  }
 0xa0f   :  { %v11224_v34 = vmax.f32 %v11096_v60, 0.0  ;;  %v21349_v60 = vpop.f32.mrb[105].mxu0 }
 0xa10   :  { %v11222_v42 = vmax.f32 %v11094_v6, 0.0  ;;  %v15820_v56 = vpop.f32.mrb[72].mxu1  ;;  %23011 = vst [vmem:[#allocation88_spill] sm:$0xff] %v21349_v60 }
 0xa11   :  { %v21328_v38 = vpack.c.bf16 %v11224_v34, %v11223_v9  ;;  %v15954_v61 = vadd.f32 %v15820_v56, %v21016_v40  ;;  %v9738_v48 = vpop.f32.mrb[73].mxu1  ;;  %v21343_v40 = vpop.permute.xlu0 %10763 }
 0xa12   :  { %v21336_v62 = vpack.c.bf16 %v11222_v42, %v11221_v25  ;;  %v15955_v29 = vadd.f32 %v9738_v48, %v21018_v59  ;;  %v15821_v58 = vpop.f32.mrb[74].mxu1  ;;  %v21351_v59 = vpop.permute.xlu1 %10768 }
 0xa13   :  { %v11099_v8 = vadd.f32 %v15954_v61, %v19761_v26  ;;  %v15956_v1 = vadd.f32 %v15821_v58, %v21020_v43  ;;  %v9741_v31 = vpop.f32.mrb[75].mxu1  ;;  %v21354_v26 = vpop.f32.mrb[106].mxu0 }
 0xa14   :  { %v11097_v2 = vadd.f32 %v15955_v29, %v19723_v19  ;;  %v15957_v5 = vadd.f32 %v9741_v31, %v21023_v51  ;;  %23012 = vst [vmem:[#allocation89_spill] sm:$0xff] %v21354_v26  ;;  %v21356_v34 = vpop.f32.mrb[107].mxu0 }
 0xa15   :  { %v11100_v55 = vadd.f32 %v15956_v1, %v19766_v50  ;;  %15927 = vmatmul.mubr.msk.bf16.gmra.mrb[52].mxu1 %vm5838_vm0, %v17155_v11  ;;  %v11227_v43 = vmax.f32 %v11099_v8, 0.0  ;;  %23013 = vst [vmem:[#allocation90_spill] sm:$0xff] %v21356_v34  ;;  %v21358_v51 = vpop.f32.mrb[108].mxu0  ;;  %v21361_v48 = vpop.permute.xlu0 %10853 }
 0xa16   :  { %v11098_v6 = vadd.f32 %v15957_v5, %v19726_v28  ;;  %v11225_v25 = vmax.f32 %v11097_v2, 0.0  ;;  %23014 = vst [vmem:[#allocation91_spill] sm:$0xff] %v21358_v51  ;;  %23015 = vst [vmem:[#allocation92_spill] sm:$0xff] %v21361_v48  ;;  %v21366_v31 = vpop.permute.xlu1 %10858  ;;  %v23088_v48 = vld [vmem:[#allocation75_spill] sm:$0xff] }
 0xa17   :  { %v11228_v9 = vmax.f32 %v11100_v55, 0.0  ;;  %23016 = vst [vmem:[#allocation93_spill] sm:$0xff] %v21366_v31  ;;  %v21372_v55 = vpop.f32.mrb[109].mxu0  ;;  %v23079_v31 = vld [vmem:[#allocation40_spill] sm:$0xff] }
 0xa18   :  { %v11226_v19 = vmax.f32 %v11098_v6, 0.0  ;;  %v15824_v42 = vpop.f32.mrb[76].mxu1  ;;  %23017 = vst [vmem:[#allocation94_spill] sm:$0xff] %v21372_v55  ;;  %v23069_v55 = vld [vmem:[#allocation7_spill] sm:$0xff] }
 0xa19   :  { %v15958_v50 = vadd.f32 %v15824_v42, %v21026_v57  ;;  %v9754_v56 = vpop.f32.mrb[77].mxu1  ;;  %v11346_v61 = vpack.c.bf16 %v11228_v9, %v11227_v43  ;;  %v21379_v9 = vpop.permute.xlu0 %10773 }
 0xa1a   :  { %v15959_v11 = vadd.f32 %v9754_v56, %v21035_v21  ;;  %v15825_v28 = vpop.f32.mrb[78].mxu1  ;;  %v11345_v29 = vpack.c.bf16 %v11226_v19, %v11225_v25  ;;  %v21383_v42 = vpop.permute.xlu1 %10778 }
 0xa1b   :  { %v11103_v58 = vadd.f32 %v15958_v50, %v19841_v49  ;;  %v15960_v8 = vadd.f32 %v15825_v28, %v21038_v7  ;;  %v9757_v1 = vpop.f32.mrb[79].mxu1  ;;  %v21375_v49 = vpop.f32.mrb[110].mxu0 }
 0xa1c   :  { %v11101_v2 = vadd.f32 %v15959_v11, %v19799_v15  ;;  %v15961_v5 = vadd.f32 %v9757_v1, %v21040_v41  ;;  %14808 = vmatprep.subr.bf16.mxu0 %v11345_v29  ;;  %23018 = vst [vmem:[#allocation95_spill] sm:$0xff] %v21375_v49  ;;  %v21377_v43 = vpop.f32.mrb[111].mxu0  ;;  %v23020_v11 = vld [vmem:[#allocation12_spill] sm:$0xff]  ;;  %v23022_v1 = vld [vmem:[#allocation30_spill] sm:$0xff] }
 0xa1d   :  { %v11104_v57 = vadd.f32 %v15960_v8, %v19849_v12  ;;  %14809 = vmatpush3.bf16.msra.mxu0 %v21246_v23  ;;  %v11231_v7 = vmax.f32 %v11103_v58, 0.0  ;;  %23019 = vst [vmem:[#allocation96_spill] sm:$0xff] %v21377_v43  ;;  %v23021_v58 = vld [vmem:[#allocation33_spill] sm:$0xff] }
 0xa1e   :  { %v11102_v21 = vadd.f32 %v15961_v5, %v19802_v33  ;;  %14810 = vmatprep.subr.bf16.mxu0 %v11346_v61  ;;  %v11229_v15 = vmax.f32 %v11101_v2, 0.0  ;;  %v23060_v43 = vld [vmem:[#allocation61_spill] sm:$0xff] }
 0xa1f   :  { %v11232_v6 = vmax.f32 %v11104_v57, 0.0  ;;  %v23025_v57 = vld [vmem:[#allocation35_spill] sm:$0xff] }
 0xa20   :  { %v11230_v41 = vmax.f32 %v11102_v21, 0.0  ;;  %v15828_v25 = vpop.f32.mrb[80].mxu1 }
 0xa21   :  { %v15962_v12 = vadd.f32 %v15828_v25, %v21042_v39  ;;  %v9770_v19 = vpop.f32.mrb[81].mxu1  ;;  %14811 = vmatpush3.bf16.msra.mxu0 %v21238_v4  ;;  %v11348_v23 = vpack.c.bf16 %v11232_v6, %v11231_v7  ;;  %v23023_v39 = vld [vmem:[#allocation36_spill] sm:$0xff]  ;;  %v21392_v4 = vpop.permute.xlu0 %10863  ;;  %v23027_v25 = vld [vmem:[#allocation11_spill] sm:$0xff] }
 0xa22   :  { %v15963_v33 = vadd.f32 %v9770_v19, %v21051_v44  ;;  %v15829_v50 = vpop.f32.mrb[82].mxu1  ;;  %v11347_v56 = vpack.c.bf16 %v11230_v41, %v11229_v15  ;;  %23024 = vst [vmem:[#allocation12_spill] sm:$0xff] %v21392_v4 }
 0xa23   :  { %v11107_v61 = vadd.f32 %v15962_v12, %v19929_v47  ;;  %v15964_v28 = vadd.f32 %v15829_v50, %v23020_v11  ;;  %v9773_v29 = vpop.f32.mrb[83].mxu1  ;;  %v21395_v47 = vpop.permute.xlu1 %10868  ;;  %v23028_v50 = vld [vmem:[#allocation15_spill] sm:$0xff] }
 0xa24   :  { %v11105_v8 = vadd.f32 %v15963_v33, %v23021_v58  ;;  %v15965_v2 = vadd.f32 %v9773_v29, %v23022_v1  ;;  %14812 = vmatprep.subr.bf16.mxu0 %v11347_v56  ;;  %23026 = vst [vmem:[#allocation33_spill] sm:$0xff] %v21395_v47  ;;  %v23054_v47 = vld [vmem:[#allocation54_spill] sm:$0xff] }
 0xa25   :  { %v11108_v5 = vadd.f32 %v15964_v28, %v23023_v39  ;;  %14813 = vmatpush3.bf16.msra.mxu0 %v21274_v35  ;;  %v11235_v21 = vmax.f32 %v11107_v61, 0.0  ;;  %v23029_v28 = vld [vmem:[#allocation38_spill] sm:$0xff]  ;;  %v21402_v1 = vpop.permute.xlu0 %10783  ;;  %v23032_v39 = vld [vmem:[#allocation20_spill] sm:$0xff] }
 0xa26   :  { %v11106_v44 = vadd.f32 %v15965_v2, %v23025_v57  ;;  %14814 = vmatprep.subr.bf16.mxu0 %v11348_v23  ;;  %v11233_v6 = vmax.f32 %v11105_v8, 0.0  ;;  %v23030_v23 = vld [vmem:[#allocation19_spill] sm:$0xff]  ;;  %v23031_v8 = vld [vmem:[#allocation10_spill] sm:$0xff] }
 0xa27   :  { %v11236_v7 = vmax.f32 %v11108_v5, 0.0  ;;  %v23033_v57 = vld [vmem:[#allocation39_spill] sm:$0xff] }
 0xa28   :  { %v11234_v15 = vmax.f32 %v11106_v44, 0.0  ;;  %v15832_v41 = vpop.f32.mrb[84].mxu1 }
 0xa29   :  { %v15966_v12 = vadd.f32 %v15832_v41, %v23027_v25  ;;  %v9786_v19 = vpop.f32.mrb[85].mxu1  ;;  %14815 = vmatpush3.bf16.msra.mxu0 %v21266_v36  ;;  %v11350_v33 = vpack.c.bf16 %v11236_v7, %v11235_v21  ;;  %v21408_v36 = vpop.permute.xlu1 %10788  ;;  %v23034_v21 = vld [vmem:[#allocation37_spill] sm:$0xff] }
 0xa2a   :  { %v15967_v35 = vadd.f32 %v9786_v19, %v23028_v50  ;;  %v15833_v56 = vpop.f32.mrb[86].mxu1  ;;  %v11349_v11 = vpack.c.bf16 %v11234_v15, %v11233_v6  ;;  %v23035_v19 = vld [vmem:[#allocation28_spill] sm:$0xff] }
 0xa2b   :  { %v11111_v29 = vadd.f32 %v15966_v12, %v23029_v28  ;;  %v15968_v61 = vadd.f32 %v15833_v56, %v23030_v23  ;;  %v9789_v58 = vpop.f32.mrb[87].mxu1  ;;  %v23037_v28 = vld [vmem:[#allocation32_spill] sm:$0xff] }
 0xa2c   :  { %v11109_v2 = vadd.f32 %v15967_v35, %v23031_v8  ;;  %v15969_v5 = vadd.f32 %v9789_v58, %v23032_v39  ;;  %14816 = vmatprep.subr.bf16.mxu0 %v11349_v11  ;;  %v21413_v11 = vpop.permute.xlu0 %10873  ;;  %v23038_v58 = vld [vmem:[#allocation45_spill] sm:$0xff] }
 0xa2d   :  { %v11112_v44 = vadd.f32 %v15968_v61, %v23033_v57  ;;  %14817 = vmatpush3.bf16.msra.mxu0 %v21304_v54  ;;  %v11239_v6 = vmax.f32 %v11111_v29, 0.0  ;;  %23036 = vst [vmem:[#allocation30_spill] sm:$0xff] %v21413_v11 }
 0xa2e   :  { %v11110_v7 = vadd.f32 %v15969_v5, %v23034_v21  ;;  %14818 = vmatprep.subr.bf16.mxu0 %v11350_v33  ;;  %v11237_v41 = vmax.f32 %v11109_v2, 0.0  ;;  %v23039_v33 = vld [vmem:[#allocation16_spill] sm:$0xff]  ;;  %v21418_v2 = vpop.permute.xlu1 %10878  ;;  %v23041_v5 = vld [vmem:[#allocation42_spill] sm:$0xff] }
 0xa2f   :  { %v11240_v15 = vmax.f32 %v11112_v44, 0.0  ;;  %23040 = vst [vmem:[#allocation36_spill] sm:$0xff] %v21418_v2  ;;  %v23042_v44 = vld [vmem:[#allocation14_spill] sm:$0xff] }
 0xa30   :  { %v11238_v25 = vmax.f32 %v11110_v7, 0.0  ;;  %v15836_v12 = vpop.f32.mrb[88].mxu1 }
 0xa31   :  { %v15970_v50 = vadd.f32 %v15836_v12, %v23035_v19  ;;  %v9802_v35 = vpop.f32.mrb[89].mxu1  ;;  %14819 = vmatpush3.bf16.msra.mxu0 %v21296_v30  ;;  %v11352_v56 = vpack.c.bf16 %v11240_v15, %v11239_v6  ;;  %v23043_v30 = vld [vmem:[#allocation46_spill] sm:$0xff]  ;;  %v23044_v6 = vld [vmem:[#allocation43_spill] sm:$0xff] }
 0xa32   :  { %v15971_v54 = vadd.f32 %v9802_v35, %v23037_v28  ;;  %v15837_v23 = vpop.f32.mrb[90].mxu1  ;;  %v11351_v61 = vpack.c.bf16 %v11238_v25, %v11237_v41  ;;  %v11409_v41 = vld [vmem:[%s22543_s7 + $0x40] sm:$0xff] }
 0xa33   :  { %v11115_v8 = vadd.f32 %v15970_v50, %v23038_v58  ;;  %v15972_v29 = vadd.f32 %v15837_v23, %v23039_v33  ;;  %v9805_v39 = vpop.f32.mrb[91].mxu1  ;;  %v11413_v25 = vld [vmem:[%s22543_s7 + $0x60] sm:$0xff]  ;;  %v21431_v50 = vpop.permute.xlu0 %10793 }
 0xa34   :  { %v11113_v57 = vadd.f32 %v15971_v54, %v23041_v5  ;;  %v15973_v21 = vadd.f32 %v9805_v39, %v23042_v44  ;;  %14820 = vmatprep.subr.bf16.mxu0 %v11351_v61  ;;  %v14362_v58 = vcombine.high %v11409_v41, %v11413_v25  ;;  %v21437_v33 = vpop.permute.xlu1 %10798  ;;  %v23046_v39 = vld [vmem:[#allocation8_spill] sm:$0xff]  ;;  %v23047_v44 = vld [vmem:[#allocation53_spill] sm:$0xff] }
 0xa35   :  { %v11116_v7 = vadd.f32 %v15972_v29, %v23043_v30  ;;  %14821 = vmatpush3.bf16.msra.mxu0 %v21336_v62  ;;  %v11243_v12 = vmax.f32 %v11115_v8, 0.0  ;;  %v23045_v62 = vld [vmem:[#allocation9_spill] sm:$0xff] }
 0xa36   :  { %v11114_v15 = vadd.f32 %v15973_v21, %v23044_v6  ;;  %14822 = vmatprep.subr.bf16.mxu0 %v11352_v56  ;;  %v11241_v35 = vmax.f32 %v11113_v57, 0.0  ;;  %v23048_v57 = vld [vmem:[#allocation21_spill] sm:$0xff] }
 0xa37   :  { %v11244_v19 = vmax.f32 %v11116_v7, 0.0  ;;  %v23049_v6 = vld [vmem:[#allocation49_spill] sm:$0xff] }
 0xa38   :  { %v11242_v28 = vmax.f32 %v11114_v15, 0.0  ;;  %v15840_v54 = vpop.f32.mrb[92].mxu1 }
 0xa39   :  { %v21433_v23 = vpack.c.bf16 %v11244_v19, %v11243_v12  ;;  %v15974_v61 = vadd.f32 %v15840_v54, %v23045_v62  ;;  %v9818_v56 = vpop.f32.mrb[93].mxu1  ;;  %14823 = vmatpush3.bf16.msra.mxu0 %v21328_v38  ;;  %v23050_v12 = vld [vmem:[#allocation17_spill] sm:$0xff]  ;;  %v23051_v54 = vld [vmem:[#allocation18_spill] sm:$0xff] }
 0xa3a   :  { %v21439_v29 = vpack.c.bf16 %v11242_v28, %v11241_v35  ;;  %v15975_v8 = vadd.f32 %v9818_v56, %v23046_v39  ;;  %v15841_v5 = vpop.f32.mrb[94].mxu1  ;;  %v23052_v62 = vld [vmem:[#allocation13_spill] sm:$0xff]  ;;  %v21450_v35 = vpop.permute.xlu0 %10883  ;;  %v23056_v28 = vld [vmem:[#allocation50_spill] sm:$0xff] }
 0xa3b   :  { %v11119_v21 = vadd.f32 %v15974_v61, %v23047_v44  ;;  %v15976_v30 = vadd.f32 %v15841_v5, %v23048_v57  ;;  %v9821_v7 = vpop.f32.mrb[95].mxu1  ;;  %v23053_v38 = vcombine.low %v23051_v54, %v23052_v62  ;;  %23055 = vst [vmem:[#allocation35_spill] sm:$0xff] %v21450_v35  ;;  %v11417_v61 = vld [vmem:[%s22543_s7 + $0x80] sm:$0xff]  ;;  %v21459_v44 = vpop.permute.xlu1 %10888 }
 0xa3c   :  { %v11117_v15 = vadd.f32 %v15975_v8, %v23049_v6  ;;  %v15977_v19 = vadd.f32 %v9821_v7, %v23050_v12  ;;  %v11421_v39 = vld [vmem:[%s22543_s7 + $0xa0] sm:$0xff]  ;;  %23057 = vst [vmem:[#allocation11_spill] sm:$0xff] %v21459_v44  ;;  %v23058_v6 = vld [vmem:[#allocation31_spill] sm:$0xff] }
 0xa3d   :  { %12394 = vmatmul.mubr.bf16.vlgmr.msra.gmra.mrb[112].mxu0 %v23053_v38  ;;  %v11120_v2 = vadd.f32 %v15976_v30, %v23054_v47  ;;  %v11247_v8 = vmax.f32 %v11119_v21, 0.0  ;;  %v14370_v54 = vcombine.high %v11417_v61, %v11421_v39  ;;  %v23059_v38 = vld [vmem:[#allocation26_spill] sm:$0xff] }
 0xa3e   :  { %12401 = vmatprep.mubr.bf16.mxu0 %v14362_v58  ;;  %v11118_v56 = vadd.f32 %v15977_v19, %v23056_v28  ;;  %v11245_v57 = vmax.f32 %v11117_v15, 0.0  ;;  %v14361_v58 = vcombine.low %v11409_v41, %v11413_v25  ;;  %v21469_v15 = vpop.permute.xlu0 %10803  ;;  %v23063_v25 = vld [vmem:[#allocation64_spill] sm:$0xff] }
 0xa3f   :  { %v11248_v5 = vmax.f32 %v11120_v2, 0.0  ;;  %v23061_v2 = vld [vmem:[#allocation63_spill] sm:$0xff] }
 0xa40   :  { %v11246_v7 = vmax.f32 %v11118_v56, 0.0  ;;  %v15844_v47 = vpop.f32.mrb[96].mxu1  ;;  %v23062_v56 = vld [vmem:[#allocation57_spill] sm:$0xff] }
 0xa41   :  { %v21461_v30 = vpack.c.bf16 %v11248_v5, %v11247_v8  ;;  %v15978_v12 = vadd.f32 %v15844_v47, %v23058_v6  ;;  %v9834_v19 = vpop.f32.mrb[97].mxu1  ;;  %v23064_v5 = vld [vmem:[#allocation62_spill] sm:$0xff] }
 0xa42   :  { %v21464_v62 = vpack.c.bf16 %v11246_v7, %v11245_v57  ;;  %v15979_v28 = vadd.f32 %v9834_v19, %v23059_v38  ;;  %v15845_v35 = vpop.f32.mrb[98].mxu1  ;;  %v21474_v57 = vpop.permute.xlu1 %10808  ;;  %v23065_v7 = vld [vmem:[#allocation58_spill] sm:$0xff] }
 0xa43   :  { %v11123_v21 = vadd.f32 %v15978_v12, %v23060_v43  ;;  %v15980_v4 = vadd.f32 %v15845_v35, %v23061_v2  ;;  %v9837_v44 = vpop.f32.mrb[99].mxu1  ;;  %v11425_v43 = vld [vmem:[%s22543_s7 + $0xc0] sm:$0xff] }
 0xa44   :  { %v11121_v41 = vadd.f32 %v15979_v28, %v23062_v56  ;;  %v15981_v8 = vadd.f32 %v9837_v44, %v23063_v25  ;;  %v11429_v35 = vld [vmem:[%s22543_s7 + $0xe0] sm:$0xff]  ;;  %v14369_v28 = vcombine.low %v11417_v61, %v11421_v39 }
 0xa45   :  { %12402 = vmatmul.mubr.bf16.gmra.mrb[116].mxu0 %v14361_v58  ;;  %v11124_v47 = vadd.f32 %v15980_v4, %v23064_v5  ;;  %v11251_v12 = vmax.f32 %v11123_v21, 0.0  ;;  %v14378_v25 = vcombine.high %v11425_v43, %v11429_v35  ;;  %v23072_v61 = vld [vmem:[#allocation22_spill] sm:$0xff] }
 0xa46   :  { %12409 = vmatprep.mubr.bf16.mxu0 %v14370_v54  ;;  %v11122_v6 = vadd.f32 %v15981_v8, %v23065_v7  ;;  %v11249_v38 = vmax.f32 %v11121_v41, 0.0  ;;  %v23066_v54 = vld [vmem:[#allocation65_spill] sm:$0xff]  ;;  %v21486_v8 = vpop.permute.xlu0 %10893  ;;  %v23068_v7 = vld [vmem:[#allocation66_spill] sm:$0xff]  ;;  %v21493_v51 = vpop.permute.xlu1 %10898 }
 0xa47   :  { %v11252_v19 = vmax.f32 %v11124_v47, 0.0  ;;  %23067 = vst [vmem:[#allocation15_spill] sm:$0xff] %v21486_v8  ;;  %v23070_v47 = vld [vmem:[#allocation67_spill] sm:$0xff]  ;;  %23071 = vst [vmem:[#allocation38_spill] sm:$0xff] %v21493_v51 }
 0xa48   :  { %v11250_v44 = vmax.f32 %v11122_v6, 0.0  ;;  %v15848_v58 = vpop.f32.mrb[100].mxu1 }
 0xa49   :  { %v21483_v4 = vpack.c.bf16 %v11252_v19, %v11251_v12  ;;  %v15982_v2 = vadd.f32 %v15848_v58, %v23066_v54  ;;  %v9850_v56 = vpop.f32.mrb[101].mxu1  ;;  %v23073_v12 = vld [vmem:[#allocation68_spill] sm:$0xff]  ;;  %v11433_v54 = vld [vmem:[%s22543_s7 + $0x100] sm:$0xff] }
 0xa4a   :  { %v21488_v5 = vpack.c.bf16 %v11250_v44, %v11249_v38  ;;  %v15983_v49 = vadd.f32 %v9850_v56, %v23068_v7  ;;  %v15849_v11 = vpop.f32.mrb[102].mxu1  ;;  %v23074_v38 = vld [vmem:[#allocation25_spill] sm:$0xff]  ;;  %v21505_v56 = vpop.permute.xlu0 %10813 }
 0xa4b   :  { %v11127_v21 = vadd.f32 %v15982_v2, %v23069_v55  ;;  %v15984_v41 = vadd.f32 %v15849_v11, %v23070_v47  ;;  %v9853_v6 = vpop.f32.mrb[103].mxu1  ;;  %v11437_v55 = vld [vmem:[%s22543_s7 + $0x120] sm:$0xff]  ;;  %v14377_v47 = vcombine.low %v11425_v43, %v11429_v35  ;;  %v23080_v35 = vld [vmem:[#allocation72_spill] sm:$0xff] }
 0xa4c   :  { %v11125_v39 = vadd.f32 %v15983_v49, %v23072_v61  ;;  %v15985_v19 = vadd.f32 %v9853_v6, %v23073_v12  ;;  %v14386_v61 = vcombine.high %v11433_v54, %v11437_v55  ;;  %v21510_v12 = vpop.permute.xlu1 %10818 }
 0xa4d   :  { %12410 = vmatmul.mubr.bf16.gmra.mrb[120].mxu0 %v14369_v28  ;;  %v11128_v58 = vadd.f32 %v15984_v41, %v21294_v27  ;;  %v11255_v11 = vmax.f32 %v11127_v21, 0.0 }
 0xa4e   :  { %12417 = vmatprep.mubr.bf16.mxu0 %v14378_v25  ;;  %v11126_v44 = vadd.f32 %v15985_v19, %v23074_v38  ;;  %v11253_v49 = vmax.f32 %v11125_v39, 0.0  ;;  %v23075_v25 = vld [vmem:[#allocation69_spill] sm:$0xff]  ;;  %v23076_v38 = vld [vmem:[#allocation70_spill] sm:$0xff] }
 0xa4f   :  { %v11256_v2 = vmax.f32 %v11128_v58, 0.0  ;;  %v23077_v58 = vld [vmem:[#allocation41_spill] sm:$0xff] }
 0xa50   :  { %v11254_v7 = vmax.f32 %v11126_v44, 0.0  ;;  %v15852_v28 = vpop.f32.mrb[104].mxu1 }
 0xa51   :  { %v21507_v27 = vpack.c.bf16 %v11256_v2, %v11255_v11  ;;  %v15986_v41 = vadd.f32 %v15852_v28, %v23075_v25  ;;  %v9866_v6 = vpop.f32.mrb[105].mxu1  ;;  %v23081_v2 = vld [vmem:[#allocation44_spill] sm:$0xff]  ;;  %v21520_v25 = vpop.permute.xlu0 %10903 }
 0xa52   :  { %v21512_v19 = vpack.c.bf16 %v11254_v7, %v11253_v49  ;;  %v15987_v51 = vadd.f32 %v9866_v6, %v23076_v38  ;;  %v15853_v21 = vpop.f32.mrb[106].mxu1  ;;  %23082 = vst [vmem:[#allocation19_spill] sm:$0xff] %v21520_v25  ;;  %v23083_v49 = vld [vmem:[#allocation34_spill] sm:$0xff] }
 0xa53   :  { %v11131_v8 = vadd.f32 %v15986_v41, %v23077_v58  ;;  %v15988_v39 = vadd.f32 %v15853_v21, %v23078_v17  ;;  %v9869_v44 = vpop.f32.mrb[107].mxu1  ;;  %v11441_v6 = vld [vmem:[%s22543_s7 + $0x140] sm:$0xff] }
 0xa54   :  { %v11129_v43 = vadd.f32 %v15987_v51, %v23079_v31  ;;  %v15989_v11 = vadd.f32 %v9869_v44, %v23080_v35  ;;  %v11445_v17 = vld [vmem:[%s22543_s7 + $0x160] sm:$0xff]  ;;  %v21529_v31 = vpop.permute.xlu1 %10908 }
 0xa55   :  { %12418 = vmatmul.mubr.bf16.gmra.mrb[124].mxu0 %v14377_v47  ;;  %v11132_v28 = vadd.f32 %v15988_v39, %v23081_v2  ;;  %v11259_v41 = vmax.f32 %v11131_v8, 0.0  ;;  %23084 = vst [vmem:[#allocation10_spill] sm:$0xff] %v21529_v31  ;;  %v23085_v58 = vld [vmem:[#allocation73_spill] sm:$0xff]  ;;  %v23086_v2 = vld [vmem:[#allocation74_spill] sm:$0xff]  ;;  %v21535_v60 = vpop.permute.xlu0 %10823  ;;  %v23090_v31 = vld [vmem:[#allocation76_spill] sm:$0xff] }
 0xa56   :  { %12425 = vmatprep.mubr.bf16.mxu0 %v14386_v61  ;;  %v11130_v7 = vadd.f32 %v15989_v11, %v23083_v49  ;;  %v11257_v47 = vmax.f32 %v11129_v43, 0.0  ;;  %v14385_v61 = vcombine.low %v11433_v54, %v11437_v55  ;;  %v14394_v11 = vcombine.high %v11441_v6, %v11445_v17  ;;  %v23089_v43 = vld [vmem:[#allocation47_spill] sm:$0xff]  ;;  %v23091_v55 = vld [vmem:[#allocation52_spill] sm:$0xff] }
 0xa57   :  { %v11260_v51 = vmax.f32 %v11132_v28, 0.0 }
 0xa58   :  { %v11258_v38 = vmax.f32 %v11130_v7, 0.0  ;;  %v15856_v21 = vpop.f32.mrb[108].mxu1 }
 0xa59   :  { %v15990_v39 = vadd.f32 %v15856_v21, %v23085_v58  ;;  %v9882_v44 = vpop.f32.mrb[109].mxu1  ;;  %v11362_v35 = vpack.c.bf16 %v11260_v51, %v11259_v41  ;;  %v21541_v51 = vpop.permute.xlu1 %10828  ;;  %v23093_v58 = vld [vmem:[#allocation77_spill] sm:$0xff] }
 0xa5a   :  { %v15991_v49 = vadd.f32 %v9882_v44, %v23086_v2  ;;  %v15857_v25 = vpop.f32.mrb[110].mxu1  ;;  %v11361_v34 = vpack.c.bf16 %v11258_v38, %v11257_v47  ;;  %v23092_v47 = vld [vmem:[#allocation48_spill] sm:$0xff]  ;;  %v21552_v2 = vpop.permute.xlu0 %10913 }
 0xa5b   :  { %v11135_v26 = vadd.f32 %v15990_v39, %v23087_v3  ;;  %v15992_v8 = vadd.f32 %v15857_v25, %v23088_v48  ;;  %v9885_v28 = vpop.f32.mrb[111].mxu1  ;;  %v11449_v48 = vld [vmem:[%s22543_s7 + $0x180] sm:$0xff] }
 0xa5c   :  { %v11133_v7 = vadd.f32 %v15991_v49, %v23089_v43  ;;  %v15993_v54 = vadd.f32 %v9885_v28, %v23090_v31  ;;  %14920 = vmatprep.subr.bf16.mxu0 %v11361_v34  ;;  %v11453_v25 = vld [vmem:[%s22543_s7 + $0x1a0] sm:$0xff] }
 0xa5d   :  { %12426 = vmatmul.mubr.bf16.gmra.mrb[128].mxu0 %v14385_v61  ;;  %v11136_v41 = vadd.f32 %v15992_v8, %v23091_v55  ;;  %v11263_v31 = vmax.f32 %v11135_v26, 0.0  ;;  %v23094_v49 = vld [vmem:[#allocation78_spill] sm:$0xff]  ;;  %v23096_v55 = vld [vmem:[#allocation79_spill] sm:$0xff] }
 0xa5e   :  { %14921 = vmatpush3.bf16.msra.mxu0 %v21439_v29  ;;  %12433 = vmatprep.mubr.bf16.mxu0 %v14394_v11  ;;  %v11134_v3 = vadd.f32 %v15993_v54, %v23092_v47  ;;  %v11261_v38 = vmax.f32 %v11133_v7, 0.0  ;;  %v14393_v29 = vcombine.low %v11441_v6, %v11445_v17  ;;  %v14402_v11 = vcombine.high %v11449_v48, %v11453_v25  ;;  %v23095_v54 = vld [vmem:[#allocation59_spill] sm:$0xff]  ;;  %v21557_v47 = vpop.permute.xlu1 %10918 }
 0xa5f   :  { %14922 = vmatprep.subr.bf16.mxu0 %v11362_v35  ;;  %v11264_v34 = vmax.f32 %v11136_v41, 0.0  ;;  %v23097_v6 = vld [vmem:[#allocation55_spill] sm:$0xff] }
 0xa60   :  { %v11262_v21 = vmax.f32 %v11134_v3, 0.0  ;;  %v15860_v61 = vpop.f32.mrb[112].mxu1  ;;  %v23098_v3 = vld [vmem:[#allocation80_spill] sm:$0xff] }
 0xa61   :  { %v15994_v39 = vadd.f32 %v15860_v61, %v23093_v58  ;;  %v9898_v44 = vpop.f32.mrb[113].mxu1  ;;  %v11364_v35 = vpack.c.bf16 %v11264_v34, %v11263_v31  ;;  %v23100_v34 = vld [vmem:[#allocation56_spill] sm:$0xff]  ;;  %v11461_v58 = vld [vmem:[%s22543_s7 + $0x1e0] sm:$0xff] }
 0xa62   :  { %14923 = vmatpush3.bf16.msra.mxu0 %v21433_v23  ;;  %v15995_v8 = vadd.f32 %v9898_v44, %v23094_v49  ;;  %v15861_v28 = vpop.f32.mrb[114].mxu1  ;;  %v11363_v43 = vpack.c.bf16 %v11262_v21, %v11261_v38  ;;  %v23099_v23 = vld [vmem:[#allocation60_spill] sm:$0xff]  ;;  %v11457_v21 = vld [vmem:[%s22543_s7 + $0x1c0] sm:$0xff] }
 0xa63   :  { %v11139_v26 = vadd.f32 %v15994_v39, %v23095_v54  ;;  %v15996_v7 = vadd.f32 %v15861_v28, %v23096_v55  ;;  %v9901_v41 = vpop.f32.mrb[115].mxu1  ;;  %v14410_v55 = vcombine.high %v11457_v21, %v11461_v58 }
 0xa64   :  { %v11137_v17 = vadd.f32 %v15995_v8, %v23097_v6  ;;  %v15997_v61 = vadd.f32 %v9901_v41, %v23098_v3  ;;  %14924 = vmatprep.subr.bf16.mxu0 %v11363_v43  ;;  %v23102_v41 = vld [vmem:[#allocation82_spill] sm:$0xff] }
 0xa65   :  { %12434 = vmatmul.mubr.bf16.gmra.mrb[132].mxu0 %v14393_v29  ;;  %v11140_v31 = vadd.f32 %v15996_v7, %v23099_v23  ;;  %v11267_v39 = vmax.f32 %v11139_v26, 0.0  ;;  %v21570_v29 = vpop.permute.xlu0 %10833  ;;  %v21574_v7 = vpop.permute.xlu1 %10838 }
 0xa66   :  { %14925 = vmatpush3.bf16.msra.mxu0 %v21464_v62  ;;  %12441 = vmatprep.mubr.bf16.mxu0 %v14402_v11  ;;  %v11138_v38 = vadd.f32 %v15997_v61, %v23100_v34  ;;  %v11265_v49 = vmax.f32 %v11137_v17, 0.0  ;;  %v14401_v62 = vcombine.low %v11449_v48, %v11453_v25  ;;  %v23101_v11 = vld [vmem:[#allocation81_spill] sm:$0xff]  ;;  %v23106_v25 = vld [vmem:[#allocation84_spill] sm:$0xff] }
 0xa67   :  { %14926 = vmatprep.subr.bf16.mxu0 %v11364_v35  ;;  %v11268_v44 = vmax.f32 %v11140_v31, 0.0  ;;  %v23103_v61 = vld [vmem:[#allocation29_spill] sm:$0xff]  ;;  %v23104_v31 = vld [vmem:[#allocation83_spill] sm:$0xff] }
 0xa68   :  { %v11266_v8 = vmax.f32 %v11138_v38, 0.0  ;;  %v15864_v28 = vpop.f32.mrb[116].mxu1  ;;  %v23105_v38 = vld [vmem:[#allocation24_spill] sm:$0xff] }
 0xa69   :  { %v15998_v43 = vadd.f32 %v15864_v28, %v23101_v11  ;;  %v9914_v54 = vpop.f32.mrb[117].mxu1  ;;  %v11366_v35 = vpack.c.bf16 %v11268_v44, %v11267_v39  ;;  %v21583_v44 = vpop.permute.xlu0 %11003  ;;  %v23108_v11 = vld [vmem:[#allocation27_spill] sm:$0xff] }
 0xa6a   :  { %14927 = vmatpush3.bf16.msra.mxu0 %v21461_v30  ;;  %v15999_v6 = vadd.f32 %v9914_v54, %v23102_v41  ;;  %v15865_v3 = vpop.f32.mrb[118].mxu1  ;;  %v11365_v26 = vpack.c.bf16 %v11266_v8, %v11265_v49  ;;  %v23107_v30 = vld [vmem:[#allocation23_spill] sm:$0xff]  ;;  %v11465_v8 = vld [vmem:[%s22543_s7 + $0x200] sm:$0xff]  ;;  %v21592_v41 = vpop.permute.xlu1 %11008 }
 0xa6b   :  { %v11143_v23 = vadd.f32 %v15998_v43, %v23103_v61  ;;  %v16000_v17 = vadd.f32 %v15865_v3, %v23104_v31  ;;  %v9917_v34 = vpop.f32.mrb[119].mxu1  ;;  %v11469_v43 = vld [vmem:[%s22543_s7 + $0x220] sm:$0xff]  ;;  %v14409_v3 = vcombine.low %v11457_v21, %v11461_v58 }
 0xa6c   :  { %v11141_v48 = vadd.f32 %v15999_v6, %v23105_v38  ;;  %v16001_v28 = vadd.f32 %v9917_v34, %v23106_v25  ;;  %14928 = vmatprep.subr.bf16.mxu0 %v11365_v26  ;;  %v23109_v26 = vld [vmem:[#allocation85_spill] sm:$0xff] }
 0xa6d   :  { %12442 = vmatmul.mubr.bf16.gmra.mrb[136].mxu0 %v14401_v62  ;;  %v11144_v39 = vadd.f32 %v16000_v17, %v23107_v30  ;;  %v11271_v62 = vmax.f32 %v11143_v23, 0.0  ;;  %v14418_v17 = vcombine.high %v11465_v8, %v11469_v43 }
 0xa6e   :  { %14929 = vmatpush3.bf16.msra.mxu0 %v21488_v5  ;;  %12449 = vmatprep.mubr.bf16.mxu0 %v14410_v55  ;;  %v11142_v49 = vadd.f32 %v16001_v28, %v23108_v11  ;;  %v11269_v6 = vmax.f32 %v11141_v48, 0.0  ;;  %v21599_v48 = vpop.permute.xlu0 %10923 }
 0xa6f   :  { %14930 = vmatprep.subr.bf16.mxu0 %v11366_v35  ;;  %v11272_v54 = vmax.f32 %v11144_v39, 0.0 }
 0xa70   :  { %v11270_v5 = vmax.f32 %v11142_v49, 0.0  ;;  %v15868_v55 = vpop.f32.mrb[120].mxu1 }
 0xa71   :  { %v16002_v61 = vadd.f32 %v15868_v55, %v23109_v26  ;;  %v9930_v31 = vpop.f32.mrb[121].mxu1  ;;  %v11368_v35 = vpack.c.bf16 %v11272_v54, %v11271_v62 }
 0xa72   :  { %14931 = vmatpush3.bf16.msra.mxu0 %v21483_v4  ;;  %v16003_v34 = vadd.f32 %v9930_v31, %v21232_v45  ;;  %v15869_v38 = vpop.f32.mrb[122].mxu1  ;;  %v11367_v25 = vpack.c.bf16 %v11270_v5, %v11269_v6  ;;  %v21605_v45 = vpop.permute.xlu1 %10928 }
 0xa73   :  { %v11147_v23 = vadd.f32 %v16002_v61, %v21379_v9  ;;  %v16004_v28 = vadd.f32 %v15869_v38, %v21236_v13  ;;  %v9933_v30 = vpop.f32.mrb[123].mxu1  ;;  %v11473_v13 = vld [vmem:[%s22543_s7 + $0x240] sm:$0xff]  ;;  %v21618_v5 = vpop.permute.xlu0 %11013 }
 0xa74   :  { %v11145_v21 = vadd.f32 %v16003_v34, %v21343_v40  ;;  %v16005_v58 = vadd.f32 %v9933_v30, %v21244_v24  ;;  %14932 = vmatprep.subr.bf16.mxu0 %v11367_v25  ;;  %v11477_v24 = vld [vmem:[%s22543_s7 + $0x260] sm:$0xff] }
 0xa75   :  { %12450 = vmatmul.mubr.bf16.gmra.mrb[140].mxu0 %v14409_v3  ;;  %v11148_v4 = vadd.f32 %v16004_v28, %v21383_v42  ;;  %v11275_v40 = vmax.f32 %v11147_v23, 0.0  ;;  %v14426_v6 = vcombine.high %v11473_v13, %v11477_v24  ;;  %v14425_v23 = vcombine.low %v11473_v13, %v11477_v24 }
 0xa76   :  { %14933 = vmatpush3.bf16.msra.mxu0 %v21512_v19  ;;  %12457 = vmatprep.mubr.bf16.mxu0 %v14418_v17  ;;  %v11146_v9 = vadd.f32 %v16005_v58, %v21351_v59  ;;  %v11273_v11 = vmax.f32 %v11145_v21, 0.0  ;;  %v14417_v19 = vcombine.low %v11465_v8, %v11469_v43  ;;  %v21625_v43 = vpop.permute.xlu1 %11018 }
 0xa77   :  { %14934 = vmatprep.subr.bf16.mxu0 %v11368_v35  ;;  %v11276_v39 = vmax.f32 %v11148_v4, 0.0  ;;  %v21637_v38 = vpop.permute.xlu0 %10933 }
 0xa78   :  { %v11274_v42 = vmax.f32 %v11146_v9, 0.0  ;;  %v15872_v49 = vpop.f32.mrb[124].mxu1 }
 0xa79   :  { %v21614_v62 = vpack.c.bf16 %v11276_v39, %v11275_v40  ;;  %v16006_v54 = vadd.f32 %v15872_v49, %v21252_v53  ;;  %v9946_v59 = vpop.f32.mrb[125].mxu1 }
 0xa7a   :  { %14935 = vmatpush3.bf16.msra.mxu0 %v21507_v27  ;;  %v21620_v55 = vpack.c.bf16 %v11274_v42, %v11273_v11  ;;  %v16007_v3 = vadd.f32 %v9946_v59, %v21260_v63  ;;  %v15873_v26 = vpop.f32.mrb[126].mxu1  ;;  %v11481_v63 = vld [vmem:[%s22543_s7 + $0x280] sm:$0xff]  ;;  %v21642_v21 = vpop.permute.xlu1 %10938 }
 0xa7b   :  { %v11151_v61 = vadd.f32 %v16006_v54, %v21431_v50  ;;  %v16008_v31 = vadd.f32 %v15873_v26, %v21264_v37  ;;  %v9949_v8 = vpop.f32.mrb[127].mxu1  ;;  %v11485_v37 = vld [vmem:[%s22543_s7 + $0x2a0] sm:$0xff]  ;;  %v21652_v42 = vpop.permute.xlu0 %11023 }
 0xa7c   :  { %v11149_v53 = vadd.f32 %v16007_v3, %v21402_v1  ;;  %v16009_v35 = vadd.f32 %v9949_v8, %v21272_v0  ;;  %v14434_v30 = vcombine.high %v11481_v63, %v11485_v37  ;;  %v14433_v59 = vcombine.low %v11481_v63, %v11485_v37 }
 0xa7d   :  { %12458 = vmatmul.mubr.bf16.gmra.mrb[144].mxu0 %v14417_v19  ;;  %v11152_v27 = vadd.f32 %v16008_v31, %v21437_v33  ;;  %v11279_v50 = vmax.f32 %v11151_v61, 0.0 }
 0xa7e   :  { %12465 = vmatprep.mubr.bf16.mxu0 %v14426_v6  ;;  %v11150_v17 = vadd.f32 %v16009_v35, %v21408_v36  ;;  %v11277_v1 = vmax.f32 %v11149_v53, 0.0  ;;  %v21661_v19 = vpop.permute.xlu1 %11028 }
 0xa7f   :  { %v11280_v34 = vmax.f32 %v11152_v27, 0.0 }
 0xa80   :  { %v11278_v0 = vmax.f32 %v11150_v17, 0.0  ;;  %v15876_v25 = vpop.f32.mrb[128].mxu1  ;;  %v21671_v17 = vpop.permute.xlu0 %10943 }
 0xa81   :  { %v21639_v33 = vpack.c.bf16 %v11280_v34, %v11279_v50  ;;  %v16010_v36 = vadd.f32 %v15876_v25, %v21280_v32  ;;  %v9962_v28 = vpop.f32.mrb[129].mxu1 }
 0xa82   :  { %v21644_v58 = vpack.c.bf16 %v11278_v0, %v11277_v1  ;;  %v16011_v4 = vadd.f32 %v9962_v28, %v21288_v46  ;;  %v15877_v9 = vpop.f32.mrb[130].mxu1  ;;  %v11489_v46 = vld [vmem:[%s22543_s7 + $0x2c0] sm:$0xff]  ;;  %v21676_v50 = vpop.permute.xlu1 %10948 }
 0xa83   :  { %v11155_v40 = vadd.f32 %v16010_v36, %v21505_v56  ;;  %v16012_v39 = vadd.f32 %v15877_v9, %v21292_v14  ;;  %v9965_v11 = vpop.f32.mrb[131].mxu1  ;;  %v11493_v14 = vld [vmem:[%s22543_s7 + $0x2e0] sm:$0xff] }
 0xa84   :  { %v11153_v13 = vadd.f32 %v16011_v4, %v21469_v15  ;;  %v16013_v24 = vadd.f32 %v9965_v11, %v21302_v52  ;;  %v14442_v26 = vcombine.high %v11489_v46, %v11493_v14  ;;  %v14441_v25 = vcombine.low %v11489_v46, %v11493_v14  ;;  %v21688_v28 = vpop.permute.xlu0 %11033  ;;  %v23110_v4 = vld [vmem:[#allocation88_spill] sm:$0xff]  ;;  %v23113_v46 = vld [vmem:[#allocation86_spill] sm:$0xff] }
 0xa85   :  { %12466 = vmatmul.mubr.bf16.gmra.mrb[148].mxu0 %v14425_v23  ;;  %v11156_v32 = vadd.f32 %v16012_v39, %v21510_v12  ;;  %v11283_v56 = vmax.f32 %v11155_v40, 0.0  ;;  %v23111_v39 = vld [vmem:[#allocation92_spill] sm:$0xff] }
 0xa86   :  { %12473 = vmatprep.mubr.bf16.mxu0 %v14434_v30  ;;  %v11154_v49 = vadd.f32 %v16013_v24, %v21474_v57  ;;  %v11281_v52 = vmax.f32 %v11153_v13, 0.0  ;;  %v23112_v13 = vld [vmem:[#allocation89_spill] sm:$0xff] }
 0xa87   :  { %v11284_v15 = vmax.f32 %v11156_v32, 0.0 }
 0xa88   :  { %v11282_v54 = vmax.f32 %v11154_v49, 0.0  ;;  %v15880_v12 = vpop.f32.mrb[132].mxu1  ;;  %v21695_v49 = vpop.permute.xlu1 %11038 }
 0xa89   :  { %v21663_v6 = vpack.c.bf16 %v11284_v15, %v11283_v56  ;;  %v16014_v57 = vadd.f32 %v15880_v12, %v21310_v10  ;;  %v9978_v3 = vpop.f32.mrb[133].mxu1  ;;  %v23114_v56 = vld [vmem:[#allocation90_spill] sm:$0xff]  ;;  %v23115_v15 = vld [vmem:[#allocation93_spill] sm:$0xff] }
 0xa8a   :  { %v21666_v61 = vpack.c.bf16 %v11282_v54, %v11281_v52  ;;  %v16015_v31 = vadd.f32 %v9978_v3, %v21318_v16  ;;  %v15881_v8 = vpop.f32.mrb[134].mxu1  ;;  %v23116_v54 = vld [vmem:[#allocation87_spill] sm:$0xff] }
 0xa8b   :  { %v11159_v53 = vadd.f32 %v16014_v57, %v21570_v29  ;;  %v16016_v35 = vadd.f32 %v15881_v8, %v21324_v18  ;;  %v9981_v27 = vpop.f32.mrb[135].mxu1  ;;  %v11497_v29 = vld [vmem:[%s22543_s7 + $0x300] sm:$0xff] }
 0xa8c   :  { %v11157_v63 = vadd.f32 %v16015_v31, %v21535_v60  ;;  %v16017_v37 = vadd.f32 %v9981_v27, %v21334_v20  ;;  %v11501_v18 = vld [vmem:[%s22543_s7 + $0x320] sm:$0xff]  ;;  %v21707_v31 = vpop.permute.xlu0 %10953 }
 0xa8d   :  { %12474 = vmatmul.mubr.bf16.gmra.mrb[152].mxu0 %v14433_v59  ;;  %v11160_v10 = vadd.f32 %v16016_v35, %v21574_v7  ;;  %v11287_v34 = vmax.f32 %v11159_v53, 0.0  ;;  %v11505_v59 = vld [vmem:[%s22543_s7 + $0x340] sm:$0xff]  ;;  %v14449_v27 = vcombine.low %v11497_v29, %v11501_v18 }
 0xa8e   :  { %12481 = vmatprep.mubr.bf16.mxu0 %v14442_v26  ;;  %v11158_v16 = vadd.f32 %v16017_v37, %v21541_v51  ;;  %v11285_v1 = vmax.f32 %v11157_v63, 0.0  ;;  %v14450_v51 = vcombine.high %v11497_v29, %v11501_v18  ;;  %v11509_v57 = vld [vmem:[%s22543_s7 + $0x360] sm:$0xff]  ;;  %v23117_v63 = vld [vmem:[#allocation91_spill] sm:$0xff]  ;;  %v23122_v29 = vld [vmem:[#allocation96_spill] sm:$0xff] }
 0xa8f   :  { %v11288_v60 = vmax.f32 %v11160_v10, 0.0 }
 0xa90   :  { %v11286_v20 = vmax.f32 %v11158_v16, 0.0  ;;  %v15884_v0 = vpop.f32.mrb[136].mxu1  ;;  %v14458_v16 = vcombine.high %v11505_v59, %v11509_v57 }
 0xa91   :  { %v21685_v7 = vpack.c.bf16 %v11288_v60, %v11287_v34  ;;  %v16018_v23 = vadd.f32 %v15884_v0, %v21339_v22  ;;  %v9994_v36 = vpop.f32.mrb[137].mxu1  ;;  %v21712_v60 = vpop.permute.xlu1 %10958 }
 0xa92   :  { %v21690_v30 = vpack.c.bf16 %v11286_v20, %v11285_v1  ;;  %v16019_v9 = vadd.f32 %v9994_v36, %v23110_v4  ;;  %v15885_v40 = vpop.f32.mrb[138].mxu1  ;;  %v23118_v1 = vld [vmem:[#allocation94_spill] sm:$0xff] }
 0xa93   :  { %v11163_v11 = vadd.f32 %v16018_v23, %v23111_v39  ;;  %v16020_v24 = vadd.f32 %v15885_v40, %v23112_v13  ;;  %v9997_v32 = vpop.f32.mrb[139].mxu1  ;;  %v23119_v23 = vld [vmem:[#allocation30_spill] sm:$0xff]  ;;  %v23121_v40 = vld [vmem:[#allocation12_spill] sm:$0xff] }
 0xa94   :  { %v11161_v14 = vadd.f32 %v16019_v9, %v23113_v46  ;;  %v16021_v22 = vadd.f32 %v9997_v32, %v23114_v56  ;;  %v23124_v32 = vld [vmem:[#allocation33_spill] sm:$0xff] }
 0xa95   :  { %12482 = vmatmul.mubr.bf16.gmra.mrb[156].mxu0 %v14441_v25  ;;  %v11164_v52 = vadd.f32 %v16020_v24, %v23115_v15  ;;  %v11291_v3 = vmax.f32 %v11163_v11, 0.0  ;;  %v23123_v11 = vld [vmem:[#allocation36_spill] sm:$0xff]  ;;  %v21720_v24 = vpop.permute.xlu0 %11043  ;;  %v11517_v56 = vld [vmem:[%s22543_s7 + $0x3a0] sm:$0xff] }
 0xa96   :  { %12489 = vmatprep.mubr.bf16.mxu0 %v14450_v51  ;;  %v11162_v12 = vadd.f32 %v16021_v22, %v23116_v54  ;;  %v11289_v8 = vmax.f32 %v11161_v14, 0.0  ;;  %v23120_v51 = vld [vmem:[#allocation95_spill] sm:$0xff]  ;;  %v11513_v14 = vld [vmem:[%s22543_s7 + $0x380] sm:$0xff] }
 0xa97   :  { %v11292_v26 = vmax.f32 %v11164_v52, 0.0  ;;  %v21729_v52 = vpop.permute.xlu1 %11048 }
 0xa98   :  { %v11290_v53 = vmax.f32 %v11162_v12, 0.0  ;;  %v15888_v35 = vpop.f32.mrb[140].mxu1 }
 0xa99   :  { %v16022_v37 = vadd.f32 %v15888_v35, %v23117_v63  ;;  %v10010_v10 = vpop.f32.mrb[141].mxu1  ;;  %v21710_v34 = vpack.c.bf16 %v11292_v26, %v11291_v3  ;;  %v14457_v26 = vcombine.low %v11505_v59, %v11509_v57 }
 0xa9a   :  { %v16023_v20 = vadd.f32 %v10010_v10, %v23118_v1  ;;  %v15889_v0 = vpop.f32.mrb[142].mxu1  ;;  %v11377_v25 = vpack.c.bf16 %v11290_v53, %v11289_v8  ;;  %v23125_v8 = vld [vmem:[#allocation15_spill] sm:$0xff] }
 0xa9b   :  { %v11167_v36 = vadd.f32 %v16022_v37, %v23119_v23  ;;  %v16024_v4 = vadd.f32 %v15889_v0, %v23120_v51  ;;  %v10013_v9 = vpop.f32.mrb[143].mxu1  ;;  %v23126_v37 = vld [vmem:[#allocation35_spill] sm:$0xff]  ;;  %v21738_v23 = vpop.permute.xlu0 %10963 }
 0xa9c   :  { %v11165_v39 = vadd.f32 %v16023_v20, %v23121_v40  ;;  %v16025_v18 = vadd.f32 %v10013_v9, %v23122_v29  ;;  %15032 = vmatprep.subr.bf16.mxu0 %v11377_v25  ;;  %v23127_v20 = vld [vmem:[#allocation38_spill] sm:$0xff] }
 0xa9d   :  { %12490 = vmatmul.mubr.bf16.gmra.mrb[160].mxu0 %v14449_v27  ;;  %v11168_v13 = vadd.f32 %v16024_v4, %v23123_v11  ;;  %v11295_v22 = vmax.f32 %v11167_v36, 0.0  ;;  %v14466_v27 = vcombine.high %v11513_v14, %v11517_v56  ;;  %v23128_v36 = vld [vmem:[#allocation11_spill] sm:$0xff]  ;;  %v21741_v4 = vpop.permute.xlu1 %10968  ;;  %v11525_v29 = vld [vmem:[%s22543_s7 + $0x3e0] sm:$0xff] }
 0xa9e   :  { %12497 = vmatprep.mubr.bf16.mxu0 %v14458_v16  ;;  %v11166_v46 = vadd.f32 %v16025_v18, %v23124_v32  ;;  %v11293_v54 = vmax.f32 %v11165_v39, 0.0  ;;  %v11521_v39 = vld [vmem:[%s22543_s7 + $0x3c0] sm:$0xff]  ;;  %v14465_v32 = vcombine.low %v11513_v14, %v11517_v56  ;;  %v11402_v56 = vld [vmem:[%s22543_s7 + $0x8] sm:$0xff] }
 0xa9f   :  { %v11296_v15 = vmax.f32 %v11168_v13, 0.0 }
 0xaa0   :  { %v11294_v12 = vmax.f32 %v11166_v46, 0.0  ;;  %v15892_v3 = vpop.f32.mrb[16].mxu1 }
 0xaa1   :  { %v11171_v53 = vadd.f32 %v15892_v3, %v23125_v8  ;;  %v10026_v35 = vpop.f32.mrb[17].mxu1  ;;  %v21732_v63 = vpack.c.bf16 %v11296_v15, %v11295_v22  ;;  %v14474_v15 = vcombine.high %v11521_v39, %v11525_v29 }
 0xaa2   :  { %v11169_v10 = vadd.f32 %v23126_v37, %v10026_v35  ;;  %v15893_v16 = vpop.f32.mrb[18].mxu1  ;;  %v21735_v1 = vpack.c.bf16 %v11294_v12, %v11293_v54  ;;  %v21754_v54 = vpop.permute.xlu0 %11053  ;;  %v23129_v12 = vld [vmem:[#allocation19_spill] sm:$0xff] }
 0xaa3   :  { %v11172_v0 = vadd.f32 %v15893_v16, %v23127_v20  ;;  %v10029_v25 = vpop.f32.mrb[19].mxu1  ;;  %v11299_v59 = vmax.f32 %v11171_v53, 0.0  ;;  %v21758_v35 = vpop.permute.xlu1 %11058  ;;  %v11406_v20 = vld [vmem:[%s22543_s7 + $0x28] sm:$0xff] }
 0xaa4   :  { %v11170_v51 = vadd.f32 %v23128_v36, %v10029_v25  ;;  %v11297_v9 = vmax.f32 %v11169_v10, 0.0 }
 0xaa5   :  { %12498 = vmatmul.mubr.bf16.gmra.mrb[164].mxu0 %v14457_v26  ;;  %v11300_v57 = vmax.f32 %v11172_v0, 0.0 }
 0xaa6   :  { %12505 = vmatprep.mubr.bf16.mxu0 %v14466_v27  ;;  %v11298_v40 = vmax.f32 %v11170_v51, 0.0  ;;  %v23130_v27 = vld [vmem:[#allocation10_spill] sm:$0xff]  ;;  %v10974_v0 = vpop.permute.xlu0 %10973  ;;  %v14473_v51 = vcombine.low %v11521_v39, %v11525_v29 }
 0xaa7   :  { %v21749_v18 = vpack.c.bf16 %v11300_v57, %v11299_v59 }
 0xaa8   :  { %v21751_v11 = vpack.c.bf16 %v11298_v40, %v11297_v9  ;;  %v15896_v13 = vpop.f32.mrb[20].mxu1  ;;  %v14356_v9 = vcombine.high %v11402_v56, %v11406_v20  ;;  %v10979_v40 = vpop.permute.xlu1 %10978 }
 0xaa9   :  { %v11175_v46 = vadd.f32 %v15896_v13, %v21552_v2  ;;  %v10042_v22 = vpop.f32.mrb[21].mxu1 }
 0xaaa   :  { %v11173_v3 = vadd.f32 %v23129_v12, %v10042_v22  ;;  %v15897_v26 = vpop.f32.mrb[22].mxu1 }
 0xaab   :  { %v11176_v8 = vadd.f32 %v15897_v26, %v21557_v47  ;;  %v10045_v53 = vpop.f32.mrb[23].mxu1  ;;  %v11303_v10 = vmax.f32 %v11175_v46, 0.0  ;;  %v21775_v26 = vpop.permute.xlu0 %11063 }
 0xaac   :  { %v11174_v37 = vadd.f32 %v23130_v27, %v10045_v53  ;;  %v11301_v14 = vmax.f32 %v11173_v3, 0.0  ;;  %v14355_v27 = vcombine.low %v11402_v56, %v11406_v20 }
 0xaad   :  { %12506 = vmatmul.mubr.bf16.gmra.mrb[168].mxu0 %v14465_v32  ;;  %v11304_v16 = vmax.f32 %v11176_v8, 0.0  ;;  %v21785_v8 = vpop.permute.xlu1 %11068 }
 0xaae   :  { %12513 = vmatprep.mubr.bf16.mxu0 %v14474_v15  ;;  %v11302_v2 = vmax.f32 %v11174_v37, 0.0 }
 0xaaf   :  { %v21767_v47 = vpack.c.bf16 %v11304_v16, %v11303_v10 }
 0xab0   :  { %v21769_v25 = vpack.c.bf16 %v11302_v2, %v11301_v14  ;;  %v15900_v36 = vpop.f32.mrb[24].mxu1 }
 0xab1   :  { %v11179_v59 = vadd.f32 %v15900_v36, %v21637_v38  ;;  %v10058_v57 = vpop.f32.mrb[25].mxu1  ;;  %v11410_v38 = vld [vmem:[%s22543_s7 + $0x48] sm:$0xff]  ;;  %v10989_v56 = vpop.permute.xlu1 %10988 }
 0xab2   :  { %v11177_v13 = vadd.f32 %v21599_v48, %v10058_v57  ;;  %v15901_v32 = vpop.f32.mrb[26].mxu1  ;;  %v11414_v48 = vld [vmem:[%s22543_s7 + $0x68] sm:$0xff] }
 0xab3   :  { %v11180_v46 = vadd.f32 %v15901_v32, %v21642_v21  ;;  %v10061_v22 = vpop.f32.mrb[27].mxu1  ;;  %v11307_v12 = vmax.f32 %v11179_v59, 0.0  ;;  %v14364_v16 = vcombine.high %v11410_v38, %v11414_v48  ;;  %v10984_v59 = vpop.permute.xlu0 %10983 }
 0xab4   :  { %v11178_v15 = vadd.f32 %v21605_v45, %v10061_v22  ;;  %v11305_v39 = vmax.f32 %v11177_v13, 0.0 }
 0xab5   :  { %12514 = vmatmul.mubr.bf16.gmra.mrb[172].mxu0 %v14473_v51  ;;  %v11308_v3 = vmax.f32 %v11180_v46, 0.0 }
 0xab6   :  { %12554 = vmatprep.mubr.bf16.mxu0 %v14356_v9  ;;  %v11306_v29 = vmax.f32 %v11178_v15, 0.0 }
 0xab7   :  { %v21783_v21 = vpack.c.bf16 %v11308_v3, %v11307_v12 }
 0xab8   :  { %v21787_v45 = vpack.c.bf16 %v11306_v29, %v11305_v39  ;;  %v15904_v53 = vpop.f32.mrb[28].mxu1 }
 0xab9   :  { %v11183_v37 = vadd.f32 %v15904_v53, %v21707_v31  ;;  %v10074_v10 = vpop.f32.mrb[29].mxu1 }
 0xaba   :  { %v11181_v14 = vadd.f32 %v21671_v17, %v10074_v10  ;;  %v15905_v2 = vpop.f32.mrb[30].mxu1  ;;  %v11418_v17 = vld [vmem:[%s22543_s7 + $0x88] sm:$0xff] }
 0xabb   :  { %v11184_v36 = vadd.f32 %v15905_v2, %v21712_v60  ;;  %v10077_v51 = vpop.f32.mrb[31].mxu1  ;;  %v11311_v9 = vmax.f32 %v11183_v37, 0.0  ;;  %v11422_v60 = vld [vmem:[%s22543_s7 + $0xa8] sm:$0xff] }
 0xabc   :  { %v11182_v57 = vadd.f32 %v21676_v50, %v10077_v51  ;;  %v11309_v20 = vmax.f32 %v11181_v14, 0.0  ;;  %v14372_v12 = vcombine.high %v11418_v17, %v11422_v60 }
 0xabd   :  { %12555 = vmatmul.mubr.bf16.vlgmr.msra.gmra.mrb[176].mxu0 %v14355_v27  ;;  %v11312_v13 = vmax.f32 %v11184_v36, 0.0  ;;  %v21810_v27 = vpop.permute.xlu1 %11078 }
 0xabe   :  { %15033 = vmatpush3.bf16.msra.mxu0 %v21620_v55  ;;  %12562 = vmatprep.mubr.bf16.mxu0 %v14364_v16  ;;  %v11310_v31 = vmax.f32 %v11182_v57, 0.0  ;;  %v14363_v55 = vcombine.low %v11410_v38, %v11414_v48 }
 0xabf   :  { %15034 = vmatprep.subr.bf16.mxu0 %v21710_v34  ;;  %v21801_v50 = vpack.c.bf16 %v11312_v13, %v11311_v9  ;;  %v21806_v34 = vpop.permute.xlu0 %11073 }
 0xac0   :  { %v21803_v32 = vpack.c.bf16 %v11310_v31, %v11309_v20  ;;  %v15908_v46 = vpop.f32.mrb[32].mxu1 }
 0xac1   :  { %v11187_v22 = vadd.f32 %v15908_v46, %v10974_v0  ;;  %v10090_v15 = vpop.f32.mrb[33].mxu1  ;;  %v10999_v36 = vpop.permute.xlu1 %10998 }
 0xac2   :  { %15035 = vmatpush3.bf16.msra.mxu0 %v21614_v62  ;;  %v11185_v3 = vadd.f32 %v21738_v23, %v10090_v15  ;;  %v15909_v39 = vpop.f32.mrb[34].mxu1  ;;  %v11430_v23 = vld [vmem:[%s22543_s7 + $0xe8] sm:$0xff] }
 0xac3   :  { %15036 = vmatprep.subr.bf16.mxu0 %v21735_v1  ;;  %v11188_v29 = vadd.f32 %v15909_v39, %v10979_v40  ;;  %v10093_v53 = vpop.f32.mrb[35].mxu1  ;;  %v11315_v38 = vmax.f32 %v11187_v22, 0.0  ;;  %v11426_v1 = vld [vmem:[%s22543_s7 + $0xc8] sm:$0xff] }
 0xac4   :  { %v11186_v37 = vadd.f32 %v21741_v4, %v10093_v53  ;;  %v11313_v62 = vmax.f32 %v11185_v3, 0.0  ;;  %v10994_v4 = vpop.permute.xlu0 %10993  ;;  %v14379_v22 = vcombine.low %v11426_v1, %v11430_v23 }
 0xac5   :  { %12563 = vmatmul.mubr.bf16.gmra.mrb[180].mxu0 %v14363_v55  ;;  %v11316_v0 = vmax.f32 %v11188_v29, 0.0 }
 0xac6   :  { %15037 = vmatpush3.bf16.msra.mxu0 %v21644_v58  ;;  %12570 = vmatprep.mubr.bf16.mxu0 %v14372_v12  ;;  %v11314_v48 = vmax.f32 %v11186_v37, 0.0  ;;  %v14371_v58 = vcombine.low %v11418_v17, %v11422_v60 }
 0xac7   :  { %15038 = vmatprep.subr.bf16.mxu0 %v21732_v63  ;;  %v21821_v40 = vpack.c.bf16 %v11316_v0, %v11315_v38  ;;  %v14380_v63 = vcombine.high %v11426_v1, %v11430_v23 }
 0xac8   :  { %v21823_v10 = vpack.c.bf16 %v11314_v48, %v11313_v62  ;;  %v15912_v16 = vpop.f32.mrb[36].mxu1 }
 0xac9   :  { %v11191_v14 = vadd.f32 %v15912_v16, %v10994_v4  ;;  %v10106_v2 = vpop.f32.mrb[37].mxu1 }
 0xaca   :  { %15039 = vmatpush3.bf16.msra.mxu0 %v21639_v33  ;;  %v11189_v51 = vadd.f32 %v10984_v59, %v10106_v2  ;;  %v15913_v57 = vpop.f32.mrb[38].mxu1  ;;  %v11434_v33 = vld [vmem:[%s22543_s7 + $0x108] sm:$0xff] }
 0xacb   :  { %15040 = vmatprep.subr.bf16.mxu0 %v21751_v11  ;;  %v11192_v9 = vadd.f32 %v15913_v57, %v10999_v36  ;;  %v10109_v13 = vpop.f32.mrb[39].mxu1  ;;  %v11319_v31 = vmax.f32 %v11191_v14, 0.0  ;;  %v11438_v11 = vld [vmem:[%s22543_s7 + $0x128] sm:$0xff] }
 0xacc   :  { %v11190_v20 = vadd.f32 %v10989_v56, %v10109_v13  ;;  %v11317_v17 = vmax.f32 %v11189_v51, 0.0  ;;  %v14387_v62 = vcombine.low %v11434_v33, %v11438_v11 }
 0xacd   :  { %12571 = vmatmul.mubr.bf16.gmra.mrb[184].mxu0 %v14371_v58  ;;  %v11320_v46 = vmax.f32 %v11192_v9, 0.0 }
 0xace   :  { %15041 = vmatpush3.bf16.msra.mxu0 %v21666_v61  ;;  %12578 = vmatprep.mubr.bf16.mxu0 %v14380_v63  ;;  %v11318_v60 = vmax.f32 %v11190_v20, 0.0 }
 0xacf   :  { %15042 = vmatprep.subr.bf16.mxu0 %v21749_v18  ;;  %v21835_v59 = vpack.c.bf16 %v11320_v46, %v11319_v31  ;;  %v14388_v18 = vcombine.high %v11434_v33, %v11438_v11 }
 0xad0   :  { %v21837_v56 = vpack.c.bf16 %v11318_v60, %v11317_v17  ;;  %v15916_v55 = vpop.f32.mrb[40].mxu1 }
 0xad1   :  { %v11195_v61 = vadd.f32 %v15916_v55, %v21618_v5  ;;  %v10122_v15 = vpop.f32.mrb[41].mxu1 }
 0xad2   :  { %15043 = vmatpush3.bf16.msra.mxu0 %v21663_v6  ;;  %v11193_v12 = vadd.f32 %v21583_v44, %v10122_v15  ;;  %v15917_v3 = vpop.f32.mrb[42].mxu1  ;;  %v11442_v44 = vld [vmem:[%s22543_s7 + $0x148] sm:$0xff] }
 0xad3   :  { %15044 = vmatprep.subr.bf16.mxu0 %v21769_v25  ;;  %v11196_v39 = vadd.f32 %v15917_v3, %v21625_v43  ;;  %v10125_v29 = vpop.f32.mrb[43].mxu1  ;;  %v11323_v37 = vmax.f32 %v11195_v61, 0.0  ;;  %v11446_v43 = vld [vmem:[%s22543_s7 + $0x168] sm:$0xff] }
 0xad4   :  { %v11194_v53 = vadd.f32 %v21592_v41, %v10125_v29  ;;  %v11321_v5 = vmax.f32 %v11193_v12, 0.0  ;;  %v14396_v1 = vcombine.high %v11442_v44, %v11446_v43 }
 0xad5   :  { %12579 = vmatmul.mubr.bf16.gmra.mrb[188].mxu0 %v14379_v22  ;;  %v11324_v38 = vmax.f32 %v11196_v39, 0.0 }
 0xad6   :  { %15045 = vmatpush3.bf16.msra.mxu0 %v21690_v30  ;;  %12586 = vmatprep.mubr.bf16.mxu0 %v14388_v18  ;;  %v11322_v6 = vmax.f32 %v11194_v53, 0.0 }
 0xad7   :  { %15046 = vmatprep.subr.bf16.mxu0 %v21767_v47  ;;  %v21853_v25 = vpack.c.bf16 %v11324_v38, %v11323_v37 }
 0xad8   :  { %v11393_v41 = vpack.c.bf16 %v11322_v6, %v11321_v5  ;;  %v15920_v0 = vpop.f32.mrb[44].mxu1 }
 0xad9   :  { %v11199_v30 = vadd.f32 %v15920_v0, %v21688_v28  ;;  %v10138_v48 = vpop.f32.mrb[45].mxu1 }
 0xada   :  { %15047 = vmatpush3.bf16.msra.mxu0 %v21685_v7  ;;  %v11197_v47 = vadd.f32 %v21652_v42, %v10138_v48  ;;  %v15921_v23 = vpop.f32.mrb[46].mxu1  ;;  %v11450_v7 = vld [vmem:[%s22543_s7 + $0x188] sm:$0xff] }
 0xadb   :  { %15144 = vmatprep.subr.bf16.mxu0 %v11393_v41  ;;  %v11200_v4 = vadd.f32 %v15921_v23, %v21695_v49  ;;  %v10141_v16 = vpop.f32.mrb[47].mxu1  ;;  %v11327_v14 = vmax.f32 %v11199_v30, 0.0  ;;  %v11454_v42 = vld [vmem:[%s22543_s7 + $0x1a8] sm:$0xff] }
 0xadc   :  { %v11198_v58 = vadd.f32 %v21661_v19, %v10141_v16  ;;  %v11325_v63 = vmax.f32 %v11197_v47, 0.0  ;;  %v14395_v19 = vcombine.low %v11442_v44, %v11446_v43  ;;  %v14404_v13 = vcombine.high %v11450_v7, %v11454_v42  ;;  %v11478_v30 = vld [vmem:[%s22543_s7 + $0x268] sm:$0xff] }
 0xadd   :  { %12587 = vmatmul.mubr.bf16.gmra.mrb[192].mxu0 %v14387_v62  ;;  %v11328_v2 = vmax.f32 %v11200_v4, 0.0  ;;  %v11474_v62 = vld [vmem:[%s22543_s7 + $0x248] sm:$0xff] }
 0xade   :  { %12594 = vmatprep.mubr.bf16.mxu0 %v14396_v1  ;;  %v11326_v36 = vmax.f32 %v11198_v58, 0.0  ;;  %v14428_v1 = vcombine.high %v11474_v62, %v11478_v30  ;;  %v11482_v47 = vld [vmem:[%s22543_s7 + $0x288] sm:$0xff]  ;;  %v14427_v4 = vcombine.low %v11474_v62, %v11478_v30 }
 0xadf   :  { %v21866_v28 = vpack.c.bf16 %v11328_v2, %v11327_v14  ;;  %v11486_v23 = vld [vmem:[%s22543_s7 + $0x2a8] sm:$0xff] }
 0xae0   :  { %v21868_v49 = vpack.c.bf16 %v11326_v36, %v11325_v63  ;;  %v15924_v51 = vpop.f32.mrb[48].mxu1  ;;  %v14436_v16 = vcombine.high %v11482_v47, %v11486_v23  ;;  %v11490_v58 = vld [vmem:[%s22543_s7 + $0x2c8] sm:$0xff]  ;;  %v14435_v2 = vcombine.low %v11482_v47, %v11486_v23  ;;  %v11407_v47 = vld [vmem:[%s22543_s7 + $0x30] sm:$0xff] }
 0xae1   :  { %v11203_v57 = vadd.f32 %v15924_v51, %v21754_v54  ;;  %v10154_v9 = vpop.f32.mrb[49].mxu1  ;;  %v11458_v54 = vld [vmem:[%s22543_s7 + $0x1c8] sm:$0xff] }
 0xae2   :  { %v11201_v20 = vadd.f32 %v21720_v24, %v10154_v9  ;;  %v15925_v31 = vpop.f32.mrb[50].mxu1  ;;  %v11462_v24 = vld [vmem:[%s22543_s7 + $0x1e8] sm:$0xff] }
 0xae3   :  { %v11204_v46 = vadd.f32 %v15925_v31, %v21758_v35  ;;  %v10157_v17 = vpop.f32.mrb[51].mxu1  ;;  %v11331_v33 = vmax.f32 %v11203_v57, 0.0  ;;  %v14412_v3 = vcombine.high %v11458_v54, %v11462_v24  ;;  %v14411_v0 = vcombine.low %v11458_v54, %v11462_v24  ;;  %v11494_v14 = vld [vmem:[%s22543_s7 + $0x2e8] sm:$0xff] }
 0xae4   :  { %v11202_v60 = vadd.f32 %v21729_v52, %v10157_v17  ;;  %v11329_v55 = vmax.f32 %v11201_v20, 0.0  ;;  %v14403_v52 = vcombine.low %v11450_v7, %v11454_v42  ;;  %v14444_v63 = vcombine.high %v11490_v58, %v11494_v14  ;;  %v11498_v36 = vld [vmem:[%s22543_s7 + $0x308] sm:$0xff] }
 0xae5   :  { %12595 = vmatmul.mubr.bf16.gmra.mrb[196].mxu0 %v14395_v19  ;;  %v11332_v11 = vmax.f32 %v11204_v46, 0.0  ;;  %v11502_v7 = vld [vmem:[%s22543_s7 + $0x328] sm:$0xff]  ;;  %v14443_v19 = vcombine.low %v11490_v58, %v11494_v14 }
 0xae6   :  { %12602 = vmatprep.mubr.bf16.mxu0 %v14404_v13  ;;  %v11330_v22 = vmax.f32 %v11202_v60, 0.0  ;;  %v14452_v13 = vcombine.high %v11498_v36, %v11502_v7  ;;  %v11506_v46 = vld [vmem:[%s22543_s7 + $0x348] sm:$0xff] }
 0xae7   :  { %v21880_v61 = vpack.c.bf16 %v11332_v11, %v11331_v33  ;;  %v11510_v17 = vld [vmem:[%s22543_s7 + $0x368] sm:$0xff]  ;;  %v14451_v11 = vcombine.low %v11498_v36, %v11502_v7  ;;  %v11411_v7 = vld [vmem:[%s22543_s7 + $0x50] sm:$0xff] }
 0xae8   :  { %v21882_v35 = vpack.c.bf16 %v11330_v22, %v11329_v55  ;;  %v15928_v15 = vpop.f32.mrb[52].mxu1  ;;  %v14460_v54 = vcombine.high %v11506_v46, %v11510_v17 }
 0xae9   :  { %v11207_v18 = vadd.f32 %v15928_v15, %v21806_v34  ;;  %v10170_v12 = vpop.f32.mrb[53].mxu1  ;;  %v11466_v34 = vld [vmem:[%s22543_s7 + $0x208] sm:$0xff] }
 0xaea   :  { %v11205_v39 = vadd.f32 %v21775_v26, %v10170_v12  ;;  %v15929_v29 = vpop.f32.mrb[54].mxu1  ;;  %v11470_v26 = vld [vmem:[%s22543_s7 + $0x228] sm:$0xff] }
 0xaeb   :  { %v11208_v53 = vadd.f32 %v15929_v29, %v21810_v27  ;;  %v10173_v37 = vpop.f32.mrb[55].mxu1  ;;  %v11335_v5 = vmax.f32 %v11207_v18, 0.0  ;;  %v14419_v48 = vcombine.low %v11466_v34, %v11470_v26  ;;  %v11518_v18 = vld [vmem:[%s22543_s7 + $0x3a8] sm:$0xff] }
 0xaec   :  { %v11206_v38 = vadd.f32 %v21785_v8, %v10173_v37  ;;  %v11333_v44 = vmax.f32 %v11205_v39, 0.0  ;;  %v14420_v8 = vcombine.high %v11466_v34, %v11470_v26  ;;  %v14459_v39 = vcombine.low %v11506_v46, %v11510_v17 }
 0xaed   :  { %12603 = vmatmul.mubr.bf16.gmra.mrb[200].mxu0 %v14403_v52  ;;  %v11336_v6 = vmax.f32 %v11208_v53, 0.0  ;;  %v11514_v52 = vld [vmem:[%s22543_s7 + $0x388] sm:$0xff] }
 0xaee   :  { %12610 = vmatprep.mubr.bf16.mxu0 %v14412_v3  ;;  %v11334_v43 = vmax.f32 %v11206_v38, 0.0  ;;  %v14468_v37 = vcombine.high %v11514_v52, %v11518_v18  ;;  %v14467_v26 = vcombine.low %v11514_v52, %v11518_v18 }
 0xaef   :  { %v21894_v41 = vpack.c.bf16 %v11336_v6, %v11335_v5  ;;  %v11522_v6 = vld [vmem:[%s22543_s7 + $0x3c8] sm:$0xff] }
 0xaf0   :  { %v21896_v27 = vpack.c.bf16 %v11334_v43, %v11333_v44  ;;  %v11526_v44 = vld [vmem:[%s22543_s7 + $0x3e8] sm:$0xff] }
 0xaf1   :  { %v14476_v62 = vcombine.high %v11522_v6, %v11526_v44 }
 0xaf5   :  { %12611 = vmatmul.mubr.bf16.gmra.mrb[204].mxu0 %v14411_v0 }
 0xaf6   :  { %12618 = vmatprep.mubr.bf16.mxu0 %v14420_v8 }
 0xafd   :  { %12619 = vmatmul.mubr.bf16.gmra.mrb[208].mxu0 %v14419_v48 }
 0xafe   :  { %12626 = vmatprep.mubr.bf16.mxu0 %v14428_v1  ;;  %v11403_v1 = vld [vmem:[%s22543_s7 + $0x10] sm:$0xff] }
 0xb05   :  { %12627 = vmatmul.mubr.bf16.gmra.mrb[212].mxu0 %v14427_v4 }
 0xb06   :  { %12634 = vmatprep.mubr.bf16.mxu0 %v14436_v16  ;;  %v14475_v16 = vcombine.low %v11522_v6, %v11526_v44  ;;  %v11435_v44 = vld [vmem:[%s22543_s7 + $0x110] sm:$0xff] }
 0xb0d   :  { %12635 = vmatmul.mubr.bf16.gmra.mrb[216].mxu0 %v14435_v2  ;;  %v14358_v2 = vcombine.high %v11403_v1, %v11407_v47 }
 0xb0e   :  { %12642 = vmatprep.mubr.bf16.mxu0 %v14444_v63 }
 0xb10   :  { %v14824_v42 = vpop.f32.mrb[112].mxu0 }
 0xb11   :  { %v14825_v51 = vpop.f32.mrb[113].mxu0 }
 0xb12   :  { %v21922_v57 = vadd.f32 %v14825_v51, %v14824_v42  ;;  %v14827_v9 = vpop.f32.mrb[114].mxu0  ;;  %v11415_v42 = vld [vmem:[%s22543_s7 + $0x70] sm:$0xff] }
 0xb13   :  { %v14828_v20 = vpop.f32.mrb[115].mxu0  ;;  %v14366_v46 = vcombine.high %v11411_v7, %v11415_v42 }
 0xb14   :  { %v21924_v31 = vadd.f32 %v14828_v20, %v14827_v9  ;;  %v14357_v9 = vcombine.low %v11403_v1, %v11407_v47 }
 0xb15   :  { %12643 = vmatmul.mubr.bf16.gmra.mrb[220].mxu0 %v14443_v19 }
 0xb16   :  { %12650 = vmatprep.mubr.bf16.mxu0 %v14452_v13 }
 0xb18   :  { %v14830_v60 = vpop.f32.mrb[116].mxu0 }
 0xb19   :  { %v14831_v33 = vpop.f32.mrb[117].mxu0 }
 0xb1a   :  { %v21932_v55 = vadd.f32 %v14831_v33, %v14830_v60  ;;  %v14833_v22 = vpop.f32.mrb[118].mxu0  ;;  %v11419_v33 = vld [vmem:[%s22543_s7 + $0x90] sm:$0xff] }
 0xb1b   :  { %v14834_v24 = vpop.f32.mrb[119].mxu0 }
 0xb1c   :  { %v21934_v15 = vadd.f32 %v14834_v24, %v14833_v22  ;;  %v14365_v24 = vcombine.low %v11411_v7, %v11415_v42 }
 0xb1d   :  { %12651 = vmatmul.mubr.bf16.gmra.mrb[224].mxu0 %v14451_v11  ;;  %v11423_v11 = vld [vmem:[%s22543_s7 + $0xb0] sm:$0xff] }
 0xb1e   :  { %12658 = vmatprep.mubr.bf16.mxu0 %v14460_v54 }
 0xb20   :  { %v14836_v12 = vpop.f32.mrb[120].mxu0 }
 0xb21   :  { %v14837_v3 = vpop.f32.mrb[121].mxu0 }
 0xb22   :  { %v21942_v29 = vadd.f32 %v14837_v3, %v14836_v12  ;;  %v14839_v53 = vpop.f32.mrb[122].mxu0  ;;  %v11427_v3 = vld [vmem:[%s22543_s7 + $0xd0] sm:$0xff] }
 0xb23   :  { %v14840_v38 = vpop.f32.mrb[123].mxu0 }
 0xb24   :  { %v21944_v5 = vadd.f32 %v14840_v38, %v14839_v53 }
 0xb25   :  { %12659 = vmatmul.mubr.bf16.gmra.mrb[228].mxu0 %v14459_v39 }
 0xb26   :  { %12666 = vmatprep.mubr.bf16.mxu0 %v14468_v37 }
 0xb28   :  { %v14842_v43 = vpop.f32.mrb[124].mxu0 }
 0xb29   :  { %v14843_v34 = vpop.f32.mrb[125].mxu0 }
 0xb2a   :  { %v21952_v0 = vadd.f32 %v14843_v34, %v14842_v43  ;;  %v14845_v8 = vpop.f32.mrb[126].mxu0 }
 0xb2b   :  { %v14846_v30 = vpop.f32.mrb[127].mxu0 }
 0xb2c   :  { %v21954_v48 = vadd.f32 %v14846_v30, %v14845_v8  ;;  %v11443_v30 = vld [vmem:[%s22543_s7 + $0x150] sm:$0xff] }
 0xb2d   :  { %12667 = vmatmul.mubr.bf16.gmra.mrb[232].mxu0 %v14467_v26 }
 0xb2e   :  { %12674 = vmatprep.mubr.bf16.mxu0 %v14476_v62 }
 0xb30   :  { %v14848_v23 = vpop.f32.mrb[128].mxu0 }
 0xb31   :  { %v14849_v4 = vpop.f32.mrb[129].mxu0 }
 0xb32   :  { %v21962_v58 = vadd.f32 %v14849_v4, %v14848_v23  ;;  %v14851_v14 = vpop.f32.mrb[130].mxu0 }
 0xb33   :  { %v14852_v63 = vpop.f32.mrb[131].mxu0 }
 0xb34   :  { %v21964_v36 = vadd.f32 %v14852_v63, %v14851_v14 }
 0xb35   :  { %12675 = vmatmul.mubr.bf16.gmra.mrb[236].mxu0 %v14475_v16 }
 0xb36   :  { %12715 = vmatprep.mubr.bf16.mxu0 %v14358_v2  ;;  %v11455_v2 = vld [vmem:[%s22543_s7 + $0x1b0] sm:$0xff] }
 0xb38   :  { %v14854_v51 = vpop.f32.mrb[132].mxu0 }
 0xb39   :  { %v14855_v19 = vpop.f32.mrb[133].mxu0 }
 0xb3a   :  { %v21972_v13 = vadd.f32 %v14855_v19, %v14854_v51  ;;  %v14857_v20 = vpop.f32.mrb[134].mxu0 }
 0xb3b   :  { %v14858_v17 = vpop.f32.mrb[135].mxu0 }
 0xb3c   :  { %v21974_v60 = vadd.f32 %v14858_v17, %v14857_v20  ;;  %v11463_v17 = vld [vmem:[%s22543_s7 + $0x1f0] sm:$0xff] }
 0xb3d   :  { %12716 = vmatmul.mubr.bf16.vlgmr.msra.gmra.mrb[240].mxu0 %v14357_v9 }
 0xb3e   :  { %15145 = vmatpush3.bf16.msra.mxu0 %v21787_v45  ;;  %12723 = vmatprep.mubr.bf16.mxu0 %v14366_v46  ;;  %v14374_v45 = vcombine.high %v11419_v33, %v11423_v11  ;;  %v11459_v46 = vld [vmem:[%s22543_s7 + $0x1d0] sm:$0xff] }
 0xb3f   :  { %15146 = vmatprep.subr.bf16.mxu0 %v21853_v25 }
 0xb40   :  { %v14860_v22 = vpop.f32.mrb[136].mxu0 }
 0xb41   :  { %v14861_v54 = vpop.f32.mrb[137].mxu0 }
 0xb42   :  { %v21984_v52 = vadd.f32 %v14861_v54, %v14860_v22  ;;  %15147 = vmatpush3.bf16.msra.mxu0 %v21783_v21  ;;  %v14863_v18 = vpop.f32.mrb[138].mxu0  ;;  %v11431_v21 = vld [vmem:[%s22543_s7 + $0xf0] sm:$0xff] }
 0xb43   :  { %15148 = vmatprep.subr.bf16.mxu0 %v21868_v49  ;;  %v14864_v25 = vpop.f32.mrb[139].mxu0  ;;  %v14373_v49 = vcombine.low %v11419_v33, %v11423_v11 }
 0xb44   :  { %v21988_v12 = vadd.f32 %v14864_v25, %v14863_v18  ;;  %v14414_v18 = vcombine.high %v11459_v46, %v11463_v17 }
 0xb45   :  { %12724 = vmatmul.mubr.bf16.gmra.mrb[244].mxu0 %v14365_v24 }
 0xb46   :  { %15149 = vmatpush3.bf16.msra.mxu0 %v21803_v32  ;;  %12731 = vmatprep.mubr.bf16.mxu0 %v14374_v45  ;;  %v14382_v32 = vcombine.high %v11427_v3, %v11431_v21 }
 0xb47   :  { %15150 = vmatprep.subr.bf16.mxu0 %v21866_v28 }
 0xb48   :  { %v14866_v39 = vpop.f32.mrb[140].mxu0 }
 0xb49   :  { %v14867_v53 = vpop.f32.mrb[141].mxu0 }
 0xb4a   :  { %v21998_v37 = vadd.f32 %v14867_v53, %v14866_v39  ;;  %15151 = vmatpush3.bf16.msra.mxu0 %v21801_v50  ;;  %v14869_v38 = vpop.f32.mrb[142].mxu0  ;;  %v11439_v50 = vld [vmem:[%s22543_s7 + $0x130] sm:$0xff] }
 0xb4b   :  { %15152 = vmatprep.subr.bf16.mxu0 %v21882_v35  ;;  %v14870_v28 = vpop.f32.mrb[143].mxu0  ;;  %v14381_v35 = vcombine.low %v11427_v3, %v11431_v21  ;;  %v22051_v3 = vpop.permute.xlu0 %11643  ;;  %v11467_v21 = vld [vmem:[%s22543_s7 + $0x210] sm:$0xff] }
 0xb4c   :  { %v22002_v6 = vadd.f32 %v14870_v28, %v14869_v38  ;;  %v11471_v39 = vld [vmem:[%s22543_s7 + $0x230] sm:$0xff] }
 0xb4d   :  { %12732 = vmatmul.mubr.bf16.gmra.mrb[248].mxu0 %v14373_v49  ;;  %v22059_v49 = vpop.permute.xlu1 %11648 }
 0xb4e   :  { %15153 = vmatpush3.bf16.msra.mxu0 %v21823_v10  ;;  %12739 = vmatprep.mubr.bf16.mxu0 %v14382_v32  ;;  %v14390_v10 = vcombine.high %v11435_v44, %v11439_v50  ;;  %v14413_v32 = vcombine.low %v11459_v46, %v11463_v17 }
 0xb4f   :  { %15154 = vmatprep.subr.bf16.mxu0 %v21880_v61 }
 0xb50   :  { %v14872_v43 = vpop.f32.mrb[144].mxu0 }
 0xb51   :  { %v14873_v34 = vpop.f32.mrb[145].mxu0 }
 0xb52   :  { %v22012_v26 = vadd.f32 %v14873_v34, %v14872_v43  ;;  %15155 = vmatpush3.bf16.msra.mxu0 %v21821_v40  ;;  %v14875_v8 = vpop.f32.mrb[146].mxu0  ;;  %v11447_v40 = vld [vmem:[%s22543_s7 + $0x170] sm:$0xff] }
 0xb53   :  { %15156 = vmatprep.subr.bf16.mxu0 %v21896_v27  ;;  %v14876_v61 = vpop.f32.mrb[147].mxu0  ;;  %v14389_v27 = vcombine.low %v11435_v44, %v11439_v50  ;;  %v14397_v42 = vcombine.low %v11443_v30, %v11447_v40  ;;  %v14422_v50 = vcombine.high %v11467_v21, %v11471_v39 }
 0xb54   :  { %v22016_v62 = vadd.f32 %v14876_v61, %v14875_v8  ;;  %v11569_v8 = vpop.permute.xlu1 %11568  ;;  %v11479_v61 = vld [vmem:[%s22543_s7 + $0x270] sm:$0xff] }
 0xb55   :  { %12740 = vmatmul.mubr.bf16.gmra.mrb[252].mxu0 %v14381_v35  ;;  %v11564_v35 = vpop.permute.xlu0 %11563 }
 0xb56   :  { %15157 = vmatpush3.bf16.msra.mxu0 %v21837_v56  ;;  %12747 = vmatprep.mubr.bf16.mxu0 %v14390_v10  ;;  %v14398_v56 = vcombine.high %v11443_v30, %v11447_v40  ;;  %v11475_v10 = vld [vmem:[%s22543_s7 + $0x250] sm:$0xff] }
 0xb57   :  { %15158 = vmatprep.subr.bf16.mxu0 %v21894_v41  ;;  %v11451_v41 = vld [vmem:[%s22543_s7 + $0x190] sm:$0xff] }
 0xb58   :  { %v14878_v1 = vpop.f32.mrb[148].mxu0  ;;  %v14406_v19 = vcombine.high %v11451_v41, %v11455_v2  ;;  %v14405_v22 = vcombine.low %v11451_v41, %v11455_v2  ;;  %v22077_v2 = vpop.permute.xlu1 %11658 }
 0xb59   :  { %v14879_v47 = vpop.f32.mrb[149].mxu0 }
 0xb5a   :  { %v22026_v23 = vadd.f32 %v14879_v47, %v14878_v1  ;;  %15159 = vmatpush3.bf16.msra.mxu0 %v21835_v59  ;;  %v14881_v4 = vpop.f32.mrb[150].mxu0  ;;  %v14421_v1 = vcombine.low %v11467_v21, %v11471_v39  ;;  %v11495_v21 = vld [vmem:[%s22543_s7 + $0x2f0] sm:$0xff] }
 0xb5b   :  { %v14882_v16 = vpop.f32.mrb[151].mxu0 }
 0xb5c   :  { %v22029_v14 = vadd.f32 %v14882_v16, %v14881_v4  ;;  %v14430_v4 = vcombine.high %v11475_v10, %v11479_v61 }
 0xb5d   :  { %12748 = vmatmul.mubr.bf16.gmra.mrb[0].mxu0 %v14389_v27 }
 0xb5e   :  { %12755 = vmatprep.mubr.bf16.mxu0 %v14398_v56  ;;  %v22073_v56 = vpop.permute.xlu0 %11653 }
 0xb60   :  { %v14884_v63 = vpop.f32.mrb[152].mxu0 }
 0xb61   :  { %v14885_v7 = vpop.f32.mrb[153].mxu0 }
 0xb62   :  { %v22037_v51 = vadd.f32 %v14885_v7, %v14884_v63  ;;  %v14887_v59 = vpop.f32.mrb[154].mxu0  ;;  %v11483_v63 = vld [vmem:[%s22543_s7 + $0x290] sm:$0xff] }
 0xb63   :  { %v14888_v9 = vpop.f32.mrb[155].mxu0  ;;  %v11487_v7 = vld [vmem:[%s22543_s7 + $0x2b0] sm:$0xff] }
 0xb64   :  { %v22039_v20 = vadd.f32 %v14888_v9, %v14887_v59  ;;  %v11574_v59 = vpop.permute.xlu0 %11573  ;;  %v14429_v9 = vcombine.low %v11475_v10, %v11479_v61 }
 0xb65   :  { %12756 = vmatmul.mubr.bf16.gmra.mrb[4].mxu0 %v14397_v42 }
 0xb66   :  { %12763 = vmatprep.mubr.bf16.mxu0 %v14406_v19 }
 0xb68   :  { %v14890_v33 = vpop.f32.mrb[156].mxu0 }
 0xb69   :  { %v14891_v11 = vpop.f32.mrb[157].mxu0 }
 0xb6a   :  { %v22047_v54 = vadd.f32 %v14891_v11, %v14890_v33  ;;  %v14893_v24 = vpop.f32.mrb[158].mxu0  ;;  %v14438_v33 = vcombine.high %v11483_v63, %v11487_v7  ;;  %v11579_v11 = vpop.permute.xlu1 %11578 }
 0xb6b   :  { %v14894_v45 = vpop.f32.mrb[159].mxu0 }
 0xb6c   :  { %v22049_v25 = vadd.f32 %v14894_v45, %v14893_v24  ;;  %v11491_v45 = vld [vmem:[%s22543_s7 + $0x2d0] sm:$0xff] }
 0xb6d   :  { %12764 = vmatmul.mubr.bf16.gmra.mrb[8].mxu0 %v14405_v22 }
 0xb6e   :  { %12771 = vmatprep.mubr.bf16.mxu0 %v14414_v18  ;;  %v22089_v18 = vpop.permute.xlu0 %11663 }
 0xb70   :  { %v14896_v53 = vpop.f32.mrb[160].mxu0 }
 0xb71   :  { %v14897_v38 = vpop.f32.mrb[161].mxu0 }
 0xb72   :  { %v22061_v28 = vadd.f32 %v14897_v38, %v14896_v53  ;;  %v14899_v44 = vpop.f32.mrb[162].mxu0  ;;  %v22097_v53 = vpop.permute.xlu1 %11668 }
 0xb73   :  { %v14900_v43 = vpop.f32.mrb[163].mxu0 }
 0xb74   :  { %v22063_v34 = vadd.f32 %v14900_v43, %v14899_v44  ;;  %v14446_v43 = vcombine.high %v11491_v45, %v11495_v21 }
 0xb75   :  { %12772 = vmatmul.mubr.bf16.gmra.mrb[12].mxu0 %v14413_v32  ;;  %v14437_v32 = vcombine.low %v11483_v63, %v11487_v7  ;;  %v14445_v63 = vcombine.low %v11491_v45, %v11495_v21  ;;  %v12396_v7 = vadd.f32 %v21922_v57, %v11564_v35  ;;  %v11507_v57 = vld [vmem:[%s22543_s7 + $0x350] sm:$0xff] }
 0xb76   :  { %12779 = vmatprep.mubr.bf16.mxu0 %v14422_v50  ;;  %v11511_v35 = vld [vmem:[%s22543_s7 + $0x370] sm:$0xff] }
 0xb78   :  { %v14902_v30 = vpop.f32.mrb[164].mxu0 }
 0xb79   :  { %v14903_v40 = vpop.f32.mrb[165].mxu0 }
 0xb7a   :  { %v22071_v47 = vadd.f32 %v14903_v40, %v14902_v30  ;;  %v14905_v27 = vpop.f32.mrb[166].mxu0  ;;  %v11584_v30 = vpop.permute.xlu0 %11583 }
 0xb7b   :  { %v14906_v16 = vpop.f32.mrb[167].mxu0  ;;  %v11589_v40 = vpop.permute.xlu1 %11588 }
 0xb7c   :  { %v22075_v41 = vadd.f32 %v14906_v16, %v14905_v27  ;;  %v11503_v27 = vld [vmem:[%s22543_s7 + $0x330] sm:$0xff] }
 0xb7d   :  { %12780 = vmatmul.mubr.bf16.gmra.mrb[16].mxu0 %v14421_v1  ;;  %v11499_v1 = vld [vmem:[%s22543_s7 + $0x310] sm:$0xff] }
 0xb7e   :  { %12787 = vmatprep.mubr.bf16.mxu0 %v14430_v4 }
 0xb80   :  { %v14908_v42 = vpop.f32.mrb[168].mxu0 }
 0xb81   :  { %v14909_v19 = vpop.f32.mrb[169].mxu0 }
 0xb82   :  { %v22085_v46 = vadd.f32 %v14909_v19, %v14908_v42  ;;  %v14911_v17 = vpop.f32.mrb[170].mxu0 }
 0xb83   :  { %v14912_v22 = vpop.f32.mrb[171].mxu0 }
 0xb84   :  { %v22087_v24 = vadd.f32 %v14912_v22, %v14911_v17  ;;  %v22110_v17 = vpop.permute.xlu0 %11673 }
 0xb85   :  { %12788 = vmatmul.mubr.bf16.gmra.mrb[20].mxu0 %v14429_v9  ;;  %v14454_v9 = vcombine.high %v11499_v1, %v11503_v27 }
 0xb86   :  { %12795 = vmatprep.mubr.bf16.mxu0 %v14438_v33 }
 0xb88   :  { %v14914_v39 = vpop.f32.mrb[172].mxu0  ;;  %v11594_v21 = vpop.permute.xlu0 %11593 }
 0xb89   :  { %v14915_v38 = vpop.f32.mrb[173].mxu0 }
 0xb8a   :  { %v22099_v44 = vadd.f32 %v14915_v38, %v14914_v39  ;;  %v14917_v50 = vpop.f32.mrb[174].mxu0  ;;  %v12399_v39 = vadd.f32 %v21924_v31, %v11569_v8  ;;  %v12404_v31 = vadd.f32 %v21932_v55, %v11574_v59  ;;  %v11515_v55 = vld [vmem:[%s22543_s7 + $0x390] sm:$0xff] }
 0xb8b   :  { %v14918_v10 = vpop.f32.mrb[175].mxu0  ;;  %v11519_v59 = vld [vmem:[%s22543_s7 + $0x3b0] sm:$0xff] }
 0xb8c   :  { %v22101_v61 = vadd.f32 %v14918_v10, %v14917_v50  ;;  %v14453_v10 = vcombine.low %v11499_v1, %v11503_v27 }
 0xb8d   :  { %12796 = vmatmul.mubr.bf16.gmra.mrb[24].mxu0 %v14437_v32  ;;  %v22115_v32 = vpop.permute.xlu1 %11678 }
 0xb8e   :  { %12803 = vmatprep.mubr.bf16.mxu0 %v14446_v43 }
 0xb90   :  { %v14936_v4 = vpop.f32.mrb[176].mxu0 }
 0xb91   :  { %v14937_v16 = vpop.f32.mrb[177].mxu0 }
 0xb92   :  { %v14938_v42 = vadd.f32 %v14937_v16, %v14936_v4  ;;  %v14939_v19 = vpop.f32.mrb[178].mxu0  ;;  %v14462_v16 = vcombine.high %v11507_v57, %v11511_v35 }
 0xb93   :  { %v14940_v33 = vpop.f32.mrb[179].mxu0 }
 0xb94   :  { %v22112_v22 = vadd.f32 %v14938_v42, %v12396_v7  ;;  %v14941_v38 = vadd.f32 %v14940_v33, %v14939_v19  ;;  %v12407_v42 = vadd.f32 %v21934_v15, %v11579_v11  ;;  %v14461_v11 = vcombine.low %v11507_v57, %v11511_v35  ;;  %v11523_v57 = vld [vmem:[%s22543_s7 + $0x3d0] sm:$0xff] }
 0xb95   :  { %12804 = vmatmul.mubr.bf16.gmra.mrb[28].mxu0 %v14445_v63  ;;  %v11599_v63 = vpop.permute.xlu1 %11598 }
 0xb96   :  { %v22117_v50 = vadd.f32 %v14941_v38, %v12399_v39  ;;  %12811 = vmatprep.mubr.bf16.mxu0 %v14454_v9  ;;  %v22131_v39 = vpop.permute.xlu0 %11683  ;;  %v12412_v38 = vadd.f32 %v21942_v29, %v11584_v30  ;;  %v11527_v29 = vld [vmem:[%s22543_s7 + $0x3f0] sm:$0xff] }
 0xb98   :  { %v14942_v45 = vpop.f32.mrb[180].mxu0 }
 0xb99   :  { %v14943_v43 = vpop.f32.mrb[181].mxu0  ;;  %v22139_v27 = vpop.permute.xlu1 %11688 }
 0xb9a   :  { %v14944_v8 = vadd.f32 %v14943_v43, %v14942_v45  ;;  %v14945_v4 = vpop.f32.mrb[182].mxu0 }
 0xb9b   :  { %v14946_v7 = vpop.f32.mrb[183].mxu0 }
 0xb9c   :  { %v22127_v19 = vadd.f32 %v14944_v8, %v12404_v31  ;;  %v14947_v9 = vadd.f32 %v14946_v7, %v14945_v4  ;;  %v12415_v8 = vadd.f32 %v21944_v5, %v11589_v40  ;;  %v11604_v7 = vpop.permute.xlu0 %11603  ;;  %v14469_v5 = vcombine.low %v11515_v55, %v11519_v59 }
 0xb9d   :  { %12812 = vmatmul.mubr.bf16.gmra.mrb[32].mxu0 %v14453_v10  ;;  %v14470_v10 = vcombine.high %v11515_v55, %v11519_v59  ;;  %v12420_v40 = vadd.f32 %v21952_v0, %v11594_v21  ;;  %v11404_v0 = vld [vmem:[%s22543_s7 + $0x18] sm:$0xff] }
 0xb9e   :  { %v22129_v33 = vadd.f32 %v14947_v9, %v12407_v42  ;;  %12819 = vmatprep.mubr.bf16.mxu0 %v14462_v16  ;;  %v11609_v9 = vpop.permute.xlu1 %11608  ;;  %v11408_v21 = vld [vmem:[%s22543_s7 + $0x38] sm:$0xff] }
 0xba0   :  { %v14948_v1 = vpop.f32.mrb[184].mxu0 }
 0xba1   :  { %v14949_v15 = vpop.f32.mrb[185].mxu0 }
 0xba2   :  { %v14950_v45 = vadd.f32 %v14949_v15, %v14948_v1  ;;  %v14951_v43 = vpop.f32.mrb[186].mxu0 }
 0xba3   :  { %v14952_v31 = vpop.f32.mrb[187].mxu0 }
 0xba4   :  { %v22143_v4 = vadd.f32 %v14950_v45, %v12412_v38  ;;  %v14953_v16 = vadd.f32 %v14952_v31, %v14951_v43  ;;  %v22154_v38 = vpop.permute.xlu0 %11693  ;;  %v12423_v43 = vadd.f32 %v21954_v48, %v11599_v63  ;;  %v14477_v63 = vcombine.low %v11523_v57, %v11527_v29 }
 0xba5   :  { %12820 = vmatmul.mubr.bf16.gmra.mrb[36].mxu0 %v14461_v11  ;;  %v14478_v11 = vcombine.high %v11523_v57, %v11527_v29 }
 0xba6   :  { %v22145_v42 = vadd.f32 %v14953_v16, %v12415_v8  ;;  %12827 = vmatprep.mubr.bf16.mxu0 %v14470_v10  ;;  %v22159_v8 = vpop.permute.xlu1 %11698 }
 0xba8   :  { %v14954_v30 = vpop.f32.mrb[188].mxu0  ;;  %v11614_v59 = vpop.permute.xlu0 %11613 }
 0xba9   :  { %v14955_v35 = vpop.f32.mrb[189].mxu0 }
 0xbaa   :  { %v14956_v1 = vadd.f32 %v14955_v35, %v14954_v30  ;;  %v14957_v15 = vpop.f32.mrb[190].mxu0  ;;  %v12428_v30 = vadd.f32 %v21962_v58, %v11604_v7  ;;  %v11412_v58 = vld [vmem:[%s22543_s7 + $0x58] sm:$0xff] }
 0xbab   :  { %v14958_v45 = vpop.f32.mrb[191].mxu0  ;;  %v11416_v7 = vld [vmem:[%s22543_s7 + $0x78] sm:$0xff] }
 0xbac   :  { %v22157_v10 = vadd.f32 %v14956_v1, %v12420_v40  ;;  %v14959_v31 = vadd.f32 %v14958_v45, %v14957_v15  ;;  %v11619_v1 = vpop.permute.xlu1 %11618 }
 0xbad   :  { %12828 = vmatmul.mubr.bf16.gmra.mrb[40].mxu0 %v14469_v5  ;;  %v14360_v5 = vcombine.high %v11404_v0, %v11408_v21 }
 0xbae   :  { %v22161_v16 = vadd.f32 %v14959_v31, %v12423_v43  ;;  %12835 = vmatprep.mubr.bf16.mxu0 %v14478_v11  ;;  %v12431_v11 = vadd.f32 %v21964_v36, %v11609_v9  ;;  %v14359_v9 = vcombine.low %v11404_v0, %v11408_v21  ;;  %v11420_v0 = vld [vmem:[%s22543_s7 + $0x98] sm:$0xff] }
 0xbb0   :  { %23131 = vst [vmem:[#allocation20_spill] sm:$0xff] %v22161_v16  ;;  %v14960_v55 = vpop.f32.mrb[192].mxu0  ;;  %v22175_v16 = vpop.permute.xlu0 %11703 }
 0xbb1   :  { %v14961_v48 = vpop.f32.mrb[193].mxu0  ;;  %v22183_v29 = vpop.permute.xlu1 %11708 }
 0xbb2   :  { %v14962_v35 = vadd.f32 %v14961_v48, %v14960_v55  ;;  %v14963_v40 = vpop.f32.mrb[194].mxu0  ;;  %v12436_v55 = vadd.f32 %v21972_v13, %v11614_v59  ;;  %v11424_v13 = vld [vmem:[%s22543_s7 + $0xb8] sm:$0xff] }
 0xbb3   :  { %v14964_v15 = vpop.f32.mrb[195].mxu0 }
 0xbb4   :  { %v22171_v45 = vadd.f32 %v14962_v35, %v12428_v30  ;;  %v14965_v43 = vadd.f32 %v14964_v15, %v14963_v40  ;;  %v14368_v30 = vcombine.high %v11412_v58, %v11416_v7  ;;  %v12439_v40 = vadd.f32 %v21974_v60, %v11619_v1 }
 0xbb5   :  { %12836 = vmatmul.mubr.bf16.gmra.mrb[44].mxu0 %v14477_v63  ;;  %v14367_v60 = vcombine.low %v11412_v58, %v11416_v7  ;;  %v11432_v58 = vld [vmem:[%s22543_s7 + $0xf8] sm:$0xff] }
 0xbb6   :  { %v22173_v31 = vadd.f32 %v14965_v43, %v12431_v11  ;;  %12876 = vmatprep.mubr.bf16.mxu0 %v14360_v5  ;;  %v11624_v11 = vpop.permute.xlu0 %11623 }
 0xbb7   :  { %v12444_v1 = vadd.f32 %v21984_v52, %v11624_v11  ;;  %v11428_v52 = vld [vmem:[%s22543_s7 + $0xd8] sm:$0xff] }
 0xbb8   :  { %23132 = vst [vmem:[#allocation39_spill] sm:$0xff] %v22173_v31  ;;  %v14966_v57 = vpop.f32.mrb[196].mxu0  ;;  %v11629_v31 = vpop.permute.xlu1 %11628 }
 0xbb9   :  { %v14967_v36 = vpop.f32.mrb[197].mxu0 }
 0xbba   :  { %v14968_v48 = vadd.f32 %v14967_v36, %v14966_v57  ;;  %v14969_v63 = vpop.f32.mrb[198].mxu0 }
 0xbbb   :  { %v14970_v35 = vpop.f32.mrb[199].mxu0 }
 0xbbc   :  { %v22187_v5 = vadd.f32 %v14968_v48, %v12436_v55  ;;  %v14971_v15 = vadd.f32 %v14970_v35, %v14969_v63  ;;  %v22198_v55 = vpop.permute.xlu0 %11713  ;;  %v12447_v63 = vadd.f32 %v21988_v12, %v11629_v31  ;;  %v14375_v31 = vcombine.low %v11420_v0, %v11424_v13 }
 0xbbd   :  { %12877 = vmatmul.mubr.bf16.vlgmr.msra.gmra.mrb[48].mxu0 %v14359_v9  ;;  %v14376_v9 = vcombine.high %v11420_v0, %v11424_v13  ;;  %v11436_v0 = vld [vmem:[%s22543_s7 + $0x118] sm:$0xff] }
 0xbbe   :  { %v22189_v43 = vadd.f32 %v14971_v15, %v12439_v40  ;;  %12884 = vmatprep.mubr.bf16.mxu0 %v14368_v30  ;;  %v22203_v40 = vpop.permute.xlu1 %11718 }
 0xbc0   :  { %v14972_v21 = vpop.f32.mrb[200].mxu0  ;;  %v11634_v11 = vpop.permute.xlu0 %11633 }
 0xbc1   :  { %v14973_v59 = vpop.f32.mrb[201].mxu0 }
 0xbc2   :  { %v14974_v57 = vadd.f32 %v14973_v59, %v14972_v21  ;;  %v14975_v36 = vpop.f32.mrb[202].mxu0  ;;  %v12452_v21 = vadd.f32 %v21998_v37, %v11634_v11  ;;  %v11440_v37 = vld [vmem:[%s22543_s7 + $0x138] sm:$0xff]  ;;  %v14383_v11 = vcombine.low %v11428_v52, %v11432_v58 }
 0xbc3   :  { %v14976_v48 = vpop.f32.mrb[203].mxu0 }
 0xbc4   :  { %v22201_v30 = vadd.f32 %v14974_v57, %v12444_v1  ;;  %v14977_v35 = vadd.f32 %v14976_v48, %v14975_v36  ;;  %v11639_v57 = vpop.permute.xlu1 %11638 }
 0xbc5   :  { %12885 = vmatmul.mubr.bf16.gmra.mrb[52].mxu0 %v14367_v60  ;;  %v14384_v60 = vcombine.high %v11428_v52, %v11432_v58  ;;  %v11444_v52 = vld [vmem:[%s22543_s7 + $0x158] sm:$0xff] }
 0xbc6   :  { %v22205_v15 = vadd.f32 %v14977_v35, %v12447_v63  ;;  %12892 = vmatprep.mubr.bf16.mxu0 %v14376_v9  ;;  %v12455_v9 = vadd.f32 %v22002_v6, %v11639_v57  ;;  %v12460_v6 = vadd.f32 %v22012_v26, %v22051_v3  ;;  %v11448_v26 = vld [vmem:[%s22543_s7 + $0x178] sm:$0xff] }
 0xbc8   :  { %v14978_v7 = vpop.f32.mrb[204].mxu0 }
 0xbc9   :  { %v14979_v12 = vpop.f32.mrb[205].mxu0 }
 0xbca   :  { %v14980_v59 = vadd.f32 %v14979_v12, %v14978_v7  ;;  %v14981_v1 = vpop.f32.mrb[206].mxu0 }
 0xbcb   :  { %v14982_v36 = vpop.f32.mrb[207].mxu0 }
 0xbcc   :  { %v22215_v48 = vadd.f32 %v14980_v59, %v12452_v21  ;;  %v14983_v63 = vadd.f32 %v14982_v36, %v14981_v1  ;;  %v12463_v1 = vadd.f32 %v22016_v62, %v22059_v49  ;;  %v12468_v62 = vadd.f32 %v22026_v23, %v22073_v56  ;;  %v11456_v23 = vld [vmem:[%s22543_s7 + $0x1b8] sm:$0xff] }
 0xbcd   :  { %12893 = vmatmul.mubr.bf16.gmra.mrb[56].mxu0 %v14375_v31  ;;  %v14392_v31 = vcombine.high %v11436_v0, %v11440_v37 }
 0xbce   :  { %v22217_v35 = vadd.f32 %v14983_v63, %v12455_v9  ;;  %12900 = vmatprep.mubr.bf16.mxu0 %v14384_v60  ;;  %v14391_v9 = vcombine.low %v11436_v0, %v11440_v37  ;;  %v11452_v0 = vld [vmem:[%s22543_s7 + $0x198] sm:$0xff] }
 0xbd0   :  { %v14984_v13 = vpop.f32.mrb[208].mxu0 }
 0xbd1   :  { %v14985_v7 = vpop.f32.mrb[209].mxu0 }
 0xbd2   :  { %v14986_v12 = vadd.f32 %v14985_v7, %v14984_v13  ;;  %v14987_v21 = vpop.f32.mrb[210].mxu0  ;;  %v14400_v13 = vcombine.high %v11444_v52, %v11448_v26 }
 0xbd3   :  { %v14988_v59 = vpop.f32.mrb[211].mxu0 }
 0xbd4   :  { %v22229_v60 = vadd.f32 %v14986_v12, %v12460_v6  ;;  %v14989_v57 = vadd.f32 %v14988_v59, %v14987_v21 }
 0xbd5   :  { %12901 = vmatmul.mubr.bf16.gmra.mrb[60].mxu0 %v14383_v11  ;;  %v12471_v11 = vadd.f32 %v22029_v14, %v22077_v2  ;;  %v12476_v14 = vadd.f32 %v22037_v51, %v22089_v18  ;;  %v11464_v51 = vld [vmem:[%s22543_s7 + $0x1f8] sm:$0xff] }
 0xbd6   :  { %v22231_v36 = vadd.f32 %v14989_v57, %v12463_v1  ;;  %12908 = vmatprep.mubr.bf16.mxu0 %v14392_v31  ;;  %v14399_v31 = vcombine.low %v11444_v52, %v11448_v26  ;;  %v14408_v1 = vcombine.high %v11452_v0, %v11456_v23  ;;  %v11460_v52 = vld [vmem:[%s22543_s7 + $0x1d8] sm:$0xff] }
 0xbd8   :  { %v14990_v3 = vpop.f32.mrb[212].mxu0 }
 0xbd9   :  { %v14991_v58 = vpop.f32.mrb[213].mxu0 }
 0xbda   :  { %v14992_v49 = vadd.f32 %v14991_v58, %v14990_v3  ;;  %v14993_v63 = vpop.f32.mrb[214].mxu0  ;;  %v12479_v3 = vadd.f32 %v22039_v20, %v22097_v53  ;;  %v12484_v20 = vadd.f32 %v22047_v54, %v22110_v17  ;;  %v11472_v54 = vld [vmem:[%s22543_s7 + $0x238] sm:$0xff] }
 0xbdb   :  { %v14994_v7 = vpop.f32.mrb[215].mxu0 }
 0xbdc   :  { %v22243_v6 = vadd.f32 %v14992_v49, %v12468_v62  ;;  %v14995_v12 = vadd.f32 %v14994_v7, %v14993_v63  ;;  %v14407_v49 = vcombine.low %v11452_v0, %v11456_v23  ;;  %v11468_v0 = vld [vmem:[%s22543_s7 + $0x218] sm:$0xff] }
 0xbdd   :  { %12909 = vmatmul.mubr.bf16.gmra.mrb[64].mxu0 %v14391_v9 }
 0xbde   :  { %v22245_v21 = vadd.f32 %v14995_v12, %v12471_v11  ;;  %12916 = vmatprep.mubr.bf16.mxu0 %v14400_v13  ;;  %v14416_v13 = vcombine.high %v11460_v52, %v11464_v51  ;;  %v12487_v11 = vadd.f32 %v22049_v25, %v22115_v32  ;;  %v12492_v25 = vadd.f32 %v22061_v28, %v22131_v39  ;;  %v11480_v28 = vld [vmem:[%s22543_s7 + $0x278] sm:$0xff] }
 0xbe0   :  { %v14996_v56 = vpop.f32.mrb[216].mxu0 }
 0xbe1   :  { %v14997_v37 = vpop.f32.mrb[217].mxu0 }
 0xbe2   :  { %v14998_v2 = vadd.f32 %v14997_v37, %v14996_v56  ;;  %v14999_v59 = vpop.f32.mrb[218].mxu0 }
 0xbe3   :  { %v15000_v57 = vpop.f32.mrb[219].mxu0 }
 0xbe4   :  { %v22257_v58 = vadd.f32 %v14998_v2, %v12476_v14  ;;  %v15001_v9 = vadd.f32 %v15000_v57, %v14999_v59  ;;  %v14424_v2 = vcombine.high %v11468_v0, %v11472_v54 }
 0xbe5   :  { %12917 = vmatmul.mubr.bf16.gmra.mrb[68].mxu0 %v14399_v31  ;;  %v14415_v31 = vcombine.low %v11460_v52, %v11464_v51  ;;  %v11476_v52 = vld [vmem:[%s22543_s7 + $0x258] sm:$0xff] }
 0xbe6   :  { %v22259_v62 = vadd.f32 %v15001_v9, %v12479_v3  ;;  %12924 = vmatprep.mubr.bf16.mxu0 %v14408_v1  ;;  %v12495_v1 = vadd.f32 %v22063_v34, %v22139_v27  ;;  %v12500_v34 = vadd.f32 %v22071_v47, %v22154_v38  ;;  %v11488_v47 = vld [vmem:[%s22543_s7 + $0x2b8] sm:$0xff] }
 0xbe8   :  { %v15002_v18 = vpop.f32.mrb[220].mxu0 }
 0xbe9   :  { %v15003_v26 = vpop.f32.mrb[221].mxu0 }
 0xbea   :  { %v15004_v53 = vadd.f32 %v15003_v26, %v15002_v18  ;;  %v15005_v63 = vpop.f32.mrb[222].mxu0  ;;  %v14423_v18 = vcombine.low %v11468_v0, %v11472_v54  ;;  %v14431_v0 = vcombine.low %v11476_v52, %v11480_v28 }
 0xbeb   :  { %v15006_v7 = vpop.f32.mrb[223].mxu0 }
 0xbec   :  { %v22271_v12 = vadd.f32 %v15004_v53, %v12484_v20  ;;  %v15007_v56 = vadd.f32 %v15006_v7, %v15005_v63  ;;  %v12503_v53 = vadd.f32 %v22075_v41, %v22159_v8  ;;  %v12508_v41 = vadd.f32 %v22085_v46, %v22175_v16  ;;  %v11496_v46 = vld [vmem:[%s22543_s7 + $0x2f8] sm:$0xff] }
 0xbed   :  { %12925 = vmatmul.mubr.bf16.gmra.mrb[72].mxu0 %v14407_v49  ;;  %v14432_v49 = vcombine.high %v11476_v52, %v11480_v28 }
 0xbee   :  { %v22273_v37 = vadd.f32 %v15007_v56, %v12487_v11  ;;  %12932 = vmatprep.mubr.bf16.mxu0 %v14416_v13  ;;  %v11484_v11 = vld [vmem:[%s22543_s7 + $0x298] sm:$0xff] }
 0xbf0   :  { %v15008_v17 = vpop.f32.mrb[224].mxu0 }
 0xbf1   :  { %v15009_v23 = vpop.f32.mrb[225].mxu0 }
 0xbf2   :  { %v15010_v32 = vadd.f32 %v15009_v23, %v15008_v17  ;;  %v15011_v14 = vpop.f32.mrb[226].mxu0  ;;  %v14440_v17 = vcombine.high %v11484_v11, %v11488_v47 }
 0xbf3   :  { %v15012_v59 = vpop.f32.mrb[227].mxu0 }
 0xbf4   :  { %v22285_v57 = vadd.f32 %v15010_v32, %v12492_v25  ;;  %v15013_v3 = vadd.f32 %v15012_v59, %v15011_v14 }
 0xbf5   :  { %12933 = vmatmul.mubr.bf16.gmra.mrb[76].mxu0 %v14415_v31  ;;  %v12511_v31 = vadd.f32 %v22087_v24, %v22183_v29  ;;  %v12516_v24 = vadd.f32 %v22099_v44, %v22198_v55  ;;  %v11504_v44 = vld [vmem:[%s22543_s7 + $0x338] sm:$0xff] }
 0xbf6   :  { %v22287_v9 = vadd.f32 %v15013_v3, %v12495_v1  ;;  %12940 = vmatprep.mubr.bf16.mxu0 %v14424_v2  ;;  %v11492_v2 = vld [vmem:[%s22543_s7 + $0x2d8] sm:$0xff]  ;;  %v14439_v1 = vcombine.low %v11484_v11, %v11488_v47 }
 0xbf7   :  { %v14448_v52 = vcombine.high %v11492_v2, %v11496_v46 }
 0xbf8   :  { %v15014_v39 = vpop.f32.mrb[228].mxu0 }
 0xbf9   :  { %v15015_v51 = vpop.f32.mrb[229].mxu0 }
 0xbfa   :  { %v15016_v27 = vadd.f32 %v15015_v51, %v15014_v39  ;;  %v15017_v26 = vpop.f32.mrb[230].mxu0  ;;  %v12519_v39 = vadd.f32 %v22101_v61, %v22203_v40 }
 0xbfb   :  { %v15018_v20 = vpop.f32.mrb[231].mxu0 }
 0xbfc   :  { %v22299_v63 = vadd.f32 %v15016_v27, %v12500_v34  ;;  %v15019_v13 = vadd.f32 %v15018_v20, %v15017_v26  ;;  %v11500_v27 = vld [vmem:[%s22543_s7 + $0x318] sm:$0xff] }
 0xbfd   :  { %12941 = vmatmul.mubr.bf16.gmra.mrb[80].mxu0 %v14423_v18  ;;  %v14456_v40 = vcombine.high %v11500_v27, %v11504_v44 }
 0xbfe   :  { %v22301_v7 = vadd.f32 %v15019_v13, %v12503_v53  ;;  %12948 = vmatprep.mubr.bf16.mxu0 %v14432_v49  ;;  %v14447_v49 = vcombine.low %v11492_v2, %v11496_v46  ;;  %v11516_v2 = vld [vmem:[%s22543_s7 + $0x398] sm:$0xff] }
 0xbff   :  { %v11520_v46 = vld [vmem:[%s22543_s7 + $0x3b8] sm:$0xff] }
 0xc00   :  { %v15020_v38 = vpop.f32.mrb[232].mxu0 }
 0xc01   :  { %v15021_v56 = vpop.f32.mrb[233].mxu0 }
 0xc02   :  { %v15022_v8 = vadd.f32 %v15021_v56, %v15020_v38  ;;  %v15023_v54 = vpop.f32.mrb[234].mxu0  ;;  %v11508_v38 = vld [vmem:[%s22543_s7 + $0x358] sm:$0xff] }
 0xc03   :  { %v15024_v23 = vpop.f32.mrb[235].mxu0  ;;  %v11512_v56 = vld [vmem:[%s22543_s7 + $0x378] sm:$0xff] }
 0xc04   :  { %v22313_v25 = vadd.f32 %v15022_v8, %v12508_v41  ;;  %v15025_v32 = vadd.f32 %v15024_v23, %v15023_v54  ;;  %v14455_v8 = vcombine.low %v11500_v27, %v11504_v44 }
 0xc05   :  { %12949 = vmatmul.mubr.bf16.gmra.mrb[84].mxu0 %v14431_v0 }
 0xc06   :  { %v22315_v14 = vadd.f32 %v15025_v32, %v12511_v31  ;;  %12956 = vmatprep.mubr.bf16.mxu0 %v14440_v17  ;;  %v14464_v17 = vcombine.high %v11508_v38, %v11512_v56 }
 0xc08   :  { %v15026_v16 = vpop.f32.mrb[236].mxu0 }
 0xc09   :  { %v15027_v59 = vpop.f32.mrb[237].mxu0 }
 0xc0a   :  { %v15028_v29 = vadd.f32 %v15027_v59, %v15026_v16  ;;  %v15029_v3 = vpop.f32.mrb[238].mxu0 }
 0xc0b   :  { %v15030_v28 = vpop.f32.mrb[239].mxu0 }
 0xc0c   :  { %v22327_v51 = vadd.f32 %v15028_v29, %v12516_v24  ;;  %v15031_v18 = vadd.f32 %v15030_v28, %v15029_v3  ;;  %v14472_v29 = vcombine.high %v11516_v2, %v11520_v46 }
 0xc0d   :  { %12957 = vmatmul.mubr.bf16.gmra.mrb[88].mxu0 %v14439_v1  ;;  %v14463_v1 = vcombine.low %v11508_v38, %v11512_v56 }
 0xc0e   :  { %v22329_v34 = vadd.f32 %v15031_v18, %v12519_v39  ;;  %12964 = vmatprep.mubr.bf16.mxu0 %v14448_v52  ;;  %v11524_v39 = vld [vmem:[%s22543_s7 + $0x3d8] sm:$0xff] }
 0xc0f   :  { %v11528_v18 = vld [vmem:[%s22543_s7 + $0x3f8] sm:$0xff] }
 0xc10   :  { %v15048_v55 = vpop.f32.mrb[240].mxu0  ;;  %v14479_v56 = vcombine.low %v11524_v39, %v11528_v18 }
 0xc11   :  { %v15049_v26 = vpop.f32.mrb[241].mxu0 }
 0xc12   :  { %v15050_v20 = vadd.f32 %v15049_v26, %v15048_v55  ;;  %v15051_v61 = vpop.f32.mrb[242].mxu0  ;;  %v14471_v55 = vcombine.low %v11516_v2, %v11520_v46 }
 0xc13   :  { %v15052_v53 = vpop.f32.mrb[243].mxu0 }
 0xc14   :  { %v22338_v13 = vadd.f32 %v15050_v20, %v22112_v22  ;;  %v15053_v11 = vadd.f32 %v15052_v53, %v15051_v61 }
 0xc15   :  { %12965 = vmatmul.mubr.bf16.gmra.mrb[92].mxu0 %v14447_v49  ;;  %v14480_v49 = vcombine.high %v11524_v39, %v11528_v18 }
 0xc16   :  { %v22341_v47 = vadd.f32 %v15053_v11, %v22117_v50  ;;  %12972 = vmatprep.mubr.bf16.mxu0 %v14456_v40  ;;  %v23133_v40 = vld [vmem:[#allocation20_spill] sm:$0xff] }
 0xc18   :  { %v15054_v0 = vpop.f32.mrb[244].mxu0 }
 0xc19   :  { %v15055_v41 = vpop.f32.mrb[245].mxu0 }
 0xc1a   :  { %v15056_v54 = vadd.f32 %v15055_v41, %v15054_v0  ;;  %v15057_v22 = vpop.f32.mrb[246].mxu0 }
 0xc1b   :  { %v15058_v23 = vpop.f32.mrb[247].mxu0 }
 0xc1c   :  { %v22350_v31 = vadd.f32 %v15056_v54, %v22127_v19  ;;  %v15059_v50 = vadd.f32 %v15058_v23, %v15057_v22 }
 0xc1d   :  { %12973 = vmatmul.mubr.bf16.gmra.mrb[96].mxu0 %v14455_v8 }
 0xc1e   :  { %v22353_v32 = vadd.f32 %v15059_v50, %v22129_v33  ;;  %12980 = vmatprep.mubr.bf16.mxu0 %v14464_v17  ;;  %v23134_v17 = vld [vmem:[#allocation39_spill] sm:$0xff] }
 0xc20   :  { %v15060_v16 = vpop.f32.mrb[248].mxu0 }
 0xc21   :  { %v15061_v59 = vpop.f32.mrb[249].mxu0 }
 0xc22   :  { %v15062_v24 = vadd.f32 %v15061_v59, %v15060_v16  ;;  %v15063_v19 = vpop.f32.mrb[250].mxu0 }
 0xc23   :  { %v15064_v3 = vpop.f32.mrb[251].mxu0 }
 0xc24   :  { %v22362_v52 = vadd.f32 %v15062_v24, %v22143_v4  ;;  %v15065_v33 = vadd.f32 %v15064_v3, %v15063_v19 }
 0xc25   :  { %12981 = vmatmul.mubr.bf16.gmra.mrb[100].mxu0 %v14463_v1 }
 0xc26   :  { %v22365_v28 = vadd.f32 %v15065_v33, %v22145_v42  ;;  %12988 = vmatprep.mubr.bf16.mxu0 %v14472_v29 }
 0xc28   :  { %v15066_v27 = vpop.f32.mrb[252].mxu0 }
 0xc29   :  { %v15067_v44 = vpop.f32.mrb[253].mxu0 }
 0xc2a   :  { %v15068_v26 = vadd.f32 %v15067_v44, %v15066_v27  ;;  %v15069_v4 = vpop.f32.mrb[254].mxu0 }
 0xc2b   :  { %v15070_v20 = vpop.f32.mrb[255].mxu0 }
 0xc2c   :  { %v22374_v61 = vadd.f32 %v15068_v26, %v22157_v10  ;;  %v15071_v42 = vadd.f32 %v15070_v20, %v15069_v4 }
 0xc2d   :  { %12989 = vmatmul.mubr.bf16.gmra.mrb[104].mxu0 %v14471_v55 }
 0xc2e   :  { %v22377_v53 = vadd.f32 %v15071_v42, %v23133_v40  ;;  %12996 = vmatprep.mubr.bf16.mxu0 %v14480_v49 }
 0xc30   :  { %v15072_v11 = vpop.f32.mrb[0].mxu0 }
 0xc31   :  { %v15073_v38 = vpop.f32.mrb[1].mxu0 }
 0xc32   :  { %v15074_v0 = vadd.f32 %v15073_v38, %v15072_v11  ;;  %v15075_v41 = vpop.f32.mrb[2].mxu0 }
 0xc33   :  { %v15076_v8 = vpop.f32.mrb[3].mxu0 }
 0xc34   :  { %v22380_v54 = vadd.f32 %v15074_v0, %v22171_v45  ;;  %v15077_v22 = vadd.f32 %v15076_v8, %v15075_v41 }
 0xc35   :  { %12997 = vmatmul.mubr.bf16.gmra.mrb[108].mxu0 %v14479_v56 }
 0xc36   :  { %v22383_v10 = vadd.f32 %v15077_v22, %v23134_v17 }
 0xc38   :  { %v15078_v23 = vpop.f32.mrb[4].mxu0 }
 0xc39   :  { %v15079_v50 = vpop.f32.mrb[5].mxu0 }
 0xc3a   :  { %v15080_v2 = vadd.f32 %v15079_v50, %v15078_v23  ;;  %v15081_v46 = vpop.f32.mrb[6].mxu0 }
 0xc3b   :  { %v15082_v16 = vpop.f32.mrb[7].mxu0 }
 0xc3c   :  { %v22386_v59 = vadd.f32 %v15080_v2, %v22187_v5  ;;  %v15083_v1 = vadd.f32 %v15082_v16, %v15081_v46 }
 0xc3e   :  { %v22389_v24 = vadd.f32 %v15083_v1, %v22189_v43 }
 0xc40   :  { %v15084_v19 = vpop.f32.mrb[8].mxu0 }
 0xc41   :  { %v15085_v45 = vpop.f32.mrb[9].mxu0 }
 0xc42   :  { %v15086_v29 = vadd.f32 %v15085_v45, %v15084_v19  ;;  %v15087_v3 = vpop.f32.mrb[10].mxu0 }
 0xc43   :  { %v15088_v33 = vpop.f32.mrb[11].mxu0 }
 0xc44   :  { %v22392_v39 = vadd.f32 %v15086_v29, %v22201_v30  ;;  %v15089_v18 = vadd.f32 %v15088_v33, %v15087_v3 }
 0xc46   :  { %v22395_v27 = vadd.f32 %v15089_v18, %v22205_v15 }
 0xc48   :  { %v15090_v44 = vpop.f32.mrb[12].mxu0 }
 0xc49   :  { %v15091_v55 = vpop.f32.mrb[13].mxu0 }
 0xc4a   :  { %v15092_v5 = vadd.f32 %v15091_v55, %v15090_v44  ;;  %v15093_v26 = vpop.f32.mrb[14].mxu0 }
 0xc4b   :  { %v15094_v4 = vpop.f32.mrb[15].mxu0 }
 0xc4c   :  { %v22398_v43 = vadd.f32 %v15092_v5, %v22215_v48  ;;  %v15095_v49 = vadd.f32 %v15094_v4, %v15093_v26 }
 0xc4e   :  { %v22401_v20 = vadd.f32 %v15095_v49, %v22217_v35 }
 0xc50   :  { %v15096_v42 = vpop.f32.mrb[16].mxu0 }
 0xc51   :  { %v15097_v40 = vpop.f32.mrb[17].mxu0 }
 0xc52   :  { %v15098_v30 = vadd.f32 %v15097_v40, %v15096_v42  ;;  %v15099_v11 = vpop.f32.mrb[18].mxu0 }
 0xc53   :  { %v15100_v38 = vpop.f32.mrb[19].mxu0 }
 0xc54   :  { %v22404_v15 = vadd.f32 %v15098_v30, %v22229_v60  ;;  %v15101_v56 = vadd.f32 %v15100_v38, %v15099_v11 }
 0xc56   :  { %v22407_v0 = vadd.f32 %v15101_v56, %v22231_v36 }
 0xc58   :  { %v15102_v41 = vpop.f32.mrb[20].mxu0 }
 0xc59   :  { %v15103_v8 = vpop.f32.mrb[21].mxu0 }
 0xc5a   :  { %v15104_v48 = vadd.f32 %v15103_v8, %v15102_v41  ;;  %v15105_v22 = vpop.f32.mrb[22].mxu0 }
 0xc5b   :  { %v15106_v17 = vpop.f32.mrb[23].mxu0 }
 0xc5c   :  { %v22410_v35 = vadd.f32 %v15104_v48, %v22243_v6  ;;  %v15107_v23 = vadd.f32 %v15106_v17, %v15105_v22 }
 0xc5e   :  { %v22413_v50 = vadd.f32 %v15107_v23, %v22245_v21 }
 0xc60   :  { %v15108_v2 = vpop.f32.mrb[24].mxu0 }
 0xc61   :  { %v15109_v46 = vpop.f32.mrb[25].mxu0 }
 0xc62   :  { %v15110_v60 = vadd.f32 %v15109_v46, %v15108_v2  ;;  %v15111_v16 = vpop.f32.mrb[26].mxu0 }
 0xc63   :  { %v15112_v1 = vpop.f32.mrb[27].mxu0 }
 0xc64   :  { %v22416_v36 = vadd.f32 %v15110_v60, %v22257_v58  ;;  %v15113_v19 = vadd.f32 %v15112_v1, %v15111_v16 }
 0xc66   :  { %v22419_v45 = vadd.f32 %v15113_v19, %v22259_v62 }
 0xc68   :  { %v15114_v29 = vpop.f32.mrb[28].mxu0 }
 0xc69   :  { %v15115_v3 = vpop.f32.mrb[29].mxu0 }
 0xc6a   :  { %v15116_v6 = vadd.f32 %v15115_v3, %v15114_v29  ;;  %v15117_v33 = vpop.f32.mrb[30].mxu0 }
 0xc6b   :  { %v15118_v18 = vpop.f32.mrb[31].mxu0 }
 0xc6c   :  { %v22422_v21 = vadd.f32 %v15116_v6, %v22271_v12  ;;  %v15119_v44 = vadd.f32 %v15118_v18, %v15117_v33 }
 0xc6e   :  { %v22425_v55 = vadd.f32 %v15119_v44, %v22273_v37 }
 0xc70   :  { %v15120_v5 = vpop.f32.mrb[32].mxu0 }
 0xc71   :  { %v15121_v26 = vpop.f32.mrb[33].mxu0 }
 0xc72   :  { %v15122_v58 = vadd.f32 %v15121_v26, %v15120_v5  ;;  %v15123_v4 = vpop.f32.mrb[34].mxu0  ;;  %v22455_v26 = vld.sshfl [vmem:[%s22545_s9] sm:$0x11 pattern:$0x75316420]  ;;  %s17195_s9 = smov [#allocation3]  }
 0xc73   :  { %v15124_v49 = vpop.f32.mrb[35].mxu0  ;;  %s13137_s22 = sshll.u32 %s17195_s9, 4  ;;  %s13138_s22 = int_to_ptr.vmem [resolvable:$true] %s13137_s22 }
 0xc74   :  { %v22428_v62 = vadd.f32 %v15122_v58, %v22285_v57  ;;  %v15125_v42 = vadd.f32 %v15124_v49, %v15123_v4  ;;  %v17194_v58 = vmov 1966171168   ;;  %s17156_s23 = scalar_lea.vmem %s13138_s22, 16  ;;  %s17160_s24 = scalar_lea.vmem %s13138_s22, 32 }
 0xc75   :  { %v13074_v4 = vunpack.c.l.s4 %v17194_v58  ;;  %p17157_p0 = scmp.ne.s32.totalorder %s13138_s22, %s17156_s23  ;;  %p17161_p1 = scmp.lt.s32.totalorder %s13138_s22, %s13138_s22 }
 0xc76   :  { %v22431_v40 = vadd.f32 %v15125_v42, %v22287_v9  ;;  %p17162_p2 = scmp.lt.s32.totalorder %s17160_s24, %s17156_s23 }
 0xc78   :  { %v15126_v30 = vpop.f32.mrb[36].mxu0  ;;  %p17163_p3 = por %p17162_p2, %p17161_p1 }
 0xc79   :  { %v15127_v11 = vpop.f32.mrb[37].mxu0 }
 0xc7a   :  { %v15128_v12 = vadd.f32 %v15127_v11, %v15126_v30  ;;  %v15129_v38 = vpop.f32.mrb[38].mxu0  ;;  %v13072_v30 = vcombine.high %v22455_v26, %v22455_v26  ;;  %v13075_v11 = vunpack.c.0.s8 %v13074_v4  ;;  %p17164_p4 = pnand %p17163_p3, %p17157_p0 }
 0xc7b   :  { %v15130_v56 = vpop.f32.mrb[39].mxu0 }
 0xc7c   :  { %v22434_v37 = vadd.f32 %v15128_v12, %v22299_v63  ;;  %v15131_v41 = vadd.f32 %v15130_v56, %v15129_v38 }
 0xc7e   :  { %v22437_v8 = vadd.f32 %v15131_v41, %v22301_v7  ;;  %v23135_v41 = vld [vmem:[#allocation6_spill] sm:$0xff] }
 0xc80   :  { %v15132_v48 = vpop.f32.mrb[40].mxu0 }
 0xc81   :  { %v15133_v22 = vpop.f32.mrb[41].mxu0 }
 0xc82   :  { %v15134_v57 = vadd.f32 %v15133_v22, %v15132_v48  ;;  %v15135_v17 = vpop.f32.mrb[42].mxu0  ;;  %v22463_v48 = vsub.s32 %v13075_v11, %v23135_v41 }
 0xc83   :  { %v15136_v23 = vpop.f32.mrb[43].mxu0 }
 0xc84   :  { %v22440_v9 = vadd.f32 %v15134_v57, %v22313_v25  ;;  %v15137_v2 = vadd.f32 %v15136_v23, %v15135_v17  ;;  %v13079_v17 = vrot.slane %v22455_v26, %v22463_v48  ;;  %v13086_v23 = vrot.slane %v13072_v30, %v22463_v48 }
 0xc86   :  { %v22443_v46 = vadd.f32 %v15137_v2, %v22315_v14  ;;  %13121 = vmatprep.mubr.bf16.mxu0 %v13086_v23 }
 0xc88   :  { %v15138_v60 = vpop.f32.mrb[44].mxu0 }
 0xc89   :  { %v15139_v16 = vpop.f32.mrb[45].mxu0 }
 0xc8a   :  { %v15140_v63 = vadd.f32 %v15139_v16, %v15138_v60  ;;  %v15141_v1 = vpop.f32.mrb[46].mxu0 }
 0xc8b   :  { %v15142_v19 = vpop.f32.mrb[47].mxu0 }
 0xc8c   :  { %v22446_v7 = vadd.f32 %v15140_v63, %v22327_v51  ;;  %v15143_v29 = vadd.f32 %v15142_v19, %v15141_v1 }
 0xc8e   :  { %v22449_v3 = vadd.f32 %v15143_v29, %v22329_v34 }
 0xc90   :  { %v15160_v6 = vpop.f32.mrb[48].mxu0 }
 0xc91   :  { %v15161_v33 = vpop.f32.mrb[49].mxu0 }
 0xc92   :  { %v15162_v25 = vadd.f32 %v15161_v33, %v15160_v6  ;;  %v15163_v18 = vpop.f32.mrb[50].mxu0 }
 0xc93   :  { %v15164_v44 = vpop.f32.mrb[51].mxu0 }
 0xc94   :  { %v12879_v14 = vadd.f32 %v15162_v25, %v22338_v13  ;;  %v15165_v5 = vadd.f32 %v15164_v44, %v15163_v18 }
 0xc96   :  { %v12882_v51 = vadd.f32 %v15165_v5, %v22341_v47  ;;  %v13005_v49 = vmax.f32 %v12879_v14, 0.0 }
 0xc98   :  { %v13006_v34 = vmax.f32 %v12882_v51, 0.0  ;;  %v15166_v42 = vpop.f32.mrb[52].mxu0 }
 0xc99   :  { %v15167_v12 = vpop.f32.mrb[53].mxu0 }
 0xc9a   :  { %v22460_v38 = vpack.c.bf16 %v13006_v34, %v13005_v49  ;;  %v15168_v13 = vadd.f32 %v15167_v12, %v15166_v42  ;;  %v15169_v56 = vpop.f32.mrb[54].mxu0 }
 0xc9b   :  { %v15170_v22 = vpop.f32.mrb[55].mxu0 }
 0xc9c   :  { %v12887_v47 = vadd.f32 %v15168_v13, %v22350_v31  ;;  %v15171_v57 = vadd.f32 %v15170_v22, %v15169_v56 }
 0xc9e   :  { %v12890_v2 = vadd.f32 %v15171_v57, %v22353_v32  ;;  %v13007_v60 = vmax.f32 %v12887_v47, 0.0 }
 0xca0   :  { %v13008_v16 = vmax.f32 %v12890_v2, 0.0  ;;  %v15172_v63 = vpop.f32.mrb[56].mxu0 }
 0xca1   :  { %v15173_v1 = vpop.f32.mrb[57].mxu0 }
 0xca2   :  { %v22470_v19 = vpack.c.bf16 %v13008_v16, %v13007_v60  ;;  %v15174_v29 = vadd.f32 %v15173_v1, %v15172_v63  ;;  %v15175_v6 = vpop.f32.mrb[58].mxu0 }
 0xca3   :  { %v15176_v33 = vpop.f32.mrb[59].mxu0 }
 0xca4   :  { %v12895_v31 = vadd.f32 %v15174_v29, %v22362_v52  ;;  %v15177_v25 = vadd.f32 %v15176_v33, %v15175_v6 }
 0xca6   :  { %v12898_v18 = vadd.f32 %v15177_v25, %v22365_v28  ;;  %v13009_v44 = vmax.f32 %v12895_v31, 0.0 }
 0xca8   :  { %v13010_v14 = vmax.f32 %v12898_v18, 0.0  ;;  %v15178_v5 = vpop.f32.mrb[60].mxu0 }
 0xca9   :  { %v15179_v51 = vpop.f32.mrb[61].mxu0 }
 0xcaa   :  { %v22474_v32 = vpack.c.bf16 %v13010_v14, %v13009_v44  ;;  %v15180_v58 = vadd.f32 %v15179_v51, %v15178_v5  ;;  %v15181_v4 = vpop.f32.mrb[62].mxu0 }
 0xcab   :  { %v15182_v49 = vpop.f32.mrb[63].mxu0 }
 0xcac   :  { %v12903_v34 = vadd.f32 %v15180_v58, %v22374_v61  ;;  %v15183_v42 = vadd.f32 %v15182_v49, %v15181_v4 }
 0xcae   :  { %v12906_v30 = vadd.f32 %v15183_v42, %v22377_v53  ;;  %v13011_v11 = vmax.f32 %v12903_v34, 0.0 }
 0xcb0   :  { %v13012_v12 = vmax.f32 %v12906_v30, 0.0  ;;  %v15184_v52 = vpop.f32.mrb[64].mxu0 }
 0xcb1   :  { %v15185_v13 = vpop.f32.mrb[65].mxu0 }
 0xcb2   :  { %v22478_v56 = vpack.c.bf16 %v13012_v12, %v13011_v11  ;;  %v15186_v28 = vadd.f32 %v15185_v13, %v15184_v52  ;;  %v15187_v22 = vpop.f32.mrb[66].mxu0 }
 0xcb3   :  { %v15188_v47 = vpop.f32.mrb[67].mxu0 }
 0xcb4   :  { %v12911_v57 = vadd.f32 %v15186_v28, %v22380_v54  ;;  %v15189_v23 = vadd.f32 %v15188_v47, %v15187_v22 }
 0xcb6   :  { %v12914_v2 = vadd.f32 %v15189_v23, %v22383_v10  ;;  %v13013_v60 = vmax.f32 %v12911_v57, 0.0 }
 0xcb8   :  { %v13014_v16 = vmax.f32 %v12914_v2, 0.0  ;;  %v15190_v61 = vpop.f32.mrb[68].mxu0 }
 0xcb9   :  { %v15191_v63 = vpop.f32.mrb[69].mxu0 }
 0xcba   :  { %v22482_v1 = vpack.c.bf16 %v13014_v16, %v13013_v60  ;;  %v15192_v53 = vadd.f32 %v15191_v63, %v15190_v61  ;;  %v15193_v29 = vpop.f32.mrb[70].mxu0 }
 0xcbb   :  { %v15194_v6 = vpop.f32.mrb[71].mxu0 }
 0xcbc   :  { %v12919_v33 = vadd.f32 %v15192_v53, %v22386_v59  ;;  %v15195_v31 = vadd.f32 %v15194_v6, %v15193_v29 }
 0xcbe   :  { %v12922_v25 = vadd.f32 %v15195_v31, %v22389_v24  ;;  %v13015_v18 = vmax.f32 %v12919_v33, 0.0 }
 0xcc0   :  { %v13016_v44 = vmax.f32 %v12922_v25, 0.0  ;;  %v15196_v54 = vpop.f32.mrb[72].mxu0 }
 0xcc1   :  { %v15197_v14 = vpop.f32.mrb[73].mxu0 }
 0xcc2   :  { %v22486_v5 = vpack.c.bf16 %v13016_v44, %v13015_v18  ;;  %v15198_v10 = vadd.f32 %v15197_v14, %v15196_v54  ;;  %v15199_v51 = vpop.f32.mrb[74].mxu0 }
 0xcc3   :  { %v15200_v58 = vpop.f32.mrb[75].mxu0 }
 0xcc4   :  { %v12927_v4 = vadd.f32 %v15198_v10, %v22392_v39  ;;  %v15201_v49 = vadd.f32 %v15200_v58, %v15199_v51 }
 0xcc6   :  { %v12930_v34 = vadd.f32 %v15201_v49, %v22395_v27  ;;  %v13017_v42 = vmax.f32 %v12927_v4, 0.0 }
 0xcc8   :  { %v13018_v30 = vmax.f32 %v12930_v34, 0.0  ;;  %v15202_v59 = vpop.f32.mrb[76].mxu0 }
 0xcc9   :  { %v15203_v11 = vpop.f32.mrb[77].mxu0 }
 0xcca   :  { %v22490_v12 = vpack.c.bf16 %v13018_v30, %v13017_v42  ;;  %v15204_v24 = vadd.f32 %v15203_v11, %v15202_v59  ;;  %v15205_v52 = vpop.f32.mrb[78].mxu0 }
 0xccb   :  { %v15206_v13 = vpop.f32.mrb[79].mxu0 }
 0xccc   :  { %v12935_v28 = vadd.f32 %v15204_v24, %v22398_v43  ;;  %v15207_v22 = vadd.f32 %v15206_v13, %v15205_v52 }
 0xcce   :  { %v12938_v47 = vadd.f32 %v15207_v22, %v22401_v20  ;;  %v13019_v57 = vmax.f32 %v12935_v28, 0.0 }
 0xcd0   :  { %v13020_v23 = vmax.f32 %v12938_v47, 0.0  ;;  %v15208_v39 = vpop.f32.mrb[80].mxu0 }
 0xcd1   :  { %v15209_v2 = vpop.f32.mrb[81].mxu0 }
 0xcd2   :  { %v22494_v60 = vpack.c.bf16 %v13020_v23, %v13019_v57  ;;  %v15210_v27 = vadd.f32 %v15209_v2, %v15208_v39  ;;  %v15211_v16 = vpop.f32.mrb[82].mxu0 }
 0xcd3   :  { %v15212_v61 = vpop.f32.mrb[83].mxu0 }
 0xcd4   :  { %v12943_v63 = vadd.f32 %v15210_v27, %v22404_v15  ;;  %v15213_v53 = vadd.f32 %v15212_v61, %v15211_v16 }
 0xcd6   :  { %v12946_v29 = vadd.f32 %v15213_v53, %v22407_v0  ;;  %v13021_v6 = vmax.f32 %v12943_v63, 0.0 }
 0xcd8   :  { %v13022_v33 = vmax.f32 %v12946_v29, 0.0  ;;  %v15214_v43 = vpop.f32.mrb[84].mxu0 }
 0xcd9   :  { %v15215_v31 = vpop.f32.mrb[85].mxu0 }
 0xcda   :  { %v15216_v25 = vadd.f32 %v15215_v31, %v15214_v43  ;;  %v15217_v20 = vpop.f32.mrb[86].mxu0  ;;  %v13046_v18 = vpack.c.bf16 %v13022_v33, %v13021_v6 }
 0xcdb   :  { %v15218_v44 = vpop.f32.mrb[87].mxu0 }
 0xcdc   :  { %v12951_v54 = vadd.f32 %v15216_v25, %v22410_v35  ;;  %v15219_v14 = vadd.f32 %v15218_v44, %v15217_v20  ;;  %15256 = vmatprep.subr.bf16.mxu0 %v13046_v18 }
 0xcdd   :  { %15257 = vmatpush3.bf16.msra.mxu0 %v22460_v38 }
 0xcde   :  { %v12954_v10 = vadd.f32 %v15219_v14, %v22413_v50  ;;  %v13023_v15 = vmax.f32 %v12951_v54, 0.0 }
 0xce0   :  { %v13024_v51 = vmax.f32 %v12954_v10, 0.0  ;;  %v15220_v58 = vpop.f32.mrb[88].mxu0 }
 0xce1   :  { %v15221_v0 = vpop.f32.mrb[89].mxu0 }
 0xce2   :  { %v15222_v4 = vadd.f32 %v15221_v0, %v15220_v58  ;;  %v15223_v49 = vpop.f32.mrb[90].mxu0  ;;  %v13047_v34 = vpack.c.bf16 %v13024_v51, %v13023_v15 }
 0xce3   :  { %v15224_v42 = vpop.f32.mrb[91].mxu0 }
 0xce4   :  { %v12959_v30 = vadd.f32 %v15222_v4, %v22416_v36  ;;  %v15225_v59 = vadd.f32 %v15224_v42, %v15223_v49  ;;  %15258 = vmatprep.subr.bf16.mxu0 %v13047_v34 }
 0xce5   :  { %15259 = vmatpush3.bf16.msra.mxu0 %v22470_v19 }
 0xce6   :  { %v12962_v35 = vadd.f32 %v15225_v59, %v22419_v45  ;;  %v13025_v11 = vmax.f32 %v12959_v30, 0.0 }
 0xce8   :  { %v13026_v38 = vmax.f32 %v12962_v35, 0.0  ;;  %v15226_v24 = vpop.f32.mrb[92].mxu0 }
 0xce9   :  { %v15227_v50 = vpop.f32.mrb[93].mxu0 }
 0xcea   :  { %v15228_v52 = vadd.f32 %v15227_v50, %v15226_v24  ;;  %v15229_v13 = vpop.f32.mrb[94].mxu0  ;;  %v13048_v28 = vpack.c.bf16 %v13026_v38, %v13025_v11  ;;  %v13058_v50 = vpop.permute.xlu0 %13057 }
 0xceb   :  { %v15230_v22 = vpop.f32.mrb[95].mxu0 }
 0xcec   :  { %v12967_v47 = vadd.f32 %v15228_v52, %v22422_v21  ;;  %v15231_v57 = vadd.f32 %v15230_v22, %v15229_v13  ;;  %15260 = vmatprep.subr.bf16.mxu0 %v13048_v28 }
 0xced   :  { %15261 = vmatpush3.bf16.msra.mxu0 %v22474_v32 }
 0xcee   :  { %v12970_v36 = vadd.f32 %v15231_v57, %v22425_v55  ;;  %v13027_v23 = vmax.f32 %v12967_v47, 0.0 }
 0xcf0   :  { %v13028_v19 = vmax.f32 %v12970_v36, 0.0  ;;  %v15232_v39 = vpop.f32.mrb[96].mxu0 }
 0xcf1   :  { %v15233_v45 = vpop.f32.mrb[97].mxu0 }
 0xcf2   :  { %v15234_v2 = vadd.f32 %v15233_v45, %v15232_v39  ;;  %v15235_v27 = vpop.f32.mrb[98].mxu0  ;;  %v13049_v16 = vpack.c.bf16 %v13028_v19, %v13027_v23 }
 0xcf3   :  { %v15236_v61 = vpop.f32.mrb[99].mxu0 }
 0xcf4   :  { %v12975_v63 = vadd.f32 %v15234_v2, %v22428_v62  ;;  %v15237_v53 = vadd.f32 %v15236_v61, %v15235_v27  ;;  %15262 = vmatprep.subr.bf16.mxu0 %v13049_v16 }
 0xcf5   :  { %15263 = vmatpush3.bf16.msra.mxu0 %v22478_v56 }
 0xcf6   :  { %v12978_v21 = vadd.f32 %v15237_v53, %v22431_v40  ;;  %v13029_v29 = vmax.f32 %v12975_v63, 0.0 }
 0xcf8   :  { %v13030_v32 = vmax.f32 %v12978_v21, 0.0  ;;  %v15238_v6 = vpop.f32.mrb[100].mxu0 }
 0xcf9   :  { %v15239_v55 = vpop.f32.mrb[101].mxu0 }
 0xcfa   :  { %v15240_v33 = vadd.f32 %v15239_v55, %v15238_v6  ;;  %v15241_v43 = vpop.f32.mrb[102].mxu0  ;;  %v13050_v31 = vpack.c.bf16 %v13030_v32, %v13029_v29 }
 0xcfb   :  { %v15242_v25 = vpop.f32.mrb[103].mxu0 }
 0xcfc   :  { %v12983_v20 = vadd.f32 %v15240_v33, %v22434_v37  ;;  %v15243_v18 = vadd.f32 %v15242_v25, %v15241_v43  ;;  %15264 = vmatprep.subr.bf16.mxu0 %v13050_v31 }
 0xcfd   :  { %15265 = vmatpush3.bf16.msra.mxu0 %v22482_v1 }
 0xcfe   :  { %v12986_v62 = vadd.f32 %v15243_v18, %v22437_v8  ;;  %v13031_v44 = vmax.f32 %v12983_v20, 0.0 }
 0xd00   :  { %v13032_v56 = vmax.f32 %v12986_v62, 0.0  ;;  %v15244_v54 = vpop.f32.mrb[104].mxu0 }
 0xd01   :  { %v15245_v40 = vpop.f32.mrb[105].mxu0 }
 0xd02   :  { %v15246_v14 = vadd.f32 %v15245_v40, %v15244_v54  ;;  %v15247_v10 = vpop.f32.mrb[106].mxu0  ;;  %v13051_v15 = vpack.c.bf16 %v13032_v56, %v13031_v44 }
 0xd03   :  { %v15248_v51 = vpop.f32.mrb[107].mxu0 }
 0xd04   :  { %v12991_v58 = vadd.f32 %v15246_v14, %v22440_v9  ;;  %v15249_v0 = vadd.f32 %v15248_v51, %v15247_v10  ;;  %15266 = vmatprep.subr.bf16.mxu0 %v13051_v15 }
 0xd05   :  { %15267 = vmatpush3.bf16.msra.mxu0 %v22486_v5 }
 0xd06   :  { %v12994_v37 = vadd.f32 %v15249_v0, %v22443_v46  ;;  %v13033_v4 = vmax.f32 %v12991_v58, 0.0  ;;  %v13062_v46 = vsub.s32 0, %v23135_v41 }
 0xd08   :  { %v13034_v1 = vmax.f32 %v12994_v37, 0.0  ;;  %v15250_v49 = vpop.f32.mrb[108].mxu0 }
 0xd09   :  { %v15251_v8 = vpop.f32.mrb[109].mxu0 }
 0xd0a   :  { %v15252_v34 = vadd.f32 %v15251_v8, %v15250_v49  ;;  %v15253_v42 = vpop.f32.mrb[110].mxu0  ;;  %v13052_v30 = vpack.c.bf16 %v13034_v1, %v13033_v4 }
 0xd0b   :  { %v15254_v59 = vpop.f32.mrb[111].mxu0 }
 0xd0c   :  { %v12999_v35 = vadd.f32 %v15252_v34, %v22446_v7  ;;  %v15255_v11 = vadd.f32 %v15254_v59, %v15253_v42  ;;  %15268 = vmatprep.subr.bf16.mxu0 %v13052_v30 }
 0xd0d   :  { %15269 = vmatpush3.bf16.msra.mxu0 %v22490_v12  ;;  %v13063_v12 = vrot.slane %v13058_v50, %v13062_v46 }
 0xd0e   :  { %v13002_v9 = vadd.f32 %v15255_v11, %v22449_v3  ;;  %v13035_v38 = vmax.f32 %v12999_v35, 0.0 }
 0xd10   :  { %v13036_v5 = vmax.f32 %v13002_v9, 0.0 }
 0xd12   :  { %v13053_v24 = vpack.c.bf16 %v13036_v5, %v13035_v38 }
 0xd14   :  { %15270 = vmatprep.subr.bf16.mxu0 %v13053_v24 }
 0xd15   :  { %15271 = vmatpush3.bf16.msra.mxu0 %v22494_v60 }
 0xd18   :  { %13122 = vmatmul.mubr.bf16.vlgmr.msra.gmra.mrb[112].mxu0 %v13079_v17 }
 0xdeb   :  { %v15272_v7 = vpop.f32.mrb[112].mxu0 }
 0xdec   :  { %v15273_v52 = vpop.f32.mrb[113].mxu0 }
 0xded   :  { %v15274_v13 = vadd.f32 %v15273_v52, %v15272_v7  ;;  %v15275_v3 = vpop.f32.mrb[114].mxu0 }
 0xdee   :  { %v15276_v28 = vpop.f32.mrb[115].mxu0 }
 0xdef   :  { %v13124_v22 = vadd.f32 %v15274_v13, %v13063_v12 }
 0xdf1   :  { %13130 = vst.msk [vmem:[#allocation3] sm:$0x1] %vm13129_vm13, %v13124_v22 }
 0xdf2   :  { %17167 = shalt.err (!%p17164_p4)
}
 0xdf3   :  { %s17168_s16 = scalar_lea.hbm %s22547_s11, 16 }
 0xdf4   :  { %p17169_p5 = scmp.ne.s32.totalorder %s22547_s11, %s17168_s16  ;;  %p17172_p6 = scmp.lt.u32.totalorder %s17168_s16, %s22547_s11 }
 0xdf6   :  { %p17174_p7 = pnand %p17172_p6, %p17169_p5 }
 0xdf8   :  { %17177 = shalt.err (!%p17174_p7)
}
 0xdf9   :  { %13140 = dma.vmem_to_hbm [thread:$0]  %s13138_s22, 16, %s22547_s11, [#allocation4]  }
 0xdfa   :  { %17178 = dma.done.wait [#allocation4], 16  }
 0xdfb   :  { %17179 = vsyncadd [#allocation4], 4294967280 }
 0xdfc   :  { %13144 = vsyncpa [#allocation4], 1 }

</bundles_post_ra>
